<compile_context>
chip_gen: v6e
topology: v6e:2x2x1
jax: 0.10.0
libtpu: 0.0.40
codegen_flags: <defaults>
</compile_context>

<pallas_src>
import functools

import jax
import jax.numpy as jnp
from jax import lax
from jax.experimental import pallas as pl
from jax.experimental.pallas import tpu as pltpu


# --------------------------------------------------------------------------
# tiling helpers
# --------------------------------------------------------------------------
def _pick_tile(m, max_tile=256):
    """Largest multiple-of-8 divisor of m (<= max_tile) leaving >=2 grid steps."""
    if m % 8 != 0:
        return m
    best = None
    for t in range(8, min(m, max_tile) + 1, 8):
        if m % t == 0 and m // t >= 2:
            best = t
    return best if best is not None else m


def _pick_group(g, seq_len, max_rows=512):
    """Largest divisor of g with >=2 grid steps and <= max_rows rows per step."""
    best = None
    for gb in range(1, g + 1):
        if g % gb == 0 and gb * seq_len <= max_rows and g // gb >= 2:
            best = gb
    return best if best is not None else 1


def _pick_experts_per_step(E, D, Hff, budget_bytes=8 << 20, max_width=2048):
    """Experts merged per MoE grid step; bounded so the (double-buffered bf16)
    merged w1/w2 blocks stay well inside v7x's 64 MiB VMEM."""
    ep = 1
    for cand in range(1, E + 1):
        if E % cand:
            continue
        w_bytes = 2 * 2 * (D * cand * Hff + cand * Hff * D)  # dbl-buffered bf16
        if cand * Hff <= max_width and w_bytes <= budget_bytes:
            ep = cand
    return ep


# --------------------------------------------------------------------------
# fused input projection:  view @ W_in + b_in + (pos_T + node_emb)
# --------------------------------------------------------------------------
def _inproj_kernel(v_ref, w_ref, b_ref, emb_ref, o_ref):
    v = v_ref[0]                                  # [T, N, C]
    T, N, C = v.shape
    x = jnp.dot(v.reshape(T * N, C).astype(jnp.bfloat16), w_ref[...],
                preferred_element_type=jnp.float32) + b_ref[...]
    o_ref[0] = x.reshape(T, N, -1) + emb_ref[...]


def input_projection(view, w, b, emb):
    B, T, N, C = view.shape
    D = w.shape[1]
    return pl.pallas_call(
        _inproj_kernel,
        out_shape=jax.ShapeDtypeStruct((B, T, N, D), jnp.float32),
        grid=(B,),
        in_specs=[
            pl.BlockSpec((1, T, N, C), lambda i: (i, 0, 0, 0)),
            pl.BlockSpec((C, D), lambda i: (0, 0)),
            pl.BlockSpec((1, D), lambda i: (0, 0)),
            pl.BlockSpec((T, N, D), lambda i: (0, 0, 0)),
        ],
        out_specs=pl.BlockSpec((1, T, N, D), lambda i: (i, 0, 0, 0)),
        compiler_params=pltpu.CompilerParams(dimension_semantics=("parallel",)),
    )(view, w, b, emb)


# --------------------------------------------------------------------------
# fused attention block: LN -> QKV -> all heads -> Wo -> +residual
# --------------------------------------------------------------------------
def _attn_block_impl(x, gamma, beta, wqkv, bqkv, wo, bo, bias, num_heads, scale):
    Gb, L, D = x.shape
    Dh = D // num_heads
    mu = jnp.mean(x, axis=-1, keepdims=True)
    var = jnp.mean((x - mu) ** 2, axis=-1, keepdims=True)
    h = (x - mu) * lax.rsqrt(var + 1e-5) * gamma + beta
    hb = h.reshape(Gb * L, D).astype(jnp.bfloat16)
    qkv = jnp.dot(hb, wqkv, preferred_element_type=jnp.float32) + bqkv
    qkv = qkv.reshape(Gb, L, 3 * D)

    heads = []
    for hd in range(num_heads):
        # fold the softmax scale into q before the bf16 cast
        q = (qkv[:, :, hd * Dh:(hd + 1) * Dh] * scale).astype(jnp.bfloat16)
        k = qkv[:, :, D + hd * Dh:D + (hd + 1) * Dh].astype(jnp.bfloat16)
        v = qkv[:, :, 2 * D + hd * Dh:2 * D + (hd + 1) * Dh].astype(jnp.bfloat16)
        s = jnp.einsum("gld,gmd->glm", q, k, preferred_element_type=jnp.float32)
        if bias is not None:
            s = s + bias[None, :, :]
        s = s - jnp.max(s, axis=-1, keepdims=True)
        p = jnp.exp(s)
        p = p * pl.reciprocal(jnp.sum(p, axis=-1, keepdims=True), approx=True)
        heads.append(jnp.einsum("glm,gmd->gld", p.astype(jnp.bfloat16), v,
                                preferred_element_type=jnp.float32))
    o = jnp.concatenate(heads, axis=-1)                      # [Gb, L, D] lane-dense
    out = jnp.dot(o.reshape(Gb * L, D).astype(jnp.bfloat16), wo,
                  preferred_element_type=jnp.float32) + bo
    return x + out.reshape(Gb, L, D)


def _attn_kernel_nobias(x_ref, g_ref, b_ref, wqkv_ref, bqkv_ref, wo_ref, bo_ref,
                        o_ref, *, num_heads, scale):
    o_ref[...] = _attn_block_impl(x_ref[...], g_ref[...], b_ref[...],
                                  wqkv_ref[...], bqkv_ref[...], wo_ref[...],
                                  bo_ref[...], None, num_heads, scale)


def _attn_kernel_bias(x_ref, g_ref, b_ref, wqkv_ref, bqkv_ref, wo_ref, bo_ref,
                      bias_ref, o_ref, *, num_heads, scale):
    o_ref[...] = _attn_block_impl(x_ref[...], g_ref[...], b_ref[...],
                                  wqkv_ref[...], bqkv_ref[...], wo_ref[...],
                                  bo_ref[...], bias_ref[...], num_heads, scale)


def attention_block(x3, ln_g, ln_b, p, bias, num_heads):
    """x3: [G, L, D] grouped sequences.  Whole pre-LN attention block + residual."""
    G, L, D = x3.shape
    Dh = D // num_heads
    gb = _pick_group(G, L)
    scale = float(Dh) ** -0.5
    xspec = pl.BlockSpec((gb, L, D), lambda i: (i, 0, 0))
    in_specs = [
        xspec,
        pl.BlockSpec((1, 1, D), lambda i: (0, 0, 0)),
        pl.BlockSpec((1, 1, D), lambda i: (0, 0, 0)),
        pl.BlockSpec((D, 3 * D), lambda i: (0, 0)),
        pl.BlockSpec((1, 3 * D), lambda i: (0, 0)),
        pl.BlockSpec((D, D), lambda i: (0, 0)),
        pl.BlockSpec((1, D), lambda i: (0, 0)),
    ]
    args = [x3, ln_g, ln_b, p["wqkv"], p["bqkv"], p["wo"], p["bo"]]
    if bias is None:
        kern = functools.partial(_attn_kernel_nobias, num_heads=num_heads, scale=scale)
    else:
        kern = functools.partial(_attn_kernel_bias, num_heads=num_heads, scale=scale)
        in_specs.append(pl.BlockSpec((L, L), lambda i: (0, 0)))
        args.append(bias)
    return pl.pallas_call(
        kern,
        out_shape=jax.ShapeDtypeStruct((G, L, D), jnp.float32),
        grid=(G // gb,),
        in_specs=in_specs,
        out_specs=xspec,
        compiler_params=pltpu.CompilerParams(dimension_semantics=("parallel",)),
    )(*args)


# --------------------------------------------------------------------------
# fused MoE block: LN -> gate (softmax + top-k) -> expert FFNs -> combine -> +res
# --------------------------------------------------------------------------
def _moe_kernel(x_ref, g_ref, b_ref, wg_ref, bg_ref,
                w1_ref, b1_ref, w2_ref, b2_ref,
                o_ref, stats_ref,
                h_sc, comb_sc, acc_sc, *, ep, hff, top_k):
    g = pl.program_id(1)
    n_g = pl.num_programs(1)
    E = comb_sc.shape[-1]

    @pl.when(g == 0)
    def _():
        x = x_ref[...]
        mu = jnp.mean(x, axis=-1, keepdims=True)
        var = jnp.mean((x - mu) ** 2, axis=-1, keepdims=True)
        h = (x - mu) * lax.rsqrt(var + 1e-5) * g_ref[...] + b_ref[...]
        h_sc[...] = h.astype(jnp.bfloat16)
        acc_sc[...] = jnp.zeros_like(acc_sc)

        # gate: logits -> softmax -> top-k combine weights (stay resident in VMEM)
        logits = jnp.dot(h_sc[...], wg_ref[...],
                         preferred_element_type=jnp.float32) + bg_ref[...]
        logits = logits - jnp.max(logits, axis=-1, keepdims=True)
        pexp = jnp.exp(logits)
        probs = pexp / jnp.sum(pexp, axis=-1, keepdims=True)        # [tm, E]
        lane = lax.broadcasted_iota(jnp.int32, probs.shape, 1)
        work = probs
        comb = jnp.zeros_like(probs)
        mask = jnp.zeros_like(probs)
        for _ in range(top_k):
            mx = jnp.max(work, axis=-1, keepdims=True)
            is_mx = work == mx
            first = jnp.min(jnp.where(is_mx, lane, E), axis=-1, keepdims=True)
            sel = lane == first
            comb = jnp.where(sel, probs, comb)
            mask = jnp.where(sel, 1.0, mask)
            work = jnp.where(sel, -jnp.inf, work)
        comb = comb / (jnp.sum(comb, axis=-1, keepdims=True) + 1e-9)
        comb_sc[...] = comb

        # per-tile gate statistics for the aux (load-balancing) loss
        psum = jnp.sum(probs, axis=0, keepdims=True)                 # [1, E]
        msum = jnp.sum(mask, axis=0, keepdims=True)                  # [1, E]
        stats_ref[...] = jnp.concatenate(
            [psum, msum, jnp.zeros((6, E), jnp.float32)], axis=0)[None]

    # expert group g: `ep` experts fused along the Hff axis
    h = h_sc[...]                                                    # bf16 [tm, D]
    a = jnp.maximum(
        jnp.dot(h, w1_ref[0], preferred_element_type=jnp.float32) + b1_ref[0],
        0.0)                                                         # [tm, ep*hff]

    comb = comb_sc[...]                                              # [tm, E]
    lane_e = lax.broadcasted_iota(jnp.int32, comb.shape, 1)
    b2 = b2_ref[0]                                                   # [ep, D]
    scale_pieces = []
    yb = None
    for j in range(ep):
        idx = g * ep + j
        w_j = jnp.sum(jnp.where(lane_e == idx, comb, 0.0),
                      axis=-1, keepdims=True)                        # [tm, 1]
        scale_pieces.append(jnp.broadcast_to(w_j, (w_j.shape[0], hff)))
        contrib = w_j * b2[j:j + 1, :]                               # [tm, D]
        yb = contrib if yb is None else yb + contrib
    scale = (jnp.concatenate(scale_pieces, axis=-1)
             if ep > 1 else scale_pieces[0])                         # [tm, ep*hff]
    # sum_j w_j * (a_j @ W2_j)  ==  (a * scale) @ [W2_0; ...; W2_{ep-1}]
    y = jnp.dot((a * scale).astype(jnp.bfloat16), w2_ref[0],
                preferred_element_type=jnp.float32)                  # [tm, D]
    acc_sc[...] += y + yb

    @pl.when(g == n_g - 1)
    def _():
        o_ref[...] = x_ref[...] + acc_sc[...]        # residual fused into the store


def moe_block(x_flat, layer, top_k):
    """x + sum_{e in top-k} combine_e * FFN_e(LN(x)); gate computed in-kernel."""
    mp = layer["moe"]
    M, D = x_flat.shape
    E = mp["wg"].shape[1]
    Gexp, _, ep_hff = mp["w1m"].shape
    ep = E // Gexp
    Hff = ep_hff // ep
    tm = _pick_tile(M)
    Mtiles = M // tm

    kern = functools.partial(_moe_kernel, ep=ep, hff=Hff, top_k=top_k)
    out, stats = pl.pallas_call(
        kern,
        out_shape=(jax.ShapeDtypeStruct((M, D), jnp.float32),
                   jax.ShapeDtypeStruct((Mtiles, 8, E), jnp.float32)),
        grid=(Mtiles, Gexp),
        in_specs=[
            pl.BlockSpec((tm, D), lambda m, g: (m, 0)),
            pl.BlockSpec((1, D), lambda m, g: (0, 0)),
            pl.BlockSpec((1, D), lambda m, g: (0, 0)),
            pl.BlockSpec((D, E), lambda m, g: (0, 0)),
            pl.BlockSpec((1, E), lambda m, g: (0, 0)),
            pl.BlockSpec((1, D, ep_hff), lambda m, g: (g, 0, 0)),
            pl.BlockSpec((1, 1, ep_hff), lambda m, g: (g, 0, 0)),
            pl.BlockSpec((1, ep_hff, D), lambda m, g: (g, 0, 0)),
            pl.BlockSpec((1, ep, D), lambda m, g: (g, 0, 0)),
        ],
        out_specs=(pl.BlockSpec((tm, D), lambda m, g: (m, 0)),
                   pl.BlockSpec((1, 8, E), lambda m, g: (m, 0, 0))),
        scratch_shapes=[
            pltpu.VMEM((tm, D), jnp.bfloat16),   # LN(x), cast once per tile
            pltpu.VMEM((tm, E), jnp.float32),    # combine weights
            pltpu.VMEM((tm, D), jnp.float32),    # expert accumulator
        ],
        compiler_params=pltpu.CompilerParams(
            dimension_semantics=("parallel", "arbitrary")),
    )(x_flat, layer["ln3_g"], layer["ln3_b"], mp["wg"], mp["bg"],
      mp["w1m"], mp["b1m"], mp["w2m"], mp["b2m"])

    # Switch-style aux loss (extended to top-k) from the per-tile gate stats
    probs_mean = jnp.sum(stats[:, 0, :], axis=0) / M
    frac = jnp.sum(stats[:, 1, :], axis=0) / (M * top_k)
    aux = jnp.float32(E) * jnp.sum(frac * probs_mean)
    return out, aux


# --------------------------------------------------------------------------
# parameter preparation (done ONCE, outside jit): bf16 weights, expert merge
# --------------------------------------------------------------------------
def prepare_params(raw, cfg):
    D = cfg["d_model"]
    E = cfg["num_experts"]
    Hff = D * cfg["mlp_ratio"]
    bf = jnp.bfloat16
    ep = _pick_experts_per_step(E, D, Hff)
    Gexp = E // ep

    def prep_attn(p):
        return {"wqkv": p["wqkv"].astype(bf), "bqkv": p["bqkv"].reshape(1, -1),
                "wo": p["wo"].astype(bf), "bo": p["bo"].reshape(1, -1)}

    layers = []
    for lp in raw["layers"]:
        mp = lp["moe"]
        w1m = (mp["w1"].reshape(Gexp, ep, D, Hff).transpose(0, 2, 1, 3)
               .reshape(Gexp, D, ep * Hff).astype(bf))
        b1m = mp["b1"].reshape(Gexp, 1, ep * Hff)
        w2m = mp["w2"].reshape(Gexp, ep * Hff, D).astype(bf)
        b2m = mp["b2"].reshape(Gexp, ep, D)
        layers.append({
            "ln1_g": lp["ln1_g"].reshape(1, 1, D), "ln1_b": lp["ln1_b"].reshape(1, 1, D),
            "ln2_g": lp["ln2_g"].reshape(1, 1, D), "ln2_b": lp["ln2_b"].reshape(1, 1, D),
            "ln3_g": lp["ln3_g"].reshape(1, D), "ln3_b": lp["ln3_b"].reshape(1, D),
            "attn_t": prep_attn(lp["attn_t"]),
            "attn_s": prep_attn(lp["attn_s"]),
            "graph_scale": lp["graph_scale"],
            "moe": {"wg": mp["wg"].astype(bf), "bg": mp["bg"].reshape(1, E),
                    "w1m": w1m, "b1m": b1m, "w2m": w2m, "b2m": b2m},
        })
    return {
        "filter_wr": raw["filter_wr"], "filter_wi": raw["filter_wi"],
        "in_w": raw["in_w"].astype(bf), "in_b": raw["in_b"].reshape(1, D),
        "emb": raw["pos_T"][:, None, :] + raw["node_emb"][None, :, :],   # [T, N, D]
        "layers": layers,
    }


# --------------------------------------------------------------------------
# forward pass (model glue in plain JAX: FFT filter, layout transposes)
# --------------------------------------------------------------------------
def moe_star_forward(params, view, graph, cfg):
    B, T, N, C = view.shape
    D = cfg["d_model"]
    H = cfg["num_heads"]

    # ---- FilterLayer (fft_status branch) --------------------------------
    if cfg["fft_status"]:
        x = jnp.transpose(view, (0, 3, 2, 1))                  # [B, C, N, T]
        # TODO(synk): rfft/irfft have no Pallas equivalent; the elementwise
        # complex-weight multiply is left to XLA (it fuses with the FFTs).
        xf = jnp.fft.rfft(x, axis=-1)
        wf = params["filter_wr"] + 1j * params["filter_wi"]    # [N, F]
        x = jnp.fft.irfft(xf * wf[None, None, :, :], n=T, axis=-1)
        view = jnp.transpose(x, (0, 3, 2, 1)).astype(jnp.float32)

    # ---- input projection + embeddings (one fused call) -----------------
    x = input_projection(view, params["in_w"], params["in_b"], params["emb"])

    aux_loss = jnp.float32(0.0)
    for layer in params["layers"]:
        # temporal attention: groups = B*N, sequence length T (bias-free)
        xt = jnp.transpose(x, (0, 2, 1, 3)).reshape(B * N, T, D)
        xt = attention_block(xt, layer["ln1_g"], layer["ln1_b"],
                             layer["attn_t"], None, H)
        # spatial attention: groups = B*T, sequence length N, graph bias
        xs = jnp.transpose(xt.reshape(B, N, T, D), (0, 2, 1, 3)).reshape(B * T, N, D)
        bias_s = layer["graph_scale"] * graph                  # [N, N]
        xs = attention_block(xs, layer["ln2_g"], layer["ln2_b"],
                             layer["attn_s"], bias_s, H)
        # fused LN + gate + MoE FFN + combine + residual
        y, aux = moe_block(xs.reshape(B * T * N, D), layer, cfg["top_k"])
        aux_loss = aux_loss + aux
        x = y.reshape(B, T, N, D)

    repr_ = jnp.transpose(x, (0, 2, 1, 3))                     # [B, N, T, D]
    return repr_, aux_loss


# --------------------------------------------------------------------------
# deterministic parameter init (shapes implied by the module's __init__)
# --------------------------------------------------------------------------
def init_params(key, cfg):
    C = cfg["d_output"]
    D = cfg["d_model"]
    T = cfg["input_length"]
    N = cfg["num_nodes"]
    E = cfg["num_experts"]
    Hff = D * cfg["mlp_ratio"]
    L = cfg["num_layers"]
    F = T // 2 + 1

    keys = iter(jax.random.split(key, 512))

    def nrm(shape, scale):
        return jax.random.normal(next(keys), shape, jnp.float32) * scale

    def attn_params():
        return {"wqkv": nrm((D, 3 * D), D ** -0.5),
                "bqkv": jnp.zeros((3 * D,), jnp.float32),
                "wo": nrm((D, D), D ** -0.5),
                "bo": jnp.zeros((D,), jnp.float32)}

    layers = []
    for _ in range(L):
        layers.append({
            "ln1_g": jnp.ones((D,), jnp.float32), "ln1_b": jnp.zeros((D,), jnp.float32),
            "ln2_g": jnp.ones((D,), jnp.float32), "ln2_b": jnp.zeros((D,), jnp.float32),
            "ln3_g": jnp.ones((D,), jnp.float32), "ln3_b": jnp.zeros((D,), jnp.float32),
            "attn_t": attn_params(),
            "attn_s": attn_params(),
            "graph_scale": jnp.float32(0.1),
            "moe": {
                "wg": nrm((D, E), D ** -0.5),
                "bg": jnp.zeros((E,), jnp.float32),
                "w1": nrm((E, D, Hff), D ** -0.5),
                "b1": jnp.zeros((E, 1, Hff), jnp.float32),
                "w2": nrm((E, Hff, D), Hff ** -0.5),
                "b2": jnp.zeros((E, 1, D), jnp.float32),
            },
        })

    return {
        "filter_wr": nrm((N, F), 0.02),
        "filter_wi": nrm((N, F), 0.02),
        "in_w": nrm((C, D), C ** -0.5),
        "in_b": jnp.zeros((D,), jnp.float32),
        "pos_T": nrm((T, D), 0.02),
        "node_emb": nrm((N, D), 0.02),
        "layers": layers,
    }


# --------------------------------------------------------------------------
if __name__ == "__main__":
    cfg = dict(
        d_output=2,        # input feature dim fed to STAttention
        d_model=32,
        num_heads=4,
        mlp_ratio=2,
        num_layers=2,
        num_experts=4,
        top_k=2,
        input_length=8,
        num_nodes=8,
        fft_status=True,
    )

    key = jax.random.PRNGKey(0)
    k_param, k_view = jax.random.split(key)
    raw_params = init_params(k_param, cfg)
    params = prepare_params(raw_params, cfg)   # bf16 weights / merged experts, once

    B, T, N, C = 2, cfg["input_length"], cfg["num_nodes"], cfg["d_output"]
    view = jax.random.normal(k_view, (B, T, N, C), jnp.float32)
    idx = jnp.arange(N)
    graph = (jnp.abs(idx[:, None] - idx[None, :]) <= 1).astype(jnp.float32)

    fwd = jax.jit(functools.partial(moe_star_forward, cfg=cfg))
    repr_, aux_loss = fwd(params, view, graph)
    jax.block_until_ready((repr_, aux_loss))

    assert repr_.shape == (B, N, T, cfg["d_model"])
    assert bool(jnp.all(jnp.isfinite(repr_))) and bool(jnp.isfinite(aux_loss))
    print("KERNEL_OK")
</pallas_src>

<mosaic_0001>
module attributes {stable_mosaic.version = 11 : i64} {
  func.func @_inproj_kernel(%arg0: i32, %arg1: memref<1x8x8x2xf32, #tpu.memory_space<vmem>>, %arg2: memref<2x32xbf16, #tpu.memory_space<vmem>>, %arg3: memref<1x32xf32, #tpu.memory_space<vmem>>, %arg4: memref<8x8x32xf32, #tpu.memory_space<vmem>>, %arg5: memref<1x8x8x32xf32, #tpu.memory_space<vmem>>) attributes {dimension_semantics = [#tpu.dimension_semantics<parallel>], iteration_bounds = array<i64: 2>, scalar_prefetch = 0 : i64, scratch_operands = 0 : i64, tpu.core_type = #tpu.core_type<tc>, window_params = [{transform_indices = @transform_0, window_bounds = array<i64: 1, 8, 8, 2>}, {pipeline_mode = #tpu.pipeline_mode<synchronous>, transform_indices = @transform_1, window_bounds = array<i64: 2, 32>}, {pipeline_mode = #tpu.pipeline_mode<synchronous>, transform_indices = @transform_2, window_bounds = array<i64: 1, 32>}, {pipeline_mode = #tpu.pipeline_mode<synchronous>, transform_indices = @transform_3, window_bounds = array<i64: 8, 8, 32>}, {transform_indices = @transform_4, window_bounds = array<i64: 1, 8, 8, 32>}]} {
    %c0 = arith.constant 0 : index
    %c0_0 = arith.constant 0 : index
    %c0_1 = arith.constant 0 : index
    %c0_2 = arith.constant 0 : index
    %0 = vector.load %arg1[%c0, %c0_0, %c0_1, %c0_2] : memref<1x8x8x2xf32, #tpu.memory_space<vmem>>, vector<1x8x8x2xf32>
    %1 = vector.shape_cast %0 : vector<1x8x8x2xf32> to vector<8x8x2xf32>
    %2 = vector.shape_cast %1 : vector<8x8x2xf32> to vector<64x2xf32>
    %3 = arith.truncf %2 : vector<64x2xf32> to vector<64x2xbf16>
    %c0_3 = arith.constant 0 : index
    %c0_4 = arith.constant 0 : index
    %4 = vector.load %arg2[%c0_3, %c0_4] : memref<2x32xbf16, #tpu.memory_space<vmem>>, vector<2x32xbf16>
    %cst = arith.constant dense<0.000000e+00> : vector<64x32xf32>
    %5 = tpu.matmul %3, %4, %cst {dimension_numbers = #tpu.dot_dimension_numbers<[1], [0], [0], [1], [0, 0, 1, 1], [], []>} : vector<64x2xbf16>, vector<2x32xbf16>, vector<64x32xf32> -> vector<64x32xf32>
    %c0_5 = arith.constant 0 : index
    %c0_6 = arith.constant 0 : index
    %6 = vector.load %arg3[%c0_5, %c0_6] : memref<1x32xf32, #tpu.memory_space<vmem>>, vector<1x32xf32>
    %7 = vector.broadcast %6 : vector<1x32xf32> to vector<64x32xf32>
    %8 = arith.addf %5, %7 : vector<64x32xf32>
    %9 = vector.shape_cast %8 : vector<64x32xf32> to vector<8x8x32xf32>
    %c0_7 = arith.constant 0 : index
    %c0_8 = arith.constant 0 : index
    %c0_9 = arith.constant 0 : index
    %10 = vector.load %arg4[%c0_7, %c0_8, %c0_9] : memref<8x8x32xf32, #tpu.memory_space<vmem>>, vector<8x8x32xf32>
    %11 = arith.addf %9, %10 : vector<8x8x32xf32>
    %c0_10 = arith.constant 0 : index
    %c0_11 = arith.constant 0 : index
    %c0_12 = arith.constant 0 : index
    %c0_13 = arith.constant 0 : index
    %12 = vector.load %arg5[%c0_10, %c0_11, %c0_12, %c0_13] : memref<1x8x8x32xf32, #tpu.memory_space<vmem>>, vector<1x8x8x32xf32>
    %13 = vector.shape_cast %12 : vector<1x8x8x32xf32> to vector<8x8x32xf32>
    %14 = vector.shape_cast %11 : vector<8x8x32xf32> to vector<1x8x8x32xf32>
    tpu.vector_store %arg5[%c0_10, %c0_11, %c0_12, %c0_13], %14 {strides = array<i32>} : memref<1x8x8x32xf32, #tpu.memory_space<vmem>>, vector<1x8x8x32xf32>,
    return
  }
  func.func @transform_0(%arg0: i32) -> (i32, i32, i32, i32) {
    %c0_i32 = arith.constant 0 : i32
    %c0_i32_0 = arith.constant 0 : i32
    %c0_i32_1 = arith.constant 0 : i32
    %c0_i32_2 = arith.constant 0 : i32
    return %arg0, %c0_i32, %c0_i32_0, %c0_i32_1 : i32, i32, i32, i32
  }
  func.func @transform_1(%arg0: i32) -> (i32, i32) {
    %c0_i32 = arith.constant 0 : i32
    %c0_i32_0 = arith.constant 0 : i32
    %c0_i32_1 = arith.constant 0 : i32
    return %c0_i32, %c0_i32_0 : i32, i32
  }
  func.func @transform_2(%arg0: i32) -> (i32, i32) {
    %c0_i32 = arith.constant 0 : i32
    %c0_i32_0 = arith.constant 0 : i32
    %c0_i32_1 = arith.constant 0 : i32
    return %c0_i32, %c0_i32_0 : i32, i32
  }
  func.func @transform_3(%arg0: i32) -> (i32, i32, i32) {
    %c0_i32 = arith.constant 0 : i32
    %c0_i32_0 = arith.constant 0 : i32
    %c0_i32_1 = arith.constant 0 : i32
    %c0_i32_2 = arith.constant 0 : i32
    return %c0_i32, %c0_i32_0, %c0_i32_1 : i32, i32, i32
  }
  func.func @transform_4(%arg0: i32) -> (i32, i32, i32, i32) {
    %c0_i32 = arith.constant 0 : i32
    %c0_i32_0 = arith.constant 0 : i32
    %c0_i32_1 = arith.constant 0 : i32
    %c0_i32_2 = arith.constant 0 : i32
    return %arg0, %c0_i32, %c0_i32_0, %c0_i32_1 : i32, i32, i32, i32
  }
}

module attributes {stable_mosaic.version = 11 : i64} {
  func.func @_attn_kernel_nobias(%arg0: i32, %arg1: memref<8x8x32xf32, #tpu.memory_space<vmem>>, %arg2: memref<1x1x32xf32, #tpu.memory_space<vmem>>, %arg3: memref<1x1x32xf32, #tpu.memory_space<vmem>>, %arg4: memref<32x96xbf16, #tpu.memory_space<vmem>>, %arg5: memref<1x96xf32, #tpu.memory_space<vmem>>, %arg6: memref<32x32xbf16, #tpu.memory_space<vmem>>, %arg7: memref<1x32xf32, #tpu.memory_space<vmem>>, %arg8: memref<8x8x32xf32, #tpu.memory_space<vmem>>) attributes {dimension_semantics = [#tpu.dimension_semantics<parallel>], iteration_bounds = array<i64: 2>, scalar_prefetch = 0 : i64, scratch_operands = 0 : i64, tpu.core_type = #tpu.core_type<tc>, window_params = [{transform_indices = @transform_0, window_bounds = array<i64: 8, 8, 32>}, {pipeline_mode = #tpu.pipeline_mode<synchronous>, transform_indices = @transform_1, window_bounds = array<i64: 1, 1, 32>}, {pipeline_mode = #tpu.pipeline_mode<synchronous>, transform_indices = @transform_2, window_bounds = array<i64: 1, 1, 32>}, {pipeline_mode = #tpu.pipeline_mode<synchronous>, transform_indices = @transform_3, window_bounds = array<i64: 32, 96>}, {pipeline_mode = #tpu.pipeline_mode<synchronous>, transform_indices = @transform_4, window_bounds = array<i64: 1, 96>}, {pipeline_mode = #tpu.pipeline_mode<synchronous>, transform_indices = @transform_5, window_bounds = array<i64: 32, 32>}, {pipeline_mode = #tpu.pipeline_mode<synchronous>, transform_indices = @transform_6, window_bounds = array<i64: 1, 32>}, {transform_indices = @transform_7, window_bounds = array<i64: 8, 8, 32>}]} {
    %c0 = arith.constant 0 : index
    %c0_0 = arith.constant 0 : index
    %c0_1 = arith.constant 0 : index
    %0 = vector.load %arg1[%c0, %c0_0, %c0_1] : memref<8x8x32xf32, #tpu.memory_space<vmem>>, vector<8x8x32xf32>
    %c0_2 = arith.constant 0 : index
    %c0_3 = arith.constant 0 : index
    %c0_4 = arith.constant 0 : index
    %1 = vector.load %arg2[%c0_2, %c0_3, %c0_4] : memref<1x1x32xf32, #tpu.memory_space<vmem>>, vector<1x1x32xf32>
    %c0_5 = arith.constant 0 : index
    %c0_6 = arith.constant 0 : index
    %c0_7 = arith.constant 0 : index
    %2 = vector.load %arg3[%c0_5, %c0_6, %c0_7] : memref<1x1x32xf32, #tpu.memory_space<vmem>>, vector<1x1x32xf32>
    %c0_8 = arith.constant 0 : index
    %c0_9 = arith.constant 0 : index
    %3 = vector.load %arg4[%c0_8, %c0_9] : memref<32x96xbf16, #tpu.memory_space<vmem>>, vector<32x96xbf16>
    %c0_10 = arith.constant 0 : index
    %c0_11 = arith.constant 0 : index
    %4 = vector.load %arg5[%c0_10, %c0_11] : memref<1x96xf32, #tpu.memory_space<vmem>>, vector<1x96xf32>
    %c0_12 = arith.constant 0 : index
    %c0_13 = arith.constant 0 : index
    %5 = vector.load %arg6[%c0_12, %c0_13] : memref<32x32xbf16, #tpu.memory_space<vmem>>, vector<32x32xbf16>
    %c0_14 = arith.constant 0 : index
    %c0_15 = arith.constant 0 : index
    %6 = vector.load %arg7[%c0_14, %c0_15] : memref<1x32xf32, #tpu.memory_space<vmem>>, vector<1x32xf32>
    %cst = arith.constant dense<0.000000e+00> : vector<8x8xf32>
    %7 = vector.multi_reduction <add>, %0, %cst [2] : vector<8x8x32xf32> to vector<8x8xf32>
    %8 = vector.shape_cast %7 : vector<8x8xf32> to vector<8x8x1xf32>
    %cst_16 = arith.constant 3.200000e+01 : f32
    %9 = vector.broadcast %cst_16 : f32 to vector<8x8x1xf32>
    %10 = arith.divf %8, %9 : vector<8x8x1xf32>
    %11 = vector.broadcast %10 : vector<8x8x1xf32> to vector<8x8x32xf32>
    %12 = arith.subf %0, %11 : vector<8x8x32xf32>
    %13 = arith.mulf %12, %12 : vector<8x8x32xf32>
    %cst_17 = arith.constant dense<0.000000e+00> : vector<8x8xf32>
    %14 = vector.multi_reduction <add>, %13, %cst_17 [2] : vector<8x8x32xf32> to vector<8x8xf32>
    %15 = vector.shape_cast %14 : vector<8x8xf32> to vector<8x8x1xf32>
    %cst_18 = arith.constant 3.200000e+01 : f32
    %16 = vector.broadcast %cst_18 : f32 to vector<8x8x1xf32>
    %17 = arith.divf %15, %16 : vector<8x8x1xf32>
    %18 = vector.broadcast %10 : vector<8x8x1xf32> to vector<8x8x32xf32>
    %19 = arith.subf %0, %18 : vector<8x8x32xf32>
    %cst_19 = arith.constant 9.99999974E-6 : f32
    %20 = vector.broadcast %cst_19 : f32 to vector<8x8x1xf32>
    %21 = arith.addf %17, %20 : vector<8x8x1xf32>
    %22 = math.rsqrt %21 : vector<8x8x1xf32>
    %23 = vector.broadcast %22 : vector<8x8x1xf32> to vector<8x8x32xf32>
    %24 = arith.mulf %19, %23 : vector<8x8x32xf32>
    %25 = vector.broadcast %1 : vector<1x1x32xf32> to vector<8x8x32xf32>
    %26 = arith.mulf %24, %25 : vector<8x8x32xf32>
    %27 = vector.broadcast %2 : vector<1x1x32xf32> to vector<8x8x32xf32>
    %28 = arith.addf %26, %27 : vector<8x8x32xf32>
    %29 = vector.shape_cast %28 : vector<8x8x32xf32> to vector<64x32xf32>
    %30 = arith.truncf %29 : vector<64x32xf32> to vector<64x32xbf16>
    %cst_20 = arith.constant dense<0.000000e+00> : vector<64x96xf32>
    %31 = tpu.matmul %30, %3, %cst_20 {dimension_numbers = #tpu.dot_dimension_numbers<[1], [0], [0], [1], [0, 0, 1, 1], [], []>} : vector<64x32xbf16>, vector<32x96xbf16>, vector<64x96xf32> -> vector<64x96xf32>
    %32 = vector.broadcast %4 : vector<1x96xf32> to vector<64x96xf32>
    %33 = arith.addf %31, %32 : vector<64x96xf32>
    %34 = vector.shape_cast %33 : vector<64x96xf32> to vector<8x8x96xf32>
    %35 = vector.extract_strided_slice %34 {offsets = [0, 0, 0], sizes = [8, 8, 8], strides = [1, 1, 1]} : vector<8x8x96xf32> to vector<8x8x8xf32>
    %cst_21 = arith.constant 0.353553385 : f32
    %36 = vector.broadcast %cst_21 : f32 to vector<8x8x8xf32>
    %37 = arith.mulf %35, %36 : vector<8x8x8xf32>
    %38 = arith.truncf %37 : vector<8x8x8xf32> to vector<8x8x8xbf16>
    %39 = vector.extract_strided_slice %34 {offsets = [0, 0, 32], sizes = [8, 8, 8], strides = [1, 1, 1]} : vector<8x8x96xf32> to vector<8x8x8xf32>
    %40 = arith.truncf %39 : vector<8x8x8xf32> to vector<8x8x8xbf16>
    %41 = vector.extract_strided_slice %34 {offsets = [0, 0, 64], sizes = [8, 8, 8], strides = [1, 1, 1]} : vector<8x8x96xf32> to vector<8x8x8xf32>
    %42 = arith.truncf %41 : vector<8x8x8xf32> to vector<8x8x8xbf16>
    "tpu.trace_start"() <{level = 10 : i32, message = "gld,gmd->glm"}> : () -> ()
    %cst_22 = arith.constant dense<0.000000e+00> : vector<8x8x8xf32>
    %43 = tpu.matmul %38, %40, %cst_22 {dimension_numbers = #tpu.dot_dimension_numbers<[2], [2], [1], [1], [0, 0, 0, 1, 1, 1], [0], [0]>} : vector<8x8x8xbf16>, vector<8x8x8xbf16>, vector<8x8x8xf32> -> vector<8x8x8xf32>
    "tpu.trace_stop"() : () -> ()
    %cst_23 = arith.constant dense<0xFF800000> : vector<8x8xf32>
    %44 = vector.multi_reduction <maximumf>, %43, %cst_23 [2] : vector<8x8x8xf32> to vector<8x8xf32>
    %45 = vector.shape_cast %44 : vector<8x8xf32> to vector<8x8x1xf32>
    %46 = vector.broadcast %45 : vector<8x8x1xf32> to vector<8x8x8xf32>
    %47 = arith.subf %43, %46 : vector<8x8x8xf32>
    %48 = math.exp %47 : vector<8x8x8xf32>
    %cst_24 = arith.constant dense<0.000000e+00> : vector<8x8xf32>
    %49 = vector.multi_reduction <add>, %48, %cst_24 [2] : vector<8x8x8xf32> to vector<8x8xf32>
    %50 = vector.shape_cast %49 : vector<8x8xf32> to vector<8x8x1xf32>
    %51 = tpu.reciprocal %50 {approx = true} : vector<8x8x1xf32> -> vector<8x8x1xf32>
    %52 = vector.broadcast %51 : vector<8x8x1xf32> to vector<8x8x8xf32>
    %53 = arith.mulf %48, %52 : vector<8x8x8xf32>
    %54 = arith.truncf %53 : vector<8x8x8xf32> to vector<8x8x8xbf16>
    "tpu.trace_start"() <{level = 10 : i32, message = "glm,gmd->gld"}> : () -> ()
    %cst_25 = arith.constant dense<0.000000e+00> : vector<8x8x8xf32>
    %55 = tpu.matmul %54, %42, %cst_25 {dimension_numbers = #tpu.dot_dimension_numbers<[2], [1], [1], [2], [0, 0, 0, 1, 1, 2], [0], [0]>} : vector<8x8x8xbf16>, vector<8x8x8xbf16>, vector<8x8x8xf32> -> vector<8x8x8xf32>
    "tpu.trace_stop"() : () -> ()
    %56 = vector.extract_strided_slice %34 {offsets = [0, 0, 8], sizes = [8, 8, 8], strides = [1, 1, 1]} : vector<8x8x96xf32> to vector<8x8x8xf32>
    %cst_26 = arith.constant 0.353553385 : f32
    %57 = vector.broadcast %cst_26 : f32 to vector<8x8x8xf32>
    %58 = arith.mulf %56, %57 : vector<8x8x8xf32>
    %59 = arith.truncf %58 : vector<8x8x8xf32> to vector<8x8x8xbf16>
    %60 = vector.extract_strided_slice %34 {offsets = [0, 0, 40], sizes = [8, 8, 8], strides = [1, 1, 1]} : vector<8x8x96xf32> to vector<8x8x8xf32>
    %61 = arith.truncf %60 : vector<8x8x8xf32> to vector<8x8x8xbf16>
    %62 = vector.extract_strided_slice %34 {offsets = [0, 0, 72], sizes = [8, 8, 8], strides = [1, 1, 1]} : vector<8x8x96xf32> to vector<8x8x8xf32>
    %63 = arith.truncf %62 : vector<8x8x8xf32> to vector<8x8x8xbf16>
    "tpu.trace_start"() <{level = 10 : i32, message = "gld,gmd->glm"}> : () -> ()
    %cst_27 = arith.constant dense<0.000000e+00> : vector<8x8x8xf32>
    %64 = tpu.matmul %59, %61, %cst_27 {dimension_numbers = #tpu.dot_dimension_numbers<[2], [2], [1], [1], [0, 0, 0, 1, 1, 1], [0], [0]>} : vector<8x8x8xbf16>, vector<8x8x8xbf16>, vector<8x8x8xf32> -> vector<8x8x8xf32>
    "tpu.trace_stop"() : () -> ()
    %cst_28 = arith.constant dense<0xFF800000> : vector<8x8xf32>
    %65 = vector.multi_reduction <maximumf>, %64, %cst_28 [2] : vector<8x8x8xf32> to vector<8x8xf32>
    %66 = vector.shape_cast %65 : vector<8x8xf32> to vector<8x8x1xf32>
    %67 = vector.broadcast %66 : vector<8x8x1xf32> to vector<8x8x8xf32>
    %68 = arith.subf %64, %67 : vector<8x8x8xf32>
    %69 = math.exp %68 : vector<8x8x8xf32>
    %cst_29 = arith.constant dense<0.000000e+00> : vector<8x8xf32>
    %70 = vector.multi_reduction <add>, %69, %cst_29 [2] : vector<8x8x8xf32> to vector<8x8xf32>
    %71 = vector.shape_cast %70 : vector<8x8xf32> to vector<8x8x1xf32>
    %72 = tpu.reciprocal %71 {approx = true} : vector<8x8x1xf32> -> vector<8x8x1xf32>
    %73 = vector.broadcast %72 : vector<8x8x1xf32> to vector<8x8x8xf32>
    %74 = arith.mulf %69, %73 : vector<8x8x8xf32>
    %75 = arith.truncf %74 : vector<8x8x8xf32> to vector<8x8x8xbf16>
    "tpu.trace_start"() <{level = 10 : i32, message = "glm,gmd->gld"}> : () -> ()
    %cst_30 = arith.constant dense<0.000000e+00> : vector<8x8x8xf32>
    %76 = tpu.matmul %75, %63, %cst_30 {dimension_numbers = #tpu.dot_dimension_numbers<[2], [1], [1], [2], [0, 0, 0, 1, 1, 2], [0], [0]>} : vector<8x8x8xbf16>, vector<8x8x8xbf16>, vector<8x8x8xf32> -> vector<8x8x8xf32>
    "tpu.trace_stop"() : () -> ()
    %77 = vector.extract_strided_slice %34 {offsets = [0, 0, 16], sizes = [8, 8, 8], strides = [1, 1, 1]} : vector<8x8x96xf32> to vector<8x8x8xf32>
    %cst_31 = arith.constant 0.353553385 : f32
    %78 = vector.broadcast %cst_31 : f32 to vector<8x8x8xf32>
    %79 = arith.mulf %77, %78 : vector<8x8x8xf32>
    %80 = arith.truncf %79 : vector<8x8x8xf32> to vector<8x8x8xbf16>
    %81 = vector.extract_strided_slice %34 {offsets = [0, 0, 48], sizes = [8, 8, 8], strides = [1, 1, 1]} : vector<8x8x96xf32> to vector<8x8x8xf32>
    %82 = arith.truncf %81 : vector<8x8x8xf32> to vector<8x8x8xbf16>
    %83 = vector.extract_strided_slice %34 {offsets = [0, 0, 80], sizes = [8, 8, 8], strides = [1, 1, 1]} : vector<8x8x96xf32> to vector<8x8x8xf32>
    %84 = arith.truncf %83 : vector<8x8x8xf32> to vector<8x8x8xbf16>
    "tpu.trace_start"() <{level = 10 : i32, message = "gld,gmd->glm"}> : () -> ()
    %cst_32 = arith.constant dense<0.000000e+00> : vector<8x8x8xf32>
    %85 = tpu.matmul %80, %82, %cst_32 {dimension_numbers = #tpu.dot_dimension_numbers<[2], [2], [1], [1], [0, 0, 0, 1, 1, 1], [0], [0]>} : vector<8x8x8xbf16>, vector<8x8x8xbf16>, vector<8x8x8xf32> -> vector<8x8x8xf32>
    "tpu.trace_stop"() : () -> ()
    %cst_33 = arith.constant dense<0xFF800000> : vector<8x8xf32>
    %86 = vector.multi_reduction <maximumf>, %85, %cst_33 [2] : vector<8x8x8xf32> to vector<8x8xf32>
    %87 = vector.shape_cast %86 : vector<8x8xf32> to vector<8x8x1xf32>
    %88 = vector.broadcast %87 : vector<8x8x1xf32> to vector<8x8x8xf32>
    %89 = arith.subf %85, %88 : vector<8x8x8xf32>
    %90 = math.exp %89 : vector<8x8x8xf32>
    %cst_34 = arith.constant dense<0.000000e+00> : vector<8x8xf32>
    %91 = vector.multi_reduction <add>, %90, %cst_34 [2] : vector<8x8x8xf32> to vector<8x8xf32>
    %92 = vector.shape_cast %91 : vector<8x8xf32> to vector<8x8x1xf32>
    %93 = tpu.reciprocal %92 {approx = true} : vector<8x8x1xf32> -> vector<8x8x1xf32>
    %94 = vector.broadcast %93 : vector<8x8x1xf32> to vector<8x8x8xf32>
    %95 = arith.mulf %90, %94 : vector<8x8x8xf32>
    %96 = arith.truncf %95 : vector<8x8x8xf32> to vector<8x8x8xbf16>
    "tpu.trace_start"() <{level = 10 : i32, message = "glm,gmd->gld"}> : () -> ()
    %cst_35 = arith.constant dense<0.000000e+00> : vector<8x8x8xf32>
    %97 = tpu.matmul %96, %84, %cst_35 {dimension_numbers = #tpu.dot_dimension_numbers<[2], [1], [1], [2], [0, 0, 0, 1, 1, 2], [0], [0]>} : vector<8x8x8xbf16>, vector<8x8x8xbf16>, vector<8x8x8xf32> -> vector<8x8x8xf32>
    "tpu.trace_stop"() : () -> ()
    %98 = vector.extract_strided_slice %34 {offsets = [0, 0, 24], sizes = [8, 8, 8], strides = [1, 1, 1]} : vector<8x8x96xf32> to vector<8x8x8xf32>
    %cst_36 = arith.constant 0.353553385 : f32
    %99 = vector.broadcast %cst_36 : f32 to vector<8x8x8xf32>
    %100 = arith.mulf %98, %99 : vector<8x8x8xf32>
    %101 = arith.truncf %100 : vector<8x8x8xf32> to vector<8x8x8xbf16>
    %102 = vector.extract_strided_slice %34 {offsets = [0, 0, 56], sizes = [8, 8, 8], strides = [1, 1, 1]} : vector<8x8x96xf32> to vector<8x8x8xf32>
    %103 = arith.truncf %102 : vector<8x8x8xf32> to vector<8x8x8xbf16>
    %104 = vector.extract_strided_slice %34 {offsets = [0, 0, 88], sizes = [8, 8, 8], strides = [1, 1, 1]} : vector<8x8x96xf32> to vector<8x8x8xf32>
    %105 = arith.truncf %104 : vector<8x8x8xf32> to vector<8x8x8xbf16>
    "tpu.trace_start"() <{level = 10 : i32, message = "gld,gmd->glm"}> : () -> ()
    %cst_37 = arith.constant dense<0.000000e+00> : vector<8x8x8xf32>
    %106 = tpu.matmul %101, %103, %cst_37 {dimension_numbers = #tpu.dot_dimension_numbers<[2], [2], [1], [1], [0, 0, 0, 1, 1, 1], [0], [0]>} : vector<8x8x8xbf16>, vector<8x8x8xbf16>, vector<8x8x8xf32> -> vector<8x8x8xf32>
    "tpu.trace_stop"() : () -> ()
    %cst_38 = arith.constant dense<0xFF800000> : vector<8x8xf32>
    %107 = vector.multi_reduction <maximumf>, %106, %cst_38 [2] : vector<8x8x8xf32> to vector<8x8xf32>
    %108 = vector.shape_cast %107 : vector<8x8xf32> to vector<8x8x1xf32>
    %109 = vector.broadcast %108 : vector<8x8x1xf32> to vector<8x8x8xf32>
    %110 = arith.subf %106, %109 : vector<8x8x8xf32>
    %111 = math.exp %110 : vector<8x8x8xf32>
    %cst_39 = arith.constant dense<0.000000e+00> : vector<8x8xf32>
    %112 = vector.multi_reduction <add>, %111, %cst_39 [2] : vector<8x8x8xf32> to vector<8x8xf32>
    %113 = vector.shape_cast %112 : vector<8x8xf32> to vector<8x8x1xf32>
    %114 = tpu.reciprocal %113 {approx = true} : vector<8x8x1xf32> -> vector<8x8x1xf32>
    %115 = vector.broadcast %114 : vector<8x8x1xf32> to vector<8x8x8xf32>
    %116 = arith.mulf %111, %115 : vector<8x8x8xf32>
    %117 = arith.truncf %116 : vector<8x8x8xf32> to vector<8x8x8xbf16>
    "tpu.trace_start"() <{level = 10 : i32, message = "glm,gmd->gld"}> : () -> ()
    %cst_40 = arith.constant dense<0.000000e+00> : vector<8x8x8xf32>
    %118 = tpu.matmul %117, %105, %cst_40 {dimension_numbers = #tpu.dot_dimension_numbers<[2], [1], [1], [2], [0, 0, 0, 1, 1, 2], [0], [0]>} : vector<8x8x8xbf16>, vector<8x8x8xbf16>, vector<8x8x8xf32> -> vector<8x8x8xf32>
    "tpu.trace_stop"() : () -> ()
    %119 = tpu.concatenate %55, %76, %97, %118 in 2 : vector<8x8x8xf32>, vector<8x8x8xf32>, vector<8x8x8xf32>, vector<8x8x8xf32> -> vector<8x8x32xf32>
    %120 = vector.shape_cast %119 : vector<8x8x32xf32> to vector<64x32xf32>
    %121 = arith.truncf %120 : vector<64x32xf32> to vector<64x32xbf16>
    %cst_41 = arith.constant dense<0.000000e+00> : vector<64x32xf32>
    %122 = tpu.matmul %121, %5, %cst_41 {dimension_numbers = #tpu.dot_dimension_numbers<[1], [0], [0], [1], [0, 0, 1, 1], [], []>} : vector<64x32xbf16>, vector<32x32xbf16>, vector<64x32xf32> -> vector<64x32xf32>
    %123 = vector.broadcast %6 : vector<1x32xf32> to vector<64x32xf32>
    %124 = arith.addf %122, %123 : vector<64x32xf32>
    %125 = vector.shape_cast %124 : vector<64x32xf32> to vector<8x8x32xf32>
    %126 = arith.addf %0, %125 : vector<8x8x32xf32>
    %c0_42 = arith.constant 0 : index
    %c0_43 = arith.constant 0 : index
    %c0_44 = arith.constant 0 : index
    %127 = vector.load %arg8[%c0_42, %c0_43, %c0_44] : memref<8x8x32xf32, #tpu.memory_space<vmem>>, vector<8x8x32xf32>
    tpu.vector_store %arg8[%c0_42, %c0_43, %c0_44], %126 {strides = array<i32>} : memref<8x8x32xf32, #tpu.memory_space<vmem>>, vector<8x8x32xf32>,
    return
  }
  func.func @transform_0(%arg0: i32) -> (i32, i32, i32) {
    %c0_i32 = arith.constant 0 : i32
    %c0_i32_0 = arith.constant 0 : i32
    %c0_i32_1 = arith.constant 0 : i32
    return %arg0, %c0_i32, %c0_i32_0 : i32, i32, i32
  }
  func.func @transform_1(%arg0: i32) -> (i32, i32, i32) {
    %c0_i32 = arith.constant 0 : i32
    %c0_i32_0 = arith.constant 0 : i32
    %c0_i32_1 = arith.constant 0 : i32
    %c0_i32_2 = arith.constant 0 : i32
    return %c0_i32, %c0_i32_0, %c0_i32_1 : i32, i32, i32
  }
  func.func @transform_2(%arg0: i32) -> (i32, i32, i32) {
    %c0_i32 = arith.constant 0 : i32
    %c0_i32_0 = arith.constant 0 : i32
    %c0_i32_1 = arith.constant 0 : i32
    %c0_i32_2 = arith.constant 0 : i32
    return %c0_i32, %c0_i32_0, %c0_i32_1 : i32, i32, i32
  }
  func.func @transform_3(%arg0: i32) -> (i32, i32) {
    %c0_i32 = arith.constant 0 : i32
    %c0_i32_0 = arith.constant 0 : i32
    %c0_i32_1 = arith.constant 0 : i32
    return %c0_i32, %c0_i32_0 : i32, i32
  }
  func.func @transform_4(%arg0: i32) -> (i32, i32) {
    %c0_i32 = arith.constant 0 : i32
    %c0_i32_0 = arith.constant 0 : i32
    %c0_i32_1 = arith.constant 0 : i32
    return %c0_i32, %c0_i32_0 : i32, i32
  }
  func.func @transform_5(%arg0: i32) -> (i32, i32) {
    %c0_i32 = arith.constant 0 : i32
    %c0_i32_0 = arith.constant 0 : i32
    %c0_i32_1 = arith.constant 0 : i32
    return %c0_i32, %c0_i32_0 : i32, i32
  }
  func.func @transform_6(%arg0: i32) -> (i32, i32) {
    %c0_i32 = arith.constant 0 : i32
    %c0_i32_0 = arith.constant 0 : i32
    %c0_i32_1 = arith.constant 0 : i32
    return %c0_i32, %c0_i32_0 : i32, i32
  }
  func.func @transform_7(%arg0: i32) -> (i32, i32, i32) {
    %c0_i32 = arith.constant 0 : i32
    %c0_i32_0 = arith.constant 0 : i32
    %c0_i32_1 = arith.constant 0 : i32
    return %arg0, %c0_i32, %c0_i32_0 : i32, i32, i32
  }
}

module attributes {stable_mosaic.version = 11 : i64} {
  func.func @_attn_kernel_bias(%arg0: i32, %arg1: memref<8x8x32xf32, #tpu.memory_space<vmem>>, %arg2: memref<1x1x32xf32, #tpu.memory_space<vmem>>, %arg3: memref<1x1x32xf32, #tpu.memory_space<vmem>>, %arg4: memref<32x96xbf16, #tpu.memory_space<vmem>>, %arg5: memref<1x96xf32, #tpu.memory_space<vmem>>, %arg6: memref<32x32xbf16, #tpu.memory_space<vmem>>, %arg7: memref<1x32xf32, #tpu.memory_space<vmem>>, %arg8: memref<8x8xf32, #tpu.memory_space<vmem>>, %arg9: memref<8x8x32xf32, #tpu.memory_space<vmem>>) attributes {dimension_semantics = [#tpu.dimension_semantics<parallel>], iteration_bounds = array<i64: 2>, scalar_prefetch = 0 : i64, scratch_operands = 0 : i64, tpu.core_type = #tpu.core_type<tc>, window_params = [{transform_indices = @transform_0, window_bounds = array<i64: 8, 8, 32>}, {pipeline_mode = #tpu.pipeline_mode<synchronous>, transform_indices = @transform_1, window_bounds = array<i64: 1, 1, 32>}, {pipeline_mode = #tpu.pipeline_mode<synchronous>, transform_indices = @transform_2, window_bounds = array<i64: 1, 1, 32>}, {pipeline_mode = #tpu.pipeline_mode<synchronous>, transform_indices = @transform_3, window_bounds = array<i64: 32, 96>}, {pipeline_mode = #tpu.pipeline_mode<synchronous>, transform_indices = @transform_4, window_bounds = array<i64: 1, 96>}, {pipeline_mode = #tpu.pipeline_mode<synchronous>, transform_indices = @transform_5, window_bounds = array<i64: 32, 32>}, {pipeline_mode = #tpu.pipeline_mode<synchronous>, transform_indices = @transform_6, window_bounds = array<i64: 1, 32>}, {pipeline_mode = #tpu.pipeline_mode<synchronous>, transform_indices = @transform_7, window_bounds = array<i64: 8, 8>}, {transform_indices = @transform_8, window_bounds = array<i64: 8, 8, 32>}]} {
    %c0 = arith.constant 0 : index
    %c0_0 = arith.constant 0 : index
    %c0_1 = arith.constant 0 : index
    %0 = vector.load %arg1[%c0, %c0_0, %c0_1] : memref<8x8x32xf32, #tpu.memory_space<vmem>>, vector<8x8x32xf32>
    %c0_2 = arith.constant 0 : index
    %c0_3 = arith.constant 0 : index
    %c0_4 = arith.constant 0 : index
    %1 = vector.load %arg2[%c0_2, %c0_3, %c0_4] : memref<1x1x32xf32, #tpu.memory_space<vmem>>, vector<1x1x32xf32>
    %c0_5 = arith.constant 0 : index
    %c0_6 = arith.constant 0 : index
    %c0_7 = arith.constant 0 : index
    %2 = vector.load %arg3[%c0_5, %c0_6, %c0_7] : memref<1x1x32xf32, #tpu.memory_space<vmem>>, vector<1x1x32xf32>
    %c0_8 = arith.constant 0 : index
    %c0_9 = arith.constant 0 : index
    %3 = vector.load %arg4[%c0_8, %c0_9] : memref<32x96xbf16, #tpu.memory_space<vmem>>, vector<32x96xbf16>
    %c0_10 = arith.constant 0 : index
    %c0_11 = arith.constant 0 : index
    %4 = vector.load %arg5[%c0_10, %c0_11] : memref<1x96xf32, #tpu.memory_space<vmem>>, vector<1x96xf32>
    %c0_12 = arith.constant 0 : index
    %c0_13 = arith.constant 0 : index
    %5 = vector.load %arg6[%c0_12, %c0_13] : memref<32x32xbf16, #tpu.memory_space<vmem>>, vector<32x32xbf16>
    %c0_14 = arith.constant 0 : index
    %c0_15 = arith.constant 0 : index
    %6 = vector.load %arg7[%c0_14, %c0_15] : memref<1x32xf32, #tpu.memory_space<vmem>>, vector<1x32xf32>
    %c0_16 = arith.constant 0 : index
    %c0_17 = arith.constant 0 : index
    %7 = vector.load %arg8[%c0_16, %c0_17] : memref<8x8xf32, #tpu.memory_space<vmem>>, vector<8x8xf32>
    %cst = arith.constant dense<0.000000e+00> : vector<8x8xf32>
    %8 = vector.multi_reduction <add>, %0, %cst [2] : vector<8x8x32xf32> to vector<8x8xf32>
    %9 = vector.shape_cast %8 : vector<8x8xf32> to vector<8x8x1xf32>
    %cst_18 = arith.constant 3.200000e+01 : f32
    %10 = vector.broadcast %cst_18 : f32 to vector<8x8x1xf32>
    %11 = arith.divf %9, %10 : vector<8x8x1xf32>
    %12 = vector.broadcast %11 : vector<8x8x1xf32> to vector<8x8x32xf32>
    %13 = arith.subf %0, %12 : vector<8x8x32xf32>
    %14 = arith.mulf %13, %13 : vector<8x8x32xf32>
    %cst_19 = arith.constant dense<0.000000e+00> : vector<8x8xf32>
    %15 = vector.multi_reduction <add>, %14, %cst_19 [2] : vector<8x8x32xf32> to vector<8x8xf32>
    %16 = vector.shape_cast %15 : vector<8x8xf32> to vector<8x8x1xf32>
    %cst_20 = arith.constant 3.200000e+01 : f32
    %17 = vector.broadcast %cst_20 : f32 to vector<8x8x1xf32>
    %18 = arith.divf %16, %17 : vector<8x8x1xf32>
    %19 = vector.broadcast %11 : vector<8x8x1xf32> to vector<8x8x32xf32>
    %20 = arith.subf %0, %19 : vector<8x8x32xf32>
    %cst_21 = arith.constant 9.99999974E-6 : f32
    %21 = vector.broadcast %cst_21 : f32 to vector<8x8x1xf32>
    %22 = arith.addf %18, %21 : vector<8x8x1xf32>
    %23 = math.rsqrt %22 : vector<8x8x1xf32>
    %24 = vector.broadcast %23 : vector<8x8x1xf32> to vector<8x8x32xf32>
    %25 = arith.mulf %20, %24 : vector<8x8x32xf32>
    %26 = vector.broadcast %1 : vector<1x1x32xf32> to vector<8x8x32xf32>
    %27 = arith.mulf %25, %26 : vector<8x8x32xf32>
    %28 = vector.broadcast %2 : vector<1x1x32xf32> to vector<8x8x32xf32>
    %29 = arith.addf %27, %28 : vector<8x8x32xf32>
    %30 = vector.shape_cast %29 : vector<8x8x32xf32> to vector<64x32xf32>
    %31 = arith.truncf %30 : vector<64x32xf32> to vector<64x32xbf16>
    %cst_22 = arith.constant dense<0.000000e+00> : vector<64x96xf32>
    %32 = tpu.matmul %31, %3, %cst_22 {dimension_numbers = #tpu.dot_dimension_numbers<[1], [0], [0], [1], [0, 0, 1, 1], [], []>} : vector<64x32xbf16>, vector<32x96xbf16>, vector<64x96xf32> -> vector<64x96xf32>
    %33 = vector.broadcast %4 : vector<1x96xf32> to vector<64x96xf32>
    %34 = arith.addf %32, %33 : vector<64x96xf32>
    %35 = vector.shape_cast %34 : vector<64x96xf32> to vector<8x8x96xf32>
    %36 = vector.extract_strided_slice %35 {offsets = [0, 0, 0], sizes = [8, 8, 8], strides = [1, 1, 1]} : vector<8x8x96xf32> to vector<8x8x8xf32>
    %cst_23 = arith.constant 0.353553385 : f32
    %37 = vector.broadcast %cst_23 : f32 to vector<8x8x8xf32>
    %38 = arith.mulf %36, %37 : vector<8x8x8xf32>
    %39 = arith.truncf %38 : vector<8x8x8xf32> to vector<8x8x8xbf16>
    %40 = vector.extract_strided_slice %35 {offsets = [0, 0, 32], sizes = [8, 8, 8], strides = [1, 1, 1]} : vector<8x8x96xf32> to vector<8x8x8xf32>
    %41 = arith.truncf %40 : vector<8x8x8xf32> to vector<8x8x8xbf16>
    %42 = vector.extract_strided_slice %35 {offsets = [0, 0, 64], sizes = [8, 8, 8], strides = [1, 1, 1]} : vector<8x8x96xf32> to vector<8x8x8xf32>
    %43 = arith.truncf %42 : vector<8x8x8xf32> to vector<8x8x8xbf16>
    "tpu.trace_start"() <{level = 10 : i32, message = "gld,gmd->glm"}> : () -> ()
    %cst_24 = arith.constant dense<0.000000e+00> : vector<8x8x8xf32>
    %44 = tpu.matmul %39, %41, %cst_24 {dimension_numbers = #tpu.dot_dimension_numbers<[2], [2], [1], [1], [0, 0, 0, 1, 1, 1], [0], [0]>} : vector<8x8x8xbf16>, vector<8x8x8xbf16>, vector<8x8x8xf32> -> vector<8x8x8xf32>
    "tpu.trace_stop"() : () -> ()
    %45 = vector.shape_cast %7 : vector<8x8xf32> to vector<1x8x8xf32>
    %46 = vector.broadcast %45 : vector<1x8x8xf32> to vector<8x8x8xf32>
    %47 = arith.addf %44, %46 : vector<8x8x8xf32>
    %cst_25 = arith.constant dense<0xFF800000> : vector<8x8xf32>
    %48 = vector.multi_reduction <maximumf>, %47, %cst_25 [2] : vector<8x8x8xf32> to vector<8x8xf32>
    %49 = vector.shape_cast %48 : vector<8x8xf32> to vector<8x8x1xf32>
    %50 = vector.broadcast %49 : vector<8x8x1xf32> to vector<8x8x8xf32>
    %51 = arith.subf %47, %50 : vector<8x8x8xf32>
    %52 = math.exp %51 : vector<8x8x8xf32>
    %cst_26 = arith.constant dense<0.000000e+00> : vector<8x8xf32>
    %53 = vector.multi_reduction <add>, %52, %cst_26 [2] : vector<8x8x8xf32> to vector<8x8xf32>
    %54 = vector.shape_cast %53 : vector<8x8xf32> to vector<8x8x1xf32>
    %55 = tpu.reciprocal %54 {approx = true} : vector<8x8x1xf32> -> vector<8x8x1xf32>
    %56 = vector.broadcast %55 : vector<8x8x1xf32> to vector<8x8x8xf32>
    %57 = arith.mulf %52, %56 : vector<8x8x8xf32>
    %58 = arith.truncf %57 : vector<8x8x8xf32> to vector<8x8x8xbf16>
    "tpu.trace_start"() <{level = 10 : i32, message = "glm,gmd->gld"}> : () -> ()
    %cst_27 = arith.constant dense<0.000000e+00> : vector<8x8x8xf32>
    %59 = tpu.matmul %58, %43, %cst_27 {dimension_numbers = #tpu.dot_dimension_numbers<[2], [1], [1], [2], [0, 0, 0, 1, 1, 2], [0], [0]>} : vector<8x8x8xbf16>, vector<8x8x8xbf16>, vector<8x8x8xf32> -> vector<8x8x8xf32>
    "tpu.trace_stop"() : () -> ()
    %60 = vector.extract_strided_slice %35 {offsets = [0, 0, 8], sizes = [8, 8, 8], strides = [1, 1, 1]} : vector<8x8x96xf32> to vector<8x8x8xf32>
    %cst_28 = arith.constant 0.353553385 : f32
    %61 = vector.broadcast %cst_28 : f32 to vector<8x8x8xf32>
    %62 = arith.mulf %60, %61 : vector<8x8x8xf32>
    %63 = arith.truncf %62 : vector<8x8x8xf32> to vector<8x8x8xbf16>
    %64 = vector.extract_strided_slice %35 {offsets = [0, 0, 40], sizes = [8, 8, 8], strides = [1, 1, 1]} : vector<8x8x96xf32> to vector<8x8x8xf32>
    %65 = arith.truncf %64 : vector<8x8x8xf32> to vector<8x8x8xbf16>
    %66 = vector.extract_strided_slice %35 {offsets = [0, 0, 72], sizes = [8, 8, 8], strides = [1, 1, 1]} : vector<8x8x96xf32> to vector<8x8x8xf32>
    %67 = arith.truncf %66 : vector<8x8x8xf32> to vector<8x8x8xbf16>
    "tpu.trace_start"() <{level = 10 : i32, message = "gld,gmd->glm"}> : () -> ()
    %cst_29 = arith.constant dense<0.000000e+00> : vector<8x8x8xf32>
    %68 = tpu.matmul %63, %65, %cst_29 {dimension_numbers = #tpu.dot_dimension_numbers<[2], [2], [1], [1], [0, 0, 0, 1, 1, 1], [0], [0]>} : vector<8x8x8xbf16>, vector<8x8x8xbf16>, vector<8x8x8xf32> -> vector<8x8x8xf32>
    "tpu.trace_stop"() : () -> ()
    %69 = vector.shape_cast %7 : vector<8x8xf32> to vector<1x8x8xf32>
    %70 = vector.broadcast %69 : vector<1x8x8xf32> to vector<8x8x8xf32>
    %71 = arith.addf %68, %70 : vector<8x8x8xf32>
    %cst_30 = arith.constant dense<0xFF800000> : vector<8x8xf32>
    %72 = vector.multi_reduction <maximumf>, %71, %cst_30 [2] : vector<8x8x8xf32> to vector<8x8xf32>
    %73 = vector.shape_cast %72 : vector<8x8xf32> to vector<8x8x1xf32>
    %74 = vector.broadcast %73 : vector<8x8x1xf32> to vector<8x8x8xf32>
    %75 = arith.subf %71, %74 : vector<8x8x8xf32>
    %76 = math.exp %75 : vector<8x8x8xf32>
    %cst_31 = arith.constant dense<0.000000e+00> : vector<8x8xf32>
    %77 = vector.multi_reduction <add>, %76, %cst_31 [2] : vector<8x8x8xf32> to vector<8x8xf32>
    %78 = vector.shape_cast %77 : vector<8x8xf32> to vector<8x8x1xf32>
    %79 = tpu.reciprocal %78 {approx = true} : vector<8x8x1xf32> -> vector<8x8x1xf32>
    %80 = vector.broadcast %79 : vector<8x8x1xf32> to vector<8x8x8xf32>
    %81 = arith.mulf %76, %80 : vector<8x8x8xf32>
    %82 = arith.truncf %81 : vector<8x8x8xf32> to vector<8x8x8xbf16>
    "tpu.trace_start"() <{level = 10 : i32, message = "glm,gmd->gld"}> : () -> ()
    %cst_32 = arith.constant dense<0.000000e+00> : vector<8x8x8xf32>
    %83 = tpu.matmul %82, %67, %cst_32 {dimension_numbers = #tpu.dot_dimension_numbers<[2], [1], [1], [2], [0, 0, 0, 1, 1, 2], [0], [0]>} : vector<8x8x8xbf16>, vector<8x8x8xbf16>, vector<8x8x8xf32> -> vector<8x8x8xf32>
    "tpu.trace_stop"() : () -> ()
    %84 = vector.extract_strided_slice %35 {offsets = [0, 0, 16], sizes = [8, 8, 8], strides = [1, 1, 1]} : vector<8x8x96xf32> to vector<8x8x8xf32>
    %cst_33 = arith.constant 0.353553385 : f32
    %85 = vector.broadcast %cst_33 : f32 to vector<8x8x8xf32>
    %86 = arith.mulf %84, %85 : vector<8x8x8xf32>
    %87 = arith.truncf %86 : vector<8x8x8xf32> to vector<8x8x8xbf16>
    %88 = vector.extract_strided_slice %35 {offsets = [0, 0, 48], sizes = [8, 8, 8], strides = [1, 1, 1]} : vector<8x8x96xf32> to vector<8x8x8xf32>
    %89 = arith.truncf %88 : vector<8x8x8xf32> to vector<8x8x8xbf16>
    %90 = vector.extract_strided_slice %35 {offsets = [0, 0, 80], sizes = [8, 8, 8], strides = [1, 1, 1]} : vector<8x8x96xf32> to vector<8x8x8xf32>
    %91 = arith.truncf %90 : vector<8x8x8xf32> to vector<8x8x8xbf16>
    "tpu.trace_start"() <{level = 10 : i32, message = "gld,gmd->glm"}> : () -> ()
    %cst_34 = arith.constant dense<0.000000e+00> : vector<8x8x8xf32>
    %92 = tpu.matmul %87, %89, %cst_34 {dimension_numbers = #tpu.dot_dimension_numbers<[2], [2], [1], [1], [0, 0, 0, 1, 1, 1], [0], [0]>} : vector<8x8x8xbf16>, vector<8x8x8xbf16>, vector<8x8x8xf32> -> vector<8x8x8xf32>
    "tpu.trace_stop"() : () -> ()
    %93 = vector.shape_cast %7 : vector<8x8xf32> to vector<1x8x8xf32>
    %94 = vector.broadcast %93 : vector<1x8x8xf32> to vector<8x8x8xf32>
    %95 = arith.addf %92, %94 : vector<8x8x8xf32>
    %cst_35 = arith.constant dense<0xFF800000> : vector<8x8xf32>
    %96 = vector.multi_reduction <maximumf>, %95, %cst_35 [2] : vector<8x8x8xf32> to vector<8x8xf32>
    %97 = vector.shape_cast %96 : vector<8x8xf32> to vector<8x8x1xf32>
    %98 = vector.broadcast %97 : vector<8x8x1xf32> to vector<8x8x8xf32>
    %99 = arith.subf %95, %98 : vector<8x8x8xf32>
    %100 = math.exp %99 : vector<8x8x8xf32>
    %cst_36 = arith.constant dense<0.000000e+00> : vector<8x8xf32>
    %101 = vector.multi_reduction <add>, %100, %cst_36 [2] : vector<8x8x8xf32> to vector<8x8xf32>
    %102 = vector.shape_cast %101 : vector<8x8xf32> to vector<8x8x1xf32>
    %103 = tpu.reciprocal %102 {approx = true} : vector<8x8x1xf32> -> vector<8x8x1xf32>
    %104 = vector.broadcast %103 : vector<8x8x1xf32> to vector<8x8x8xf32>
    %105 = arith.mulf %100, %104 : vector<8x8x8xf32>
    %106 = arith.truncf %105 : vector<8x8x8xf32> to vector<8x8x8xbf16>
    "tpu.trace_start"() <{level = 10 : i32, message = "glm,gmd->gld"}> : () -> ()
    %cst_37 = arith.constant dense<0.000000e+00> : vector<8x8x8xf32>
    %107 = tpu.matmul %106, %91, %cst_37 {dimension_numbers = #tpu.dot_dimension_numbers<[2], [1], [1], [2], [0, 0, 0, 1, 1, 2], [0], [0]>} : vector<8x8x8xbf16>, vector<8x8x8xbf16>, vector<8x8x8xf32> -> vector<8x8x8xf32>
    "tpu.trace_stop"() : () -> ()
    %108 = vector.extract_strided_slice %35 {offsets = [0, 0, 24], sizes = [8, 8, 8], strides = [1, 1, 1]} : vector<8x8x96xf32> to vector<8x8x8xf32>
    %cst_38 = arith.constant 0.353553385 : f32
    %109 = vector.broadcast %cst_38 : f32 to vector<8x8x8xf32>
    %110 = arith.mulf %108, %109 : vector<8x8x8xf32>
    %111 = arith.truncf %110 : vector<8x8x8xf32> to vector<8x8x8xbf16>
    %112 = vector.extract_strided_slice %35 {offsets = [0, 0, 56], sizes = [8, 8, 8], strides = [1, 1, 1]} : vector<8x8x96xf32> to vector<8x8x8xf32>
    %113 = arith.truncf %112 : vector<8x8x8xf32> to vector<8x8x8xbf16>
    %114 = vector.extract_strided_slice %35 {offsets = [0, 0, 88], sizes = [8, 8, 8], strides = [1, 1, 1]} : vector<8x8x96xf32> to vector<8x8x8xf32>
    %115 = arith.truncf %114 : vector<8x8x8xf32> to vector<8x8x8xbf16>
    "tpu.trace_start"() <{level = 10 : i32, message = "gld,gmd->glm"}> : () -> ()
    %cst_39 = arith.constant dense<0.000000e+00> : vector<8x8x8xf32>
    %116 = tpu.matmul %111, %113, %cst_39 {dimension_numbers = #tpu.dot_dimension_numbers<[2], [2], [1], [1], [0, 0, 0, 1, 1, 1], [0], [0]>} : vector<8x8x8xbf16>, vector<8x8x8xbf16>, vector<8x8x8xf32> -> vector<8x8x8xf32>
    "tpu.trace_stop"() : () -> ()
    %117 = vector.shape_cast %7 : vector<8x8xf32> to vector<1x8x8xf32>
    %118 = vector.broadcast %117 : vector<1x8x8xf32> to vector<8x8x8xf32>
    %119 = arith.addf %116, %118 : vector<8x8x8xf32>
    %cst_40 = arith.constant dense<0xFF800000> : vector<8x8xf32>
    %120 = vector.multi_reduction <maximumf>, %119, %cst_40 [2] : vector<8x8x8xf32> to vector<8x8xf32>
    %121 = vector.shape_cast %120 : vector<8x8xf32> to vector<8x8x1xf32>
    %122 = vector.broadcast %121 : vector<8x8x1xf32> to vector<8x8x8xf32>
    %123 = arith.subf %119, %122 : vector<8x8x8xf32>
    %124 = math.exp %123 : vector<8x8x8xf32>
    %cst_41 = arith.constant dense<0.000000e+00> : vector<8x8xf32>
    %125 = vector.multi_reduction <add>, %124, %cst_41 [2] : vector<8x8x8xf32> to vector<8x8xf32>
    %126 = vector.shape_cast %125 : vector<8x8xf32> to vector<8x8x1xf32>
    %127 = tpu.reciprocal %126 {approx = true} : vector<8x8x1xf32> -> vector<8x8x1xf32>
    %128 = vector.broadcast %127 : vector<8x8x1xf32> to vector<8x8x8xf32>
    %129 = arith.mulf %124, %128 : vector<8x8x8xf32>
    %130 = arith.truncf %129 : vector<8x8x8xf32> to vector<8x8x8xbf16>
    "tpu.trace_start"() <{level = 10 : i32, message = "glm,gmd->gld"}> : () -> ()
    %cst_42 = arith.constant dense<0.000000e+00> : vector<8x8x8xf32>
    %131 = tpu.matmul %130, %115, %cst_42 {dimension_numbers = #tpu.dot_dimension_numbers<[2], [1], [1], [2], [0, 0, 0, 1, 1, 2], [0], [0]>} : vector<8x8x8xbf16>, vector<8x8x8xbf16>, vector<8x8x8xf32> -> vector<8x8x8xf32>
    "tpu.trace_stop"() : () -> ()
    %132 = tpu.concatenate %59, %83, %107, %131 in 2 : vector<8x8x8xf32>, vector<8x8x8xf32>, vector<8x8x8xf32>, vector<8x8x8xf32> -> vector<8x8x32xf32>
    %133 = vector.shape_cast %132 : vector<8x8x32xf32> to vector<64x32xf32>
    %134 = arith.truncf %133 : vector<64x32xf32> to vector<64x32xbf16>
    %cst_43 = arith.constant dense<0.000000e+00> : vector<64x32xf32>
    %135 = tpu.matmul %134, %5, %cst_43 {dimension_numbers = #tpu.dot_dimension_numbers<[1], [0], [0], [1], [0, 0, 1, 1], [], []>} : vector<64x32xbf16>, vector<32x32xbf16>, vector<64x32xf32> -> vector<64x32xf32>
    %136 = vector.broadcast %6 : vector<1x32xf32> to vector<64x32xf32>
    %137 = arith.addf %135, %136 : vector<64x32xf32>
    %138 = vector.shape_cast %137 : vector<64x32xf32> to vector<8x8x32xf32>
    %139 = arith.addf %0, %138 : vector<8x8x32xf32>
    %c0_44 = arith.constant 0 : index
    %c0_45 = arith.constant 0 : index
    %c0_46 = arith.constant 0 : index
    %140 = vector.load %arg9[%c0_44, %c0_45, %c0_46] : memref<8x8x32xf32, #tpu.memory_space<vmem>>, vector<8x8x32xf32>
    tpu.vector_store %arg9[%c0_44, %c0_45, %c0_46], %139 {strides = array<i32>} : memref<8x8x32xf32, #tpu.memory_space<vmem>>, vector<8x8x32xf32>,
    return
  }
  func.func @transform_0(%arg0: i32) -> (i32, i32, i32) {
    %c0_i32 = arith.constant 0 : i32
    %c0_i32_0 = arith.constant 0 : i32
    %c0_i32_1 = arith.constant 0 : i32
    return %arg0, %c0_i32, %c0_i32_0 : i32, i32, i32
  }
  func.func @transform_1(%arg0: i32) -> (i32, i32, i32) {
    %c0_i32 = arith.constant 0 : i32
    %c0_i32_0 = arith.constant 0 : i32
    %c0_i32_1 = arith.constant 0 : i32
    %c0_i32_2 = arith.constant 0 : i32
    return %c0_i32, %c0_i32_0, %c0_i32_1 : i32, i32, i32
  }
  func.func @transform_2(%arg0: i32) -> (i32, i32, i32) {
    %c0_i32 = arith.constant 0 : i32
    %c0_i32_0 = arith.constant 0 : i32
    %c0_i32_1 = arith.constant 0 : i32
    %c0_i32_2 = arith.constant 0 : i32
    return %c0_i32, %c0_i32_0, %c0_i32_1 : i32, i32, i32
  }
  func.func @transform_3(%arg0: i32) -> (i32, i32) {
    %c0_i32 = arith.constant 0 : i32
    %c0_i32_0 = arith.constant 0 : i32
    %c0_i32_1 = arith.constant 0 : i32
    return %c0_i32, %c0_i32_0 : i32, i32
  }
  func.func @transform_4(%arg0: i32) -> (i32, i32) {
    %c0_i32 = arith.constant 0 : i32
    %c0_i32_0 = arith.constant 0 : i32
    %c0_i32_1 = arith.constant 0 : i32
    return %c0_i32, %c0_i32_0 : i32, i32
  }
  func.func @transform_5(%arg0: i32) -> (i32, i32) {
    %c0_i32 = arith.constant 0 : i32
    %c0_i32_0 = arith.constant 0 : i32
    %c0_i32_1 = arith.constant 0 : i32
    return %c0_i32, %c0_i32_0 : i32, i32
  }
  func.func @transform_6(%arg0: i32) -> (i32, i32) {
    %c0_i32 = arith.constant 0 : i32
    %c0_i32_0 = arith.constant 0 : i32
    %c0_i32_1 = arith.constant 0 : i32
    return %c0_i32, %c0_i32_0 : i32, i32
  }
  func.func @transform_7(%arg0: i32) -> (i32, i32) {
    %c0_i32 = arith.constant 0 : i32
    %c0_i32_0 = arith.constant 0 : i32
    %c0_i32_1 = arith.constant 0 : i32
    return %c0_i32, %c0_i32_0 : i32, i32
  }
  func.func @transform_8(%arg0: i32) -> (i32, i32, i32) {
    %c0_i32 = arith.constant 0 : i32
    %c0_i32_0 = arith.constant 0 : i32
    %c0_i32_1 = arith.constant 0 : i32
    return %arg0, %c0_i32, %c0_i32_0 : i32, i32, i32
  }
}

module attributes {stable_mosaic.version = 11 : i64} {
  func.func @_moe_kernel(%arg0: i32, %arg1: i32, %arg2: memref<64x32xf32, #tpu.memory_space<vmem>>, %arg3: memref<1x32xf32, #tpu.memory_space<vmem>>, %arg4: memref<1x32xf32, #tpu.memory_space<vmem>>, %arg5: memref<32x4xbf16, #tpu.memory_space<vmem>>, %arg6: memref<1x4xf32, #tpu.memory_space<vmem>>, %arg7: memref<1x32x256xbf16, #tpu.memory_space<vmem>>, %arg8: memref<1x1x256xf32, #tpu.memory_space<vmem>>, %arg9: memref<1x256x32xbf16, #tpu.memory_space<vmem>>, %arg10: memref<1x4x32xf32, #tpu.memory_space<vmem>>, %arg11: memref<64x32xf32, #tpu.memory_space<vmem>>, %arg12: memref<1x8x4xf32, #tpu.memory_space<vmem>>, %arg13: memref<64x32xbf16, #tpu.memory_space<vmem>>, %arg14: memref<64x4xf32, #tpu.memory_space<vmem>>, %arg15: memref<64x32xf32, #tpu.memory_space<vmem>>) attributes {dimension_semantics = [#tpu.dimension_semantics<parallel>, #tpu.dimension_semantics<arbitrary>], iteration_bounds = array<i64: 2, 1>, scalar_prefetch = 0 : i64, scratch_operands = 3 : i64, tpu.core_type = #tpu.core_type<tc>, window_params = [{transform_indices = @transform_0, window_bounds = array<i64: 64, 32>}, {pipeline_mode = #tpu.pipeline_mode<synchronous>, transform_indices = @transform_1, window_bounds = array<i64: 1, 32>}, {pipeline_mode = #tpu.pipeline_mode<synchronous>, transform_indices = @transform_2, window_bounds = array<i64: 1, 32>}, {pipeline_mode = #tpu.pipeline_mode<synchronous>, transform_indices = @transform_3, window_bounds = array<i64: 32, 4>}, {pipeline_mode = #tpu.pipeline_mode<synchronous>, transform_indices = @transform_4, window_bounds = array<i64: 1, 4>}, {transform_indices = @transform_5, window_bounds = array<i64: 1, 32, 256>}, {transform_indices = @transform_6, window_bounds = array<i64: 1, 1, 256>}, {transform_indices = @transform_7, window_bounds = array<i64: 1, 256, 32>}, {transform_indices = @transform_8, window_bounds = array<i64: 1, 4, 32>}, {transform_indices = @transform_9, window_bounds = array<i64: 64, 32>}, {transform_indices = @transform_10, window_bounds = array<i64: 1, 8, 4>}]} {
    %c0_i32 = arith.constant 0 : i32
    %0 = arith.cmpi eq, %arg1, %c0_i32 : i32
    %1 = arith.extui %0 : i1 to i32
    %c0_i32_0 = arith.constant 0 : i32
    %2 = arith.cmpi ne, %1, %c0_i32_0 : i32
    scf.if %2 {
      %c0_36 = arith.constant 0 : index
      %c0_37 = arith.constant 0 : index
      %89 = vector.load %arg2[%c0_36, %c0_37] : memref<64x32xf32, #tpu.memory_space<vmem>>, vector<64x32xf32>
      %cst_38 = arith.constant dense<0.000000e+00> : vector<64xf32>
      %90 = vector.multi_reduction <add>, %89, %cst_38 [1] : vector<64x32xf32> to vector<64xf32>
      %91 = vector.shape_cast %90 : vector<64xf32> to vector<64x1xf32>
      %cst_39 = arith.constant 3.200000e+01 : f32
      %92 = vector.broadcast %cst_39 : f32 to vector<64x1xf32>
      %93 = arith.divf %91, %92 : vector<64x1xf32>
      %94 = vector.broadcast %93 : vector<64x1xf32> to vector<64x32xf32>
      %95 = arith.subf %89, %94 : vector<64x32xf32>
      %96 = arith.mulf %95, %95 : vector<64x32xf32>
      %cst_40 = arith.constant dense<0.000000e+00> : vector<64xf32>
      %97 = vector.multi_reduction <add>, %96, %cst_40 [1] : vector<64x32xf32> to vector<64xf32>
      %98 = vector.shape_cast %97 : vector<64xf32> to vector<64x1xf32>
      %cst_41 = arith.constant 3.200000e+01 : f32
      %99 = vector.broadcast %cst_41 : f32 to vector<64x1xf32>
      %100 = arith.divf %98, %99 : vector<64x1xf32>
      %101 = vector.broadcast %93 : vector<64x1xf32> to vector<64x32xf32>
      %102 = arith.subf %89, %101 : vector<64x32xf32>
      %cst_42 = arith.constant 9.99999974E-6 : f32
      %103 = vector.broadcast %cst_42 : f32 to vector<64x1xf32>
      %104 = arith.addf %100, %103 : vector<64x1xf32>
      %105 = math.rsqrt %104 : vector<64x1xf32>
      %106 = vector.broadcast %105 : vector<64x1xf32> to vector<64x32xf32>
      %107 = arith.mulf %102, %106 : vector<64x32xf32>
      %c0_43 = arith.constant 0 : index
      %c0_44 = arith.constant 0 : index
      %108 = vector.load %arg3[%c0_43, %c0_44] : memref<1x32xf32, #tpu.memory_space<vmem>>, vector<1x32xf32>
      %109 = vector.broadcast %108 : vector<1x32xf32> to vector<64x32xf32>
      %110 = arith.mulf %107, %109 : vector<64x32xf32>
      %c0_45 = arith.constant 0 : index
      %c0_46 = arith.constant 0 : index
      %111 = vector.load %arg4[%c0_45, %c0_46] : memref<1x32xf32, #tpu.memory_space<vmem>>, vector<1x32xf32>
      %112 = vector.broadcast %111 : vector<1x32xf32> to vector<64x32xf32>
      %113 = arith.addf %110, %112 : vector<64x32xf32>
      %114 = arith.truncf %113 : vector<64x32xf32> to vector<64x32xbf16>
      %c0_47 = arith.constant 0 : index
      %c0_48 = arith.constant 0 : index
      %115 = vector.load %arg13[%c0_47, %c0_48] : memref<64x32xbf16, #tpu.memory_space<vmem>>, vector<64x32xbf16>
      tpu.vector_store %arg13[%c0_47, %c0_48], %114 {strides = array<i32>} : memref<64x32xbf16, #tpu.memory_space<vmem>>, vector<64x32xbf16>,
      %cst_49 = arith.constant 0.000000e+00 : f32
      %116 = vector.broadcast %cst_49 : f32 to vector<64x32xf32>
      %c0_50 = arith.constant 0 : index
      %c0_51 = arith.constant 0 : index
      %117 = vector.load %arg15[%c0_50, %c0_51] : memref<64x32xf32, #tpu.memory_space<vmem>>, vector<64x32xf32>
      tpu.vector_store %arg15[%c0_50, %c0_51], %116 {strides = array<i32>} : memref<64x32xf32, #tpu.memory_space<vmem>>, vector<64x32xf32>,
      %c0_52 = arith.constant 0 : index
      %c0_53 = arith.constant 0 : index
      %118 = vector.load %arg13[%c0_52, %c0_53] : memref<64x32xbf16, #tpu.memory_space<vmem>>, vector<64x32xbf16>
      %c0_54 = arith.constant 0 : index
      %c0_55 = arith.constant 0 : index
      %119 = vector.load %arg5[%c0_54, %c0_55] : memref<32x4xbf16, #tpu.memory_space<vmem>>, vector<32x4xbf16>
      %cst_56 = arith.constant dense<0.000000e+00> : vector<64x4xf32>
      %120 = tpu.matmul %118, %119, %cst_56 {dimension_numbers = #tpu.dot_dimension_numbers<[1], [0], [0], [1], [0, 0, 1, 1], [], []>} : vector<64x32xbf16>, vector<32x4xbf16>, vector<64x4xf32> -> vector<64x4xf32>
      %c0_57 = arith.constant 0 : index
      %c0_58 = arith.constant 0 : index
      %121 = vector.load %arg6[%c0_57, %c0_58] : memref<1x4xf32, #tpu.memory_space<vmem>>, vector<1x4xf32>
      %122 = vector.broadcast %121 : vector<1x4xf32> to vector<64x4xf32>
      %123 = arith.addf %120, %122 : vector<64x4xf32>
      %cst_59 = arith.constant dense<0xFF800000> : vector<64xf32>
      %124 = vector.multi_reduction <maximumf>, %123, %cst_59 [1] : vector<64x4xf32> to vector<64xf32>
      %125 = vector.shape_cast %124 : vector<64xf32> to vector<64x1xf32>
      %126 = vector.broadcast %125 : vector<64x1xf32> to vector<64x4xf32>
      %127 = arith.subf %123, %126 : vector<64x4xf32>
      %128 = math.exp %127 : vector<64x4xf32>
      %cst_60 = arith.constant dense<0.000000e+00> : vector<64xf32>
      %129 = vector.multi_reduction <add>, %128, %cst_60 [1] : vector<64x4xf32> to vector<64xf32>
      %130 = vector.shape_cast %129 : vector<64xf32> to vector<64x1xf32>
      %131 = vector.broadcast %130 : vector<64x1xf32> to vector<64x4xf32>
      %132 = arith.divf %128, %131 : vector<64x4xf32>
      %133 = tpu.iota {dimensions = array<i32: 1>} : vector<64x4xi32>
      %cst_61 = arith.constant 0.000000e+00 : f32
      %134 = vector.broadcast %cst_61 : f32 to vector<64x4xf32>
      %cst_62 = arith.constant 0.000000e+00 : f32
      %135 = vector.broadcast %cst_62 : f32 to vector<64x4xf32>
      %cst_63 = arith.constant dense<0xFF800000> : vector<64xf32>
      %136 = vector.multi_reduction <maximumf>, %132, %cst_63 [1] : vector<64x4xf32> to vector<64xf32>
      %137 = vector.shape_cast %136 : vector<64xf32> to vector<64x1xf32>
      %138 = vector.broadcast %137 : vector<64x1xf32> to vector<64x4xf32>
      %139 = arith.cmpf oeq, %132, %138 : vector<64x4xf32>
      %c4_i32_64 = arith.constant 4 : i32
      %140 = vector.broadcast %c4_i32_64 : i32 to vector<64x4xi32>
      %141 = arith.select %139, %133, %140 : vector<64x4xi1>, vector<64x4xi32>
      %cst_65 = arith.constant dense<2147483647> : vector<64xi32>
      %142 = vector.multi_reduction <minsi>, %141, %cst_65 [1] : vector<64x4xi32> to vector<64xi32>
      %143 = vector.shape_cast %142 : vector<64xi32> to vector<64x1xi32>
      %144 = vector.broadcast %143 : vector<64x1xi32> to vector<64x4xi32>
      %145 = arith.cmpi eq, %133, %144 : vector<64x4xi32>
      %146 = arith.select %145, %132, %134 : vector<64x4xi1>, vector<64x4xf32>
      %cst_66 = arith.constant 1.000000e+00 : f32
      %147 = vector.broadcast %cst_66 : f32 to vector<64x4xf32>
      %148 = arith.select %145, %147, %135 : vector<64x4xi1>, vector<64x4xf32>
      %cst_67 = arith.constant 0xFF800000 : f32
      %149 = vector.broadcast %cst_67 : f32 to vector<64x4xf32>
      %150 = arith.select %145, %149, %132 : vector<64x4xi1>, vector<64x4xf32>
      %cst_68 = arith.constant dense<0xFF800000> : vector<64xf32>
      %151 = vector.multi_reduction <maximumf>, %150, %cst_68 [1] : vector<64x4xf32> to vector<64xf32>
      %152 = vector.shape_cast %151 : vector<64xf32> to vector<64x1xf32>
      %153 = vector.broadcast %152 : vector<64x1xf32> to vector<64x4xf32>
      %154 = arith.cmpf oeq, %150, %153 : vector<64x4xf32>
      %c4_i32_69 = arith.constant 4 : i32
      %155 = vector.broadcast %c4_i32_69 : i32 to vector<64x4xi32>
      %156 = arith.select %154, %133, %155 : vector<64x4xi1>, vector<64x4xi32>
      %cst_70 = arith.constant dense<2147483647> : vector<64xi32>
      %157 = vector.multi_reduction <minsi>, %156, %cst_70 [1] : vector<64x4xi32> to vector<64xi32>
      %158 = vector.shape_cast %157 : vector<64xi32> to vector<64x1xi32>
      %159 = vector.broadcast %158 : vector<64x1xi32> to vector<64x4xi32>
      %160 = arith.cmpi eq, %133, %159 : vector<64x4xi32>
      %161 = arith.select %160, %132, %146 : vector<64x4xi1>, vector<64x4xf32>
      %cst_71 = arith.constant 1.000000e+00 : f32
      %162 = vector.broadcast %cst_71 : f32 to vector<64x4xf32>
      %163 = arith.select %160, %162, %148 : vector<64x4xi1>, vector<64x4xf32>
      %cst_72 = arith.constant dense<0.000000e+00> : vector<64xf32>
      %164 = vector.multi_reduction <add>, %161, %cst_72 [1] : vector<64x4xf32> to vector<64xf32>
      %165 = vector.shape_cast %164 : vector<64xf32> to vector<64x1xf32>
      %cst_73 = arith.constant 9.99999971E-10 : f32
      %166 = vector.broadcast %cst_73 : f32 to vector<64x1xf32>
      %167 = arith.addf %165, %166 : vector<64x1xf32>
      %168 = vector.broadcast %167 : vector<64x1xf32> to vector<64x4xf32>
      %169 = arith.divf %161, %168 : vector<64x4xf32>
      %c0_74 = arith.constant 0 : index
      %c0_75 = arith.constant 0 : index
      %170 = vector.load %arg14[%c0_74, %c0_75] : memref<64x4xf32, #tpu.memory_space<vmem>>, vector<64x4xf32>
      tpu.vector_store %arg14[%c0_74, %c0_75], %169 {strides = array<i32>} : memref<64x4xf32, #tpu.memory_space<vmem>>, vector<64x4xf32>,
      %cst_76 = arith.constant dense<0.000000e+00> : vector<4xf32>
      %171 = vector.multi_reduction <add>, %132, %cst_76 [0] : vector<64x4xf32> to vector<4xf32>
      %172 = vector.shape_cast %171 : vector<4xf32> to vector<1x4xf32>
      %cst_77 = arith.constant dense<0.000000e+00> : vector<4xf32>
      %173 = vector.multi_reduction <add>, %163, %cst_77 [0] : vector<64x4xf32> to vector<4xf32>
      %174 = vector.shape_cast %173 : vector<4xf32> to vector<1x4xf32>
      %cst_78 = arith.constant 0.000000e+00 : f32
      %175 = vector.broadcast %cst_78 : f32 to vector<6x4xf32>
      %176 = tpu.concatenate %172, %174, %175 in 0 : vector<1x4xf32>, vector<1x4xf32>, vector<6x4xf32> -> vector<8x4xf32>
      %177 = vector.shape_cast %176 : vector<8x4xf32> to vector<1x8x4xf32>
      %c0_79 = arith.constant 0 : index
      %c0_80 = arith.constant 0 : index
      %c0_81 = arith.constant 0 : index
      %178 = vector.load %arg12[%c0_79, %c0_80, %c0_81] : memref<1x8x4xf32, #tpu.memory_space<vmem>>, vector<1x8x4xf32>
      tpu.vector_store %arg12[%c0_79, %c0_80, %c0_81], %177 {strides = array<i32>} : memref<1x8x4xf32, #tpu.memory_space<vmem>>, vector<1x8x4xf32>,
    } else {
    }
    %c0 = arith.constant 0 : index
    %c0_1 = arith.constant 0 : index
    %3 = vector.load %arg13[%c0, %c0_1] : memref<64x32xbf16, #tpu.memory_space<vmem>>, vector<64x32xbf16>
    %c0_2 = arith.constant 0 : index
    %c0_3 = arith.constant 0 : index
    %c0_4 = arith.constant 0 : index
    %4 = vector.load %arg7[%c0_2, %c0_3, %c0_4] : memref<1x32x256xbf16, #tpu.memory_space<vmem>>, vector<1x32x256xbf16>
    %5 = vector.shape_cast %4 : vector<1x32x256xbf16> to vector<32x256xbf16>
    %cst = arith.constant dense<0.000000e+00> : vector<64x256xf32>
    %6 = tpu.matmul %3, %5, %cst {dimension_numbers = #tpu.dot_dimension_numbers<[1], [0], [0], [1], [0, 0, 1, 1], [], []>} : vector<64x32xbf16>, vector<32x256xbf16>, vector<64x256xf32> -> vector<64x256xf32>
    %c0_5 = arith.constant 0 : index
    %c0_6 = arith.constant 0 : index
    %c0_7 = arith.constant 0 : index
    %7 = vector.load %arg8[%c0_5, %c0_6, %c0_7] : memref<1x1x256xf32, #tpu.memory_space<vmem>>, vector<1x1x256xf32>
    %8 = vector.shape_cast %7 : vector<1x1x256xf32> to vector<1x256xf32>
    %9 = vector.broadcast %8 : vector<1x256xf32> to vector<64x256xf32>
    %10 = arith.addf %6, %9 : vector<64x256xf32>
    %cst_8 = arith.constant 0.000000e+00 : f32
    %11 = vector.broadcast %cst_8 : f32 to vector<64x256xf32>
    %12 = arith.maximumf %10, %11 : vector<64x256xf32>
    %c0_9 = arith.constant 0 : index
    %c0_10 = arith.constant 0 : index
    %13 = vector.load %arg14[%c0_9, %c0_10] : memref<64x4xf32, #tpu.memory_space<vmem>>, vector<64x4xf32>
    %14 = tpu.iota {dimensions = array<i32: 1>} : vector<64x4xi32>
    %c0_11 = arith.constant 0 : index
    %c0_12 = arith.constant 0 : index
    %c0_13 = arith.constant 0 : index
    %15 = vector.load %arg10[%c0_11, %c0_12, %c0_13] : memref<1x4x32xf32, #tpu.memory_space<vmem>>, vector<1x4x32xf32>
    %16 = vector.shape_cast %15 : vector<1x4x32xf32> to vector<4x32xf32>
    %c4_i32 = arith.constant 4 : i32
    %17 = arith.muli %arg1, %c4_i32 : i32
    %c0_i32_14 = arith.constant 0 : i32
    %18 = arith.addi %17, %c0_i32_14 : i32
    %19 = vector.broadcast %18 : i32 to vector<64x4xi32>
    %20 = arith.cmpi eq, %14, %19 : vector<64x4xi32>
    %cst_15 = arith.constant 0.000000e+00 : f32
    %21 = vector.broadcast %cst_15 : f32 to vector<64x4xf32>
    %22 = arith.select %20, %13, %21 : vector<64x4xi1>, vector<64x4xf32>
    %cst_16 = arith.constant dense<0.000000e+00> : vector<64xf32>
    %23 = vector.multi_reduction <add>, %22, %cst_16 [1] : vector<64x4xf32> to vector<64xf32>
    %24 = vector.shape_cast %23 : vector<64xf32> to vector<64x1xf32>
    %25 = vector.shape_cast %24 : vector<64x1xf32> to vector<64x1xf32>
    %26 = vector.broadcast %25 : vector<64x1xf32> to vector<64x64xf32>
    %27 = vector.extract_strided_slice %16 {offsets = [0, 0], sizes = [1, 32], strides = [1, 1]} : vector<4x32xf32> to vector<1x32xf32>
    %28 = vector.broadcast %24 : vector<64x1xf32> to vector<64x32xf32>
    %29 = vector.broadcast %27 : vector<1x32xf32> to vector<64x32xf32>
    %30 = arith.mulf %28, %29 : vector<64x32xf32>
    %c4_i32_17 = arith.constant 4 : i32
    %31 = arith.muli %arg1, %c4_i32_17 : i32
    %c1_i32 = arith.constant 1 : i32
    %32 = arith.addi %31, %c1_i32 : i32
    %33 = vector.broadcast %32 : i32 to vector<64x4xi32>
    %34 = arith.cmpi eq, %14, %33 : vector<64x4xi32>
    %cst_18 = arith.constant 0.000000e+00 : f32
    %35 = vector.broadcast %cst_18 : f32 to vector<64x4xf32>
    %36 = arith.select %34, %13, %35 : vector<64x4xi1>, vector<64x4xf32>
    %cst_19 = arith.constant dense<0.000000e+00> : vector<64xf32>
    %37 = vector.multi_reduction <add>, %36, %cst_19 [1] : vector<64x4xf32> to vector<64xf32>
    %38 = vector.shape_cast %37 : vector<64xf32> to vector<64x1xf32>
    %39 = vector.shape_cast %38 : vector<64x1xf32> to vector<64x1xf32>
    %40 = vector.broadcast %39 : vector<64x1xf32> to vector<64x64xf32>
    %41 = vector.extract_strided_slice %16 {offsets = [1, 0], sizes = [1, 32], strides = [1, 1]} : vector<4x32xf32> to vector<1x32xf32>
    %42 = vector.broadcast %38 : vector<64x1xf32> to vector<64x32xf32>
    %43 = vector.broadcast %41 : vector<1x32xf32> to vector<64x32xf32>
    %44 = arith.mulf %42, %43 : vector<64x32xf32>
    %45 = arith.addf %30, %44 : vector<64x32xf32>
    %c4_i32_20 = arith.constant 4 : i32
    %46 = arith.muli %arg1, %c4_i32_20 : i32
    %c2_i32 = arith.constant 2 : i32
    %47 = arith.addi %46, %c2_i32 : i32
    %48 = vector.broadcast %47 : i32 to vector<64x4xi32>
    %49 = arith.cmpi eq, %14, %48 : vector<64x4xi32>
    %cst_21 = arith.constant 0.000000e+00 : f32
    %50 = vector.broadcast %cst_21 : f32 to vector<64x4xf32>
    %51 = arith.select %49, %13, %50 : vector<64x4xi1>, vector<64x4xf32>
    %cst_22 = arith.constant dense<0.000000e+00> : vector<64xf32>
    %52 = vector.multi_reduction <add>, %51, %cst_22 [1] : vector<64x4xf32> to vector<64xf32>
    %53 = vector.shape_cast %52 : vector<64xf32> to vector<64x1xf32>
    %54 = vector.shape_cast %53 : vector<64x1xf32> to vector<64x1xf32>
    %55 = vector.broadcast %54 : vector<64x1xf32> to vector<64x64xf32>
    %56 = vector.extract_strided_slice %16 {offsets = [2, 0], sizes = [1, 32], strides = [1, 1]} : vector<4x32xf32> to vector<1x32xf32>
    %57 = vector.broadcast %53 : vector<64x1xf32> to vector<64x32xf32>
    %58 = vector.broadcast %56 : vector<1x32xf32> to vector<64x32xf32>
    %59 = arith.mulf %57, %58 : vector<64x32xf32>
    %60 = arith.addf %45, %59 : vector<64x32xf32>
    %c4_i32_23 = arith.constant 4 : i32
    %61 = arith.muli %arg1, %c4_i32_23 : i32
    %c3_i32 = arith.constant 3 : i32
    %62 = arith.addi %61, %c3_i32 : i32
    %63 = vector.broadcast %62 : i32 to vector<64x4xi32>
    %64 = arith.cmpi eq, %14, %63 : vector<64x4xi32>
    %cst_24 = arith.constant 0.000000e+00 : f32
    %65 = vector.broadcast %cst_24 : f32 to vector<64x4xf32>
    %66 = arith.select %64, %13, %65 : vector<64x4xi1>, vector<64x4xf32>
    %cst_25 = arith.constant dense<0.000000e+00> : vector<64xf32>
    %67 = vector.multi_reduction <add>, %66, %cst_25 [1] : vector<64x4xf32> to vector<64xf32>
    %68 = vector.shape_cast %67 : vector<64xf32> to vector<64x1xf32>
    %69 = vector.shape_cast %68 : vector<64x1xf32> to vector<64x1xf32>
    %70 = vector.broadcast %69 : vector<64x1xf32> to vector<64x64xf32>
    %71 = vector.extract_strided_slice %16 {offsets = [3, 0], sizes = [1, 32], strides = [1, 1]} : vector<4x32xf32> to vector<1x32xf32>
    %72 = vector.broadcast %68 : vector<64x1xf32> to vector<64x32xf32>
    %73 = vector.broadcast %71 : vector<1x32xf32> to vector<64x32xf32>
    %74 = arith.mulf %72, %73 : vector<64x32xf32>
    %75 = arith.addf %60, %74 : vector<64x32xf32>
    %76 = tpu.concatenate %26, %40, %55, %70 in 1 : vector<64x64xf32>, vector<64x64xf32>, vector<64x64xf32>, vector<64x64xf32> -> vector<64x256xf32>
    %77 = arith.mulf %12, %76 : vector<64x256xf32>
    %78 = arith.truncf %77 : vector<64x256xf32> to vector<64x256xbf16>
    %c0_26 = arith.constant 0 : index
    %c0_27 = arith.constant 0 : index
    %c0_28 = arith.constant 0 : index
    %79 = vector.load %arg9[%c0_26, %c0_27, %c0_28] : memref<1x256x32xbf16, #tpu.memory_space<vmem>>, vector<1x256x32xbf16>
    %80 = vector.shape_cast %79 : vector<1x256x32xbf16> to vector<256x32xbf16>
    %cst_29 = arith.constant dense<0.000000e+00> : vector<64x32xf32>
    %81 = tpu.matmul %78, %80, %cst_29 {dimension_numbers = #tpu.dot_dimension_numbers<[1], [0], [0], [1], [0, 0, 1, 1], [], []>} : vector<64x256xbf16>, vector<256x32xbf16>, vector<64x32xf32> -> vector<64x32xf32>
    %c0_30 = arith.constant 0 : index
    %c0_31 = arith.constant 0 : index
    %82 = vector.load %arg15[%c0_30, %c0_31] : memref<64x32xf32, #tpu.memory_space<vmem>>, vector<64x32xf32>
    %83 = arith.addf %81, %75 : vector<64x32xf32>
    %84 = arith.addf %82, %83 : vector<64x32xf32>
    %c0_32 = arith.constant 0 : index
    %c0_33 = arith.constant 0 : index
    %85 = vector.load %arg15[%c0_32, %c0_33] : memref<64x32xf32, #tpu.memory_space<vmem>>, vector<64x32xf32>
    tpu.vector_store %arg15[%c0_32, %c0_33], %84 {strides = array<i32>} : memref<64x32xf32, #tpu.memory_space<vmem>>, vector<64x32xf32>,
    %c0_i32_34 = arith.constant 0 : i32
    %86 = arith.cmpi eq, %arg1, %c0_i32_34 : i32
    %87 = arith.extui %86 : i1 to i32
    %c0_i32_35 = arith.constant 0 : i32
    %88 = arith.cmpi ne, %87, %c0_i32_35 : i32
    scf.if %88 {
      %c0_36 = arith.constant 0 : index
      %c0_37 = arith.constant 0 : index
      %89 = vector.load %arg2[%c0_36, %c0_37] : memref<64x32xf32, #tpu.memory_space<vmem>>, vector<64x32xf32>
      %c0_38 = arith.constant 0 : index
      %c0_39 = arith.constant 0 : index
      %90 = vector.load %arg15[%c0_38, %c0_39] : memref<64x32xf32, #tpu.memory_space<vmem>>, vector<64x32xf32>
      %91 = arith.addf %89, %90 : vector<64x32xf32>
      %c0_40 = arith.constant 0 : index
      %c0_41 = arith.constant 0 : index
      %92 = vector.load %arg11[%c0_40, %c0_41] : memref<64x32xf32, #tpu.memory_space<vmem>>, vector<64x32xf32>
      tpu.vector_store %arg11[%c0_40, %c0_41], %91 {strides = array<i32>} : memref<64x32xf32, #tpu.memory_space<vmem>>, vector<64x32xf32>,
    } else {
    }
    return
  }
  func.func @transform_0(%arg0: i32, %arg1: i32) -> (i32, i32) {
    %c0_i32 = arith.constant 0 : i32
    %c0_i32_0 = arith.constant 0 : i32
    return %arg0, %c0_i32 : i32, i32
  }
  func.func @transform_1(%arg0: i32, %arg1: i32) -> (i32, i32) {
    %c0_i32 = arith.constant 0 : i32
    %c0_i32_0 = arith.constant 0 : i32
    %c0_i32_1 = arith.constant 0 : i32
    return %c0_i32, %c0_i32_0 : i32, i32
  }
  func.func @transform_2(%arg0: i32, %arg1: i32) -> (i32, i32) {
    %c0_i32 = arith.constant 0 : i32
    %c0_i32_0 = arith.constant 0 : i32
    %c0_i32_1 = arith.constant 0 : i32
    return %c0_i32, %c0_i32_0 : i32, i32
  }
  func.func @transform_3(%arg0: i32, %arg1: i32) -> (i32, i32) {
    %c0_i32 = arith.constant 0 : i32
    %c0_i32_0 = arith.constant 0 : i32
    %c0_i32_1 = arith.constant 0 : i32
    return %c0_i32, %c0_i32_0 : i32, i32
  }
  func.func @transform_4(%arg0: i32, %arg1: i32) -> (i32, i32) {
    %c0_i32 = arith.constant 0 : i32
    %c0_i32_0 = arith.constant 0 : i32
    %c0_i32_1 = arith.constant 0 : i32
    return %c0_i32, %c0_i32_0 : i32, i32
  }
  func.func @transform_5(%arg0: i32, %arg1: i32) -> (i32, i32, i32) {
    %c0_i32 = arith.constant 0 : i32
    %c0_i32_0 = arith.constant 0 : i32
    %c0_i32_1 = arith.constant 0 : i32
    return %arg1, %c0_i32, %c0_i32_0 : i32, i32, i32
  }
  func.func @transform_6(%arg0: i32, %arg1: i32) -> (i32, i32, i32) {
    %c0_i32 = arith.constant 0 : i32
    %c0_i32_0 = arith.constant 0 : i32
    %c0_i32_1 = arith.constant 0 : i32
    return %arg1, %c0_i32, %c0_i32_0 : i32, i32, i32
  }
  func.func @transform_7(%arg0: i32, %arg1: i32) -> (i32, i32, i32) {
    %c0_i32 = arith.constant 0 : i32
    %c0_i32_0 = arith.constant 0 : i32
    %c0_i32_1 = arith.constant 0 : i32
    return %arg1, %c0_i32, %c0_i32_0 : i32, i32, i32
  }
  func.func @transform_8(%arg0: i32, %arg1: i32) -> (i32, i32, i32) {
    %c0_i32 = arith.constant 0 : i32
    %c0_i32_0 = arith.constant 0 : i32
    %c0_i32_1 = arith.constant 0 : i32
    return %arg1, %c0_i32, %c0_i32_0 : i32, i32, i32
  }
  func.func @transform_9(%arg0: i32, %arg1: i32) -> (i32, i32) {
    %c0_i32 = arith.constant 0 : i32
    %c0_i32_0 = arith.constant 0 : i32
    return %arg0, %c0_i32 : i32, i32
  }
  func.func @transform_10(%arg0: i32, %arg1: i32) -> (i32, i32, i32) {
    %c0_i32 = arith.constant 0 : i32
    %c0_i32_0 = arith.constant 0 : i32
    %c0_i32_1 = arith.constant 0 : i32
    return %arg0, %c0_i32, %c0_i32_0 : i32, i32, i32
  }
}

</mosaic_0001>

<bundles_post_ra>
// kernel: reverse.0
= control target key start
LH: loop header
LB: loop body
LE: loop exit
PB: predicated region body
PF: predicated region fallthrough
CT: control target
= control target key end

     0   :  { %v66_v4 = vld [vmem:[#allocation1 + $0x18] sm:$0xf]  ;;  %v76_v5 = vld [vmem:[#allocation1 + $0x10] sm:$0xf]  ;;  %v86_v6 = vld [vmem:[#allocation1 + $0x8] sm:$0xf]  ;;  %v103_v8 = vlaneseq  ;;  %s284_s0 = inlined_call_operand.vmem [shape: f32[2,2,8,3], index: 0, kind: input, shape index: {}]   ;;  %s285_s1 = inlined_call_operand.vmem [shape: f32[2,2,8,3], index: 1, kind: output, shape index: {}]  }
   0x1   :  { %v19_v0 = vld [vmem:[%s284_s0] sm:$0xf]  ;;  %v21_v1 = vld [vmem:[%s284_s0 + $0x4] sm:$0xf]  ;;  %v23_v2 = vld [vmem:[%s284_s0 + $0x8] sm:$0xf] }
   0x2   :  { %20 = vst [vmem:[#allocation1 + $0x4] sm:$0xf] %v19_v0  ;;  %22 = vst [vmem:[#allocation1 + $0xc] sm:$0xf] %v21_v1  ;;  %v25_v3 = vld [vmem:[%s284_s0 + $0xc] sm:$0xf] }
   0x3   :  { %24 = vst [vmem:[#allocation1 + $0x14] sm:$0xf] %v23_v2  ;;  %26 = vst [vmem:[#allocation1 + $0x1c] sm:$0xf] %v25_v3  ;;  %v93_v7 = vld [vmem:[#allocation1] sm:$0xf] }
   0x4   :  { %68 = vst [vmem:[#allocation0 + $0x30] sm:$0xf] %v66_v4  ;;  %78 = vst [vmem:[#allocation0 + $0x20] sm:$0xf] %v76_v5  ;;  %v104_v20 = vshrl.u32 %v103_v8, 7 }
   0x5   :  { %88 = vst [vmem:[#allocation0 + $0x10] sm:$0xf] %v86_v6  ;;  %94 = vst [vmem:[#allocation0] sm:$0xf] %v93_v7 }
   0x6   :  { %vm105_vm0 = vcmp.lt.s32.totalorder %v104_v20, 3 }
   0x9   :  { %v81_v10 = vld [vmem:[#allocation1 + $0xc] sm:$0xf]  ;;  %v90_v11 = vld [vmem:[#allocation1 + $0x4] sm:$0xf] }
   0xa   :  { %v71_v9 = vld [vmem:[#allocation1 + $0x14] sm:$0xf]  ;;  %v61_v12 = vld [vmem:[#allocation1 + $0x1c] sm:$0xf]  ;;  %83 = vst [vmem:[#allocation0 + $0x18] sm:$0xf] %v81_v10 }
   0xb   :  { %73 = vst [vmem:[#allocation0 + $0x28] sm:$0xf] %v71_v9  ;;  %92 = vst [vmem:[#allocation0 + $0x8] sm:$0xf] %v90_v11  ;;  %v124_v13 = vld [vmem:[#allocation0 + $0x27] ss:$-1 sm:$0xff] }
   0xc   :  { %v138_v14 = vld [vmem:[#allocation0 + $0x37] ss:$-1 sm:$0xff]  ;;  %63 = vst [vmem:[#allocation0 + $0x38] sm:$0xf] %v61_v12  ;;  %v96_v15 = vld [vmem:[#allocation0 + $0x7] ss:$-1 sm:$0xff] }
   0xd   :  { %v110_v16 = vld [vmem:[#allocation0 + $0x17] ss:$-1 sm:$0xff]  ;;  %v125_v17 = vrot.slane %v124_v13, 5  ;;  %v139_v18 = vrot.slane %v138_v14, 5  ;;  %v97_v19 = vrot.slane %v96_v15, 5 }
   0xe   :  { %v111_v21 = vrot.slane %v110_v16, 5 }
   0xf   :  { %126 = vst [vmem:[#allocation2 + $0x10] sm:$0xff] %v125_v17  ;;  %140 = vst [vmem:[#allocation2 + $0x18] sm:$0xff] %v139_v18 }
  0x10   :  { %98 = vst [vmem:[#allocation2] sm:$0xff] %v97_v19  ;;  %112 = vst [vmem:[#allocation2 + $0x8] sm:$0xff] %v111_v21 }
  0x11   :  { %v115_v23 = vld [vmem:[#allocation0 + $0x1f] ss:$-1 sm:$0xff] }
  0x12   :  { %v101_v22 = vld [vmem:[#allocation0 + $0xf] ss:$-1 sm:$0xff]  ;;  %v116_v26 = vrot.slane %v115_v23, 5 }
  0x13   :  { %v129_v24 = vld [vmem:[#allocation0 + $0x2f] ss:$-1 sm:$0xff]  ;;  %v102_v25 = vrot.slane %v101_v22, 5  ;;  %v143_v28 = vld [vmem:[#allocation0 + $0x3f] ss:$-1 sm:$0xff] }
  0x14   :  { %v130_v27 = vrot.slane %v129_v24, 5  ;;  %v144_v29 = vrot.slane %v143_v28, 5  ;;  %120 = vst.msk [vmem:[#allocation2 + $0x8] sm:$0xff] %vm105_vm0, %v116_v26 }
  0x15   :  { %106 = vst.msk [vmem:[#allocation2] sm:$0xff] %vm105_vm0, %v102_v25 }
  0x16   :  { %134 = vst.msk [vmem:[#allocation2 + $0x10] sm:$0xff] %vm105_vm0, %v130_v27  ;;  %148 = vst.msk [vmem:[#allocation2 + $0x18] sm:$0xff] %vm105_vm0, %v144_v29 }
  0x1b   :  { %v158_v31 = vld [vmem:[#allocation2 + $0x8] sm:$0xf] }
  0x1c   :  { %v153_v30 = vld [vmem:[#allocation2] sm:$0xf]  ;;  %162 = vst [vmem:[#allocation3 + $0x4] sm:$0xf] %v158_v31 }
  0x1d   :  { %v164_v32 = vld [vmem:[#allocation2 + $0x10] sm:$0xf]  ;;  %156 = vst [vmem:[#allocation3] sm:$0xf] %v153_v30  ;;  %v171_v33 = vld [vmem:[#allocation2 + $0x18] sm:$0xf] }
  0x1e   :  { %169 = vst [vmem:[#allocation3 + $0x8] sm:$0xf] %v164_v32  ;;  %176 = vst [vmem:[#allocation3 + $0xc] sm:$0xf] %v171_v33 }
  0x24   :  { %v193_v34 = vld [vmem:[#allocation3] sm:$0xff]  }
  0x25   :  { %194 = vst [vmem:[%s285_s1] sm:$0xff] %v193_v34   ;;  %v197_v35 = vld [vmem:[#allocation3 + $0x8] sm:$0xff]  }
  0x26   :  { %198 = vst [vmem:[%s285_s1 + $0x8] sm:$0xff] %v197_v35  }

// kernel: moe_star_forward.7
= control target key start
LH: loop header
LB: loop body
LE: loop exit
PB: predicated region body
PF: predicated region fallthrough
CT: control target
= control target key end

     0   :  { %s459_s15 = smov 0   ;;  %s524_s0 = inlined_call_operand.vmem [shape: f32[2,8,8,2], index: 0, kind: input, shape index: {}]   ;;  %s525_s1 = inlined_call_operand.vmem [shape: bf16[2,32], index: 1, kind: input, shape index: {}]   ;;  %s526_s2 = inlined_call_operand.vmem [shape: f32[1,32], index: 2, kind: input, shape index: {}]   ;;  %s527_s3 = inlined_call_operand.vmem [shape: f32[8,8,32], index: 3, kind: input, shape index: {}]   ;;  %s528_s4 = inlined_call_operand.vmem [shape: f32[2,8,8,32], index: 4, kind: output, shape index: {}]  }
   0x1 LB: > { %s381_s16 = sadd.s32 4294967295, %s432_s15   ;;  %p385_p0 = scmp.ge.s32.totalorder %s432_s15, 1  ;;  %s432_s15 = sphi %s459_s15, %s14_s15  }
   0x2   : > { %p162_p1 = scmp.lt.s32.totalorder %s432_s15, 3 }
   0x4   : > { %p163_p2 = pnand %p385_p0, %p162_p1 }
   0x5   : > { %p188_p3 = scmp.lt.s32.totalorder (!%p163_p2), %s381_s16, 1 }
   0x6   : > { %166 = sbr.rel (%p163_p2) target bundleno = 223 (0xdf), region = 36 }
   0xb   : > { %v211_v0 = vld [vmem:[%s525_s1] sm:$0x1]  ;;  %vm232_vm0 = vcmask 1040384   ;;  %s530_s16 = smov (!%p188_p3, %s381_s16), 1  ;;  %vm219_vm1 = vcmask 15360   ;;  %v303_v16 = vld [vmem:[%s527_s3 + $0x10] sm:$0xff] }
   0xc   : > { %416 = vmatprep.subr.msk.bf16.mxu0 %vm232_vm0, %v211_v0  ;;  %417 = vmatprep.subr.msk.bf16.mxu1 %vm232_vm0, %v211_v0  ;;  %v234_v1 = vsel %vm232_vm0, %v211_v0, 0  ;;  %s397_s19 = sshll.u32 %s530_s16, 6  ;;  %v390_v14 = vld [vmem:[%s526_s2] ss:$0 sm:$0xff]  ;;  %v307_v19 = vld [vmem:[%s527_s3 + $0x30] sm:$0xff]  ;;  %vm317_vm2 = vcmask 261120  }
   0xd   : > { %405 = vmatpush3.bf16.msra.mxu0 %v234_v1  ;;  %415 = vmatpush3.bf16.msra.mxu1 %v234_v1  ;;  %s192_s22 = scalar_lea.vmem %s524_s0, %s397_s19  ;;  %s485_s5 = scalar_lea.vmem %s528_s4, %s397_s19  ;;  %v301_v22 = vld [vmem:[%s527_s3] sm:$0xff]  ;;  %v304_v30 = vld [vmem:[%s527_s3 + $0x18] sm:$0xff]  ;;  %v302_v38 = vld [vmem:[%s527_s3 + $0x8] sm:$0xff] }
   0xe   : > { %v199_v2 = vld [vmem:[%s192_s22] sm:$0xff]  ;;  %v200_v3 = vld [vmem:[%s192_s22 + $0x8] sm:$0xff]  ;;  %v201_v7 = vld [vmem:[%s192_s22 + $0x10] sm:$0xff] }
   0xf   : > { %v203_v4 = vld [vmem:[%s192_s22 + $0x20] sm:$0xff]  ;;  %v207_v5 = vpack.c.bf16 %v200_v3, %v199_v2  ;;  %v204_v6 = vld [vmem:[%s192_s22 + $0x28] sm:$0xff]  ;;  %v202_v8 = vld [vmem:[%s192_s22 + $0x18] sm:$0xff] }
  0x10   : > { %v209_v9 = vpack.c.bf16 %v204_v6, %v203_v4  ;;  %v208_v10 = vpack.c.bf16 %v202_v8, %v201_v7  ;;  %v205_v11 = vld [vmem:[%s192_s22 + $0x30] sm:$0xff]  ;;  %v206_v12 = vld [vmem:[%s192_s22 + $0x38] sm:$0xff]  ;;  %v305_v26 = vld [vmem:[%s527_s3 + $0x20] sm:$0xff] }
  0x11   : > { %406 = vmatprep.mubr.msk.bf16.mxu0 %vm219_vm1, %v207_v5  ;;  %v210_v13 = vpack.c.bf16 %v206_v12, %v205_v11  ;;  %v308_v34 = vld [vmem:[%s527_s3 + $0x38] sm:$0xff]  ;;  %v306_v42 = vld [vmem:[%s527_s3 + $0x28] sm:$0xff] }
  0x12   : > { %410 = vmatprep.mubr.msk.bf16.mxu1 %vm219_vm1, %v209_v9  ;;  %407 = vmatmul.mubr.msk.bf16.vlgmr.msra.gmra.mxu0 %vm219_vm1, %v208_v10 }
  0x13   : > { %411 = vmatmul.mubr.msk.bf16.vlgmr.msra.gmra.mxu1 %vm219_vm1, %v210_v13 }
  0xd2   : > { %v408_v15 = vpop.f32.mrf.mxu0 }
  0xd3   : > { %v279_v17 = vadd.f32 %v408_v15, %v390_v14  ;;  %v412_v18 = vpop.f32.mrf.mxu1 }
  0xd4   : > { %v295_v20 = vadd.f32 %v412_v18, %v390_v14  ;;  %v270_v21 = vpop.f32.mrf.mxu0 }
  0xd5   : > { %v311_v23 = vadd.f32 %v303_v16, %v279_v17  ;;  %v271_v24 = vadd.f32 %v390_v14, %v270_v21  ;;  %v286_v25 = vpop.f32.mrf.mxu1 }
  0xd6   : > { %v315_v27 = vadd.f32 %v307_v19, %v295_v20  ;;  %v287_v28 = vadd.f32 %v390_v14, %v286_v25  ;;  %v409_v29 = vpop.f32.mrf.mxu0 }
  0xd7   : > { %320 = vst.msk [vmem:[%s485_s5 + $0x10] sm:$0xff] %vm317_vm2, %v311_v23  ;;  %v309_v31 = vadd.f32 %v301_v22, %v271_v24  ;;  %v282_v32 = vadd.f32 %v409_v29, %v390_v14  ;;  %v413_v33 = vpop.f32.mrf.mxu1 }
  0xd8   : > { %324 = vst.msk [vmem:[%s485_s5 + $0x30] sm:$0xff] %vm317_vm2, %v315_v27  ;;  %v313_v35 = vadd.f32 %v305_v26, %v287_v28  ;;  %v298_v36 = vadd.f32 %v413_v33, %v390_v14  ;;  %v273_v37 = vpop.f32.mrf.mxu0 }
  0xd9   : > { %318 = vst.msk [vmem:[%s485_s5] sm:$0xff] %vm317_vm2, %v309_v31  ;;  %v312_v39 = vadd.f32 %v304_v30, %v282_v32  ;;  %v274_v40 = vadd.f32 %v390_v14, %v273_v37  ;;  %v289_v41 = vpop.f32.mrf.mxu1 }
  0xda   : > { %322 = vst.msk [vmem:[%s485_s5 + $0x20] sm:$0xff] %vm317_vm2, %v313_v35  ;;  %v316_v43 = vadd.f32 %v308_v34, %v298_v36  ;;  %v290_v44 = vadd.f32 %v390_v14, %v289_v41 }
  0xdb   : > { %321 = vst.msk [vmem:[%s485_s5 + $0x18] sm:$0xff] %vm317_vm2, %v312_v39  ;;  %v310_v45 = vadd.f32 %v302_v38, %v274_v40 }
  0xdc   : > { %325 = vst.msk [vmem:[%s485_s5 + $0x38] sm:$0xff] %vm317_vm2, %v316_v43  ;;  %v314_v46 = vadd.f32 %v306_v42, %v290_v44 }
  0xdd   : > { %319 = vst.msk [vmem:[%s485_s5 + $0x8] sm:$0xff] %vm317_vm2, %v310_v45 }
  0xde   : > { %323 = vst.msk [vmem:[%s485_s5 + $0x28] sm:$0xff] %vm317_vm2, %v314_v46 }
  0xdf PF: > { %s14_s15 = sadd.s32 1, %s432_s15  }
  0xe0   : > { %p11_p4 = scmp.ge.s32.totalorder %s14_s15, 4  }
  0xe2   :  { %13 = sbr.rel (!%p11_p4) target bundleno = 1 (0x1), region = 66 }

// kernel: moe_star_forward.10
= control target key start
LH: loop header
LB: loop body
LE: loop exit
PB: predicated region body
PF: predicated region fallthrough
CT: control target
= control target key end

     0   :  { %s2545_s13 = smov 0   ;;  %s2547_s14 = smov 0   ;;  %s3467_s0 = inlined_call_operand.vmem [shape: f32[128,32], index: 0, kind: input, shape index: {}]   ;;  %s3468_s1 = inlined_call_operand.vmem [shape: f32[1,32], index: 1, kind: input, shape index: {}]   ;;  %s3469_s2 = inlined_call_operand.vmem [shape: f32[1,32], index: 2, kind: input, shape index: {}]   ;;  %s3470_s3 = inlined_call_operand.vmem [shape: bf16[32,4], index: 3, kind: input, shape index: {}]   ;;  %s3471_s4 = inlined_call_operand.vmem [shape: f32[1,4], index: 4, kind: input, shape index: {}]   ;;  %s3472_s5 = inlined_call_operand.vmem [shape: bf16[1,32,256], index: 5, kind: input, shape index: {}]   ;;  %s3473_s6 = inlined_call_operand.vmem [shape: f32[1,1,256], index: 6, kind: input, shape index: {}]   ;;  %s3474_s7 = inlined_call_operand.vmem [shape: bf16[1,256,32], index: 7, kind: input, shape index: {}]   ;;  %s3475_s8 = inlined_call_operand.vmem [shape: f32[1,4,32], index: 8, kind: input, shape index: {}]   ;;  %s3476_s9 = inlined_call_operand.vmem [shape: f32[128,32], index: 9, kind: output, shape index: {0}]   ;;  %s3477_s10 = inlined_call_operand.vmem [shape: f32[2,8,4], index: 10, kind: output, shape index: {1}]  }
   0x1   :  { %s2549_s15 = smov 0  }
   0x2 LB: > { %s33_s16 = sadd.s32 1, %s2482_s14  ;;  %p2203_p0 = scmp.ge.s32.totalorder %s2486_s15, 1  ;;  %s2486_s15 = sphi %s2549_s15, %s21_s15   ;;  %s2482_s14 = sphi %s2547_s14, %s3479_s14   ;;  %s2478_s13 = sphi %s2545_s13, %s3478_s13  }
   0x3   : > { %p35_p1 = scmp.ge.s32.totalorder %s33_s16, 2  ;;  %p366_p2 = scmp.lt.s32.totalorder %s2486_s15, 3 }
   0x5   : > { %s3481_s16 = smov (%p35_p1, %s33_s16), 0  ;;  %p367_p3 = pnand %p2203_p0, %p366_p2 }
   0x6   : > { %s2204_s17 = sshll.u32 (!%p367_p3), %s2478_s13, 3  ;;  %p456_p5 = scmp.lt.s32.totalorder (!%p367_p3), %s2478_s13, 1 }
   0x7   : > { %370 = sbr.rel (%p367_p3) target bundleno = 2313 (0x909), region = 56  ;;  %p427_p4 = scmp.lt.s32.totalorder (!%p367_p3), %s2204_s17, 15 }
   0xc   : > { %s3483_s17 = smov (!%p427_p4, %s2204_s17), 15  ;;  %vm473_vm0 = vcmask 261120   ;;  %v2368_v56 = vld [vmem:[%s3472_s5 + $0x14] ss:$8 sps:$4 sm:$0xff]   ;;  %v2370_v57 = vld [vmem:[%s3472_s5 + $0x10] ss:$8 sps:$4 sm:$0xff]  }
   0xd   : > { %s2205_s18 = sshll.u32 %s3483_s17, 3  ;;  %1445 = vmatprep.subr.bf16.mxu1 %v2368_v56  ;;  %v2371_v58 = vld [vmem:[%s3470_s3 + $0x8] sm:$0xff]   ;;  %v2375_v61 = vld [vmem:[%s3470_s3] sm:$0xff]   ;;  %v2488_v62 = vmov 0   ;;  %vm641_vm1 = vcmask 257024   ;;  %vm786_vm2 = vcmask 31744  }
   0xe   : > { %s2574_s21 = scalar_lea.vmem %s3467_s0, %s2205_s18  ;;  %1446 = vmatpush1.bf16.msra.mxu1 %v2370_v57  ;;  %v2372_v59 = vld [vmem:[%s3472_s5 + $0x4] ss:$8 sps:$4 sm:$0xff]   ;;  %v2374_v60 = vld [vmem:[%s3472_s5] ss:$8 sps:$4 sm:$0xff]   ;;  %2314 = vmatprep.subr.bf16.mxu0 %v2371_v58  ;;  %s3485_s13 = smov (!%p456_p5, %s2478_s13), 1 }
   0xf   : > { %v465_v0 = vld [vmem:[%s2574_s21] sm:$0xff]  ;;  %v467_v1 = vld [vmem:[%s2574_s21 + $0x10] sm:$0xff]  ;;  %v466_v2 = vld [vmem:[%s2574_s21 + $0x8] sm:$0xff]  ;;  %1447 = vmatprep.subr.bf16.mxu1 %v2372_v59  ;;  %2315 = vmatpush3.bf16.msra.mxu0 %v2371_v58  ;;  %s2208_s27 = sshll.u32 %s3485_s13, 3 }
  0x10   : > { %v474_v3 = vsel %vm473_vm0, %v465_v0, 0.0  ;;  %v480_v4 = vsel %vm473_vm0, %v467_v1, 0.0  ;;  %v468_v5 = vld [vmem:[%s2574_s21 + $0x18] sm:$0xff]  ;;  %v469_v6 = vld [vmem:[%s2574_s21 + $0x20] sm:$0xff]  ;;  %v470_v7 = vld [vmem:[%s2574_s21 + $0x28] sm:$0xff]  ;;  %v477_v8 = vsel %vm473_vm0, %v466_v2, 0.0  ;;  %1465 = vmatprep.mubr.bf16.mxu1 %v2488_v62  ;;  %2316 = vmatprep.subr.bf16.mxu0 %v2375_v61  ;;  %s459_s30 = scalar_lea.vmem %s3477_s10, %s2208_s27  ;;  %s3424_s27 = scalar_lea.vmem %s3476_s9, %s2205_s18 }
  0x11   : > { %475 = vadd.xlane.f32.xlu0 %v474_v3  ;;  %481 = vadd.xlane.f32.xlu1 %v480_v4  ;;  %v483_v9 = vsel %vm473_vm0, %v468_v5, 0.0  ;;  %v486_v10 = vsel %vm473_vm0, %v469_v6, 0.0  ;;  %v489_v11 = vsel %vm473_vm0, %v470_v7, 0.0  ;;  %v471_v12 = vld [vmem:[%s2574_s21 + $0x30] sm:$0xff]  ;;  %v472_v13 = vld [vmem:[%s2574_s21 + $0x38] sm:$0xff] }
  0x12   : > { %v492_v14 = vsel %vm473_vm0, %v471_v12, 0.0  ;;  %v495_v15 = vsel %vm473_vm0, %v472_v13, 0.0  ;;  %1448 = vmatpush1.bf16.msra.mxu1 %v2374_v60 }
  0x13   : > { %2317 = vmatpush3.bf16.msra.mxu0 %v2375_v61 }
  0x15   : > { %478 = vadd.xlane.f32.xlu0 %v477_v8  ;;  %484 = vadd.xlane.f32.xlu1 %v483_v9 }
  0x19   : > { %487 = vadd.xlane.f32.xlu0 %v486_v10  ;;  %490 = vadd.xlane.f32.xlu1 %v489_v11 }
  0x1d   : > { %493 = vadd.xlane.f32.xlu0 %v492_v14  ;;  %496 = vadd.xlane.f32.xlu1 %v495_v15 }
  0x9a   : > { %v476_v16 = vpop.xlane.xlu0 %475  ;;  %v482_v17 = vpop.xlane.xlu1 %481 }
  0x9b   : > { %v499_v18 = vmul.f32 0.03125, %v476_v16  ;;  %v501_v19 = vmul.f32 0.03125, %v482_v17 }
  0x9d   : > { %v2592_v20 = vsub.f32 %v465_v0, %v499_v18  ;;  %v2594_v21 = vsub.f32 %v467_v1, %v501_v19 }
  0x9e   : > { %v479_v22 = vpop.xlane.xlu0 %478  ;;  %v485_v23 = vpop.xlane.xlu1 %484 }
  0x9f   : > { %v500_v24 = vmul.f32 0.03125, %v479_v22  ;;  %v502_v25 = vmul.f32 0.03125, %v485_v23  ;;  %v515_v26 = vmul.f32 %v2592_v20, %v2592_v20  ;;  %v517_v27 = vmul.f32 %v2594_v21, %v2594_v21 }
  0xa1   : > { %v2600_v28 = vsub.f32 %v466_v2, %v500_v24  ;;  %v2602_v29 = vsub.f32 %v468_v5, %v502_v25  ;;  %v523_v30 = vsel %vm473_vm0, %v515_v26, 0.0  ;;  %v529_v33 = vsel %vm473_vm0, %v517_v27, 0.0  ;;  %v2209_v25 = vld [vmem:[%s3468_s1] ss:$0 sm:$0xff] }
  0xa2   : > { %524 = vadd.xlane.f32.xlu0 %v523_v30  ;;  %v488_v31 = vpop.xlane.xlu0 %487  ;;  %v491_v32 = vpop.xlane.xlu1 %490  ;;  %v2210_v30 = vld [vmem:[%s3469_s2] ss:$0 sm:$0xff] }
  0xa3   : > { %v503_v34 = vmul.f32 0.03125, %v488_v31  ;;  %v504_v35 = vmul.f32 0.03125, %v491_v32  ;;  %v516_v36 = vmul.f32 %v2600_v28, %v2600_v28  ;;  %v518_v37 = vmul.f32 %v2602_v29, %v2602_v29 }
  0xa5   : > { %v2610_v38 = vsub.f32 %v469_v6, %v503_v34  ;;  %v2612_v39 = vsub.f32 %v470_v7, %v504_v35  ;;  %v526_v40 = vsel %vm473_vm0, %v516_v36, 0.0  ;;  %v532_v43 = vsel %vm473_vm0, %v518_v37, 0.0 }
  0xa6   : > { %530 = vadd.xlane.f32.xlu0 %v529_v33  ;;  %527 = vadd.xlane.f32.xlu1 %v526_v40  ;;  %v494_v41 = vpop.xlane.xlu0 %493  ;;  %v497_v42 = vpop.xlane.xlu1 %496 }
  0xa7   : > { %v505_v44 = vmul.f32 0.03125, %v494_v41  ;;  %v506_v45 = vmul.f32 0.03125, %v497_v42  ;;  %v519_v46 = vmul.f32 %v2610_v38, %v2610_v38  ;;  %v520_v47 = vmul.f32 %v2612_v39, %v2612_v39 }
  0xa9   : > { %v2620_v48 = vsub.f32 %v471_v12, %v505_v44  ;;  %v2622_v49 = vsub.f32 %v472_v13, %v506_v45  ;;  %v535_v50 = vsel %vm473_vm0, %v519_v46, 0.0  ;;  %v538_v51 = vsel %vm473_vm0, %v520_v47, 0.0 }
  0xaa   : > { %533 = vadd.xlane.f32.xlu1 %v532_v43  ;;  %536 = vadd.xlane.f32.xlu0 %v535_v50 }
  0xab   : > { %v521_v52 = vmul.f32 %v2620_v48, %v2620_v48  ;;  %v522_v53 = vmul.f32 %v2622_v49, %v2622_v49 }
  0xad   : > { %v541_v54 = vsel %vm473_vm0, %v521_v52, 0.0  ;;  %v544_v55 = vsel %vm473_vm0, %v522_v53, 0.0 }
  0xae   : > { %539 = vadd.xlane.f32.xlu1 %v538_v51  ;;  %542 = vadd.xlane.f32.xlu0 %v541_v54 }
  0xb2   : > { %545 = vadd.xlane.f32.xlu1 %v544_v55 }
 0x12b   : > { %v525_v63 = vpop.xlane.xlu0 %524 }
 0x12c   : > { %v547_v0 = vmul.f32 0.03125, %v525_v63 }
 0x12e   : > { %v555_v1 = vadd.f32 1e-05, %v547_v0 }
 0x12f   : > { %v528_v2 = vpop.xlane.xlu1 %527  ;;  %v531_v3 = vpop.xlane.xlu0 %530 }
 0x130   : > { %2400 = vrsqrt.f32 %v555_v1  ;;  %v548_v4 = vmul.f32 0.03125, %v528_v2  ;;  %v549_v5 = vmul.f32 0.03125, %v531_v3 }
 0x132   : > { %v556_v6 = vadd.f32 1e-05, %v548_v4  ;;  %v557_v7 = vadd.f32 1e-05, %v549_v5 }
 0x133   : > { %v534_v8 = vpop.xlane.xlu1 %533  ;;  %v537_v9 = vpop.xlane.xlu0 %536 }
 0x134   : > { %2402 = vrsqrt.f32 %v556_v6  ;;  %v550_v10 = vmul.f32 0.03125, %v534_v8  ;;  %v551_v11 = vmul.f32 0.03125, %v537_v9 }
 0x135   : > { %2404 = vrsqrt.f32 %v557_v7 }
 0x136   : > { %v558_v12 = vadd.f32 1e-05, %v550_v10  ;;  %v559_v13 = vadd.f32 1e-05, %v551_v11  ;;  %v2219_v11 = vld [vmem:[%s3471_s4] ss:$0 sm:$0xff] }
 0x137   : > { %v540_v14 = vpop.xlane.xlu1 %539  ;;  %v543_v15 = vpop.xlane.xlu0 %542 }
 0x138   : > { %2406 = vrsqrt.f32 %v558_v12  ;;  %v552_v16 = vmul.f32 0.03125, %v540_v14  ;;  %v553_v17 = vmul.f32 0.03125, %v543_v15 }
 0x139   : > { %2408 = vrsqrt.f32 %v559_v13 }
 0x13a   : > { %v560_v18 = vadd.f32 1e-05, %v552_v16  ;;  %v561_v19 = vadd.f32 1e-05, %v553_v17 }
 0x13b   : > { %v546_v22 = vpop.xlane.xlu1 %545 }
 0x13c   : > { %2410 = vrsqrt.f32 %v560_v18  ;;  %v554_v23 = vmul.f32 0.03125, %v546_v22 }
 0x13d   : > { %v2401_v24 = vpop.eup %2400  ;;  %2412 = vrsqrt.f32 %v561_v19 }
 0x13e   : > { %v571_v26 = vmul.f32 %v2401_v24, %v2592_v20  ;;  %v562_v27 = vadd.f32 1e-05, %v554_v23 }
 0x140   : > { %v586_v31 = vmul.f32 %v2209_v25, %v571_v26  ;;  %2414 = vrsqrt.f32 %v562_v27 }
 0x141   : > { %v2403_v32 = vpop.eup %2402 }
 0x142   : > { %v2405_v33 = vpop.eup %2404  ;;  %v601_v34 = vadd.f32 %v2210_v30, %v586_v31  ;;  %v572_v35 = vmul.f32 %v2403_v32, %v2600_v28 }
 0x143   : > { %v573_v36 = vmul.f32 %v2405_v33, %v2594_v21 }
 0x144   : > { %v2260_v37 = vpack.c.bf16 %v601_v34, %v601_v34  ;;  %v587_v40 = vmul.f32 %v2209_v25, %v572_v35 }
 0x145   : > { %v2407_v41 = vpop.eup %2406  ;;  %v588_v42 = vmul.f32 %v2209_v25, %v573_v36 }
 0x146   : > { %v2409_v20 = vpop.eup %2408  ;;  %642 = vst.msk [vmem:[#allocation2] sm:$0xf] %vm641_vm1, %v2260_v37  ;;  %v602_v43 = vadd.f32 %v2210_v30, %v587_v40  ;;  %v574_v44 = vmul.f32 %v2407_v41, %v2602_v29 }
 0x147   : > { %v603_v45 = vadd.f32 %v2210_v30, %v588_v42  ;;  %v575_v46 = vmul.f32 %v2409_v20, %v2610_v38 }
 0x148   : > { %v2261_v47 = vpack.c.bf16 %v602_v43, %v602_v43  ;;  %v589_v50 = vmul.f32 %v2209_v25, %v574_v44 }
 0x149   : > { %v2411_v51 = vpop.eup %2410  ;;  %v2262_v28 = vpack.c.bf16 %v603_v45, %v603_v45  ;;  %v590_v52 = vmul.f32 %v2209_v25, %v575_v46 }
 0x14a   : > { %v2413_v53 = vpop.eup %2412  ;;  %643 = vst.msk [vmem:[#allocation2 + $0x4] sm:$0xf] %vm641_vm1, %v2261_v47  ;;  %v604_v21 = vadd.f32 %v2210_v30, %v589_v50  ;;  %v576_v54 = vmul.f32 %v2411_v51, %v2612_v39 }
 0x14b   : > { %644 = vst.msk [vmem:[#allocation2 + $0x8] sm:$0xf] %vm641_vm1, %v2262_v28  ;;  %v605_v55 = vadd.f32 %v2210_v30, %v590_v52  ;;  %v577_v56 = vmul.f32 %v2413_v53, %v2620_v48 }
 0x14c   : > { %v2263_v29 = vpack.c.bf16 %v604_v21, %v604_v21  ;;  %v591_v57 = vmul.f32 %v2209_v25, %v576_v54 }
 0x14d   : > { %v2415_v58 = vpop.eup %2414  ;;  %v2264_v38 = vpack.c.bf16 %v605_v55, %v605_v55  ;;  %v592_v59 = vmul.f32 %v2209_v25, %v577_v56 }
 0x14e   : > { %645 = vst.msk [vmem:[#allocation2 + $0xc] sm:$0xf] %vm641_vm1, %v2263_v29  ;;  %v606_v60 = vadd.f32 %v2210_v30, %v591_v57  ;;  %v578_v61 = vmul.f32 %v2415_v58, %v2622_v49 }
 0x14f   : > { %646 = vst.msk [vmem:[#allocation2 + $0x10] sm:$0xf] %vm641_vm1, %v2264_v38  ;;  %v607_v63 = vadd.f32 %v2210_v30, %v592_v59 }
 0x150   : > { %v2265_v0 = vpack.c.bf16 %v606_v60, %v606_v60  ;;  %v593_v39 = vmul.f32 %v2209_v25, %v578_v61 }
 0x151   : > { %v2266_v1 = vpack.c.bf16 %v607_v63, %v607_v63  ;;  %v2376_v2 = vld [vmem:[#allocation2] sm:$0xff]  }
 0x152   : > { %647 = vst.msk [vmem:[#allocation2 + $0x14] sm:$0xf] %vm641_vm1, %v2265_v0  ;;  %v608_v48 = vadd.f32 %v2210_v30, %v593_v39  ;;  %v2377_v3 = vld [vmem:[#allocation2] sm:$0xff]   ;;  %2318 = vmatprep.mubr.msk.bf16.mxu0 %vm473_vm0, %v2376_v2 }
 0x153   : > { %648 = vst.msk [vmem:[#allocation2 + $0x18] sm:$0xf] %vm641_vm1, %v2266_v1  ;;  %2238 = vmatmul.mubr.msk.bf16.vlgmr.msra.gmra.mxu1 %vm473_vm0, %v2377_v3 }
 0x154   : > { %v2267_v4 = vpack.c.bf16 %v608_v48, %v608_v48  ;;  %1475 = vmatprep.mubr.bf16.mxu1 %v2488_v62 }
 0x155   : > { %v2378_v5 = vld [vmem:[#allocation2 + $0x8] sm:$0xff]  }
 0x156   : > { %649 = vst.msk [vmem:[#allocation2 + $0x1c] sm:$0xf] %vm641_vm1, %v2267_v4  ;;  %2319 = vmatmul.mubr.msk.bf16.vlgmr.msra.gmra.mxu0 %vm473_vm0, %v2378_v5  ;;  %v2380_v6 = vld [vmem:[#allocation2 + $0x8] sm:$0xff]  }
 0x159   : > { %v2379_v49 = vld [vmem:[#allocation2 + $0x10] sm:$0xff]  }
 0x15a   : > { %2322 = vmatprep.mubr.msk.bf16.mxu0 %vm473_vm0, %v2379_v49  ;;  %v2382_v8 = vld [vmem:[#allocation2 + $0x10] sm:$0xff]  }
 0x15b   : > { %2239 = vmatmul.mubr.msk.bf16.gmra.mxu1 %vm473_vm0, %v2380_v6 }
 0x15c   : > { %1485 = vmatprep.mubr.bf16.mxu1 %v2488_v62 }
 0x15d   : > { %v2381_v7 = vld [vmem:[#allocation2 + $0x18] sm:$0xff]  }
 0x15e   : > { %2323 = vmatmul.mubr.msk.bf16.gmra.mxu0 %vm473_vm0, %v2381_v7  ;;  %v2383_v9 = vld [vmem:[#allocation2 + $0x18] sm:$0xff]  }
 0x163   : > { %2240 = vmatmul.mubr.msk.bf16.gmra.mxu1 %vm473_vm0, %v2382_v8 }
 0x164   : > { %1495 = vmatprep.mubr.bf16.mxu1 %v2488_v62 }
 0x16b   : > { %2241 = vmatmul.mubr.msk.bf16.gmra.mxu1 %vm473_vm0, %v2383_v9 }
 0x216   : > { %v2320_v10 = vpop.f32.mrf.mxu0 }
 0x217   : > { %v764_v24 = vadd.f32 %v2320_v10, %v2219_v11 }
 0x218   : > { %v755_v12 = vpop.f32.mrf.mxu0 }
 0x219   : > { %v756_v13 = vadd.f32 %v2219_v11, %v755_v12  ;;  %v793_v33 = vsel %vm786_vm2, %v764_v24, -inf }
 0x21a   : > { %v2321_v14 = vpop.f32.mrf.mxu0 }
 0x21b   : > { %v787_v15 = vsel %vm786_vm2, %v756_v13, -inf  ;;  %v767_v30 = vadd.f32 %v2321_v14, %v2219_v11 }
 0x21c   : > { %v758_v16 = vpop.f32.mrf.mxu0  ;;  %788 = vmax.xlane.f32.xlu0 %v787_v15 }
 0x21d   : > { %v759_v17 = vadd.f32 %v2219_v11, %v758_v16  ;;  %v796_v35 = vsel %vm786_vm2, %v767_v30, -inf }
 0x21e   : > { %v2324_v18 = vpop.f32.mrf.mxu0 }
 0x21f   : > { %v790_v62 = vsel %vm786_vm2, %v759_v17, -inf  ;;  %v780_v31 = vadd.f32 %v2324_v18, %v2219_v11 }
 0x220   : > { %791 = vmax.xlane.f32.xlu1 %v790_v62  ;;  %v771_v19 = vpop.f32.mrf.mxu0 }
 0x221   : > { %v772_v22 = vadd.f32 %v2219_v11, %v771_v19  ;;  %v805_v36 = vsel %vm786_vm2, %v780_v31, -inf }
 0x222   : > { %v2325_v23 = vpop.f32.mrf.mxu0 }
 0x223   : > { %v799_v25 = vsel %vm786_vm2, %v772_v22, -inf  ;;  %v783_v34 = vadd.f32 %v2325_v23, %v2219_v11 }
 0x224   : > { %v774_v26 = vpop.f32.mrf.mxu0  ;;  %800 = vmax.xlane.f32.xlu0 %v799_v25 }
 0x225   : > { %v775_v27 = vadd.f32 %v2219_v11, %v774_v26  ;;  %v808_v37 = vsel %vm786_vm2, %v783_v34, -inf }
 0x227   : > { %v802_v32 = vsel %vm786_vm2, %v775_v27, -inf }
 0x228   : > { %803 = vmax.xlane.f32.xlu1 %v802_v32  ;;  %794 = vmax.xlane.f32.xlu0 %v793_v33 }
 0x22c   : > { %797 = vmax.xlane.f32.xlu1 %v796_v35  ;;  %806 = vmax.xlane.f32.xlu0 %v805_v36 }
 0x230   : > { %809 = vmax.xlane.f32.xlu1 %v808_v37 }
 0x2a5   : > { %v789_v40 = vpop.xlane.xlu0 %788 }
 0x2a6   : > { %v811_v41 = vsub.f32 %v756_v13, %v789_v40 }
 0x2a8   : > { %v819_v42 = vmul.f32 1.442695, %v811_v41 }
 0x2a9   : > { %v792_v20 = vpop.xlane.xlu1 %791 }
 0x2aa   : > { %2416 = vpow2.f32 %v819_v42  ;;  %v812_v43 = vsub.f32 %v759_v17, %v792_v20 }
 0x2ac   : > { %v821_v44 = vmul.f32 1.442695, %v812_v43 }
 0x2ad   : > { %v801_v45 = vpop.xlane.xlu0 %800 }
 0x2ae   : > { %2418 = vpow2.f32 %v821_v44  ;;  %v815_v46 = vsub.f32 %v772_v22, %v801_v45 }
 0x2b0   : > { %v827_v47 = vmul.f32 1.442695, %v815_v46 }
 0x2b1   : > { %v804_v50 = vpop.xlane.xlu1 %803  ;;  %v795_v51 = vpop.xlane.xlu0 %794 }
 0x2b2   : > { %2420 = vpow2.f32 %v827_v47  ;;  %v816_v28 = vsub.f32 %v775_v27, %v804_v50  ;;  %v813_v52 = vsub.f32 %v764_v24, %v795_v51  ;;  %v875_v47 = vlaneseq }
 0x2b4   : > { %v829_v53 = vmul.f32 1.442695, %v816_v28  ;;  %v823_v21 = vmul.f32 1.442695, %v813_v52  ;;  %v2736_v50 = vand.u32 127, %v875_v47 }
 0x2b5   : > { %v798_v54 = vpop.xlane.xlu1 %797  ;;  %v807_v55 = vpop.xlane.xlu0 %806 }
 0x2b6   : > { %2422 = vpow2.f32 %v829_v53  ;;  %v814_v56 = vsub.f32 %v767_v30, %v798_v54  ;;  %v817_v29 = vsub.f32 %v780_v31, %v807_v55 }
 0x2b7   : > { %v2417_v57 = vpop.eup %2416  ;;  %2424 = vpow2.f32 %v823_v21 }
 0x2b8   : > { %v825_v58 = vmul.f32 1.442695, %v814_v56  ;;  %v831_v38 = vmul.f32 1.442695, %v817_v29  ;;  %v835_v59 = vsel %vm786_vm2, %v2417_v57, 0.0 }
 0x2b9   : > { %v810_v60 = vpop.xlane.xlu1 %809  ;;  %836 = vadd.xlane.f32.xlu0 %v835_v59 }
 0x2ba   : > { %2426 = vpow2.f32 %v825_v58  ;;  %v818_v61 = vsub.f32 %v783_v34, %v810_v60 }
 0x2bb   : > { %v2419_v63 = vpop.eup %2418  ;;  %2428 = vpow2.f32 %v831_v38 }
 0x2bc   : > { %v833_v0 = vmul.f32 1.442695, %v818_v61  ;;  %v838_v39 = vsel %vm786_vm2, %v2419_v63, 0.0 }
 0x2bd   : > { %839 = vadd.xlane.f32.xlu1 %v838_v39 }
 0x2be   : > { %2430 = vpow2.f32 %v833_v0 }
 0x2bf   : > { %v2421_v1 = vpop.eup %2420 }
 0x2c0   : > { %v847_v2 = vsel %vm786_vm2, %v2421_v1, 0.0 }
 0x2c1   : > { %848 = vadd.xlane.f32.xlu0 %v847_v2 }
 0x2c3   : > { %v2423_v48 = vpop.eup %2422 }
 0x2c4   : > { %v2425_v3 = vpop.eup %2424  ;;  %v850_v4 = vsel %vm786_vm2, %v2423_v48, 0.0 }
 0x2c5   : > { %851 = vadd.xlane.f32.xlu1 %v850_v4  ;;  %v841_v5 = vsel %vm786_vm2, %v2425_v3, 0.0 }
 0x2c6   : > { %842 = vadd.xlane.f32.xlu0 %v841_v5 }
 0x2c7   : > { %v2427_v49 = vpop.eup %2426 }
 0x2c8   : > { %v2429_v6 = vpop.eup %2428  ;;  %v844_v7 = vsel %vm786_vm2, %v2427_v49, 0.0 }
 0x2c9   : > { %845 = vadd.xlane.f32.xlu1 %v844_v7  ;;  %v853_v8 = vsel %vm786_vm2, %v2429_v6, 0.0 }
 0x2ca   : > { %854 = vadd.xlane.f32.xlu0 %v853_v8 }
 0x2cb   : > { %v2431_v9 = vpop.eup %2430 }
 0x2cc   : > { %v856_v10 = vsel %vm786_vm2, %v2431_v9, 0.0 }
 0x2cd   : > { %857 = vadd.xlane.f32.xlu1 %v856_v10 }
 0x342   : > { %v837_v11 = vpop.xlane.xlu0 %836 }
 0x343   : > { %2432 = vrcp.f32 %v837_v11 }
 0x346   : > { %v840_v12 = vpop.xlane.xlu1 %839 }
 0x347   : > { %2434 = vrcp.f32 %v840_v12 }
 0x34a   : > { %v849_v13 = vpop.xlane.xlu0 %848 }
 0x34b   : > { %2436 = vrcp.f32 %v849_v13 }
 0x34e   : > { %v852_v14 = vpop.xlane.xlu1 %851 }
 0x34f   : > { %2438 = vrcp.f32 %v852_v14  ;;  %v843_v15 = vpop.xlane.xlu0 %842 }
 0x350   : > { %v2433_v16 = vpop.eup %2432  ;;  %2440 = vrcp.f32 %v843_v15 }
 0x351   : > { %v2703_v17 = vmul.f32 %v2433_v16, %v2417_v57 }
 0x352   : > { %v846_v18 = vpop.xlane.xlu1 %845 }
 0x353   : > { %2442 = vrcp.f32 %v846_v18  ;;  %v855_v62 = vpop.xlane.xlu0 %854  ;;  %v877_v19 = vsel %vm786_vm2, %v2703_v17, -inf }
 0x354   : > { %v2435_v22 = vpop.eup %2434  ;;  %2444 = vrcp.f32 %v855_v62  ;;  %878 = vmax.xlane.f32.xlu0 %v877_v19 }
 0x355   : > { %v2707_v23 = vmul.f32 %v2435_v22, %v2419_v63 }
 0x356   : > { %v858_v24 = vpop.xlane.xlu1 %857 }
 0x357   : > { %2446 = vrcp.f32 %v858_v24  ;;  %v880_v25 = vsel %vm786_vm2, %v2707_v23, -inf }
 0x358   : > { %v2437_v26 = vpop.eup %2436  ;;  %881 = vmax.xlane.f32.xlu1 %v880_v25 }
 0x359   : > { %v2711_v27 = vmul.f32 %v2437_v26, %v2421_v1 }
 0x35b   : > { %v889_v30 = vsel %vm786_vm2, %v2711_v27, -inf }
 0x35c   : > { %v2439_v31 = vpop.eup %2438  ;;  %890 = vmax.xlane.f32.xlu0 %v889_v30 }
 0x35d   : > { %v2441_v32 = vpop.eup %2440  ;;  %v2715_v33 = vmul.f32 %v2439_v31, %v2423_v48 }
 0x35e   : > { %v2717_v34 = vmul.f32 %v2441_v32, %v2425_v3 }
 0x35f   : > { %v892_v35 = vsel %vm786_vm2, %v2715_v33, -inf }
 0x360   : > { %v2443_v36 = vpop.eup %2442  ;;  %893 = vmax.xlane.f32.xlu1 %v892_v35  ;;  %v883_v37 = vsel %vm786_vm2, %v2717_v34, -inf }
 0x361   : > { %v2445_v40 = vpop.eup %2444  ;;  %v2723_v41 = vmul.f32 %v2443_v36, %v2427_v49  ;;  %884 = vmax.xlane.f32.xlu0 %v883_v37 }
 0x362   : > { %v2725_v42 = vmul.f32 %v2445_v40, %v2429_v6 }
 0x363   : > { %v886_v20 = vsel %vm786_vm2, %v2723_v41, -inf }
 0x364   : > { %v2447_v43 = vpop.eup %2446  ;;  %887 = vmax.xlane.f32.xlu1 %v886_v20  ;;  %v895_v44 = vsel %vm786_vm2, %v2725_v42, -inf }
 0x365   : > { %v2731_v45 = vmul.f32 %v2447_v43, %v2431_v9  ;;  %896 = vmax.xlane.f32.xlu0 %v895_v44 }
 0x367   : > { %v898_v46 = vsel %vm786_vm2, %v2731_v45, -inf }
 0x368   : > { %899 = vmax.xlane.f32.xlu1 %v898_v46 }
 0x3dd   : > { %v879_v51 = vpop.xlane.xlu0 %878 }
 0x3de   : > { %vm901_vm3 = vcmp.eq.f32.partialorder %v2703_v17, %v879_v51 }
 0x3df   : > { %v909_v28 = vsel %vm901_vm3, %v2736_v50, 4 }
 0x3e0   : > { %v917_v52 = vsel %vm786_vm2, %v909_v28, 2147483647 }
 0x3e1   : > { %v882_v53 = vpop.xlane.xlu1 %881  ;;  %v919_v21 = vshra.s32 %v917_v52, 16  ;;  %v918_v24 = vand.u32 65535, %v917_v52 }
 0x3e2   : > { %vm902_vm4 = vcmp.eq.f32.partialorder %v2707_v23, %v882_v53 }
 0x3e3   : > { %v910_v54 = vsel %vm902_vm4, %v2736_v50, 4  ;;  %v921_v55 = vcvt.s32.f32 %v919_v21  ;;  %v920_v26 = vcvt.s32.f32 %v918_v24 }
 0x3e4   : > { %v932_v56 = vsel %vm786_vm2, %v910_v54, 2147483647 }
 0x3e5   : > { %922 = vmin.xlane.f32.xlu0 %v921_v55  ;;  %v891_v29 = vpop.xlane.xlu0 %890  ;;  %v934_v57 = vshra.s32 %v932_v56, 16  ;;  %v933_v30 = vand.u32 65535, %v932_v56 }
 0x3e6   : > { %vm905_vm5 = vcmp.eq.f32.partialorder %v2711_v27, %v891_v29 }
 0x3e7   : > { %v913_v58 = vsel %vm905_vm5, %v2736_v50, 4  ;;  %v936_v38 = vcvt.s32.f32 %v934_v57  ;;  %v935_v35 = vcvt.s32.f32 %v933_v30 }
 0x3e8   : > { %v977_v59 = vsel %vm786_vm2, %v913_v58, 2147483647 }
 0x3e9   : > { %937 = vmin.xlane.f32.xlu1 %v936_v38  ;;  %v894_v60 = vpop.xlane.xlu1 %893  ;;  %v979_v61 = vshra.s32 %v977_v59, 16  ;;  %v978_v36 = vand.u32 65535, %v977_v59 }
 0x3ea   : > { %vm906_vm6 = vcmp.eq.f32.partialorder %v2715_v33, %v894_v60  ;;  %v885_v63 = vpop.xlane.xlu0 %884 }
 0x3eb   : > { %v914_v0 = vsel %vm906_vm6, %v2736_v50, 4  ;;  %vm903_vm7 = vcmp.eq.f32.partialorder %v2717_v34, %v885_v63  ;;  %v981_v39 = vcvt.s32.f32 %v979_v61  ;;  %v980_v20 = vcvt.s32.f32 %v978_v36 }
 0x3ec   : > { %v992_v1 = vsel %vm786_vm2, %v914_v0, 2147483647  ;;  %v911_v2 = vsel %vm903_vm7, %v2736_v50, 4  ;;  %v2489_v63 = vmov 0.0  }
 0x3ed   : > { %v947_v48 = vsel %vm786_vm2, %v911_v2, 2147483647  ;;  %v888_v3 = vpop.xlane.xlu1 %887  ;;  %982 = vmin.xlane.f32.xlu0 %v981_v39  ;;  %v994_v4 = vshra.s32 %v992_v1, 16  ;;  %v993_v43 = vand.u32 65535, %v992_v1  ;;  %650 = vst.msk [vmem:[#allocation4] sm:$0xff] %vm473_vm0, %v2489_v63  ;;  %651 = vst.msk [vmem:[#allocation4 + $0x8] sm:$0xff] %vm473_vm0, %v2489_v63 }
 0x3ee   : > { %vm904_vm8 = vcmp.eq.f32.partialorder %v2723_v41, %v888_v3  ;;  %v897_v5 = vpop.xlane.xlu0 %896  ;;  %v949_v49 = vshra.s32 %v947_v48, 16  ;;  %v948_v44 = vand.u32 65535, %v947_v48  ;;  %652 = vst.msk [vmem:[#allocation4 + $0x10] sm:$0xff] %vm473_vm0, %v2489_v63  ;;  %653 = vst.msk [vmem:[#allocation4 + $0x18] sm:$0xff] %vm473_vm0, %v2489_v63 }
 0x3ef   : > { %v912_v6 = vsel %vm904_vm8, %v2736_v50, 4  ;;  %vm907_vm9 = vcmp.eq.f32.partialorder %v2725_v42, %v897_v5  ;;  %v996_v7 = vcvt.s32.f32 %v994_v4  ;;  %v995_v28 = vcvt.s32.f32 %v993_v43  ;;  %654 = vst.msk [vmem:[#allocation4 + $0x20] sm:$0xff] %vm473_vm0, %v2489_v63  ;;  %655 = vst.msk [vmem:[#allocation4 + $0x28] sm:$0xff] %vm473_vm0, %v2489_v63 }
 0x3f0   : > { %v962_v8 = vsel %vm786_vm2, %v912_v6, 2147483647  ;;  %v915_v9 = vsel %vm907_vm9, %v2736_v50, 4  ;;  %v951_v10 = vcvt.s32.f32 %v949_v49  ;;  %v950_v21 = vcvt.s32.f32 %v948_v44  ;;  %656 = vst.msk [vmem:[#allocation4 + $0x30] sm:$0xff] %vm473_vm0, %v2489_v63  ;;  %657 = vst.msk [vmem:[#allocation4 + $0x38] sm:$0xff] %vm473_vm0, %v2489_v63 }
 0x3f1   : > { %v1007_v11 = vsel %vm786_vm2, %v915_v9, 2147483647  ;;  %997 = vmin.xlane.f32.xlu1 %v996_v7  ;;  %v900_v12 = vpop.xlane.xlu1 %899  ;;  %v964_v13 = vshra.s32 %v962_v8, 16  ;;  %v963_v52 = vand.u32 65535, %v962_v8 }
 0x3f2   : > { %vm908_vm10 = vcmp.eq.f32.partialorder %v2731_v45, %v900_v12  ;;  %952 = vmin.xlane.f32.xlu0 %v951_v10  ;;  %v1009_v14 = vshra.s32 %v1007_v11, 16  ;;  %v1008_v54 = vand.u32 65535, %v1007_v11 }
 0x3f3   : > { %v916_v15 = vsel %vm908_vm10, %v2736_v50, 4  ;;  %v966_v16 = vcvt.s32.f32 %v964_v13  ;;  %v965_v57 = vcvt.s32.f32 %v963_v52 }
 0x3f4   : > { %v1022_v18 = vsel %vm786_vm2, %v916_v15, 2147483647  ;;  %v1011_v62 = vcvt.s32.f32 %v1009_v14  ;;  %v1010_v59 = vcvt.s32.f32 %v1008_v54 }
 0x3f5   : > { %967 = vmin.xlane.f32.xlu1 %v966_v16  ;;  %v1024_v19 = vshra.s32 %v1022_v18, 16  ;;  %v1023_v58 = vand.u32 65535, %v1022_v18 }
 0x3f6   : > { %1012 = vmin.xlane.f32.xlu0 %v1011_v62 }
 0x3f7   : > { %v1026_v22 = vcvt.s32.f32 %v1024_v19 }
 0x3f9   : > { %1027 = vmin.xlane.f32.xlu1 %v1026_v22 }
 0x46e   : > { %v923_v25 = vpop.xlane.xlu0 %922 }
 0x46f   : > { %vm924_vm11 = vcmp.eq.f32.partialorder %v921_v55, %v923_v25  ;;  %v929_v2 = vcvt.f32.s32 %v923_v25 }
 0x470   : > { %v925_v31 = vsel %vm924_vm11, %v920_v26, inf }
 0x471   : > { %926 = vmin.xlane.f32.xlu0 %v925_v31  ;;  %v930_v3 = vshll.u32 %v929_v2, 16 }
 0x472   : > { %v938_v32 = vpop.xlane.xlu1 %937 }
 0x473   : > { %vm939_vm12 = vcmp.eq.f32.partialorder %v936_v38, %v938_v32  ;;  %v944_v4 = vcvt.f32.s32 %v938_v32 }
 0x474   : > { %v940_v37 = vsel %vm939_vm12, %v935_v35, inf }
 0x475   : > { %941 = vmin.xlane.f32.xlu1 %v940_v37 }
 0x476   : > { %v983_v40 = vpop.xlane.xlu0 %982 }
 0x477   : > { %vm984_vm13 = vcmp.eq.f32.partialorder %v981_v39, %v983_v40  ;;  %v1025_v39 = vcvt.s32.f32 %v1023_v58  ;;  %v989_v8 = vcvt.f32.s32 %v983_v40 }
 0x478   : > { %v985_v46 = vsel %vm984_vm13, %v980_v20, inf }
 0x479   : > { %986 = vmin.xlane.f32.xlu0 %v985_v46  ;;  %v990_v14 = vshll.u32 %v989_v8, 16 }
 0x47a   : > { %v2762_v51 = vpop.xlane.xlu1 %997 }
 0x47b   : > { %v2764_v53 = vpop.xlane.xlu0 %952  ;;  %vm999_vm14 = vcmp.eq.f32.partialorder %v996_v7, %v2762_v51  ;;  %v945_v7 = vshll.u32 %v944_v4, 16  ;;  %v1004_v15 = vcvt.f32.s32 %v2762_v51 }
 0x47c   : > { %v1000_v55 = vsel %vm999_vm14, %v995_v28, inf  ;;  %vm954_vm15 = vcmp.eq.f32.partialorder %v951_v10, %v2764_v53  ;;  %v959_v18 = vcvt.f32.s32 %v2764_v53 }
 0x47d   : > { %1001 = vmin.xlane.f32.xlu1 %v1000_v55  ;;  %v955_v56 = vsel %vm954_vm15, %v950_v21, inf  ;;  %v1005_v25 = vshll.u32 %v1004_v15, 16 }
 0x47e   : > { %956 = vmin.xlane.f32.xlu0 %v955_v56  ;;  %v2768_v29 = vpop.xlane.xlu1 %967  ;;  %v960_v32 = vshll.u32 %v959_v18, 16 }
 0x47f   : > { %v2770_v38 = vpop.xlane.xlu0 %1012  ;;  %vm969_vm1 = vcmp.eq.f32.partialorder %v966_v16, %v2768_v29  ;;  %v974_v26 = vcvt.f32.s32 %v2768_v29 }
 0x480   : > { %v970_v60 = vsel %vm969_vm1, %v965_v57, inf  ;;  %vm1014_vm3 = vcmp.eq.f32.partialorder %v1011_v62, %v2770_v38  ;;  %v1019_v35 = vcvt.f32.s32 %v2770_v38 }
 0x481   : > { %971 = vmin.xlane.f32.xlu1 %v970_v60  ;;  %v1015_v61 = vsel %vm1014_vm3, %v1010_v59, inf  ;;  %v975_v46 = vshll.u32 %v974_v26, 16 }
 0x482   : > { %1016 = vmin.xlane.f32.xlu0 %v1015_v61  ;;  %v1028_v0 = vpop.xlane.xlu1 %1027  ;;  %v1020_v53 = vshll.u32 %v1019_v35, 16 }
 0x483   : > { %vm1029_vm4 = vcmp.eq.f32.partialorder %v1026_v22, %v1028_v0  ;;  %v1034_v51 = vcvt.f32.s32 %v1028_v0 }
 0x484   : > { %v1030_v1 = vsel %vm1029_vm4, %v1025_v39, inf }
 0x485   : > { %1031 = vmin.xlane.f32.xlu1 %v1030_v1  ;;  %v1035_v59 = vshll.u32 %v1034_v51, 16 }
 0x4fa   : > { %v927_v48 = vpop.xlane.xlu0 %926 }
 0x4fb   : > { %v928_v5 = vcvt.f32.s32 %v927_v48 }
 0x4fd   : > { %v2790_v49 = vadd.s32 %v930_v3, %v928_v5 }
 0x4fe   : > { %v942_v6 = vpop.xlane.xlu1 %941 }
 0x4ff   : > { %v943_v9 = vcvt.f32.s32 %v942_v6  ;;  %vm1037_vm5 = vcmp.eq.s32.totalorder %v2736_v50, %v2790_v49 }
 0x500   : > { %v2798_v10 = vsel %vm1037_vm5, -inf, %v2703_v17 }
 0x501   : > { %v2800_v11 = vadd.s32 %v945_v7, %v943_v9  ;;  %v1069_v12 = vsel %vm786_vm2, %v2798_v10, -inf }
 0x502   : > { %1070 = vmax.xlane.f32.xlu0 %v1069_v12  ;;  %v987_v13 = vpop.xlane.xlu0 %986 }
 0x503   : > { %v988_v16 = vcvt.f32.s32 %v987_v13  ;;  %vm1038_vm6 = vcmp.eq.s32.totalorder %v2736_v50, %v2800_v11 }
 0x504   : > { %v1062_v62 = vsel %vm1038_vm6, -inf, %v2707_v23 }
 0x505   : > { %v2812_v19 = vadd.s32 %v990_v14, %v988_v16  ;;  %v1072_v22 = vsel %vm786_vm2, %v1062_v62, -inf }
 0x506   : > { %1073 = vmax.xlane.f32.xlu1 %v1072_v22  ;;  %v1002_v24 = vpop.xlane.xlu1 %1001 }
 0x507   : > { %v1003_v30 = vcvt.f32.s32 %v1002_v24  ;;  %v957_v31 = vpop.xlane.xlu0 %956  ;;  %vm1041_vm7 = vcmp.eq.s32.totalorder %v2736_v50, %v2812_v19 }
 0x508   : > { %v958_v36 = vcvt.f32.s32 %v957_v31  ;;  %v1065_v37 = vsel %vm1041_vm7, -inf, %v2711_v27  ;;  %v1049_v11 = vsel %vm1041_vm7, %v2711_v27, 0.0 }
 0x509   : > { %v2823_v40 = vadd.s32 %v1005_v25, %v1003_v30  ;;  %v1081_v20 = vsel %vm786_vm2, %v1065_v37, -inf }
 0x50a   : > { %v2826_v43 = vadd.s32 %v960_v32, %v958_v36  ;;  %v972_v44 = vpop.xlane.xlu1 %971  ;;  %1082 = vmax.xlane.f32.xlu0 %v1081_v20 }
 0x50b   : > { %v973_v28 = vcvt.f32.s32 %v972_v44  ;;  %v1017_v52 = vpop.xlane.xlu0 %1016  ;;  %vm1042_vm8 = vcmp.eq.s32.totalorder %v2736_v50, %v2823_v40 }
 0x50c   : > { %v1018_v21 = vcvt.f32.s32 %v1017_v52  ;;  %v1066_v54 = vsel %vm1042_vm8, -inf, %v2715_v33  ;;  %vm1039_vm9 = vcmp.eq.s32.totalorder %v2736_v50, %v2826_v43 }
 0x50d   : > { %v2836_v55 = vadd.s32 %v975_v46, %v973_v28  ;;  %v1084_v56 = vsel %vm786_vm2, %v1066_v54, -inf  ;;  %v1063_v29 = vsel %vm1039_vm9, -inf, %v2717_v34 }
 0x50e   : > { %v2843_v57 = vadd.s32 %v1020_v53, %v1018_v21  ;;  %1085 = vmax.xlane.f32.xlu1 %v1084_v56  ;;  %v1032_v58 = vpop.xlane.xlu1 %1031  ;;  %v1075_v38 = vsel %vm786_vm2, %v1063_v29, -inf }
 0x50f   : > { %v1033_v60 = vcvt.f32.s32 %v1032_v58  ;;  %1076 = vmax.xlane.f32.xlu0 %v1075_v38  ;;  %vm1040_vm10 = vcmp.eq.s32.totalorder %v2736_v50, %v2836_v55 }
 0x510   : > { %v1064_v61 = vsel %vm1040_vm10, -inf, %v2723_v41  ;;  %vm1043_vm11 = vcmp.eq.s32.totalorder %v2736_v50, %v2843_v57  ;;  %v1048_v40 = vsel %vm1040_vm10, %v2723_v41, 0.0 }
 0x511   : > { %v2854_v0 = vadd.s32 %v1035_v59, %v1033_v60  ;;  %v1078_v39 = vsel %vm786_vm2, %v1064_v61, -inf  ;;  %v1067_v1 = vsel %vm1043_vm11, -inf, %v2725_v42 }
 0x512   : > { %1079 = vmax.xlane.f32.xlu1 %v1078_v39  ;;  %v1087_v2 = vsel %vm786_vm2, %v1067_v1, -inf }
 0x513   : > { %1088 = vmax.xlane.f32.xlu0 %v1087_v2  ;;  %vm1044_vm12 = vcmp.eq.s32.totalorder %v2736_v50, %v2854_v0 }
 0x514   : > { %v1068_v48 = vsel %vm1044_vm12, -inf, %v2731_v45  ;;  %v1060_v57 = vsel %vm1044_vm12, 1.0, %v2489_v63 }
 0x515   : > { %v1090_v3 = vsel %vm786_vm2, %v1068_v48, -inf }
 0x516   : > { %1091 = vmax.xlane.f32.xlu1 %v1090_v3 }
 0x58b   : > { %v1071_v4 = vpop.xlane.xlu0 %1070 }
 0x58c   : > { %vm1093_vm13 = vcmp.eq.f32.partialorder %v2798_v10, %v1071_v4 }
 0x58d   : > { %v1101_v5 = vsel %vm1093_vm13, %v2736_v50, 4 }
 0x58e   : > { %v1109_v6 = vsel %vm786_vm2, %v1101_v5, 2147483647 }
 0x58f   : > { %v1074_v7 = vpop.xlane.xlu1 %1073  ;;  %v1111_v8 = vshra.s32 %v1109_v6, 16  ;;  %v1110_v39 = vand.u32 65535, %v1109_v6 }
 0x590   : > { %vm1094_vm14 = vcmp.eq.f32.partialorder %v1062_v62, %v1074_v7 }
 0x591   : > { %v1102_v9 = vsel %vm1094_vm14, %v2736_v50, 4  ;;  %v1113_v12 = vcvt.s32.f32 %v1111_v8  ;;  %v1112_v2 = vcvt.s32.f32 %v1110_v39 }
 0x592   : > { %v1124_v13 = vsel %vm786_vm2, %v1102_v9, 2147483647 }
 0x593   : > { %1114 = vmin.xlane.f32.xlu0 %v1113_v12  ;;  %v1083_v14 = vpop.xlane.xlu0 %1082  ;;  %v1126_v15 = vshra.s32 %v1124_v13, 16  ;;  %v1125_v3 = vand.u32 65535, %v1124_v13 }
 0x594   : > { %vm1097_vm15 = vcmp.eq.f32.partialorder %v1065_v37, %v1083_v14 }
 0x595   : > { %v1105_v16 = vsel %vm1097_vm15, %v2736_v50, 4  ;;  %v1128_v18 = vcvt.s32.f32 %v1126_v15  ;;  %v1127_v5 = vcvt.s32.f32 %v1125_v3 }
 0x596   : > { %v1169_v10 = vsel %vm786_vm2, %v1105_v16, 2147483647 }
 0x597   : > { %1129 = vmin.xlane.f32.xlu1 %v1128_v18  ;;  %v1086_v22 = vpop.xlane.xlu1 %1085  ;;  %v1171_v24 = vshra.s32 %v1169_v10, 16  ;;  %v1170_v7 = vand.u32 65535, %v1169_v10 }
 0x598   : > { %vm1098_vm1 = vcmp.eq.f32.partialorder %v1066_v54, %v1086_v22  ;;  %v1077_v25 = vpop.xlane.xlu0 %1076 }
 0x599   : > { %v1106_v62 = vsel %vm1098_vm1, %v2736_v50, 4  ;;  %vm1095_vm3 = vcmp.eq.f32.partialorder %v1063_v29, %v1077_v25  ;;  %v1173_v26 = vcvt.s32.f32 %v1171_v24  ;;  %v1172_v14 = vcvt.s32.f32 %v1170_v7 }
 0x59a   : > { %v1184_v30 = vsel %vm786_vm2, %v1106_v62, 2147483647  ;;  %v1103_v31 = vsel %vm1095_vm3, %v2736_v50, 4 }
 0x59b   : > { %v1139_v32 = vsel %vm786_vm2, %v1103_v31, 2147483647  ;;  %v1080_v35 = vpop.xlane.xlu1 %1079  ;;  %1174 = vmin.xlane.f32.xlu0 %v1173_v26  ;;  %v1186_v36 = vshra.s32 %v1184_v30, 16  ;;  %v1185_v15 = vand.u32 65535, %v1184_v30 }
 0x59c   : > { %vm1096_vm4 = vcmp.eq.f32.partialorder %v1064_v61, %v1080_v35  ;;  %v1089_v37 = vpop.xlane.xlu0 %1088  ;;  %v1141_v20 = vshra.s32 %v1139_v32, 16  ;;  %v1140_v6 = vand.u32 65535, %v1139_v32 }
 0x59d   : > { %v1104_v44 = vsel %vm1096_vm4, %v2736_v50, 4  ;;  %vm1099_vm13 = vcmp.eq.f32.partialorder %v1067_v1, %v1089_v37  ;;  %v1188_v46 = vcvt.s32.f32 %v1186_v36  ;;  %v1187_v13 = vcvt.s32.f32 %v1185_v15 }
 0x59e   : > { %v1154_v51 = vsel %vm786_vm2, %v1104_v44, 2147483647  ;;  %v1107_v28 = vsel %vm1099_vm13, %v2736_v50, 4  ;;  %v1143_v52 = vcvt.s32.f32 %v1141_v20 }
 0x59f   : > { %v1199_v53 = vsel %vm786_vm2, %v1107_v28, 2147483647  ;;  %1189 = vmin.xlane.f32.xlu1 %v1188_v46  ;;  %v1092_v21 = vpop.xlane.xlu1 %1091  ;;  %v1156_v54 = vshra.s32 %v1154_v51, 16  ;;  %v1155_v22 = vand.u32 65535, %v1154_v51  ;;  %v1310_v51 = vsel %vm786_vm2, %v2707_v23, 0.0 }
 0x5a0   : > { %vm1100_vm14 = vcmp.eq.f32.partialorder %v1068_v48, %v1092_v21  ;;  %1144 = vmin.xlane.f32.xlu0 %v1143_v52  ;;  %v1201_v56 = vshra.s32 %v1199_v53, 16  ;;  %v1200_v10 = vand.u32 65535, %v1199_v53  ;;  %v1309_v28 = vsel %vm786_vm2, %v2703_v17, 0.0 }
 0x5a1   : > { %v1108_v29 = vsel %vm1100_vm14, %v2736_v50, 4  ;;  %v1158_v58 = vcvt.s32.f32 %v1156_v54  ;;  %v1157_v30 = vcvt.s32.f32 %v1155_v22  ;;  %v1311_v53 = vadd.f32 %v1310_v51, %v1309_v28 }
 0x5a2   : > { %v1214_v38 = vsel %vm786_vm2, %v1108_v29, 2147483647  ;;  %v1203_v59 = vcvt.s32.f32 %v1201_v56  ;;  %v1202_v35 = vcvt.s32.f32 %v1200_v10  ;;  %v1314_v21 = vsel %vm786_vm2, %v2723_v41, 0.0 }
 0x5a3   : > { %1159 = vmin.xlane.f32.xlu1 %v1158_v58  ;;  %v1216_v60 = vshra.s32 %v1214_v38, 16  ;;  %v1215_v31 = vand.u32 65535, %v1214_v38  ;;  %v1316_v29 = vsel %vm786_vm2, %v2711_v27, 0.0  ;;  %v1322_v10 = vsel %vm786_vm2, %v2731_v45, 0.0 }
 0x5a4   : > { %1204 = vmin.xlane.f32.xlu0 %v1203_v59 }
 0x5a5   : > { %v1218_v61 = vcvt.s32.f32 %v1216_v60  ;;  %v1217_v44 = vcvt.s32.f32 %v1215_v31 }
 0x5a7   : > { %1219 = vmin.xlane.f32.xlu1 %v1218_v61 }
 0x61c   : > { %v1115_v1 = vpop.xlane.xlu0 %1114 }
 0x61d   : > { %vm1116_vm15 = vcmp.eq.f32.partialorder %v1113_v12, %v1115_v1  ;;  %v1121_v38 = vcvt.f32.s32 %v1115_v1  ;;  %v1053_v1 = vsel %vm1037_vm5, 1.0, %v2489_v63 }
 0x61e   : > { %v1117_v4 = vsel %vm1116_vm15, %v1112_v2, inf }
 0x61f   : > { %1118 = vmin.xlane.f32.xlu0 %v1117_v4  ;;  %v1122_v39 = vshll.u32 %v1121_v38, 16 }
 0x620   : > { %v2886_v48 = vpop.xlane.xlu1 %1129 }
 0x621   : > { %vm1131_vm1 = vcmp.eq.f32.partialorder %v1128_v18, %v2886_v48  ;;  %v1142_v18 = vcvt.s32.f32 %v1140_v6  ;;  %v1136_v2 = vcvt.f32.s32 %v2886_v48 }
 0x622   : > { %v1132_v8 = vsel %vm1131_vm1, %v1127_v5, inf  ;;  %v1320_v5 = vsel %vm786_vm2, %v2725_v42, 0.0 }
 0x623   : > { %1133 = vmin.xlane.f32.xlu1 %v1132_v8  ;;  %v1045_v8 = vsel %vm1037_vm5, %v2703_v17, 0.0  ;;  %v1137_v15 = vshll.u32 %v1136_v2, 16 }
 0x624   : > { %v2889_v9 = vpop.xlane.xlu0 %1174 }
 0x625   : > { %vm1176_vm3 = vcmp.eq.f32.partialorder %v1173_v26, %v2889_v9  ;;  %v1181_v48 = vcvt.f32.s32 %v2889_v9  ;;  %v1046_v9 = vsel %vm1038_vm6, %v2707_v23, 0.0 }
 0x626   : > { %v1177_v16 = vsel %vm1176_vm3, %v1172_v14, inf }
 0x627   : > { %1178 = vmin.xlane.f32.xlu0 %v1177_v16 }
 0x628   : > { %v2892_v12 = vpop.xlane.xlu1 %1189 }
 0x629   : > { %v2894_v24 = vpop.xlane.xlu0 %1144  ;;  %vm1191_vm4 = vcmp.eq.f32.partialorder %v1188_v46, %v2892_v12 }
 0x62a   : > { %v1192_v25 = vsel %vm1191_vm4, %v1187_v13, inf  ;;  %vm1146_vm13 = vcmp.eq.f32.partialorder %v1143_v52, %v2894_v24  ;;  %v1312_v52 = vsel %vm786_vm2, %v2717_v34, 0.0 }
 0x62b   : > { %1193 = vmin.xlane.f32.xlu1 %v1192_v25  ;;  %v1147_v62 = vsel %vm1146_vm13, %v1142_v18, inf  ;;  %v1313_v54 = vadd.f32 %v1312_v52, %v1311_v53  ;;  %v1057_v52 = vsel %vm1041_vm7, 1.0, %v2489_v63  ;;  %v1050_v53 = vsel %vm1042_vm8, %v2715_v33, 0.0 }
 0x62c   : > { %1148 = vmin.xlane.f32.xlu0 %v1147_v62  ;;  %v2898_v26 = vpop.xlane.xlu1 %1159  ;;  %v1182_v62 = vshll.u32 %v1181_v48, 16  ;;  %vm1638_vm13 = vcmp.eq.s32.totalorder %v2736_v50, 2 }
 0x62d   : > { %v2900_v32 = vpop.xlane.xlu0 %1204  ;;  %vm1161_vm14 = vcmp.eq.f32.partialorder %v1158_v58, %v2898_v26  ;;  %v1315_v56 = vadd.f32 %v1314_v21, %v1313_v54  ;;  %v1166_v28 = vcvt.f32.s32 %v2898_v26 }
 0x62e   : > { %v1162_v36 = vsel %vm1161_vm14, %v1157_v30, inf  ;;  %vm1206_vm15 = vcmp.eq.f32.partialorder %v1203_v59, %v2900_v32  ;;  %v1318_v59 = vsel %vm786_vm2, %v2715_v33, 0.0  ;;  %v1196_v30 = vcvt.f32.s32 %v2892_v12 }
 0x62f   : > { %1163 = vmin.xlane.f32.xlu1 %v1162_v36  ;;  %v1207_v37 = vsel %vm1206_vm15, %v1202_v35, inf  ;;  %v1317_v58 = vadd.f32 %v1316_v29, %v1315_v56  ;;  %v1151_v35 = vcvt.f32.s32 %v2894_v24  ;;  %v1211_v54 = vcvt.f32.s32 %v2900_v32 }
 0x630   : > { %1208 = vmin.xlane.f32.xlu0 %v1207_v37  ;;  %v2904_v20 = vpop.xlane.xlu1 %1219  ;;  %v1197_v21 = vshll.u32 %v1196_v30, 16  ;;  %v1047_v32 = vsel %vm1039_vm9, %v2717_v34, 0.0  ;;  %vm1693_vm14 = vcmp.eq.s32.totalorder %v2736_v50, 3  ;;  %vm1535_vm15 = vcmp.eq.s32.totalorder %v2736_v50, 0 }
 0x631   : > { %vm1221_vm1 = vcmp.eq.f32.partialorder %v1218_v61, %v2904_v20  ;;  %v1319_v61 = vadd.f32 %v1318_v59, %v1317_v58  ;;  %v1152_v26 = vshll.u32 %v1151_v35, 16 }
 0x632   : > { %v1222_v46 = vsel %vm1221_vm1, %v1217_v44, inf  ;;  %vm1583_vm1 = vcmp.eq.s32.totalorder %v2736_v50, 1 }
 0x633   : > { %1223 = vmin.xlane.f32.xlu1 %v1222_v46  ;;  %v1321_v14 = vadd.f32 %v1320_v5, %v1319_v61  ;;  %v1058_v61 = vsel %vm1042_vm8, 1.0, %v2489_v63  ;;  %v1226_v5 = vcvt.f32.s32 %v2904_v20  ;;  %v1056_v20 = vsel %vm1040_vm10, 1.0, %v2489_v63 }
 0x635   : > { %v2947_v25 = vadd.f32 %v1322_v10, %v1321_v14  ;;  %v1051_v10 = vsel %vm1043_vm11, %v2725_v42, 0.0 }
 0x6a8   : > { %v1119_v60 = vpop.xlane.xlu0 %1118 }
 0x6a9   : > { %v1120_v3 = vcvt.f32.s32 %v1119_v60 }
 0x6ab   : > { %v1123_v4 = vadd.s32 %v1122_v39, %v1120_v3  ;;  %v1167_v39 = vshll.u32 %v1166_v28, 16 }
 0x6ac   : > { %v1134_v7 = vpop.xlane.xlu1 %1133 }
 0x6ad   : > { %v1135_v6 = vcvt.f32.s32 %v1134_v7  ;;  %vm1229_vm3 = vcmp.eq.s32.totalorder %v2736_v50, %v1123_v4  ;;  %v1212_v4 = vshll.u32 %v1211_v54, 16 }
 0x6ae   : > { %v2933_v16 = vsel %vm1229_vm3, %v2703_v17, %v1045_v8  ;;  %v1245_v13 = vsel %vm1229_vm3, 1.0, %v1053_v1  ;;  %v1054_v17 = vsel %vm1038_vm6, 1.0, %v2489_v63 }
 0x6af   : > { %v1138_v22 = vadd.s32 %v1137_v15, %v1135_v6  ;;  %v1253_v18 = vsel %vm786_vm2, %v2933_v16, 0.0  ;;  %v1330_v44 = vsel %vm786_vm2, %v1245_v13, 0.0 }
 0x6b0   : > { %1254 = vadd.xlane.f32.xlu0 %v1253_v18  ;;  %v1179_v49 = vpop.xlane.xlu0 %1178 }
 0x6b1   : > { %v1180_v31 = vcvt.f32.s32 %v1179_v49  ;;  %vm1230_vm5 = vcmp.eq.s32.totalorder %v2736_v50, %v1138_v22  ;;  %v1227_v49 = vshll.u32 %v1226_v5, 16 }
 0x6b2   : > { %v2953_v36 = vsel %vm1230_vm5, %v2707_v23, %v1046_v9  ;;  %v1246_v37 = vsel %vm1230_vm5, 1.0, %v1054_v17 }
 0x6b3   : > { %v1183_v46 = vadd.s32 %v1182_v62, %v1180_v31  ;;  %v1256_v12 = vsel %vm786_vm2, %v2953_v36, 0.0  ;;  %v1331_v51 = vsel %vm786_vm2, %v1246_v37, 0.0 }
 0x6b4   : > { %1257 = vadd.xlane.f32.xlu1 %v1256_v12  ;;  %v1332_v24 = vadd.f32 %v1331_v51, %v1330_v44  ;;  %v1194_v23 = vpop.xlane.xlu1 %1193  ;;  %v1059_v12 = vsel %vm1043_vm11, 1.0, %v2489_v63  ;;  %vm1351_vm11 = vcmask 1040384  }
 0x6b5   : > { %v1195_v56 = vcvt.f32.s32 %v1194_v23  ;;  %v1149_v29 = vpop.xlane.xlu0 %1148  ;;  %vm1233_vm6 = vcmp.eq.s32.totalorder %v2736_v50, %v1183_v46 }
 0x6b6   : > { %v1150_v58 = vcvt.f32.s32 %v1149_v29  ;;  %v2975_v38 = vsel %vm1233_vm6, %v2711_v27, %v1049_v11  ;;  %v1249_v59 = vsel %vm1233_vm6, 1.0, %v1057_v52  ;;  %v1055_v27 = vsel %vm1039_vm9, 1.0, %v2489_v63 }
 0x6b7   : > { %v1198_v19 = vadd.s32 %v1197_v21, %v1195_v56  ;;  %v1265_v60 = vsel %vm786_vm2, %v2975_v38, 0.0  ;;  %v1337_v46 = vsel %vm786_vm2, %v1249_v59, 0.0 }
 0x6b8   : > { %v1153_v2 = vadd.s32 %v1152_v26, %v1150_v58  ;;  %v1164_v3 = vpop.xlane.xlu1 %1163  ;;  %1266 = vadd.xlane.f32.xlu0 %v1265_v60 }
 0x6b9   : > { %v1165_v7 = vcvt.f32.s32 %v1164_v3  ;;  %v1209_v8 = vpop.xlane.xlu0 %1208  ;;  %vm1234_vm7 = vcmp.eq.s32.totalorder %v2736_v50, %v1198_v19 }
 0x6ba   : > { %v1210_v1 = vcvt.f32.s32 %v1209_v8  ;;  %v2998_v14 = vsel %vm1234_vm7, %v2715_v33, %v1050_v53  ;;  %v1250_v15 = vsel %vm1234_vm7, 1.0, %v1058_v61  ;;  %vm1231_vm8 = vcmp.eq.s32.totalorder %v2736_v50, %v1153_v2 }
 0x6bb   : > { %v1168_v43 = vadd.s32 %v1167_v39, %v1165_v7  ;;  %v1268_v48 = vsel %vm786_vm2, %v2998_v14, 0.0  ;;  %v3004_v6 = vsel %vm1231_vm8, %v2717_v34, %v1047_v32  ;;  %v1247_v33 = vsel %vm1231_vm8, 1.0, %v1055_v27 }
 0x6bc   : > { %v1213_v13 = vadd.s32 %v1212_v4, %v1210_v1  ;;  %1269 = vadd.xlane.f32.xlu1 %v1268_v48  ;;  %v1224_v22 = vpop.xlane.xlu1 %1223  ;;  %v1259_v18 = vsel %vm786_vm2, %v3004_v6, 0.0  ;;  %v1333_v9 = vsel %vm786_vm2, %v1247_v33, 0.0  ;;  %v1339_v23 = vsel %vm786_vm2, %v1250_v15, 0.0 }
 0x6bd   : > { %v1225_v34 = vcvt.f32.s32 %v1224_v22  ;;  %1260 = vadd.xlane.f32.xlu0 %v1259_v18  ;;  %vm1232_vm9 = vcmp.eq.s32.totalorder %v2736_v50, %v1168_v43  ;;  %v1334_v55 = vadd.f32 %v1333_v9, %v1332_v24 }
 0x6be   : > { %v3019_v17 = vsel %vm1232_vm9, %v2723_v41, %v1048_v40  ;;  %v1248_v62 = vsel %vm1232_vm9, 1.0, %v1056_v20  ;;  %vm1235_vm10 = vcmp.eq.s32.totalorder %v2736_v50, %v1213_v13  ;;  %v1324_v41 = vrot.slane %v2947_v25, 4 }
 0x6bf   : > { %v1228_v30 = vadd.s32 %v1227_v49, %v1225_v34  ;;  %v1262_v31 = vsel %vm786_vm2, %v3019_v17, 0.0  ;;  %v1335_v35 = vsel %vm786_vm2, %v1248_v62, 0.0  ;;  %v3026_v37 = vsel %vm1235_vm10, %v2725_v42, %v1051_v10 }
 0x6c0   : > { %1263 = vadd.xlane.f32.xlu1 %v1262_v31  ;;  %v1336_v11 = vadd.f32 %v1335_v35, %v1334_v55  ;;  %v1271_v44 = vsel %vm786_vm2, %v3026_v37, 0.0  ;;  %v1052_v42 = vsel %vm1044_vm12, %v2731_v45, 0.0  ;;  %v1251_v28 = vsel %vm1235_vm10, 1.0, %v1059_v12 }
 0x6c1   : > { %1272 = vadd.xlane.f32.xlu0 %v1271_v44  ;;  %vm1236_vm4 = vcmp.eq.s32.totalorder %v2736_v50, %v1228_v30  ;;  %v1325_v54 = vadd.f32 %v1324_v41, %v2947_v25  ;;  %v1341_v56 = vsel %vm786_vm2, %v1251_v28, 0.0  ;;  %vm1353_vm12 = vcmask 1041408  }
 0x6c2   : > { %v1338_v51 = vadd.f32 %v1337_v46, %v1336_v11  ;;  %v3042_v24 = vsel %vm1236_vm4, %v2731_v45, %v1052_v42  ;;  %v1252_v21 = vsel %vm1236_vm4, 1.0, %v1060_v57 }
 0x6c3   : > { %v1274_v52 = vsel %vm786_vm2, %v3042_v24, 0.0  ;;  %v1343_v29 = vsel %vm786_vm2, %v1252_v21, 0.0  ;;  %v1326_v26 = vrot.slane %v1325_v54, 2 }
 0x6c4   : > { %v1340_v53 = vadd.f32 %v1339_v23, %v1338_v51  ;;  %1275 = vadd.xlane.f32.xlu1 %v1274_v52 }
 0x6c5   : > { %v1327_v0 = vadd.f32 %v1326_v26, %v1325_v54  ;;  %v2384_v26 = vld [vmem:[%s3474_s7 + $0x78] sm:$0xff]  }
 0x6c6   : > { %v1342_v45 = vadd.f32 %v1341_v56, %v1340_v53  ;;  %2274 = vmatprep.subr.bf16.mxu0 %v2384_v26  ;;  %2326 = vmatprep.subr.bf16.mxu1 %v2384_v26 }
 0x6c7   : > { %v1328_v60 = vrot.slane %v1327_v0, 1 }
 0x6c8   : > { %v1344_v58 = vadd.f32 %v1343_v29, %v1342_v45 }
 0x6c9   : > { %v1329_v25 = vadd.f32 %v1328_v60, %v1327_v0 }
 0x6ca   : > { %v1345_v59 = vrot.slane %v1344_v58, 4 }
 0x6cc   : > { %v1346_v19 = vadd.f32 %v1345_v59, %v1344_v58  ;;  %v2385_v58 = vld [vmem:[%s3474_s7 + $0x38] sm:$0xff]  }
 0x6cd   : > { %2275 = vmatpush3.bf16.msra.mxu0 %v2385_v58  ;;  %2334 = vmatpush3.bf16.msra.mxu1 %v2385_v58 }
 0x6ce   : > { %v1347_v63 = vrot.slane %v1346_v19, 2 }
 0x6d0   : > { %v1348_v61 = vadd.f32 %v1347_v63, %v1346_v19 }
 0x6d2   : > { %v1349_v32 = vrot.slane %v1348_v61, 1 }
 0x6d4   : > { %v1350_v39 = vadd.f32 %v1349_v32, %v1348_v61  ;;  %v2386_v32 = vld [vmem:[%s3474_s7 + $0x70] sm:$0xff]  }
 0x6d5   : > { %2276 = vmatprep.subr.bf16.mxu0 %v2386_v32  ;;  %2327 = vmatprep.subr.bf16.mxu1 %v2386_v32 }
 0x6d6   : > { %v1352_v2 = vsel %vm1351_vm11, %v1329_v25, %v1350_v39  ;;  %v2387_v25 = vld [vmem:[%s3474_s7 + $0x30] sm:$0xff]  }
 0x6d7   : > { %v1354_v3 = vsel %vm1353_vm12, %v1352_v2, 0.0  ;;  %2277 = vmatpush3.bf16.msra.mxu0 %v2387_v25  ;;  %2335 = vmatpush3.bf16.msra.mxu1 %v2387_v25 }
 0x6d8   : > { %1355 = vst.msk [vmem:[%s459_s30] sm:$0xff] %vm786_vm2, %v1354_v3  ;;  %v2388_v3 = vld [vmem:[%s3474_s7 + $0x68] sm:$0xff]  }
 0x6d9   : > { %2278 = vmatprep.subr.bf16.mxu0 %v2388_v3  ;;  %2328 = vmatprep.subr.bf16.mxu1 %v2388_v3 }
 0x739   : > { %v1255_v27 = vpop.xlane.xlu0 %1254 }
 0x73a   : > { %v1277_v40 = vadd.f32 1e-09, %v1255_v27  ;;  %v2389_v27 = vld [vmem:[%s3474_s7 + $0x28] sm:$0xff]  }
 0x73b   : > { %2279 = vmatpush3.bf16.msra.mxu0 %v2389_v27  ;;  %2336 = vmatpush3.bf16.msra.mxu1 %v2389_v27 }
 0x73c   : > { %2448 = vrcp.f32 %v1277_v40 }
 0x73d   : > { %v1258_v4 = vpop.xlane.xlu1 %1257 }
 0x73e   : > { %v1278_v5 = vadd.f32 1e-09, %v1258_v4 }
 0x740   : > { %2450 = vrcp.f32 %v1278_v5 }
 0x741   : > { %v1267_v7 = vpop.xlane.xlu0 %1266 }
 0x742   : > { %v1281_v8 = vadd.f32 1e-09, %v1267_v7 }
 0x744   : > { %2452 = vrcp.f32 %v1281_v8 }
 0x745   : > { %v1270_v1 = vpop.xlane.xlu1 %1269 }
 0x746   : > { %v1282_v15 = vadd.f32 1e-09, %v1270_v1  ;;  %v1261_v43 = vpop.xlane.xlu0 %1260  ;;  %v2390_v1 = vld [vmem:[%s3474_s7 + $0x60] sm:$0xff]  }
 0x747   : > { %v1279_v48 = vadd.f32 1e-09, %v1261_v43  ;;  %2280 = vmatprep.subr.bf16.mxu0 %v2390_v1  ;;  %2329 = vmatprep.subr.bf16.mxu1 %v2390_v1 }
 0x748   : > { %2454 = vrcp.f32 %v1282_v15  ;;  %v2391_v15 = vld [vmem:[%s3474_s7 + $0x20] sm:$0xff]  }
 0x749   : > { %v2449_v20 = vpop.eup %2448  ;;  %2456 = vrcp.f32 %v1279_v48  ;;  %v1264_v13 = vpop.xlane.xlu1 %1263  ;;  %2281 = vmatpush3.bf16.msra.mxu0 %v2391_v15  ;;  %2337 = vmatpush3.bf16.msra.mxu1 %v2391_v15 }
 0x74a   : > { %v1286_v22 = vmul.f32 %v2449_v20, %v2933_v16  ;;  %v1280_v33 = vadd.f32 1e-09, %v1264_v13  ;;  %v1273_v18 = vpop.xlane.xlu0 %1272 }
 0x74b   : > { %v1283_v10 = vadd.f32 1e-09, %v1273_v18 }
 0x74c   : > { %1301 = vst.msk [vmem:[#allocation3] sm:$0xff] %vm786_vm2, %v1286_v22  ;;  %2458 = vrcp.f32 %v1280_v33 }
 0x74d   : > { %v2451_v49 = vpop.eup %2450  ;;  %2460 = vrcp.f32 %v1283_v10  ;;  %v1276_v34 = vpop.xlane.xlu1 %1275  ;;  %v2392_v10 = vld [vmem:[%s3474_s7 + $0x58] sm:$0xff]  }
 0x74e   : > { %v1288_v9 = vmul.f32 %v2451_v49, %v2953_v36  ;;  %v1284_v55 = vadd.f32 1e-09, %v1276_v34  ;;  %v2393_v49 = vld [vmem:[%s3474_s7 + $0x18] sm:$0xff]   ;;  %2282 = vmatprep.subr.bf16.mxu0 %v2392_v10  ;;  %2330 = vmatprep.subr.bf16.mxu1 %v2392_v10 }
 0x74f   : > { %2283 = vmatpush3.bf16.msra.mxu0 %v2393_v49  ;;  %2338 = vmatpush3.bf16.msra.mxu1 %v2393_v49 }
 0x750   : > { %1302 = vst.msk [vmem:[#allocation3 + $0x8] sm:$0xff] %vm786_vm2, %v1288_v9  ;;  %2462 = vrcp.f32 %v1284_v55  ;;  %v2394_v55 = vld [vmem:[%s3474_s7 + $0x50] sm:$0xff]  }
 0x751   : > { %v2453_v62 = vpop.eup %2452  ;;  %2284 = vmatprep.subr.bf16.mxu0 %v2394_v55  ;;  %2331 = vmatprep.subr.bf16.mxu1 %v2394_v55 }
 0x752   : > { %v1294_v30 = vmul.f32 %v2453_v62, %v2975_v38  ;;  %v2395_v62 = vld [vmem:[%s3474_s7 + $0x10] sm:$0xff]  }
 0x753   : > { %v1522_v52 = vld [vmem:[#allocation3] sm:$0xff]  ;;  %2285 = vmatpush3.bf16.msra.mxu0 %v2395_v62  ;;  %2339 = vmatpush3.bf16.msra.mxu1 %v2395_v62 }
 0x754   : > { %1305 = vst.msk [vmem:[#allocation3 + $0x20] sm:$0xff] %vm786_vm2, %v1294_v30  ;;  %v1639_v56 = vsel %vm1638_vm13, %v1522_v52, 0.0  ;;  %v1694_v19 = vsel %vm1693_vm14, %v1522_v52, 0.0  ;;  %v1536_v39 = vsel %vm1535_vm15, %v1522_v52, 0.0  ;;  %v1584_v5 = vsel %vm1583_vm1, %v1522_v52, 0.0 }
 0x755   : > { %v2455_v16 = vpop.eup %2454  ;;  %v1647_v59 = vsel %vm786_vm2, %v1639_v56, 0.0  ;;  %v1702_v60 = vsel %vm786_vm2, %v1694_v19, 0.0  ;;  %v1545_v40 = vsel %vm786_vm2, %v1536_v39, 0.0  ;;  %v1592_v43 = vsel %vm786_vm2, %v1584_v5, 0.0  ;;  %v1467_v39 = vpop.f32.mrf.mxu1 }
 0x756   : > { %v2457_v31 = vpop.eup %2456  ;;  %v1296_v35 = vmul.f32 %v2455_v16, %v2998_v14 }
 0x757   : > { %v1290_v11 = vmul.f32 %v2457_v31, %v3004_v6  ;;  %v1523_v45 = vld [vmem:[#allocation3 + $0x8] sm:$0xff] }
 0x758   : > { %1306 = vst.msk [vmem:[#allocation3 + $0x28] sm:$0xff] %vm786_vm2, %v1296_v35  ;;  %v1640_v0 = vsel %vm1638_vm13, %v1523_v45, 0.0  ;;  %v1695_v61 = vsel %vm1693_vm14, %v1523_v45, 0.0  ;;  %v1537_v4 = vsel %vm1535_vm15, %v1523_v45, 0.0  ;;  %v1585_v48 = vsel %vm1583_vm1, %v1523_v45, 0.0 }
 0x759   : > { %v2459_v44 = vpop.eup %2458  ;;  %1303 = vst.msk [vmem:[#allocation3 + $0x10] sm:$0xff] %vm786_vm2, %v1290_v11  ;;  %v1650_v63 = vsel %vm786_vm2, %v1640_v0, 0.0  ;;  %v1705_v2 = vsel %vm786_vm2, %v1695_v61, 0.0  ;;  %v1548_v8 = vsel %vm786_vm2, %v1537_v4, 0.0  ;;  %v1595_v22 = vsel %vm786_vm2, %v1585_v48, 0.0 }
 0x75a   : > { %v2461_v36 = vpop.eup %2460  ;;  %v1292_v41 = vmul.f32 %v2459_v44, %v3019_v17  ;;  %v1368_v48 = vld [vmem:[%s3473_s6] sm:$0x3] }
 0x75b   : > { %v1298_v46 = vmul.f32 %v2461_v36, %v3026_v37  ;;  %v1526_v35 = vld [vmem:[#allocation3 + $0x20] sm:$0xff] }
 0x75c   : > { %1304 = vst.msk [vmem:[#allocation3 + $0x18] sm:$0xff] %vm786_vm2, %v1292_v41  ;;  %v2396_v41 = vld [vmem:[%s3474_s7 + $0x48] sm:$0xff]   ;;  %v1588_v45 = vsel %vm1583_vm1, %v1526_v35, 0.0 }
 0x75d   : > { %v2463_v38 = vpop.eup %2462  ;;  %1307 = vst.msk [vmem:[#allocation3 + $0x30] sm:$0xff] %vm786_vm2, %v1298_v46  ;;  %v1643_v46 = vsel %vm1638_vm13, %v1526_v35, 0.0  ;;  %2286 = vmatprep.subr.bf16.mxu0 %v2396_v41  ;;  %2332 = vmatprep.subr.bf16.mxu1 %v2396_v41  ;;  %v1604_v26 = vsel %vm786_vm2, %v1588_v45, 0.0 }
 0x75e   : > { %v1300_v12 = vmul.f32 %v2463_v38, %v3042_v24 }
 0x75f   : > { %v1527_v38 = vld [vmem:[#allocation3 + $0x28] sm:$0xff] }
 0x760   : > { %1308 = vst.msk [vmem:[#allocation3 + $0x38] sm:$0xff] %vm786_vm2, %v1300_v12  ;;  %v3076_v14 = vld [vmem:[#allocation3 + $0x10] sm:$0xff]  ;;  %v2397_v12 = vld [vmem:[%s3474_s7 + $0x8] sm:$0xff]   ;;  %v1699_v52 = vsel %vm1693_vm14, %v1527_v38, 0.0  ;;  %v1541_v56 = vsel %vm1535_vm15, %v1527_v38, 0.0  ;;  %v1589_v58 = vsel %vm1583_vm1, %v1527_v38, 0.0 }
 0x761   : > { %v1641_v6 = vsel %vm1638_vm13, %v3076_v14, 0.0  ;;  %v1696_v42 = vsel %vm1693_vm14, %v3076_v14, 0.0  ;;  %v1538_v57 = vsel %vm1535_vm15, %v3076_v14, 0.0  ;;  %2287 = vmatpush3.bf16.msra.mxu0 %v2397_v12  ;;  %2340 = vmatpush3.bf16.msra.mxu1 %v2397_v12  ;;  %v1607_v0 = vsel %vm786_vm2, %v1589_v58, 0.0 }
 0x762   : > { %v1653_v17 = vsel %vm786_vm2, %v1641_v6, 0.0  ;;  %v1708_v24 = vsel %vm786_vm2, %v1696_v42, 0.0  ;;  %v1551_v21 = vsel %vm786_vm2, %v1538_v57, 0.0  ;;  %v1644_v42 = vsel %vm1638_vm13, %v1527_v38, 0.0 }
 0x763   : > { %1654 = vadd.xlane.f32.xlu0 %v1653_v17  ;;  %v3084_v37 = vld [vmem:[#allocation3 + $0x18] sm:$0xff]  ;;  %v1659_v17 = vsel %vm786_vm2, %v1643_v46, 0.0 }
 0x764   : > { %v1642_v51 = vsel %vm1638_vm13, %v3084_v37, 0.0  ;;  %v1697_v23 = vsel %vm1693_vm14, %v3084_v37, 0.0  ;;  %v1539_v54 = vsel %vm1535_vm15, %v3084_v37, 0.0  ;;  %v3145_v7 = vld [vmem:[#allocation3 + $0x30] sm:$0xff] }
 0x765   : > { %v1656_v28 = vsel %vm786_vm2, %v1642_v51, 0.0  ;;  %v1711_v53 = vsel %vm786_vm2, %v1697_v23, 0.0  ;;  %v1554_v29 = vsel %vm786_vm2, %v1539_v54, 0.0  ;;  %v1645_v20 = vsel %vm1638_vm13, %v3145_v7, 0.0  ;;  %v2398_v51 = vld [vmem:[%s3474_s7 + $0x40] sm:$0xff]  }
 0x766   : > { %1657 = vadd.xlane.f32.xlu1 %v1656_v28  ;;  %v1665_v33 = vsel %vm786_vm2, %v1645_v20, 0.0  ;;  %v1700_v34 = vsel %vm1693_vm14, %v3145_v7, 0.0  ;;  %v1542_v31 = vsel %vm1535_vm15, %v3145_v7, 0.0  ;;  %v1698_v28 = vsel %vm1693_vm14, %v1526_v35, 0.0  ;;  %2288 = vmatprep.subr.bf16.mxu0 %v2398_v51 }
 0x767   : > { %1709 = vadd.xlane.f32.xlu0 %v1708_v24  ;;  %v3160_v13 = vld [vmem:[#allocation3 + $0x38] sm:$0xff]  ;;  %v1720_v30 = vsel %vm786_vm2, %v1700_v34, 0.0  ;;  %v1563_v44 = vsel %vm786_vm2, %v1542_v31, 0.0  ;;  %v2399_v24 = vld [vmem:[%s3474_s7] sm:$0xff]   ;;  %2333 = vmatprep.subr.bf16.mxu1 %v2398_v51  ;;  %v1662_v23 = vsel %vm786_vm2, %v1644_v42, 0.0  ;;  %v1714_v57 = vsel %vm786_vm2, %v1698_v28, 0.0 }
 0x768   : > { %v1646_v18 = vsel %vm1638_vm13, %v3160_v13, 0.0  ;;  %v1701_v16 = vsel %vm1693_vm14, %v3160_v13, 0.0  ;;  %v1543_v36 = vsel %vm1535_vm15, %v3160_v13, 0.0  ;;  %2289 = vmatpush3.bf16.msra.mxu0 %v2399_v24  ;;  %2341 = vmatpush3.bf16.msra.mxu1 %v2399_v24 }
 0x769   : > { %v1668_v9 = vsel %vm786_vm2, %v1646_v18, 0.0  ;;  %v1723_v11 = vsel %vm786_vm2, %v1701_v16, 0.0  ;;  %v1566_v6 = vsel %vm786_vm2, %v1543_v36, 0.0 }
 0x76a   : > { %1712 = vadd.xlane.f32.xlu1 %v1711_v53  ;;  %v1540_v53 = vsel %vm1535_vm15, %v1526_v35, 0.0 }
 0x76b   : > { %1552 = vadd.xlane.f32.xlu0 %v1551_v21  ;;  %v1717_v21 = vsel %vm786_vm2, %v1699_v52, 0.0  ;;  %v1557_v54 = vsel %vm786_vm2, %v1540_v53, 0.0 }
 0x76e   : > { %1555 = vadd.xlane.f32.xlu1 %v1554_v29  ;;  %v1560_v29 = vsel %vm786_vm2, %v1541_v56, 0.0 }
 0x76f   : > { %1648 = vadd.xlane.f32.xlu0 %v1647_v59  ;;  %v1586_v59 = vsel %vm1583_vm1, %v3076_v14, 0.0  ;;  %v1591_v14 = vsel %vm1583_vm1, %v3160_v13, 0.0 }
 0x770   : > { %v1598_v19 = vsel %vm786_vm2, %v1586_v59, 0.0  ;;  %v1613_v25 = vsel %vm786_vm2, %v1591_v14, 0.0 }
 0x772   : > { %1651 = vadd.xlane.f32.xlu1 %v1650_v63  ;;  %v1587_v63 = vsel %vm1583_vm1, %v3084_v37, 0.0  ;;  %v1469_v37 = vpop.f32.mrf.mxu1 }
 0x773   : > { %1703 = vadd.xlane.f32.xlu0 %v1702_v60  ;;  %v1590_v60 = vsel %vm1583_vm1, %v3145_v7, 0.0  ;;  %v1601_v61 = vsel %vm786_vm2, %v1587_v63, 0.0  ;;  %v1371_v7 = vshrl.u32 %v875_v47, 7 }
 0x774   : > { %v1610_v32 = vsel %vm786_vm2, %v1590_v60, 0.0  ;;  %vm1746_vm2 = vcmask 523264  }
 0x775   : > { %v1673_v46 = vsub.s32 2, %v1371_v7  ;;  %v1728_v28 = vsub.s32 3, %v1371_v7 }
 0x776   : > { %1706 = vadd.xlane.f32.xlu1 %v1705_v2  ;;  %v1471_v2 = vpop.f32.mrf.mxu1 }
 0x777   : > { %1546 = vadd.xlane.f32.xlu0 %v1545_v40 }
 0x778   : > { %v1473_v3 = vpop.f32.mrf.mxu1 }
 0x77a   : > { %1549 = vadd.xlane.f32.xlu1 %v1548_v8  ;;  %v3250_v40 = vpop.f32.mrf.mxu1  ;;  %v1376_v8 = vsub.s32 1, %v1371_v7 }
 0x77b   : > { %1593 = vadd.xlane.f32.xlu0 %v1592_v43 }
 0x77c   : > { %v1479_v50 = vpop.f32.mrf.mxu1  ;;  %v3266_v20 = vrot.slane %v1368_v48, %v1376_v8 }
 0x77e   : > { %1596 = vadd.xlane.f32.xlu1 %v1595_v22  ;;  %v3261_v43 = vpop.f32.mrf.mxu1  ;;  %v1372_v22 = vsub.s32 0, %v1371_v7  ;;  %v1470_v47 = vadd.f32 %v1469_v37, %v3266_v20  ;;  %v1474_v10 = vadd.f32 %v1473_v3, %v3266_v20  ;;  %v1480_v42 = vadd.f32 %v1479_v50, %v3266_v20 }
 0x77f   : > { %1666 = vadd.xlane.f32.xlu0 %v1665_v33 }
 0x780   : > { %v1483_v18 = vpop.f32.mrf.mxu1  ;;  %v3272_v34 = vrot.slane %v1368_v48, %v1372_v22  ;;  %v1509_v16 = vmax.f32 %v1474_v10, 0.0  ;;  %v1511_v58 = vmax.f32 %v1480_v42, 0.0 }
 0x781   : > { %v1484_v51 = vadd.f32 %v1483_v18, %v3266_v20 }
 0x782   : > { %1669 = vadd.xlane.f32.xlu1 %v1668_v9  ;;  %v3274_v55 = vpop.f32.mrf.mxu1  ;;  %v1468_v35 = vadd.f32 %v1467_v39, %v3272_v34 }
 0x783   : > { %1721 = vadd.xlane.f32.xlu0 %v1720_v30  ;;  %v1507_v30 = vmax.f32 %v1470_v47, 0.0  ;;  %v1513_v59 = vmax.f32 %v1484_v51, 0.0 }
 0x784   : > { %v1489_v41 = vpop.f32.mrf.mxu1  ;;  %v1506_v52 = vmax.f32 %v1468_v35, 0.0 }
 0x786   : > { %1724 = vadd.xlane.f32.xlu1 %v1723_v11  ;;  %v1532_v11 = vld [vmem:[%s3475_s8] sm:$0xf] }
 0x787   : > { %1564 = vadd.xlane.f32.xlu0 %v1563_v44  ;;  %v3287_v24 = vrot.slane %v1532_v11, %v1372_v22 }
 0x78a   : > { %1567 = vadd.xlane.f32.xlu1 %v1566_v6  ;;  %v3282_v6 = vrot.slane %v1532_v11, %v1376_v8 }
 0x78b   : > { %1660 = vadd.xlane.f32.xlu0 %v1659_v17  ;;  %v1472_v17 = vadd.f32 %v1471_v2, %v3272_v34 }
 0x78e   : > { %1663 = vadd.xlane.f32.xlu1 %v1662_v23 }
 0x78f   : > { %1715 = vadd.xlane.f32.xlu0 %v1714_v57 }
 0x792   : > { %1718 = vadd.xlane.f32.xlu1 %v1717_v21  ;;  %v1491_v21 = vpop.f32.mrf.mxu1 }
 0x793   : > { %1558 = vadd.xlane.f32.xlu0 %v1557_v54  ;;  %v3289_v54 = vrot.slane %v1532_v11, %v1673_v46 }
 0x794   : > { %v1493_v3 = vpop.f32.mrf.mxu1 }
 0x795   : > { %v1494_v42 = vadd.f32 %v1493_v3, %v3266_v20 }
 0x796   : > { %1561 = vadd.xlane.f32.xlu1 %v1560_v29 }
 0x797   : > { %1605 = vadd.xlane.f32.xlu0 %v1604_v26  ;;  %v1508_v26 = vmax.f32 %v1472_v17, 0.0 }
 0x79a   : > { %1608 = vadd.xlane.f32.xlu1 %v1607_v0 }
 0x79b   : > { %1599 = vadd.xlane.f32.xlu0 %v1598_v19  ;;  %v3297_v19 = vrot.slane %v1532_v11, %v1728_v28 }
 0x79e   : > { %1602 = vadd.xlane.f32.xlu1 %v1601_v61 }
 0x79f   : > { %1611 = vadd.xlane.f32.xlu0 %v1610_v32 }
 0x7a2   : > { %1614 = vadd.xlane.f32.xlu1 %v1613_v25 }
 0x7ec   : > { %v3248_v27 = vpop.xlane.xlu0 %1654 }
 0x7ef   : > { %v3252_v4 = vpop.xlane.xlu1 %1657 }
 0x7f0   : > { %v3254_v5 = vpop.xlane.xlu0 %1709 }
 0x7f1   : > { %v1757_v63 = vsel %vm1746_vm2, %v3248_v27, %v3254_v5 }
 0x7f2   : > { %v1768_v22 = vmul.f32 %v1757_v63, %v1511_v58 }
 0x7f3   : > { %v3257_v1 = vpop.xlane.xlu1 %1712 }
 0x7f4   : > { %v3259_v15 = vpop.xlane.xlu0 %1552  ;;  %v1758_v56 = vsel %vm1746_vm2, %v3252_v4, %v3257_v1 }
 0x7f5   : > { %v1770_v14 = vmul.f32 %v1758_v56, %v1513_v59 }
 0x7f7   : > { %v3268_v13 = vpop.xlane.xlu1 %1555  ;;  %v1782_v11 = vpack.c.bf16 %v1770_v14, %v1768_v22  ;;  %v1678_v22 = vmul.f32 %v3289_v54, %v3252_v4 }
 0x7f8   : > { %v1649_v33 = vpop.xlane.xlu0 %1648 }
 0x7f9   : > { %v1675_v60 = vmul.f32 %v3289_v54, %v1649_v33 }
 0x7fb   : > { %v1652_v49 = vpop.xlane.xlu1 %1651 }
 0x7fc   : > { %v1704_v9 = vpop.xlane.xlu0 %1703 }
 0x7fd   : > { %v1755_v62 = vsel %vm1746_vm2, %v1649_v33, %v1704_v9  ;;  %v1730_v7 = vmul.f32 %v3297_v19, %v1704_v9  ;;  %v1676_v33 = vmul.f32 %v3289_v54, %v1652_v49 }
 0x7fe   : > { %v1764_v38 = vmul.f32 %v1755_v62, %v1507_v30 }
 0x7ff   : > { %v1707_v31 = vpop.xlane.xlu1 %1706 }
 0x800   : > { %v1756_v44 = vsel %vm1746_vm2, %v1652_v49, %v1707_v31  ;;  %v1547_v36 = vpop.xlane.xlu0 %1546  ;;  %v1731_v30 = vmul.f32 %v3297_v19, %v1707_v31  ;;  %v1490_v31 = vadd.f32 %v1489_v41, %v3266_v20  ;;  %v1492_v41 = vadd.f32 %v1491_v21, %v3272_v34 }
 0x801   : > { %v1766_v12 = vmul.f32 %v1756_v44, %v1509_v16  ;;  %v1573_v45 = vmul.f32 %v3287_v24, %v1547_v36  ;;  %v1497_v44 = vpop.f32.mrf.mxu1 }
 0x802   : > { %v1515_v56 = vmax.f32 %v1490_v31, 0.0  ;;  %v1516_v14 = vmax.f32 %v1492_v41, 0.0 }
 0x803   : > { %v1550_v23 = vpop.xlane.xlu1 %1549  ;;  %v1780_v57 = vpack.c.bf16 %v1766_v12, %v1764_v38  ;;  %v1499_v46 = vpop.f32.mrf.mxu1 }
 0x804   : > { %v1594_v53 = vpop.xlane.xlu0 %1593  ;;  %v1574_v25 = vmul.f32 %v3287_v24, %v1550_v23 }
 0x805   : > { %v1620_v29 = vmul.f32 %v3282_v6, %v1594_v53  ;;  %1955 = vmatprep.mubr.bf16.mxu0 %v1780_v57  ;;  %v1747_v0 = vsel %vm1746_vm2, %v1547_v36, %v1594_v53  ;;  %v1501_v17 = vpop.f32.mrf.mxu1  ;;  %v1488_v53 = vadd.f32 %v3274_v55, %v3272_v34 }
 0x806   : > { %v1763_v8 = vmul.f32 %v1747_v0, %v1506_v52  ;;  %v3333_v52 = vadd.f32 %v3261_v43, %v3272_v34  ;;  %v3344_v59 = vadd.f32 %v1501_v17, %v3272_v34 }
 0x807   : > { %v1628_v61 = vadd.f32 %v1620_v29, %v1573_v45  ;;  %v1597_v32 = vpop.xlane.xlu1 %1596  ;;  %v1503_v57 = vpop.f32.mrf.mxu1  ;;  %v1517_v29 = vmax.f32 %v1494_v42, 0.0 }
 0x808   : > { %v1621_v39 = vmul.f32 %v3282_v6, %v1597_v32  ;;  %v1748_v37 = vsel %vm1746_vm2, %v1550_v23, %v1597_v32  ;;  %v3306_v2 = vpop.xlane.xlu0 %1666  ;;  %v3329_v23 = vadd.f32 %v3250_v40, %v3272_v34  ;;  %v1500_v40 = vadd.f32 %v1499_v46, %v3266_v20 }
 0x809   : > { %v1683_v50 = vadd.f32 %v1675_v60, %v1628_v61  ;;  %v1765_v48 = vmul.f32 %v1748_v37, %v1508_v26  ;;  %v3340_v26 = vadd.f32 %v1497_v44, %v3272_v34  ;;  %v1504_v43 = vadd.f32 %v1503_v57, %v3266_v20 }
 0x80a   : > { %v1629_v18 = vadd.f32 %v1621_v39, %v1574_v25  ;;  %v1510_v61 = vmax.f32 %v3329_v23, 0.0  ;;  %v1512_v21 = vmax.f32 %v3333_v52, 0.0  ;;  %v1514_v32 = vmax.f32 %v1488_v53, 0.0 }
 0x80b   : > { %v1779_v47 = vpack.c.bf16 %v1765_v48, %v1763_v8  ;;  %v3310_v10 = vpop.xlane.xlu1 %1669  ;;  %v3312_v62 = vadd.f32 %v1730_v7, %v1683_v50  ;;  %v1518_v25 = vmax.f32 %v3340_v26, 0.0  ;;  %v1519_v39 = vmax.f32 %v1500_v40, 0.0 }
 0x80c   : > { %v1684_v16 = vadd.f32 %v1676_v33, %v1629_v18  ;;  %v3315_v35 = vpop.xlane.xlu0 %1721  ;;  %v1520_v34 = vmax.f32 %v3344_v59, 0.0  ;;  %v1521_v7 = vmax.f32 %v1504_v43, 0.0  ;;  %v1677_v48 = vmul.f32 %v3289_v54, %v3248_v27 }
 0x80d   : > { %1956 = vmatmul.mubr.bf16.vlgmr.msra.gmra.mxu0 %v1779_v47  ;;  %v1761_v20 = vsel %vm1746_vm2, %v3306_v2, %v3315_v35  ;;  %v1732_v47 = vmul.f32 %v3297_v19, %v3254_v5 }
 0x80e   : > { %1963 = vmatprep.mubr.bf16.mxu0 %v1782_v11  ;;  %v3317_v9 = vadd.f32 %v1731_v30, %v1684_v16  ;;  %v1575_v30 = vmul.f32 %v3287_v24, %v3259_v15  ;;  %v1576_v16 = vmul.f32 %v3287_v24, %v3268_v13  ;;  %v1776_v27 = vmul.f32 %v1761_v20, %v1519_v39 }
 0x80f   : > { %v3319_v36 = vpop.xlane.xlu1 %1724  ;;  %v1733_v20 = vmul.f32 %v3297_v19, %v3257_v1 }
 0x810   : > { %v3321_v49 = vpop.xlane.xlu0 %1564  ;;  %v1762_v50 = vsel %vm1746_vm2, %v3310_v10, %v3319_v36 }
 0x811   : > { %v1778_v44 = vmul.f32 %v1762_v50, %v1521_v7  ;;  %v1579_v41 = vmul.f32 %v3287_v24, %v3321_v49 }
 0x813   : > { %v3323_v38 = vpop.xlane.xlu1 %1567 }
 0x814   : > { %v1661_v12 = vpop.xlane.xlu0 %1660 }
 0x815   : > { %v1679_v4 = vmul.f32 %v3289_v54, %v1661_v12 }
 0x817   : > { %v1664_v51 = vpop.xlane.xlu1 %1663 }
 0x818   : > { %v1716_v28 = vpop.xlane.xlu0 %1715 }
 0x819   : > { %v1759_v45 = vsel %vm1746_vm2, %v1661_v12, %v1716_v28  ;;  %v1734_v31 = vmul.f32 %v3297_v19, %v1716_v28  ;;  %v1680_v12 = vmul.f32 %v3289_v54, %v1664_v51 }
 0x81a   : > { %v1772_v63 = vmul.f32 %v1759_v45, %v1515_v56 }
 0x81b   : > { %v1719_v58 = vpop.xlane.xlu1 %1718 }
 0x81c   : > { %v1760_v0 = vsel %vm1746_vm2, %v1664_v51, %v1719_v58  ;;  %v1559_v55 = vpop.xlane.xlu0 %1558 }
 0x81d   : > { %v1774_v60 = vmul.f32 %v1760_v0, %v1517_v29  ;;  %v1577_v33 = vmul.f32 %v3287_v24, %v1559_v55 }
 0x81f   : > { %v1562_v37 = vpop.xlane.xlu1 %1561  ;;  %v1784_v3 = vpack.c.bf16 %v1774_v60, %v1772_v63  ;;  %v1735_v60 = vmul.f32 %v3297_v19, %v1719_v58 }
 0x820   : > { %v1606_v8 = vpop.xlane.xlu0 %1605  ;;  %v1578_v42 = vmul.f32 %v3287_v24, %v1562_v37 }
 0x821   : > { %v1624_v18 = vmul.f32 %v3282_v6, %v1606_v8  ;;  %1971 = vmatprep.mubr.bf16.mxu1 %v1784_v3  ;;  %v1751_v11 = vsel %vm1746_vm2, %v1559_v55, %v1606_v8  ;;  %v1786_v55 = vpack.c.bf16 %v1778_v44, %v1776_v27 }
 0x822   : > { %v1771_v53 = vmul.f32 %v1751_v11, %v1514_v32 }
 0x823   : > { %v1632_v46 = vadd.f32 %v1624_v18, %v1577_v33  ;;  %v1609_v17 = vpop.xlane.xlu1 %1608  ;;  %v1580_v18 = vmul.f32 %v3287_v24, %v3323_v38  ;;  %v1682_v24 = vmul.f32 %v3289_v54, %v3310_v10 }
 0x824   : > { %v1625_v5 = vmul.f32 %v3282_v6, %v1609_v17  ;;  %v1752_v23 = vsel %vm1746_vm2, %v1562_v37, %v1609_v17  ;;  %v1600_v57 = vpop.xlane.xlu0 %1599 }
 0x825   : > { %v1687_v52 = vadd.f32 %v1679_v4, %v1632_v46  ;;  %v1773_v56 = vmul.f32 %v1752_v23, %v1516_v14  ;;  %v1622_v45 = vmul.f32 %v3282_v6, %v1600_v57  ;;  %v1749_v28 = vsel %vm1746_vm2, %v3259_v15, %v1600_v57  ;;  %v2008_v57 = vld [vmem:[%s2574_s21 + $0x8] sm:$0xff] }
 0x826   : > { %v1633_v29 = vadd.f32 %v1625_v5, %v1578_v42  ;;  %v1767_v3 = vmul.f32 %v1749_v28, %v1510_v61  ;;  %v1820_v42 = vld [vmem:[#allocation4 + $0x8] sm:$0xff]  ;;  %v2007_v5 = vld [vmem:[%s2574_s21] sm:$0xff] }
 0x827   : > { %v1783_v40 = vpack.c.bf16 %v1773_v56, %v1771_v53  ;;  %v1630_v43 = vadd.f32 %v1622_v45, %v1575_v30  ;;  %v1603_v0 = vpop.xlane.xlu1 %1602  ;;  %v3382_v63 = vadd.f32 %v1734_v31, %v1687_v52 }
 0x828   : > { %v1688_v32 = vadd.f32 %v1680_v12, %v1633_v29  ;;  %v1623_v14 = vmul.f32 %v3282_v6, %v1603_v0  ;;  %v1750_v39 = vsel %vm1746_vm2, %v3268_v13, %v1603_v0  ;;  %v1612_v37 = vpop.xlane.xlu0 %1611  ;;  %v1681_v13 = vmul.f32 %v3289_v54, %v3306_v2 }
 0x829   : > { %v1685_v51 = vadd.f32 %v1677_v48, %v1630_v43  ;;  %v1769_v7 = vmul.f32 %v1750_v39, %v1512_v21  ;;  %v1626_v15 = vmul.f32 %v3282_v6, %v1612_v37  ;;  %1972 = vmatmul.mubr.bf16.vlgmr.msra.gmra.mxu1 %v1783_v40  ;;  %v1753_v58 = vsel %vm1746_vm2, %v3321_v49, %v1612_v37 }
 0x82a   : > { %v1631_v50 = vadd.f32 %v1623_v14, %v1576_v16  ;;  %1979 = vmatprep.mubr.bf16.mxu1 %v1786_v55  ;;  %v3393_v8 = vadd.f32 %v1735_v60, %v1688_v32  ;;  %v1736_v49 = vmul.f32 %v3297_v19, %v3315_v35  ;;  %v1775_v2 = vmul.f32 %v1753_v58, %v1518_v25  ;;  %v1821_v32 = vld [vmem:[#allocation4 + $0x10] sm:$0xff]  ;;  %v1824_v14 = vld [vmem:[#allocation4 + $0x28] sm:$0xff] }
 0x82b   : > { %v1634_v33 = vadd.f32 %v1626_v15, %v1579_v41  ;;  %v1615_v48 = vpop.xlane.xlu1 %1614  ;;  %v1781_v61 = vpack.c.bf16 %v1769_v7, %v1767_v3  ;;  %v1740_v21 = vadd.f32 %v1732_v47, %v1685_v51  ;;  %v1823_v41 = vld [vmem:[#allocation4 + $0x20] sm:$0xff] }
 0x82c   : > { %v1686_v30 = vadd.f32 %v1678_v22, %v1631_v50  ;;  %v1627_v1 = vmul.f32 %v3282_v6, %v1615_v48  ;;  %v1754_v16 = vsel %vm1746_vm2, %v3323_v38, %v1615_v48  ;;  %v1737_v38 = vmul.f32 %v3297_v19, %v3319_v36 }
 0x82d   : > { %v1689_v11 = vadd.f32 %v1681_v13, %v1634_v33  ;;  %v1777_v27 = vmul.f32 %v1754_v16, %v1520_v34  ;;  %1964 = vmatmul.mubr.bf16.gmra.mxu0 %v1781_v61  ;;  %v1819_v34 = vld [vmem:[#allocation4] sm:$0xff]  ;;  %v1822_v13 = vld [vmem:[#allocation4 + $0x18] sm:$0xff]  ;;  %v1825_v33 = vld [vmem:[#allocation4 + $0x30] sm:$0xff] }
 0x82e   : > { %v1635_v22 = vadd.f32 %v1627_v1, %v1580_v18  ;;  %v1741_v47 = vadd.f32 %v1733_v20, %v1686_v30  ;;  %v2011_v18 = vld [vmem:[%s2574_s21 + $0x20] sm:$0xff] }
 0x82f   : > { %v1785_v6 = vpack.c.bf16 %v1777_v27, %v1775_v2  ;;  %v1744_v44 = vadd.f32 %v1736_v49, %v1689_v11  ;;  %v1826_v11 = vld [vmem:[#allocation4 + $0x38] sm:$0xff] }
 0x830   : > { %v1690_v4 = vadd.f32 %v1682_v24, %v1635_v22  ;;  %v2009_v24 = vld [vmem:[%s2574_s21 + $0x10] sm:$0xff]  ;;  %v2012_v22 = vld [vmem:[%s2574_s21 + $0x28] sm:$0xff] }
 0x831   : > { %1980 = vmatmul.mubr.bf16.gmra.mxu1 %v1785_v6 }
 0x832   : > { %v3412_v35 = vadd.f32 %v1737_v38, %v1690_v4 }
 0x8cd   : > { %v2290_v26 = vpop.f32.mrf.mxu0 }
 0x8cf   : > { %v2291_v59 = vpop.f32.mrf.mxu0 }
 0x8d0   : > { %v2292_v25 = vadd.f32 %v2291_v59, %v2290_v26  ;;  %v2010_v26 = vld [vmem:[%s2574_s21 + $0x18] sm:$0xff]  ;;  %v2013_v59 = vld [vmem:[%s2574_s21 + $0x30] sm:$0xff] }
 0x8d1   : > { %v2293_v46 = vpop.f32.mrf.mxu0 }
 0x8d2   : > { %v1958_v54 = vadd.f32 %v2292_v25, %v3312_v62 }
 0x8d3   : > { %v2294_v10 = vpop.f32.mrf.mxu0 }
 0x8d4   : > { %v1988_v17 = vadd.f32 %v1958_v54, %v1819_v34  ;;  %v2295_v31 = vadd.f32 %v2294_v10, %v2293_v46  ;;  %v2014_v54 = vld [vmem:[%s2574_s21 + $0x38] sm:$0xff] }
 0x8d6   : > { %1996 = vst.msk [vmem:[#allocation4] sm:$0xff] %vm473_vm0, %v1988_v17  ;;  %v1961_v19 = vadd.f32 %v2295_v31, %v3317_v9 }
 0x8d8   : > { %v1989_v36 = vadd.f32 %v1961_v19, %v1820_v42 }
 0x8da   : > { %1997 = vst.msk [vmem:[#allocation4 + $0x8] sm:$0xff] %vm473_vm0, %v1989_v36 }
 0x8dd   : > { %v2015_v62 = vld [vmem:[#allocation4] sm:$0xff] }
 0x8de   : > { %v2023_v23 = vadd.f32 %v2015_v62, %v2007_v5 }
 0x8e0   : > { %2031 = vst.msk [vmem:[%s3424_s27] sm:$0xff] %vm473_vm0, %v2023_v23 }
 0x8e1   : > { %v2016_v52 = vld [vmem:[#allocation4 + $0x8] sm:$0xff] }
 0x8e2   : > { %v2024_v53 = vadd.f32 %v2016_v52, %v2008_v57 }
 0x8e4   : > { %2032 = vst.msk [vmem:[%s3424_s27 + $0x8] sm:$0xff] %vm473_vm0, %v2024_v53 }
 0x8e9   : > { %v2302_v9 = vpop.f32.mrf.mxu1 }
 0x8eb   : > { %v2303_v56 = vpop.f32.mrf.mxu1 }
 0x8ec   : > { %v2304_v45 = vadd.f32 %v2303_v56, %v2302_v9 }
 0x8ed   : > { %v2296_v12 = vpop.f32.mrf.mxu0  ;;  %v2305_v29 = vpop.f32.mrf.mxu1 }
 0x8ee   : > { %v1974_v28 = vadd.f32 %v2304_v45, %v3382_v63 }
 0x8ef   : > { %v2297_v40 = vpop.f32.mrf.mxu0  ;;  %v2306_v43 = vpop.f32.mrf.mxu1 }
 0x8f0   : > { %v1992_v0 = vadd.f32 %v1974_v28, %v1823_v41  ;;  %v2298_v55 = vadd.f32 %v2297_v40, %v2296_v12  ;;  %v2307_v60 = vadd.f32 %v2306_v43, %v2305_v29 }
 0x8f1   : > { %v2299_v39 = vpop.f32.mrf.mxu0  ;;  %v2308_v37 = vpop.f32.mrf.mxu1 }
 0x8f2   : > { %2000 = vst.msk [vmem:[#allocation4 + $0x20] sm:$0xff] %vm473_vm0, %v1992_v0  ;;  %v1966_v51 = vadd.f32 %v2298_v55, %v1740_v21  ;;  %v1977_v3 = vadd.f32 %v2307_v60, %v3393_v8 }
 0x8f3   : > { %v2300_v7 = vpop.f32.mrf.mxu0  ;;  %v2309_v15 = vpop.f32.mrf.mxu1 }
 0x8f4   : > { %v1990_v20 = vadd.f32 %v1966_v51, %v1821_v32  ;;  %v1993_v50 = vadd.f32 %v1977_v3, %v1824_v14  ;;  %v2301_v63 = vadd.f32 %v2300_v7, %v2299_v39  ;;  %v2310_v58 = vadd.f32 %v2309_v15, %v2308_v37 }
 0x8f5   : > { %v2311_v48 = vpop.f32.mrf.mxu1 }
 0x8f6   : > { %1998 = vst.msk [vmem:[#allocation4 + $0x10] sm:$0xff] %vm473_vm0, %v1990_v20  ;;  %2001 = vst.msk [vmem:[#allocation4 + $0x28] sm:$0xff] %vm473_vm0, %v1993_v50  ;;  %v1969_v61 = vadd.f32 %v2301_v63, %v1741_v47  ;;  %v1982_v21 = vadd.f32 %v2310_v58, %v1744_v44 }
 0x8f7   : > { %v2312_v8 = vpop.f32.mrf.mxu1 }
 0x8f8   : > { %v1991_v30 = vadd.f32 %v1969_v61, %v1822_v13  ;;  %v1994_v1 = vadd.f32 %v1982_v21, %v1825_v33  ;;  %v2313_v16 = vadd.f32 %v2312_v8, %v2311_v48 }
 0x8f9   : > { %v2019_v49 = vld [vmem:[#allocation4 + $0x20] sm:$0xff] }
 0x8fa   : > { %v2027_v2 = vadd.f32 %v2019_v49, %v2011_v18  ;;  %1999 = vst.msk [vmem:[#allocation4 + $0x18] sm:$0xff] %vm473_vm0, %v1991_v30  ;;  %2002 = vst.msk [vmem:[#allocation4 + $0x30] sm:$0xff] %vm473_vm0, %v1994_v1  ;;  %v1985_v27 = vadd.f32 %v2313_v16, %v3412_v35 }
 0x8fc   : > { %2035 = vst.msk [vmem:[%s3424_s27 + $0x20] sm:$0xff] %vm473_vm0, %v2027_v2  ;;  %v1995_v47 = vadd.f32 %v1985_v27, %v1826_v11 }
 0x8fd   : > { %v2017_v6 = vld [vmem:[#allocation4 + $0x10] sm:$0xff]  ;;  %v2020_v44 = vld [vmem:[#allocation4 + $0x28] sm:$0xff] }
 0x8fe   : > { %v2025_v38 = vadd.f32 %v2017_v6, %v2009_v24  ;;  %v2028_v4 = vadd.f32 %v2020_v44, %v2012_v22  ;;  %2003 = vst.msk [vmem:[#allocation4 + $0x38] sm:$0xff] %vm473_vm0, %v1995_v47 }
 0x900   : > { %2033 = vst.msk [vmem:[%s3424_s27 + $0x10] sm:$0xff] %vm473_vm0, %v2025_v38  ;;  %2036 = vst.msk [vmem:[%s3424_s27 + $0x28] sm:$0xff] %vm473_vm0, %v2028_v4 }
 0x901   : > { %v2018_v35 = vld [vmem:[#allocation4 + $0x18] sm:$0xff]  ;;  %v2021_v25 = vld [vmem:[#allocation4 + $0x30] sm:$0xff] }
 0x902   : > { %v2026_v34 = vadd.f32 %v2018_v35, %v2010_v26  ;;  %v2029_v46 = vadd.f32 %v2021_v25, %v2013_v59 }
 0x904   : > { %2034 = vst.msk [vmem:[%s3424_s27 + $0x18] sm:$0xff] %vm473_vm0, %v2026_v34  ;;  %2037 = vst.msk [vmem:[%s3424_s27 + $0x30] sm:$0xff] %vm473_vm0, %v2029_v46 }
 0x905   : > { %v2022_v10 = vld [vmem:[#allocation4 + $0x38] sm:$0xff] }
 0x906   : > { %v2030_v17 = vadd.f32 %v2022_v10, %v2014_v54 }
 0x908   : > { %2038 = vst.msk [vmem:[%s3424_s27 + $0x38] sm:$0xff] %vm473_vm0, %v2030_v17 }
 0x909 PF: > { %s21_s15 = sadd.s32 1, %s2486_s15   ;;  %s3478_s13 = smov %s2482_s14 }
 0x90a   : > { %p18_p6 = scmp.ge.s32.totalorder %s21_s15, 4   ;;  %s3479_s14 = smov %s3481_s16 }
 0x90c   :  { %20 = sbr.rel (!%p18_p6) target bundleno = 2 (0x2), region = 118 }

// kernel: moe_star_forward.9
= control target key start
LH: loop header
LB: loop body
LE: loop exit
PB: predicated region body
PF: predicated region fallthrough
CT: control target
= control target key end

     0   :  { %s5356_s27 = smov 0   ;;  %s6471_s0 = inlined_call_operand.vmem [shape: f32[16,8,32], index: 0, kind: input, shape index: {}]   ;;  %s6472_s1 = inlined_call_operand.vmem [shape: f32[1,1,32], index: 1, kind: input, shape index: {}]   ;;  %s6473_s2 = inlined_call_operand.vmem [shape: f32[1,1,32], index: 2, kind: input, shape index: {}]   ;;  %s6474_s3 = inlined_call_operand.vmem [shape: bf16[32,96], index: 3, kind: input, shape index: {}]   ;;  %s6475_s4 = inlined_call_operand.vmem [shape: f32[1,96], index: 4, kind: input, shape index: {}]   ;;  %s6476_s5 = inlined_call_operand.vmem [shape: bf16[32,32], index: 5, kind: input, shape index: {}]   ;;  %s6477_s6 = inlined_call_operand.vmem [shape: f32[1,32], index: 6, kind: input, shape index: {}]   ;;  %s6478_s7 = inlined_call_operand.vmem [shape: f32[8,8], index: 7, kind: input, shape index: {}]   ;;  %s6479_s8 = inlined_call_operand.vmem [shape: f32[16,8,32], index: 8, kind: output, shape index: {}]  }
   0x1 LB: > { %s4403_s28 = sadd.s32 4294967295, %s5293_s27   ;;  %p4407_p0 = scmp.ge.s32.totalorder %s5293_s27, 1  ;;  %s5293_s27 = sphi %s5356_s27, %s18_s27  }
   0x2   : > { %p263_p1 = scmp.lt.s32.totalorder %s5293_s27, 3 }
   0x4   : > { %p264_p2 = pnand %p4407_p0, %p263_p1 }
   0x5   : > { %s4408_s29 = sshll.u32 (!%p264_p2), %s4403_s28, 3  ;;  %s5297_s22 = smov (!%p264_p2), 96  }
   0x6   : > { %267 = sbr.rel (%p264_p2) target bundleno = 3649 (0xe41), region = 52  ;;  %p298_p3 = scmp.lt.s32.totalorder (!%p264_p2), %s4408_s29, 15 }
   0x7   : > { %s5298_s23 = smov (!%p264_p2), 64   ;;  %s5299_s26 = smov (!%p264_p2), 88  }
   0x8   : > { %s5300_s28 = smov (!%p264_p2), 120   ;;  %s5301_s9 = smov (!%p264_p2), 56  }
   0x9   : > { %s5302_s10 = smov (!%p264_p2), 80   ;;  %s5303_s12 = smov (!%p264_p2), 112  }
   0xa   : > { %s5304_s13 = smov (!%p264_p2), 48   ;;  %s5305_s16 = smov (!%p264_p2), 72  }
   0xb   : > { %s6481_s29 = smov (!%p298_p3, %s4408_s29), 15  ;;  %vm331_vm0 = vcmask 261120   ;;  %v5130_v56 = vld [vmem:[%s6474_s3 + $0x8] sm:$0xff]   ;;  %v5131_v57 = vld [vmem:[%s6474_s3] sm:$0xff]   ;;  %vm5296_vm1 = vmmov 0   ;;  %vm591_vm2 = vcmask 64512  }
   0xc   : > { %s4409_s30 = sshll.u32 %s6481_s29, 3  ;;  %4634 = vmatprep.subr.bf16.mxu0 %v5130_v56  ;;  %5042 = vmatprep.subr.bf16.mxu1 %v5130_v56  ;;  %vm1082_vm3 = vcmask 1043456   ;;  %s5306_s17 = smov 104   ;;  %vm4214_vm4 = vcmask 130048   ;;  %vm4223_vm5 = vcmask 195584  }
   0xd   : > { %s5372_s11 = scalar_lea.vmem %s6471_s0, %s4409_s30  ;;  %4635 = vmatpush3.bf16.msra.mxu0 %v5130_v56  ;;  %5044 = vmatpush3.bf16.msra.mxu1 %v5130_v56  ;;  %s5307_s18 = smov 40  }
   0xe   : > { %v310_v0 = vld [vmem:[%s5372_s11] sm:$0xff]  ;;  %v312_v1 = vld [vmem:[%s5372_s11 + $0x10] sm:$0xff]  ;;  %v311_v2 = vld [vmem:[%s5372_s11 + $0x8] sm:$0xff]  ;;  %4636 = vmatprep.subr.bf16.mxu0 %v5131_v57  ;;  %5043 = vmatprep.subr.bf16.mxu1 %v5131_v57  ;;  %s5308_s19 = smov 8   ;;  %s5309_s20 = smov 16  }
   0xf   : > { %v332_v3 = vsel %vm331_vm0, %v310_v0, 0.0  ;;  %v338_v4 = vsel %vm331_vm0, %v312_v1, 0.0  ;;  %v313_v5 = vld [vmem:[%s5372_s11 + $0x18] sm:$0xff]  ;;  %v335_v6 = vsel %vm331_vm0, %v311_v2, 0.0  ;;  %v314_v8 = vld [vmem:[%s5372_s11 + $0x20] sm:$0xff]  ;;  %v315_v9 = vld [vmem:[%s5372_s11 + $0x28] sm:$0xff] }
  0x10   : > { %333 = vadd.xlane.f32.xlu0 %v332_v3  ;;  %339 = vadd.xlane.f32.xlu1 %v338_v4  ;;  %v341_v7 = vsel %vm331_vm0, %v313_v5, 0.0  ;;  %v344_v10 = vsel %vm331_vm0, %v314_v8, 0.0  ;;  %v347_v11 = vsel %vm331_vm0, %v315_v9, 0.0  ;;  %v316_v12 = vld [vmem:[%s5372_s11 + $0x30] sm:$0xff]  ;;  %v317_v13 = vld [vmem:[%s5372_s11 + $0x38] sm:$0xff] }
  0x11   : > { %v350_v14 = vsel %vm331_vm0, %v316_v12, 0.0  ;;  %v353_v15 = vsel %vm331_vm0, %v317_v13, 0.0  ;;  %4637 = vmatpush3.bf16.msra.mxu0 %v5131_v57  ;;  %5045 = vmatpush3.bf16.msra.mxu1 %v5131_v57 }
  0x14   : > { %336 = vadd.xlane.f32.xlu0 %v335_v6  ;;  %342 = vadd.xlane.f32.xlu1 %v341_v7 }
  0x18   : > { %345 = vadd.xlane.f32.xlu0 %v344_v10  ;;  %348 = vadd.xlane.f32.xlu1 %v347_v11 }
  0x1c   : > { %351 = vadd.xlane.f32.xlu0 %v350_v14  ;;  %354 = vadd.xlane.f32.xlu1 %v353_v15 }
  0x99   : > { %v334_v16 = vpop.xlane.xlu0 %333  ;;  %v340_v17 = vpop.xlane.xlu1 %339 }
  0x9a   : > { %v357_v18 = vmul.f32 0.03125, %v334_v16  ;;  %v359_v19 = vmul.f32 0.03125, %v340_v17 }
  0x9c   : > { %v5390_v20 = vsub.f32 %v310_v0, %v357_v18  ;;  %v5392_v21 = vsub.f32 %v312_v1, %v359_v19 }
  0x9d   : > { %v337_v22 = vpop.xlane.xlu0 %336  ;;  %v343_v23 = vpop.xlane.xlu1 %342 }
  0x9e   : > { %v358_v24 = vmul.f32 0.03125, %v337_v22  ;;  %v360_v25 = vmul.f32 0.03125, %v343_v23  ;;  %v373_v26 = vmul.f32 %v5390_v20, %v5390_v20  ;;  %v375_v27 = vmul.f32 %v5392_v21, %v5392_v21  ;;  %v4412_v22 = vld [vmem:[%s6472_s1] ss:$0 sm:$0xff] }
  0xa0   : > { %v5398_v28 = vsub.f32 %v311_v2, %v358_v24  ;;  %v5400_v29 = vsub.f32 %v313_v5, %v360_v25  ;;  %v381_v30 = vsel %vm331_vm0, %v373_v26, 0.0  ;;  %v387_v33 = vsel %vm331_vm0, %v375_v27, 0.0  ;;  %v4413_v27 = vld [vmem:[%s6473_s2] ss:$0 sm:$0xff] }
  0xa1   : > { %382 = vadd.xlane.f32.xlu0 %v381_v30  ;;  %v346_v31 = vpop.xlane.xlu0 %345  ;;  %v349_v32 = vpop.xlane.xlu1 %348 }
  0xa2   : > { %v361_v34 = vmul.f32 0.03125, %v346_v31  ;;  %v362_v35 = vmul.f32 0.03125, %v349_v32  ;;  %v374_v36 = vmul.f32 %v5398_v28, %v5398_v28  ;;  %v376_v37 = vmul.f32 %v5400_v29, %v5400_v29 }
  0xa4   : > { %v5408_v38 = vsub.f32 %v314_v8, %v361_v34  ;;  %v5410_v39 = vsub.f32 %v315_v9, %v362_v35  ;;  %v384_v40 = vsel %vm331_vm0, %v374_v36, 0.0  ;;  %v390_v43 = vsel %vm331_vm0, %v376_v37, 0.0 }
  0xa5   : > { %388 = vadd.xlane.f32.xlu0 %v387_v33  ;;  %385 = vadd.xlane.f32.xlu1 %v384_v40  ;;  %v352_v41 = vpop.xlane.xlu0 %351  ;;  %v355_v42 = vpop.xlane.xlu1 %354 }
  0xa6   : > { %v363_v44 = vmul.f32 0.03125, %v352_v41  ;;  %v364_v45 = vmul.f32 0.03125, %v355_v42  ;;  %v377_v46 = vmul.f32 %v5408_v38, %v5408_v38  ;;  %v378_v47 = vmul.f32 %v5410_v39, %v5410_v39 }
  0xa8   : > { %v5418_v48 = vsub.f32 %v316_v12, %v363_v44  ;;  %v5420_v49 = vsub.f32 %v317_v13, %v364_v45  ;;  %v393_v50 = vsel %vm331_vm0, %v377_v46, 0.0  ;;  %v396_v51 = vsel %vm331_vm0, %v378_v47, 0.0 }
  0xa9   : > { %391 = vadd.xlane.f32.xlu1 %v390_v43  ;;  %394 = vadd.xlane.f32.xlu0 %v393_v50 }
  0xaa   : > { %v379_v52 = vmul.f32 %v5418_v48, %v5418_v48  ;;  %v380_v53 = vmul.f32 %v5420_v49, %v5420_v49 }
  0xac   : > { %v399_v54 = vsel %vm331_vm0, %v379_v52, 0.0  ;;  %v402_v55 = vsel %vm331_vm0, %v380_v53, 0.0 }
  0xad   : > { %397 = vadd.xlane.f32.xlu1 %v396_v51  ;;  %400 = vadd.xlane.f32.xlu0 %v399_v54 }
  0xb1   : > { %403 = vadd.xlane.f32.xlu1 %v402_v55 }
 0x12a   : > { %v383_v58 = vpop.xlane.xlu0 %382 }
 0x12b   : > { %v405_v59 = vmul.f32 0.03125, %v383_v58 }
 0x12d   : > { %v413_v60 = vadd.f32 1e-05, %v405_v59 }
 0x12e   : > { %v386_v61 = vpop.xlane.xlu1 %385  ;;  %v389_v62 = vpop.xlane.xlu0 %388 }
 0x12f   : > { %5134 = vrsqrt.f32 %v413_v60  ;;  %v406_v63 = vmul.f32 0.03125, %v386_v61  ;;  %v407_v0 = vmul.f32 0.03125, %v389_v62 }
 0x131   : > { %v414_v1 = vadd.f32 1e-05, %v406_v63  ;;  %v415_v2 = vadd.f32 1e-05, %v407_v0 }
 0x132   : > { %v392_v3 = vpop.xlane.xlu1 %391  ;;  %v395_v4 = vpop.xlane.xlu0 %394 }
 0x133   : > { %5136 = vrsqrt.f32 %v414_v1  ;;  %v408_v5 = vmul.f32 0.03125, %v392_v3  ;;  %v409_v6 = vmul.f32 0.03125, %v395_v4 }
 0x134   : > { %5138 = vrsqrt.f32 %v415_v2 }
 0x135   : > { %v416_v7 = vadd.f32 1e-05, %v408_v5  ;;  %v417_v8 = vadd.f32 1e-05, %v409_v6 }
 0x136   : > { %v398_v9 = vpop.xlane.xlu1 %397  ;;  %v401_v10 = vpop.xlane.xlu0 %400 }
 0x137   : > { %5140 = vrsqrt.f32 %v416_v7  ;;  %v410_v11 = vmul.f32 0.03125, %v398_v9  ;;  %v411_v12 = vmul.f32 0.03125, %v401_v10 }
 0x138   : > { %5142 = vrsqrt.f32 %v417_v8 }
 0x139   : > { %v418_v13 = vadd.f32 1e-05, %v410_v11  ;;  %v419_v14 = vadd.f32 1e-05, %v411_v12 }
 0x13a   : > { %v404_v15 = vpop.xlane.xlu1 %403 }
 0x13b   : > { %5144 = vrsqrt.f32 %v418_v13  ;;  %v412_v16 = vmul.f32 0.03125, %v404_v15 }
 0x13c   : > { %v5135_v17 = vpop.eup %5134  ;;  %5146 = vrsqrt.f32 %v419_v14 }
 0x13d   : > { %v420_v18 = vadd.f32 1e-05, %v412_v16  ;;  %v429_v19 = vmul.f32 %v5135_v17, %v5390_v20 }
 0x13f   : > { %5148 = vrsqrt.f32 %v420_v18  ;;  %v443_v26 = vmul.f32 %v4412_v22, %v429_v19 }
 0x140   : > { %v5137_v23 = vpop.eup %5136 }
 0x141   : > { %v5139_v24 = vpop.eup %5138  ;;  %v430_v25 = vmul.f32 %v5137_v23, %v5398_v28  ;;  %v457_v20 = vadd.f32 %v4413_v27, %v443_v26 }
 0x142   : > { %v431_v30 = vmul.f32 %v5139_v24, %v5392_v21 }
 0x143   : > { %v444_v31 = vmul.f32 %v4412_v22, %v430_v25 }
 0x144   : > { %v5141_v32 = vpop.eup %5140  ;;  %v445_v36 = vmul.f32 %v4412_v22, %v431_v30 }
 0x145   : > { %v5143_v33 = vpop.eup %5142  ;;  %v458_v34 = vadd.f32 %v4413_v27, %v444_v31  ;;  %v432_v35 = vmul.f32 %v5141_v32, %v5400_v29 }
 0x146   : > { %v433_v37 = vmul.f32 %v5143_v33, %v5408_v38  ;;  %v459_v43 = vadd.f32 %v4413_v27, %v445_v36 }
 0x147   : > { %v465_v40 = vpack.c.bf16 %v458_v34, %v457_v20  ;;  %v446_v41 = vmul.f32 %v4412_v22, %v432_v35 }
 0x148   : > { %v5145_v28 = vpop.eup %5144  ;;  %v447_v45 = vmul.f32 %v4412_v22, %v433_v37 }
 0x149   : > { %v5147_v42 = vpop.eup %5146  ;;  %4638 = vmatprep.mubr.msk.bf16.mxu0 %vm331_vm0, %v465_v40  ;;  %v460_v44 = vadd.f32 %v4413_v27, %v446_v41  ;;  %v434_v21 = vmul.f32 %v5145_v28, %v5410_v39 }
 0x14a   : > { %v435_v46 = vmul.f32 %v5147_v42, %v5418_v48  ;;  %v461_v29 = vadd.f32 %v4413_v27, %v447_v45  ;;  %v5295_v48 = vmov 0.0  }
 0x14b   : > { %v466_v47 = vpack.c.bf16 %v460_v44, %v459_v43  ;;  %v448_v50 = vmul.f32 %v4412_v22, %v434_v21  ;;  %4646 = vmatprep.subr.bf16.mxu1 %v5295_v48  ;;  %4658 = vmatprep.subr.bf16.mxu0 %v5295_v48 }
 0x14c   : > { %v5149_v51 = vpop.eup %5148  ;;  %v449_v53 = vmul.f32 %v4412_v22, %v435_v46 }
 0x14d   : > { %4639 = vmatmul.mubr.msk.bf16.vlgmr.msra.gmra.mxu0 %vm331_vm0, %v466_v47  ;;  %v462_v38 = vadd.f32 %v4413_v27, %v448_v50  ;;  %v436_v52 = vmul.f32 %v5149_v51, %v5420_v49  ;;  %v4414_v49 = vld [vmem:[%s6475_s4] ss:$0 sm:$0xff] }
 0x14e   : > { %v463_v56 = vadd.f32 %v4413_v27, %v449_v53  ;;  %4660 = vmatprep.mubr.msk.bf16.mxu0 %vm5296_vm1, %v5295_v48 }
 0x14f   : > { %v467_v54 = vpack.c.bf16 %v462_v38, %v461_v29  ;;  %v450_v55 = vmul.f32 %v4412_v22, %v436_v52 }
 0x151   : > { %4642 = vmatprep.mubr.msk.bf16.mxu1 %vm331_vm0, %v467_v54  ;;  %v464_v57 = vadd.f32 %v4413_v27, %v450_v55 }
 0x153   : > { %v468_v39 = vpack.c.bf16 %v464_v57, %v463_v56 }
 0x155   : > { %4643 = vmatmul.mubr.msk.bf16.vlgmr.msra.gmra.mxu1 %vm331_vm0, %v468_v39 }
 0x156   : > { %4648 = vmatprep.mubr.msk.bf16.mxu1 %vm5296_vm1, %v5295_v48 }
 0x20d   : > { %v4640_v58 = vpop.f32.mrf.mxu0 }
 0x20e   : > { %v542_v2 = vadd.f32 %v4640_v58, %v4414_v49 }
 0x20f   : > { %v533_v59 = vpop.f32.mrf.mxu0 }
 0x210   : > { %v534_v60 = vadd.f32 %v4414_v49, %v533_v59  ;;  %v5469_v7 = vpack.c.bf16 %v542_v2, %v542_v2  ;;  %v566_v30 = vmul.f32 0.35355338, %v542_v2 }
 0x211   : > { %v4641_v61 = vpop.f32.mrf.mxu0 }
 0x212   : > { %v5463_v62 = vpack.c.bf16 %v534_v60, %v534_v60  ;;  %v545_v8 = vadd.f32 %v4641_v61, %v4414_v49  ;;  %v564_v22 = vmul.f32 0.35355338, %v534_v60  ;;  %v5515_v20 = vpack.c.bf16 %v566_v30, %v566_v30  ;;  %v5580_v61 = vld [vmem:[%s6478_s7] sm:$0xff] }
 0x213   : > { %v536_v63 = vpop.f32.mrf.mxu0 }
 0x214   : > { %v537_v0 = vadd.f32 %v4414_v49, %v536_v63  ;;  %589 = vrot.lane.b32.xlu0 %v5463_v62, %s5297_s22  ;;  %v5477_v12 = vpack.c.bf16 %v545_v8, %v545_v8  ;;  %v5505_v24 = vpack.c.bf16 %v564_v22, %v564_v22  ;;  %v567_v40 = vmul.f32 0.35355338, %v545_v8 }
 0x215   : > { %v4644_v1 = vpop.f32.mrf.mxu1 }
 0x216   : > { %v5466_v3 = vpack.c.bf16 %v537_v0, %v537_v0  ;;  %v5471_v9 = vadd.f32 %v4644_v1, %v4414_v49  ;;  %v565_v31 = vmul.f32 0.35355338, %v537_v0  ;;  %v5531_v43 = vpack.c.bf16 %v567_v40, %v567_v40 }
 0x217   : > { %v549_v4 = vpop.f32.mrf.mxu1 }
 0x218   : > { %v550_v5 = vadd.f32 %v4414_v49, %v549_v4  ;;  %639 = vrot.lane.b32.xlu1 %v5466_v3, %s5297_s22  ;;  %v5481_v13 = vpack.c.bf16 %v5471_v9, %v5471_v9  ;;  %v5517_v34 = vpack.c.bf16 %v565_v31, %v565_v31  ;;  %v570_v47 = vmul.f32 0.35355338, %v5471_v9 }
 0x219   : > { %v4645_v6 = vpop.f32.mrf.mxu1 }
 0x21a   : > { %v5473_v10 = vpack.c.bf16 %v550_v5, %v550_v5  ;;  %v5485_v15 = vadd.f32 %v4645_v6, %v4414_v49  ;;  %v568_v41 = vmul.f32 0.35355338, %v550_v5  ;;  %v5550_v29 = vpack.c.bf16 %v570_v47, %v570_v47 }
 0x21b   : > { %v552_v11 = vpop.f32.mrf.mxu1 }
 0x21c   : > { %688 = vrot.lane.b32.xlu1 %v5469_v7, %s5297_s22  ;;  %786 = vrot.lane.b32.xlu0 %v5473_v10, %s5297_s22  ;;  %v553_v14 = vadd.f32 %v4414_v49, %v552_v11  ;;  %v5494_v17 = vpack.c.bf16 %v5485_v15, %v5485_v15  ;;  %v5533_v44 = vpack.c.bf16 %v568_v41, %v568_v41  ;;  %v571_v55 = vmul.f32 0.35355338, %v5485_v15 }
 0x21e   : > { %v5487_v16 = vpack.c.bf16 %v553_v14, %v553_v14  ;;  %v569_v50 = vmul.f32 0.35355338, %v553_v14  ;;  %v5569_v57 = vpack.c.bf16 %v571_v55, %v571_v55 }
 0x220   : > { %737 = vrot.lane.b32.xlu1 %v5477_v12, %s5297_s22  ;;  %884 = vrot.lane.b32.xlu0 %v5481_v13, %s5297_s22  ;;  %v5552_v38 = vpack.c.bf16 %v569_v50, %v569_v50 }
 0x224   : > { %835 = vrot.lane.b32.xlu1 %v5487_v16, %s5297_s22  ;;  %1077 = vrot.lane.b32.xlu0 %v5463_v62, %s5298_s23 }
 0x228   : > { %933 = vrot.lane.b32.xlu1 %v5494_v17, %s5297_s22 }
 0x22c   : > { %1174 = vrot.lane.b32.xlu1 %v5469_v7, %s5298_s23 }
 0x230   : > { %1222 = vrot.lane.b32.xlu1 %v5477_v12, %s5298_s23 }
 0x234   : > { %1126 = vrot.lane.b32.xlu1 %v5466_v3, %s5298_s23 }
 0x286   : > { %v590_v18 = vpop.permute.xlu0 %589 }
 0x287   : > { %v596_v19 = vsel %vm591_vm2, %v590_v18, 0 }
 0x288   : > { %4647 = vmatpush3.bf16.xpose.msra.mxu1 %v596_v19 }
 0x289   : > { %4652 = vmatprep.subr.bf16.mxu1 %v5295_v48 }
 0x28a   : > { %v640_v23 = vpop.permute.xlu1 %639 }
 0x28b   : > { %v645_v26 = vsel %vm591_vm2, %v640_v23, 0 }
 0x28e   : > { %v689_v25 = vpop.permute.xlu1 %688  ;;  %v787_v33 = vpop.permute.xlu0 %786 }
 0x28f   : > { %v694_v27 = vsel %vm591_vm2, %v689_v25, 0  ;;  %4649 = vmatmul.mubr.msk.bf16.vlgmr.msra.gmra.mxu1 %vm591_vm2, %v5505_v24  ;;  %v792_v36 = vsel %vm591_vm2, %v787_v33, 0 }
 0x290   : > { %4653 = vmatpush3.bf16.xpose.msra.mxu1 %v645_v26  ;;  %4659 = vmatpush3.bf16.xpose.msra.mxu0 %v694_v27 }
 0x291   : > { %4654 = vmatprep.mubr.msk.bf16.mxu1 %vm5296_vm1, %v5295_v48  ;;  %4664 = vmatprep.subr.bf16.mxu1 %v5295_v48 }
 0x292   : > { %v738_v32 = vpop.permute.xlu1 %737  ;;  %4670 = vmatprep.subr.bf16.mxu0 %v5295_v48  ;;  %v885_v42 = vpop.permute.xlu0 %884 }
 0x293   : > { %v743_v37 = vsel %vm591_vm2, %v738_v32, 0  ;;  %v890_v21 = vsel %vm591_vm2, %v885_v42, 0 }
 0x296   : > { %v836_v35 = vpop.permute.xlu1 %835  ;;  %v1078_v51 = vpop.permute.xlu0 %1077 }
 0x297   : > { %4655 = vmatmul.mubr.msk.bf16.vlgmr.msra.gmra.mxu1 %vm591_vm2, %v5517_v34  ;;  %4661 = vmatmul.mubr.msk.bf16.vlgmr.msra.gmra.mxu0 %vm591_vm2, %v5515_v20  ;;  %v841_v45 = vsel %vm591_vm2, %v836_v35, 0  ;;  %v1084_v53 = vsel %vm1082_vm3, %v1078_v51, 0 }
 0x298   : > { %4665 = vmatpush3.bf16.xpose.msra.mxu1 %v743_v37  ;;  %4671 = vmatpush3.bf16.xpose.msra.mxu0 %v792_v36 }
 0x299   : > { %4672 = vmatprep.mubr.msk.bf16.mxu0 %vm5296_vm1, %v5295_v48  ;;  %4666 = vmatprep.mubr.msk.bf16.mxu1 %vm5296_vm1, %v5295_v48 }
 0x29a   : > { %v934_v28 = vpop.permute.xlu1 %933  ;;  %4676 = vmatprep.subr.bf16.mxu1 %v5295_v48  ;;  %4682 = vmatprep.subr.bf16.mxu0 %v5295_v48 }
 0x29b   : > { %v939_v54 = vsel %vm591_vm2, %v934_v28, 0 }
 0x29e   : > { %v5541_v46 = vpop.permute.xlu1 %1174 }
 0x29f   : > { %4667 = vmatmul.mubr.msk.bf16.vlgmr.msra.gmra.mxu1 %vm591_vm2, %v5531_v43  ;;  %4673 = vmatmul.mubr.msk.bf16.vlgmr.msra.gmra.mxu0 %vm591_vm2, %v5533_v44 }
 0x2a0   : > { %4677 = vmatpush3.bf16.xpose.msra.mxu1 %v841_v45  ;;  %4683 = vmatpush3.bf16.xpose.msra.mxu0 %v890_v21 }
 0x2a1   : > { %4678 = vmatprep.mubr.msk.bf16.mxu1 %vm5296_vm1, %v5295_v48  ;;  %4684 = vmatprep.mubr.msk.bf16.mxu0 %vm5296_vm1, %v5295_v48 }
 0x2a2   : > { %4688 = vmatprep.subr.bf16.mxu1 %v5295_v48  ;;  %4694 = vmatprep.subr.bf16.mxu0 %v5295_v48  ;;  %v5554_v52 = vpop.permute.xlu1 %1222 }
 0x2a6   : > { %v1127_v56 = vpop.permute.xlu1 %1126 }
 0x2a7   : > { %4679 = vmatmul.mubr.msk.bf16.vlgmr.msra.gmra.mxu1 %vm591_vm2, %v5552_v38  ;;  %4685 = vmatmul.mubr.msk.bf16.vlgmr.msra.gmra.mxu0 %vm591_vm2, %v5550_v29  ;;  %v1132_v39 = vsel %vm1082_vm3, %v1127_v56, 0 }
 0x2a8   : > { %4689 = vmatpush3.bf16.xpose.msra.mxu1 %v939_v54  ;;  %4695 = vmatpush3.bf16.msra.mxu0 %v1084_v53 }
 0x2a9   : > { %4690 = vmatprep.mubr.msk.bf16.mxu1 %vm5296_vm1, %v5295_v48  ;;  %4700 = vmatprep.subr.bf16.mxu1 %v5295_v48 }
 0x2aa   : > { %4696 = vmatprep.mubr.msk.bf16.mxu0 %vm5296_vm1, %v5295_v48  ;;  %4706 = vmatprep.subr.bf16.mxu0 %v5295_v48 }
 0x2af   : > { %4691 = vmatmul.mubr.msk.bf16.vlgmr.msra.gmra.mxu1 %vm591_vm2, %v5569_v57 }
 0x2b0   : > { %4701 = vmatpush3.bf16.msra.mxu1 %v1132_v39  ;;  %4702 = vmatprep.mubr.msk.bf16.mxu1 %vm5296_vm1, %v5295_v48 }
 0x2b1   : > { %4712 = vmatprep.subr.bf16.mxu1 %v5295_v48 }
 0x34f   : > { %v632_v58 = vpop.f32.mrf.mxu1 }
 0x350   : > { %v633_v6 = vadd.f32 %v632_v58, %v5580_v61 }
 0x351   : > { %v4650_v49 = vpop.f32.mrf.mxu1 }
 0x352   : > { %v981_v19 = vsel %vm591_vm2, %v633_v6, -inf }
 0x353   : > { %v635_v59 = vpop.f32.mrf.mxu1 }
 0x355   : > { %v4651_v60 = vpop.f32.mrf.mxu1 }
 0x357   : > { %v681_v63 = vpop.f32.mrf.mxu1  ;;  %v730_v0 = vpop.f32.mrf.mxu0 }
 0x358   : > { %v682_v1 = vadd.f32 %v681_v63, %v5580_v61  ;;  %v731_v2 = vadd.f32 %v730_v0, %v5580_v61 }
 0x359   : > { %v4656_v4 = vpop.f32.mrf.mxu1  ;;  %v4662_v5 = vpop.f32.mrf.mxu0 }
 0x35a   : > { %v987_v8 = vsel %vm591_vm2, %v731_v2, -inf  ;;  %v984_v9 = vsel %vm591_vm2, %v682_v1, -inf }
 0x35b   : > { %v733_v11 = vpop.f32.mrf.mxu0  ;;  %988 = vmax.xlane.f32.xlu0 %v987_v8  ;;  %985 = vmax.xlane.f32.xlu1 %v984_v9  ;;  %v684_v14 = vpop.f32.mrf.mxu1 }
 0x35d   : > { %v4657_v15 = vpop.f32.mrf.mxu1  ;;  %v4663_v18 = vpop.f32.mrf.mxu0 }
 0x35f   : > { %982 = vmax.xlane.f32.xlu0 %v981_v19  ;;  %v779_v22 = vpop.f32.mrf.mxu1  ;;  %v828_v23 = vpop.f32.mrf.mxu0 }
 0x360   : > { %v829_v25 = vadd.f32 %v828_v23, %v5580_v61  ;;  %v780_v42 = vadd.f32 %v779_v22, %v5580_v61 }
 0x361   : > { %v4668_v26 = vpop.f32.mrf.mxu1  ;;  %v4674_v27 = vpop.f32.mrf.mxu0 }
 0x362   : > { %v993_v30 = vsel %vm591_vm2, %v829_v25, -inf  ;;  %v990_v53 = vsel %vm591_vm2, %v780_v42, -inf }
 0x363   : > { %v782_v31 = vpop.f32.mrf.mxu1  ;;  %994 = vmax.xlane.f32.xlu0 %v993_v30  ;;  %v831_v32 = vpop.f32.mrf.mxu0 }
 0x365   : > { %v4669_v33 = vpop.f32.mrf.mxu1  ;;  %v4675_v35 = vpop.f32.mrf.mxu0 }
 0x367   : > { %v877_v36 = vpop.f32.mrf.mxu1  ;;  %v926_v37 = vpop.f32.mrf.mxu0 }
 0x368   : > { %v5591_v40 = vadd.f32 %v926_v37, %v5580_v61  ;;  %v878_v58 = vadd.f32 %v877_v36, %v5580_v61 }
 0x369   : > { %v4680_v41 = vpop.f32.mrf.mxu1  ;;  %v4686_v28 = vpop.f32.mrf.mxu0 }
 0x36a   : > { %v999_v21 = vsel %vm591_vm2, %v5591_v40, -inf  ;;  %v996_v59 = vsel %vm591_vm2, %v878_v58, -inf }
 0x36b   : > { %v880_v45 = vpop.f32.mrf.mxu1  ;;  %1000 = vmax.xlane.f32.xlu0 %v999_v21  ;;  %v929_v47 = vpop.f32.mrf.mxu0 }
 0x36c   : > { %1318 = vrot.lane.b32.xlu1 %v5487_v16, %s5298_s23 }
 0x36d   : > { %v4681_v50 = vpop.f32.mrf.mxu1  ;;  %v4687_v51 = vpop.f32.mrf.mxu0 }
 0x36f   : > { %v975_v54 = vpop.f32.mrf.mxu1  ;;  %991 = vmax.xlane.f32.xlu0 %v990_v53 }
 0x370   : > { %v976_v49 = vadd.f32 %v975_v54, %v5580_v61 }
 0x371   : > { %v4692_v55 = vpop.f32.mrf.mxu1 }
 0x372   : > { %v1002_v60 = vsel %vm591_vm2, %v976_v49, -inf }
 0x373   : > { %v978_v56 = vpop.f32.mrf.mxu1 }
 0x375   : > { %v4693_v39 = vpop.f32.mrf.mxu1 }
 0x385   : > { %1270 = vrot.lane.b32.xlu0 %v5473_v10, %s5298_s23 }
 0x390   : > { %997 = vmax.xlane.f32.xlu1 %v996_v59 }
 0x394   : > { %1003 = vmax.xlane.f32.xlu1 %v1002_v60 }
 0x3a5   : > { %1414 = vrot.lane.b32.xlu1 %v5494_v17, %s5298_s23 }
 0x3e4   : > { %v986_v63 = vpop.xlane.xlu1 %985  ;;  %v989_v0 = vpop.xlane.xlu0 %988 }
 0x3e5   : > { %v1006_v4 = vsub.f32 %v682_v1, %v986_v63  ;;  %v1007_v5 = vsub.f32 %v731_v2, %v989_v0 }
 0x3e7   : > { %v1015_v8 = vmul.f32 1.442695, %v1006_v4  ;;  %v1017_v9 = vmul.f32 1.442695, %v1007_v5 }
 0x3e8   : > { %v983_v11 = vpop.xlane.xlu0 %982  ;;  %v5627_v41 = vpop.permute.xlu1 %1318 }
 0x3e9   : > { %5150 = vpow2.f32 %v1015_v8  ;;  %v1005_v14 = vsub.f32 %v633_v6, %v983_v11 }
 0x3ea   : > { %5152 = vpow2.f32 %v1017_v9 }
 0x3eb   : > { %v1013_v15 = vmul.f32 1.442695, %v1005_v14  ;;  %v1228_v14 = vsel %vm1082_vm3, %v5554_v52, 0  ;;  %v1180_v52 = vsel %vm1082_vm3, %v5541_v46, 0 }
 0x3ec   : > { %v995_v18 = vpop.xlane.xlu0 %994 }
 0x3ed   : > { %5154 = vpow2.f32 %v1013_v15  ;;  %v1009_v19 = vsub.f32 %v829_v25, %v995_v18 }
 0x3ef   : > { %v1021_v22 = vmul.f32 1.442695, %v1009_v19 }
 0x3f1   : > { %5156 = vpow2.f32 %v1021_v22 }
 0x3f4   : > { %v1001_v23 = vpop.xlane.xlu0 %1000 }
 0x3f5   : > { %v1011_v45 = vsub.f32 %v5591_v40, %v1001_v23 }
 0x3f6   : > { %v5607_v26 = vpop.eup %5150 }
 0x3f7   : > { %v5609_v27 = vpop.eup %5152  ;;  %v1032_v1 = vsel %vm591_vm2, %v5607_v26, 0.0  ;;  %v1025_v47 = vmul.f32 1.442695, %v1011_v45 }
 0x3f8   : > { %1033 = vadd.xlane.f32.xlu1 %v1032_v1  ;;  %v1035_v2 = vsel %vm591_vm2, %v5609_v27, 0.0  ;;  %v992_v6 = vpop.xlane.xlu0 %991 }
 0x3f9   : > { %1036 = vadd.xlane.f32.xlu0 %v1035_v2  ;;  %v1008_v30 = vsub.f32 %v780_v42, %v992_v6 }
 0x3fa   : > { %v5615_v31 = vpop.eup %5154 }
 0x3fb   : > { %v1019_v25 = vmul.f32 1.442695, %v1008_v30  ;;  %v1029_v32 = vsel %vm591_vm2, %v5615_v31, 0.0 }
 0x3fc   : > { %v1271_v59 = vpop.permute.xlu0 %1270 }
 0x3fd   : > { %5158 = vpow2.f32 %v1019_v25  ;;  %1030 = vadd.xlane.f32.xlu0 %v1029_v32  ;;  %v1276_v2 = vsel %vm1082_vm3, %v1271_v59, 0  ;;  %v1324_v32 = vsel %vm1082_vm3, %v5627_v41, 0 }
 0x3fe   : > { %v5619_v33 = vpop.eup %5156 }
 0x3ff   : > { %v1041_v35 = vsel %vm591_vm2, %v5619_v33, 0.0 }
 0x401   : > { %1042 = vadd.xlane.f32.xlu0 %v1041_v35 }
 0x40a   : > { %v5623_v36 = vpop.eup %5158 }
 0x40b   : > { %v1038_v37 = vsel %vm591_vm2, %v5623_v36, 0.0 }
 0x40c   : > { %1039 = vadd.xlane.f32.xlu1 %v1038_v37 }
 0x417   : > { %1366 = vrot.lane.b32.xlu0 %v5481_v13, %s5298_s23  ;;  %s5310_s23 = smov 24  }
 0x419   : > { %v998_v28 = vpop.xlane.xlu1 %997 }
 0x41a   : > { %v1010_v42 = vsub.f32 %v878_v58, %v998_v28 }
 0x41c   : > { %v1023_v21 = vmul.f32 1.442695, %v1010_v42 }
 0x41d   : > { %v1004_v40 = vpop.xlane.xlu1 %1003 }
 0x41e   : > { %5160 = vpow2.f32 %v1023_v21  ;;  %v1012_v55 = vsub.f32 %v976_v49, %v1004_v40 }
 0x41f   : > { %5162 = vpow2.f32 %v1025_v47 }
 0x420   : > { %v1027_v56 = vmul.f32 1.442695, %v1012_v55 }
 0x421   : > { %v5664_v49 = vpop.permute.xlu1 %1414 }
 0x422   : > { %5164 = vpow2.f32 %v1027_v56  ;;  %v1420_v45 = vsel %vm1082_vm3, %v5664_v49, 0 }
 0x42b   : > { %v5632_v50 = vpop.eup %5160 }
 0x42c   : > { %v1044_v51 = vsel %vm591_vm2, %v5632_v50, 0.0  ;;  %v5636_v53 = vpop.eup %5162 }
 0x42d   : > { %1045 = vadd.xlane.f32.xlu1 %v1044_v51  ;;  %v1047_v54 = vsel %vm591_vm2, %v5636_v53, 0.0 }
 0x42f   : > { %v5650_v39 = vpop.eup %5164 }
 0x430   : > { %v1050_v58 = vsel %vm591_vm2, %v5650_v39, 0.0 }
 0x436   : > { %1048 = vadd.xlane.f32.xlu0 %v1047_v54 }
 0x43e   : > { %1516 = vrot.lane.b32.xlu1 %v5466_v3, %s5299_s26 }
 0x44c   : > { %1465 = vrot.lane.b32.xlu0 %v5463_v62, %s5299_s26 }
 0x450   : > { %1463 = vrot.lane.b32.xlu0 %v5505_v24, %s5300_s28 }
 0x454   : > { %1567 = vrot.lane.b32.xlu0 %v5469_v7, %s5299_s26 }
 0x458   : > { %1565 = vrot.lane.b32.xlu0 %v5515_v20, %s5300_s28 }
 0x45c   : > { %1669 = vrot.lane.b32.xlu0 %v5473_v10, %s5299_s26 }
 0x460   : > { %1667 = vrot.lane.b32.xlu0 %v5533_v44, %s5300_s28 }
 0x462   : > { %1051 = vadd.xlane.f32.xlu1 %v1050_v58 }
 0x464   : > { %1771 = vrot.lane.b32.xlu0 %v5481_v13, %s5299_s26 }
 0x468   : > { %1769 = vrot.lane.b32.xlu0 %v5550_v29, %s5300_s28 }
 0x46c   : > { %1966 = vrot.lane.b32.xlu0 %v5463_v62, %s5301_s9 }
 0x473   : > { %1514 = vrot.lane.b32.xlu1 %v5517_v34, %s5300_s28 }
 0x477   : > { %1618 = vrot.lane.b32.xlu1 %v5477_v12, %s5299_s26 }
 0x47b   : > { %1616 = vrot.lane.b32.xlu1 %v5531_v43, %s5300_s28 }
 0x47f   : > { %1720 = vrot.lane.b32.xlu1 %v5487_v16, %s5299_s26 }
 0x481   : > { %v1034_v60 = vpop.xlane.xlu1 %1033 }
 0x482   : > { %5166 = vrcp.f32 %v1034_v60  ;;  %v1037_v63 = vpop.xlane.xlu0 %1036 }
 0x483   : > { %1718 = vrot.lane.b32.xlu1 %v5552_v38, %s5300_s28 }
 0x486   : > { %v1031_v0 = vpop.xlane.xlu0 %1030 }
 0x487   : > { %5168 = vrcp.f32 %v1031_v0  ;;  %1822 = vrot.lane.b32.xlu1 %v5494_v17, %s5299_s26 }
 0x488   : > { %5170 = vrcp.f32 %v1037_v63 }
 0x48a   : > { %v1043_v5 = vpop.xlane.xlu0 %1042 }
 0x48b   : > { %1820 = vrot.lane.b32.xlu1 %v5569_v57, %s5300_s28  ;;  %5172 = vrcp.f32 %v1043_v5 }
 0x48f   : > { %v5167_v4 = vpop.eup %5166  ;;  %2014 = vrot.lane.b32.xlu1 %v5466_v3, %s5301_s9 }
 0x490   : > { %v1062_v8 = vmul.f32 %v5167_v4, %v5607_v26 }
 0x492   : > { %v1070_v9 = vpack.c.bf16 %v1062_v8, %v1062_v8 }
 0x493   : > { %2062 = vrot.lane.b32.xlu1 %v5469_v7, %s5301_s9 }
 0x494   : > { %v5169_v11 = vpop.eup %5168  ;;  %4703 = vmatmul.mubr.msk.bf16.vlgmr.msra.gmra.mxu1 %vm591_vm2, %v1070_v9 }
 0x495   : > { %4713 = vmatpush3.bf16.msra.mxu1 %v1228_v14  ;;  %v1040_v15 = vpop.xlane.xlu1 %1039  ;;  %v1061_v18 = vmul.f32 %v5169_v11, %v5615_v31  ;;  %4714 = vmatprep.mubr.msk.bf16.mxu1 %vm5296_vm1, %v5295_v48  ;;  %v5171_v22 = vpop.eup %5170 }
 0x496   : > { %5174 = vrcp.f32 %v1040_v15  ;;  %4724 = vmatprep.subr.bf16.mxu1 %v5295_v48  ;;  %v1063_v23 = vmul.f32 %v5171_v22, %v5609_v27  ;;  %v1367_v31 = vpop.permute.xlu0 %1366 }
 0x497   : > { %2110 = vrot.lane.b32.xlu1 %v5477_v12, %s5301_s9  ;;  %v1069_v19 = vpack.c.bf16 %v1061_v18, %v1061_v18  ;;  %v1372_v35 = vsel %vm1082_vm3, %v1367_v31, 0 }
 0x498   : > { %v1071_v26 = vpack.c.bf16 %v1063_v23, %v1063_v23  ;;  %v5173_v1 = vpop.eup %5172 }
 0x499   : > { %4697 = vmatmul.mubr.msk.bf16.vlgmr.msra.gmra.mxu0 %vm591_vm2, %v1069_v19  ;;  %v1065_v6 = vmul.f32 %v5173_v1, %v5619_v33 }
 0x49a   : > { %4707 = vmatpush3.bf16.msra.mxu0 %v1180_v52  ;;  %4708 = vmatprep.mubr.msk.bf16.mxu0 %vm5296_vm1, %v5295_v48 }
 0x49b   : > { %4718 = vmatprep.subr.bf16.mxu0 %v5295_v48  ;;  %v1073_v27 = vpack.c.bf16 %v1065_v6, %v1065_v6 }
 0x4a1   : > { %4709 = vmatmul.mubr.msk.bf16.vlgmr.msra.gmra.mxu0 %vm591_vm2, %v1071_v26 }
 0x4a2   : > { %4719 = vmatpush3.bf16.msra.mxu0 %v1276_v2  ;;  %4720 = vmatprep.mubr.msk.bf16.mxu0 %vm5296_vm1, %v5295_v48 }
 0x4a3   : > { %v5175_v46 = vpop.eup %5174  ;;  %4730 = vmatprep.subr.bf16.mxu0 %v5295_v48 }
 0x4a4   : > { %v1064_v30 = vmul.f32 %v5175_v46, %v5623_v36 }
 0x4a6   : > { %v1072_v25 = vpack.c.bf16 %v1064_v30, %v1064_v30 }
 0x4a8   : > { %4715 = vmatmul.mubr.msk.bf16.vlgmr.msra.gmra.mxu1 %vm591_vm2, %v1072_v25 }
 0x4a9   : > { %4721 = vmatmul.mubr.msk.bf16.vlgmr.msra.gmra.mxu0 %vm591_vm2, %v1073_v27  ;;  %4725 = vmatpush3.bf16.msra.mxu1 %v1324_v32 }
 0x4aa   : > { %4731 = vmatpush3.bf16.msra.mxu0 %v1372_v35  ;;  %4726 = vmatprep.mubr.msk.bf16.mxu1 %vm5296_vm1, %v5295_v48 }
 0x4ab   : > { %4736 = vmatprep.subr.bf16.mxu1 %v5295_v48  ;;  %4732 = vmatprep.mubr.msk.bf16.mxu0 %vm5296_vm1, %v5295_v48 }
 0x4ac   : > { %4742 = vmatprep.subr.bf16.mxu0 %v5295_v48 }
 0x4b6   : > { %v1046_v33 = vpop.xlane.xlu1 %1045 }
 0x4b7   : > { %5176 = vrcp.f32 %v1046_v33 }
 0x4ba   : > { %v1517_v60 = vpop.permute.xlu1 %1516 }
 0x4bb   : > { %v1522_v22 = vsel %vm591_vm2, %v1517_v60, 0 }
 0x4bf   : > { %v1049_v36 = vpop.xlane.xlu0 %1048 }
 0x4c0   : > { %5178 = vrcp.f32 %v1049_v36 }
 0x4c3   : > { %v1466_v37 = vpop.permute.xlu0 %1465 }
 0x4c4   : > { %v5177_v41 = vpop.eup %5176 }
 0x4c5   : > { %v1066_v28 = vmul.f32 %v5177_v41, %v5632_v50  ;;  %v1471_v50 = vsel %vm591_vm2, %v1466_v37, 0 }
 0x4c7   : > { %v1464_v42 = vpop.permute.xlu0 %1463  ;;  %v1074_v21 = vpack.c.bf16 %v1066_v28, %v1066_v28 }
 0x4c9   : > { %4727 = vmatmul.mubr.msk.bf16.vlgmr.msra.gmra.mxu1 %vm591_vm2, %v1074_v21 }
 0x4ca   : > { %4737 = vmatpush3.bf16.msra.mxu1 %v1420_v45  ;;  %4738 = vmatprep.mubr.msk.bf16.mxu1 %vm5296_vm1, %v5295_v48 }
 0x4cb   : > { %v1568_v47 = vpop.permute.xlu0 %1567  ;;  %4748 = vmatprep.subr.bf16.mxu1 %v5295_v48 }
 0x4cc   : > { %v1573_v58 = vsel %vm591_vm2, %v1568_v47, 0 }
 0x4cd   : > { %v5179_v51 = vpop.eup %5178 }
 0x4ce   : > { %v1067_v54 = vmul.f32 %v5179_v51, %v5636_v53 }
 0x4cf   : > { %v1566_v55 = vpop.permute.xlu0 %1565 }
 0x4d0   : > { %v1075_v40 = vpack.c.bf16 %v1067_v54, %v1067_v54 }
 0x4d2   : > { %4733 = vmatmul.mubr.msk.bf16.vlgmr.msra.gmra.mxu0 %vm591_vm2, %v1075_v40 }
 0x4d3   : > { %4743 = vmatpush3.bf16.xpose.msra.mxu0 %v1471_v50  ;;  %4744 = vmatprep.mubr.msk.bf16.mxu0 %vm5296_vm1, %v5295_v48  ;;  %v1670_v56 = vpop.permute.xlu0 %1669 }
 0x4d4   : > { %4754 = vmatprep.subr.bf16.mxu0 %v5295_v48  ;;  %v1675_v49 = vsel %vm591_vm2, %v1670_v56, 0 }
 0x4d7   : > { %v1668_v53 = vpop.permute.xlu0 %1667 }
 0x4da   : > { %4745 = vmatmul.mubr.msk.bf16.vlgmr.msra.gmra.mxu0 %vm591_vm2, %v1464_v42 }
 0x4db   : > { %4755 = vmatpush3.bf16.xpose.msra.mxu0 %v1573_v58  ;;  %4756 = vmatprep.mubr.msk.bf16.mxu0 %vm5296_vm1, %v5295_v48  ;;  %v1772_v59 = vpop.permute.xlu0 %1771 }
 0x4dc   : > { %4766 = vmatprep.subr.bf16.mxu0 %v5295_v48  ;;  %v1777_v0 = vsel %vm591_vm2, %v1772_v59, 0 }
 0x4df   : > { %v1770_v63 = vpop.permute.xlu0 %1769 }
 0x4e2   : > { %4757 = vmatmul.mubr.msk.bf16.vlgmr.msra.gmra.mxu0 %vm591_vm2, %v1566_v55 }
 0x4e3   : > { %4767 = vmatpush3.bf16.xpose.msra.mxu0 %v1675_v49  ;;  %4768 = vmatprep.mubr.msk.bf16.mxu0 %vm5296_vm1, %v5295_v48  ;;  %v1967_v5 = vpop.permute.xlu0 %1966 }
 0x4e4   : > { %4778 = vmatprep.subr.bf16.mxu0 %v5295_v48  ;;  %v1972_v9 = vsel %vm1082_vm3, %v1967_v5, 0 }
 0x4ea   : > { %4769 = vmatmul.mubr.msk.bf16.vlgmr.msra.gmra.mxu0 %vm591_vm2, %v1668_v53 }
 0x4eb   : > { %4779 = vmatpush3.bf16.xpose.msra.mxu0 %v1777_v0  ;;  %v1052_v4 = vpop.xlane.xlu1 %1051  ;;  %4780 = vmatprep.mubr.msk.bf16.mxu0 %vm5296_vm1, %v5295_v48 }
 0x4ec   : > { %5180 = vrcp.f32 %v1052_v4  ;;  %4790 = vmatprep.subr.bf16.mxu0 %v5295_v48 }
 0x4ef   : > { %v1515_v8 = vpop.permute.xlu1 %1514 }
 0x4f2   : > { %4781 = vmatmul.mubr.msk.bf16.vlgmr.msra.gmra.mxu0 %vm591_vm2, %v1770_v63 }
 0x4f3   : > { %4791 = vmatpush3.bf16.msra.mxu0 %v1972_v9  ;;  %4792 = vmatprep.mubr.msk.bf16.mxu0 %vm5296_vm1, %v5295_v48  ;;  %v1619_v11 = vpop.permute.xlu1 %1618 }
 0x4f4   : > { %4802 = vmatprep.subr.bf16.mxu0 %v5295_v48  ;;  %v1624_v23 = vsel %vm591_vm2, %v1619_v11, 0 }
 0x4f7   : > { %v1617_v19 = vpop.permute.xlu1 %1616 }
 0x4f9   : > { %v5181_v14 = vpop.eup %5180 }
 0x4fa   : > { %v1068_v15 = vmul.f32 %v5181_v14, %v5650_v39 }
 0x4fb   : > { %v1721_v52 = vpop.permute.xlu1 %1720 }
 0x4fc   : > { %v1076_v18 = vpack.c.bf16 %v1068_v15, %v1068_v15  ;;  %v1726_v26 = vsel %vm591_vm2, %v1721_v52, 0 }
 0x4fe   : > { %4739 = vmatmul.mubr.msk.bf16.vlgmr.msra.gmra.mxu1 %vm591_vm2, %v1076_v18 }
 0x4ff   : > { %4749 = vmatpush3.bf16.xpose.msra.mxu1 %v1522_v22  ;;  %4750 = vmatprep.mubr.msk.bf16.mxu1 %vm5296_vm1, %v5295_v48  ;;  %v1719_v39 = vpop.permute.xlu1 %1718 }
 0x500   : > { %4760 = vmatprep.subr.bf16.mxu1 %v5295_v48 }
 0x503   : > { %v1823_v1 = vpop.permute.xlu1 %1822 }
 0x504   : > { %v1828_v46 = vsel %vm591_vm2, %v1823_v1, 0 }
 0x506   : > { %4751 = vmatmul.mubr.msk.bf16.vlgmr.msra.gmra.mxu1 %vm591_vm2, %v1515_v8 }
 0x507   : > { %4761 = vmatpush3.bf16.xpose.msra.mxu1 %v1624_v23  ;;  %4762 = vmatprep.mubr.msk.bf16.mxu1 %vm5296_vm1, %v5295_v48  ;;  %v1821_v2 = vpop.permute.xlu1 %1820 }
 0x508   : > { %4772 = vmatprep.subr.bf16.mxu1 %v5295_v48 }
 0x50b   : > { %v2015_v6 = vpop.permute.xlu1 %2014 }
 0x50c   : > { %v2020_v30 = vsel %vm1082_vm3, %v2015_v6, 0 }
 0x50e   : > { %4763 = vmatmul.mubr.msk.bf16.vlgmr.msra.gmra.mxu1 %vm591_vm2, %v1617_v19 }
 0x50f   : > { %4773 = vmatpush3.bf16.xpose.msra.mxu1 %v1726_v26  ;;  %4774 = vmatprep.mubr.msk.bf16.mxu1 %vm5296_vm1, %v5295_v48 }
 0x510   : > { %4784 = vmatprep.subr.bf16.mxu1 %v5295_v48 }
 0x516   : > { %4775 = vmatmul.mubr.msk.bf16.vlgmr.msra.gmra.mxu1 %vm591_vm2, %v1719_v39 }
 0x517   : > { %4785 = vmatpush3.bf16.xpose.msra.mxu1 %v1828_v46  ;;  %4786 = vmatprep.mubr.msk.bf16.mxu1 %vm5296_vm1, %v5295_v48 }
 0x518   : > { %4796 = vmatprep.subr.bf16.mxu1 %v5295_v48 }
 0x51e   : > { %4787 = vmatmul.mubr.msk.bf16.vlgmr.msra.gmra.mxu1 %vm591_vm2, %v1821_v2 }
 0x51f   : > { %4797 = vmatpush3.bf16.msra.mxu1 %v2020_v30  ;;  %4798 = vmatprep.mubr.msk.bf16.mxu1 %vm5296_vm1, %v5295_v48 }
 0x520   : > { %4808 = vmatprep.subr.bf16.mxu1 %v5295_v48 }
 0x554   : > { %v5770_v31 = vpop.f32.mrf.mxu1 }
 0x556   : > { %v4704_v25 = vpop.f32.mrf.mxu1 }
 0x558   : > { %v1171_v27 = vpop.f32.mrf.mxu1 }
 0x559   : > { %v5772_v32 = vpop.f32.mrf.mxu0 }
 0x55a   : > { %v4705_v35 = vpop.f32.mrf.mxu1 }
 0x55b   : > { %v4698_v33 = vpop.f32.mrf.mxu0 }
 0x55d   : > { %v1123_v36 = vpop.f32.mrf.mxu0 }
 0x55f   : > { %v4699_v37 = vpop.f32.mrf.mxu0 }
 0x561   : > { %v5774_v41 = vpop.f32.mrf.mxu0 }
 0x563   : > { %v4710_v28 = vpop.f32.mrf.mxu0 }
 0x565   : > { %v1219_v42 = vpop.f32.mrf.mxu0 }
 0x567   : > { %v4711_v21 = vpop.f32.mrf.mxu0 }
 0x568   : > { %v5776_v45 = vpop.f32.mrf.mxu1 }
 0x569   : > { %v5778_v47 = vpop.f32.mrf.mxu0 }
 0x56a   : > { %v4716_v51 = vpop.f32.mrf.mxu1 }
 0x56b   : > { %v4722_v54 = vpop.f32.mrf.mxu0 }
 0x56c   : > { %v1267_v40 = vpop.f32.mrf.mxu1 }
 0x56d   : > { %v1315_v55 = vpop.f32.mrf.mxu0 }
 0x56e   : > { %v4717_v50 = vpop.f32.mrf.mxu1 }
 0x56f   : > { %v4723_v56 = vpop.f32.mrf.mxu0 }
 0x589   : > { %v5780_v58 = vpop.f32.mrf.mxu1 }
 0x58b   : > { %v4728_v53 = vpop.f32.mrf.mxu1 }
 0x58d   : > { %v1363_v49 = vpop.f32.mrf.mxu1 }
 0x58f   : > { %v4729_v59 = vpop.f32.mrf.mxu1 }
 0x592   : > { %v5782_v60 = vpop.f32.mrf.mxu0 }
 0x594   : > { %v4734_v63 = vpop.f32.mrf.mxu0 }
 0x596   : > { %v1411_v0 = vpop.f32.mrf.mxu0 }
 0x598   : > { %v4735_v4 = vpop.f32.mrf.mxu0 }
 0x59a   : > { %v1507_v5 = vpop.f32.mrf.mxu0 }
 0x59b   : > { %v5785_v8 = vadd.f32 %v1507_v5, %v5580_v61 }
 0x59c   : > { %v4746_v9 = vpop.f32.mrf.mxu0 }
 0x59d   : > { %v1870_v11 = vsel %vm591_vm2, %v5785_v8, -inf }
 0x59e   : > { %1871 = vmax.xlane.f32.xlu0 %v1870_v11  ;;  %v1510_v14 = vpop.f32.mrf.mxu0 }
 0x5a0   : > { %v4747_v15 = vpop.f32.mrf.mxu0 }
 0x5a2   : > { %v1609_v18 = vpop.f32.mrf.mxu0 }
 0x5a3   : > { %v1610_v19 = vadd.f32 %v1609_v18, %v5580_v61 }
 0x5a4   : > { %v4758_v22 = vpop.f32.mrf.mxu0 }
 0x5a5   : > { %v1876_v52 = vsel %vm591_vm2, %v1610_v19, -inf }
 0x5a6   : > { %1877 = vmax.xlane.f32.xlu0 %v1876_v52  ;;  %v1612_v23 = vpop.f32.mrf.mxu0 }
 0x5a8   : > { %v4759_v39 = vpop.f32.mrf.mxu0 }
 0x5aa   : > { %v1711_v26 = vpop.f32.mrf.mxu0 }
 0x5ab   : > { %v1712_v53 = vadd.f32 %v1711_v26, %v5580_v61 }
 0x5ac   : > { %v4770_v1 = vpop.f32.mrf.mxu0 }
 0x5ad   : > { %v1882_v4 = vsel %vm591_vm2, %v1712_v53, -inf }
 0x5ae   : > { %v1714_v2 = vpop.f32.mrf.mxu0 }
 0x5b0   : > { %v4771_v46 = vpop.f32.mrf.mxu0 }
 0x5b2   : > { %v1813_v6 = vpop.f32.mrf.mxu0 }
 0x5b3   : > { %v5799_v0 = vadd.f32 %v1813_v6, %v5580_v61 }
 0x5b4   : > { %v4782_v30 = vpop.f32.mrf.mxu0 }
 0x5b5   : > { %v1888_v15 = vsel %vm591_vm2, %v5799_v0, -inf }
 0x5b6   : > { %v1816_v25 = vpop.f32.mrf.mxu0 }
 0x5b8   : > { %v4783_v27 = vpop.f32.mrf.mxu0 }
 0x5be   : > { %v5791_v35 = vpop.f32.mrf.mxu1 }
 0x5c0   : > { %v4740_v33 = vpop.f32.mrf.mxu1 }
 0x5c2   : > { %v1459_v36 = vpop.f32.mrf.mxu1 }
 0x5c4   : > { %v4741_v37 = vpop.f32.mrf.mxu1 }
 0x5c6   : > { %v1558_v28 = vpop.f32.mrf.mxu1 }
 0x5c7   : > { %v1559_v42 = vadd.f32 %v1558_v28, %v5580_v61 }
 0x5c8   : > { %v4752_v21 = vpop.f32.mrf.mxu1 }
 0x5c9   : > { %v1873_v51 = vsel %vm591_vm2, %v1559_v42, -inf  ;;  %v5824_v21 = vpop.permute.xlu1 %2062 }
 0x5ca   : > { %1874 = vmax.xlane.f32.xlu1 %v1873_v51  ;;  %v1561_v54 = vpop.f32.mrf.mxu1 }
 0x5cc   : > { %v4753_v40 = vpop.f32.mrf.mxu1 }
 0x5ce   : > { %v1660_v55 = vpop.f32.mrf.mxu1 }
 0x5cf   : > { %v1661_v50 = vadd.f32 %v1660_v55, %v5580_v61 }
 0x5d0   : > { %v4764_v56 = vpop.f32.mrf.mxu1 }
 0x5d1   : > { %v1879_v49 = vsel %vm591_vm2, %v1661_v50, -inf }
 0x5d2   : > { %v1663_v59 = vpop.f32.mrf.mxu1  ;;  %1880 = vmax.xlane.f32.xlu0 %v1879_v49 }
 0x5d4   : > { %v4765_v63 = vpop.f32.mrf.mxu1 }
 0x5d6   : > { %v1762_v5 = vpop.f32.mrf.mxu1  ;;  %1883 = vmax.xlane.f32.xlu0 %v1882_v4 }
 0x5d7   : > { %v1763_v9 = vadd.f32 %v1762_v5, %v5580_v61 }
 0x5d8   : > { %v4776_v11 = vpop.f32.mrf.mxu1 }
 0x5d9   : > { %v1885_v14 = vsel %vm591_vm2, %v1763_v9, -inf }
 0x5da   : > { %1886 = vmax.xlane.f32.xlu1 %v1885_v14  ;;  %v1765_v18 = vpop.f32.mrf.mxu1  ;;  %1889 = vmax.xlane.f32.xlu0 %v1888_v15 }
 0x5dc   : > { %v4777_v22 = vpop.f32.mrf.mxu1 }
 0x5de   : > { %v1864_v52 = vpop.f32.mrf.mxu1 }
 0x5df   : > { %v5811_v1 = vadd.f32 %v1864_v52, %v5580_v61 }
 0x5e0   : > { %v4788_v23 = vpop.f32.mrf.mxu1 }
 0x5e1   : > { %v1891_v2 = vsel %vm591_vm2, %v5811_v1, -inf }
 0x5e2   : > { %v1867_v39 = vpop.f32.mrf.mxu1 }
 0x5e4   : > { %v4789_v26 = vpop.f32.mrf.mxu1 }
 0x5eb   : > { %2206 = vrot.lane.b32.xlu1 %v5487_v16, %s5301_s9 }
 0x5f0   : > { %2158 = vrot.lane.b32.xlu0 %v5473_v10, %s5301_s9 }
 0x60f   : > { %1892 = vmax.xlane.f32.xlu1 %v1891_v2 }
 0x627   : > { %v1872_v46 = vpop.xlane.xlu0 %1871 }
 0x628   : > { %v1894_v6 = vsub.f32 %v5785_v8, %v1872_v46  ;;  %v5826_v8 = vpop.permute.xlu1 %2110 }
 0x62a   : > { %v1902_v30 = vmul.f32 1.442695, %v1894_v6 }
 0x62c   : > { %5182 = vpow2.f32 %v1902_v30 }
 0x62f   : > { %v1878_v25 = vpop.xlane.xlu0 %1877 }
 0x630   : > { %v1896_v27 = vsub.f32 %v1610_v19, %v1878_v25 }
 0x632   : > { %v1906_v33 = vmul.f32 1.442695, %v1896_v27 }
 0x634   : > { %5184 = vpow2.f32 %v1906_v33 }
 0x639   : > { %v5816_v36 = vpop.eup %5182 }
 0x63a   : > { %v1918_v37 = vsel %vm591_vm2, %v5816_v36, 0.0 }
 0x63b   : > { %1919 = vadd.xlane.f32.xlu0 %v1918_v37 }
 0x641   : > { %v5820_v61 = vpop.eup %5184 }
 0x642   : > { %v1924_v28 = vsel %vm591_vm2, %v5820_v61, 0.0 }
 0x643   : > { %1925 = vadd.xlane.f32.xlu0 %v1924_v28 }
 0x653   : > { %v1875_v51 = vpop.xlane.xlu1 %1874 }
 0x654   : > { %v1895_v19 = vsub.f32 %v1559_v42, %v1875_v51 }
 0x656   : > { %v1904_v54 = vmul.f32 1.442695, %v1895_v19  ;;  %v2068_v19 = vsel %vm1082_vm3, %v5824_v21, 0 }
 0x658   : > { %5186 = vpow2.f32 %v1904_v54 }
 0x65b   : > { %v1881_v40 = vpop.xlane.xlu0 %1880 }
 0x65c   : > { %v1897_v55 = vsub.f32 %v1661_v50, %v1881_v40 }
 0x65e   : > { %v1908_v56 = vmul.f32 1.442695, %v1897_v55 }
 0x65f   : > { %v1884_v49 = vpop.xlane.xlu0 %1883 }
 0x660   : > { %5188 = vpow2.f32 %v1908_v56  ;;  %v1898_v59 = vsub.f32 %v1712_v53, %v1884_v49 }
 0x662   : > { %v1910_v63 = vmul.f32 1.442695, %v1898_v59 }
 0x663   : > { %v1887_v53 = vpop.xlane.xlu1 %1886  ;;  %v1890_v18 = vpop.xlane.xlu0 %1889 }
 0x664   : > { %5190 = vpow2.f32 %v1910_v63  ;;  %v1899_v15 = vsub.f32 %v1763_v9, %v1887_v53  ;;  %v1900_v52 = vsub.f32 %v5799_v0, %v1890_v18 }
 0x665   : > { %v5828_v4 = vpop.eup %5186 }
 0x666   : > { %v1921_v5 = vsel %vm591_vm2, %v5828_v4, 0.0  ;;  %v1912_v22 = vmul.f32 1.442695, %v1899_v15  ;;  %v1914_v23 = vmul.f32 1.442695, %v1900_v52 }
 0x667   : > { %1922 = vadd.xlane.f32.xlu1 %v1921_v5  ;;  %v5855_v0 = vpop.permute.xlu1 %2206  ;;  %v2159_v6 = vpop.permute.xlu0 %2158 }
 0x668   : > { %5192 = vpow2.f32 %v1912_v22  ;;  %v2164_v21 = vsel %vm1082_vm3, %v2159_v6, 0 }
 0x669   : > { %5194 = vpow2.f32 %v1914_v23 }
 0x66d   : > { %v5832_v11 = vpop.eup %5188 }
 0x66e   : > { %v1927_v42 = vsel %vm591_vm2, %v5832_v11, 0.0 }
 0x66f   : > { %1928 = vadd.xlane.f32.xlu1 %v1927_v42  ;;  %v2116_v42 = vsel %vm1082_vm3, %v5826_v8, 0  ;;  %v2212_v8 = vsel %vm1082_vm3, %v5855_v0, 0 }
 0x671   : > { %v5836_v14 = vpop.eup %5190 }
 0x672   : > { %v1930_v50 = vsel %vm591_vm2, %v5836_v14, 0.0 }
 0x673   : > { %1931 = vadd.xlane.f32.xlu0 %v1930_v50 }
 0x675   : > { %v5845_v39 = vpop.eup %5192 }
 0x676   : > { %v1933_v26 = vsel %vm591_vm2, %v5845_v39, 0.0  ;;  %v5849_v2 = vpop.eup %5194 }
 0x677   : > { %v1936_v46 = vsel %vm591_vm2, %v5849_v2, 0.0 }
 0x680   : > { %2302 = vrot.lane.b32.xlu1 %v5494_v17, %s5301_s9 }
 0x689   : > { %2254 = vrot.lane.b32.xlu0 %v5481_v13, %s5301_s9 }
 0x698   : > { %v1893_v9 = vpop.xlane.xlu1 %1892 }
 0x699   : > { %v1901_v30 = vsub.f32 %v5811_v1, %v1893_v9 }
 0x69b   : > { %v1916_v25 = vmul.f32 1.442695, %v1901_v30 }
 0x6a4   : > { %1934 = vadd.xlane.f32.xlu1 %v1933_v26 }
 0x6a8   : > { %1937 = vadd.xlane.f32.xlu0 %v1936_v46 }
 0x6b5   : > { %2402 = vrot.lane.b32.xlu1 %v5466_v3, %s5302_s10 }
 0x6be   : > { %2352 = vrot.lane.b32.xlu0 %v5463_v62, %s5302_s10 }
 0x6c2   : > { %2350 = vrot.lane.b32.xlu0 %v5505_v24, %s5303_s12 }
 0x6c4   : > { %v1920_v27 = vpop.xlane.xlu0 %1919 }
 0x6c5   : > { %5196 = vrcp.f32 %v1920_v27 }
 0x6c6   : > { %2452 = vrot.lane.b32.xlu0 %v5469_v7, %s5302_s10  ;;  %5198 = vpow2.f32 %v1916_v25 }
 0x6ca   : > { %2450 = vrot.lane.b32.xlu0 %v5515_v20, %s5303_s12 }
 0x6cc   : > { %v1926_v33 = vpop.xlane.xlu0 %1925 }
 0x6cd   : > { %5200 = vrcp.f32 %v1926_v33 }
 0x6ce   : > { %2552 = vrot.lane.b32.xlu0 %v5473_v10, %s5302_s10 }
 0x6d2   : > { %v5197_v1 = vpop.eup %5196  ;;  %2550 = vrot.lane.b32.xlu0 %v5533_v44, %s5303_s12 }
 0x6d3   : > { %v1950_v37 = vmul.f32 %v5197_v1, %v5816_v36  ;;  %v5871_v28 = vpop.eup %5198 }
 0x6d4   : > { %v1939_v54 = vsel %vm591_vm2, %v5871_v28, 0.0 }
 0x6d5   : > { %v1958_v51 = vpack.c.bf16 %v1950_v37, %v1950_v37 }
 0x6d6   : > { %2652 = vrot.lane.b32.xlu0 %v5481_v13, %s5302_s10 }
 0x6d7   : > { %4793 = vmatmul.mubr.msk.bf16.vlgmr.msra.gmra.mxu0 %vm591_vm2, %v1958_v51 }
 0x6d8   : > { %4803 = vmatpush3.bf16.msra.mxu0 %v2068_v19  ;;  %4804 = vmatprep.mubr.msk.bf16.mxu0 %vm5296_vm1, %v5295_v48 }
 0x6d9   : > { %1940 = vadd.xlane.f32.xlu1 %v1939_v54  ;;  %4814 = vmatprep.subr.bf16.mxu0 %v5295_v48 }
 0x6da   : > { %v5201_v36 = vpop.eup %5200  ;;  %2650 = vrot.lane.b32.xlu0 %v5550_v29, %s5303_s12 }
 0x6db   : > { %v1952_v40 = vmul.f32 %v5201_v36, %v5820_v61 }
 0x6dd   : > { %v1960_v55 = vpack.c.bf16 %v1952_v40, %v1952_v40 }
 0x6de   : > { %2846 = vrot.lane.b32.xlu0 %v5463_v62, %s5304_s13 }
 0x6df   : > { %4805 = vmatmul.mubr.msk.bf16.vlgmr.msra.gmra.mxu0 %vm591_vm2, %v1960_v55 }
 0x6e0   : > { %4815 = vmatpush3.bf16.msra.mxu0 %v2164_v21  ;;  %4816 = vmatprep.mubr.msk.bf16.mxu0 %vm5296_vm1, %v5295_v48 }
 0x6e1   : > { %4826 = vmatprep.subr.bf16.mxu0 %v5295_v48 }
 0x6ea   : > { %2400 = vrot.lane.b32.xlu1 %v5517_v34, %s5303_s12 }
 0x6ee   : > { %2502 = vrot.lane.b32.xlu1 %v5477_v12, %s5302_s10 }
 0x6f0   : > { %v1923_v61 = vpop.xlane.xlu1 %1922 }
 0x6f1   : > { %5202 = vrcp.f32 %v1923_v61 }
 0x6f2   : > { %2500 = vrot.lane.b32.xlu1 %v5531_v43, %s5303_s12 }
 0x6f6   : > { %2602 = vrot.lane.b32.xlu1 %v5487_v16, %s5302_s10 }
 0x6f8   : > { %v1929_v56 = vpop.xlane.xlu1 %1928 }
 0x6f9   : > { %5204 = vrcp.f32 %v1929_v56 }
 0x6fa   : > { %2600 = vrot.lane.b32.xlu1 %v5552_v38, %s5303_s12 }
 0x6fc   : > { %v1932_v49 = vpop.xlane.xlu0 %1931 }
 0x6fd   : > { %5206 = vrcp.f32 %v1932_v49 }
 0x6fe   : > { %v5203_v59 = vpop.eup %5202  ;;  %2702 = vrot.lane.b32.xlu1 %v5494_v17, %s5302_s10 }
 0x6ff   : > { %v1951_v63 = vmul.f32 %v5203_v59, %v5828_v4 }
 0x700   : > { %v2255_v22 = vpop.permute.xlu0 %2254 }
 0x701   : > { %v1959_v5 = vpack.c.bf16 %v1951_v63, %v1951_v63 }
 0x702   : > { %2700 = vrot.lane.b32.xlu1 %v5569_v57, %s5303_s12  ;;  %s6442_s12 = scalar_lea.vmem %s6479_s8, %s4409_s30 }
 0x703   : > { %4799 = vmatmul.mubr.msk.bf16.vlgmr.msra.gmra.mxu1 %vm591_vm2, %v1959_v5 }
 0x704   : > { %4809 = vmatpush3.bf16.msra.mxu1 %v2116_v42  ;;  %4810 = vmatprep.mubr.msk.bf16.mxu1 %vm5296_vm1, %v5295_v48 }
 0x705   : > { %4820 = vmatprep.subr.bf16.mxu1 %v5295_v48 }
 0x706   : > { %v5205_v50 = vpop.eup %5204  ;;  %2894 = vrot.lane.b32.xlu1 %v5466_v3, %s5304_s13 }
 0x707   : > { %v1953_v4 = vmul.f32 %v5205_v50, %v5832_v11  ;;  %v2260_v11 = vsel %vm1082_vm3, %v2255_v22, 0 }
 0x709   : > { %v1961_v53 = vpack.c.bf16 %v1953_v4, %v1953_v4 }
 0x70a   : > { %v5207_v15 = vpop.eup %5206  ;;  %2942 = vrot.lane.b32.xlu1 %v5469_v7, %s5304_s13 }
 0x70b   : > { %4811 = vmatmul.mubr.msk.bf16.vlgmr.msra.gmra.mxu1 %vm591_vm2, %v1961_v53  ;;  %v1954_v18 = vmul.f32 %v5207_v15, %v5836_v14  ;;  %v2303_v14 = vpop.permute.xlu1 %2302 }
 0x70c   : > { %4821 = vmatpush3.bf16.msra.mxu1 %v2212_v8  ;;  %4822 = vmatprep.mubr.msk.bf16.mxu1 %vm5296_vm1, %v5295_v48  ;;  %v2308_v33 = vsel %vm1082_vm3, %v2303_v14, 0 }
 0x70d   : > { %v1962_v52 = vpack.c.bf16 %v1954_v18, %v1954_v18  ;;  %4832 = vmatprep.subr.bf16.mxu1 %v5295_v48 }
 0x70e   : > { %2990 = vrot.lane.b32.xlu1 %v5477_v12, %s5304_s13 }
 0x70f   : > { %4817 = vmatmul.mubr.msk.bf16.vlgmr.msra.gmra.mxu0 %vm591_vm2, %v1962_v52 }
 0x710   : > { %4827 = vmatpush3.bf16.msra.mxu0 %v2260_v11  ;;  %4828 = vmatprep.mubr.msk.bf16.mxu0 %vm5296_vm1, %v5295_v48 }
 0x711   : > { %4838 = vmatprep.subr.bf16.mxu0 %v5295_v48 }
 0x72d   : > { %v1935_v23 = vpop.xlane.xlu1 %1934 }
 0x72e   : > { %5208 = vrcp.f32 %v1935_v23 }
 0x731   : > { %v1938_v26 = vpop.xlane.xlu0 %1937  ;;  %v2403_v61 = vpop.permute.xlu1 %2402 }
 0x732   : > { %5210 = vrcp.f32 %v1938_v26  ;;  %v2408_v15 = vsel %vm591_vm2, %v2403_v61, 0 }
 0x735   : > { %v2353_v46 = vpop.permute.xlu0 %2352 }
 0x736   : > { %v2358_v19 = vsel %vm591_vm2, %v2353_v46, 0 }
 0x739   : > { %v2351_v0 = vpop.permute.xlu0 %2350 }
 0x73b   : > { %v5209_v9 = vpop.eup %5208 }
 0x73c   : > { %v1955_v6 = vmul.f32 %v5209_v9, %v5845_v39 }
 0x73d   : > { %v2453_v30 = vpop.permute.xlu0 %2452 }
 0x73e   : > { %v1963_v25 = vpack.c.bf16 %v1955_v6, %v1955_v6 }
 0x73f   : > { %v5211_v27 = vpop.eup %5210 }
 0x740   : > { %4823 = vmatmul.mubr.msk.bf16.vlgmr.msra.gmra.mxu1 %vm591_vm2, %v1963_v25  ;;  %v1956_v1 = vmul.f32 %v5211_v27, %v5849_v2  ;;  %v2458_v2 = vsel %vm591_vm2, %v2453_v30, 0 }
 0x741   : > { %4833 = vmatpush3.bf16.msra.mxu1 %v2308_v33  ;;  %4834 = vmatprep.mubr.msk.bf16.mxu1 %vm5296_vm1, %v5295_v48  ;;  %v2451_v51 = vpop.permute.xlu0 %2450 }
 0x742   : > { %v1964_v37 = vpack.c.bf16 %v1956_v1, %v1956_v1  ;;  %4844 = vmatprep.subr.bf16.mxu1 %v5295_v48 }
 0x744   : > { %4829 = vmatmul.mubr.msk.bf16.vlgmr.msra.gmra.mxu0 %vm591_vm2, %v1964_v37 }
 0x745   : > { %4839 = vmatpush3.bf16.xpose.msra.mxu0 %v2358_v19  ;;  %4840 = vmatprep.mubr.msk.bf16.mxu0 %vm5296_vm1, %v5295_v48  ;;  %v2553_v39 = vpop.permute.xlu0 %2552 }
 0x746   : > { %4850 = vmatprep.subr.bf16.mxu0 %v5295_v48  ;;  %v2558_v36 = vsel %vm591_vm2, %v2553_v39, 0 }
 0x749   : > { %v2551_v54 = vpop.permute.xlu0 %2550 }
 0x74c   : > { %4841 = vmatmul.mubr.msk.bf16.vlgmr.msra.gmra.mxu0 %vm591_vm2, %v2351_v0 }
 0x74d   : > { %4851 = vmatpush3.bf16.xpose.msra.mxu0 %v2458_v2  ;;  %4852 = vmatprep.mubr.msk.bf16.mxu0 %vm5296_vm1, %v5295_v48  ;;  %v2653_v40 = vpop.permute.xlu0 %2652 }
 0x74e   : > { %4862 = vmatprep.subr.bf16.mxu0 %v5295_v48  ;;  %v2658_v21 = vsel %vm591_vm2, %v2653_v40, 0 }
 0x751   : > { %v2651_v55 = vpop.permute.xlu0 %2650 }
 0x754   : > { %4853 = vmatmul.mubr.msk.bf16.vlgmr.msra.gmra.mxu0 %vm591_vm2, %v2451_v51 }
 0x755   : > { %4863 = vmatpush3.bf16.xpose.msra.mxu0 %v2558_v36  ;;  %4864 = vmatprep.mubr.msk.bf16.mxu0 %vm5296_vm1, %v5295_v48  ;;  %v2847_v56 = vpop.permute.xlu0 %2846 }
 0x756   : > { %4874 = vmatprep.subr.bf16.mxu0 %v5295_v48  ;;  %v2852_v59 = vsel %vm1082_vm3, %v2847_v56, 0 }
 0x75c   : > { %4865 = vmatmul.mubr.msk.bf16.vlgmr.msra.gmra.mxu0 %vm591_vm2, %v2551_v54 }
 0x75d   : > { %4875 = vmatpush3.bf16.xpose.msra.mxu0 %v2658_v21  ;;  %4876 = vmatprep.mubr.msk.bf16.mxu0 %vm5296_vm1, %v5295_v48 }
 0x75e   : > { %4886 = vmatprep.subr.bf16.mxu0 %v5295_v48 }
 0x762   : > { %v1941_v49 = vpop.xlane.xlu1 %1940 }
 0x763   : > { %5212 = vrcp.f32 %v1941_v49 }
 0x764   : > { %4877 = vmatmul.mubr.msk.bf16.vlgmr.msra.gmra.mxu0 %vm591_vm2, %v2651_v55 }
 0x765   : > { %4887 = vmatpush3.bf16.msra.mxu0 %v2852_v59  ;;  %4888 = vmatprep.mubr.msk.bf16.mxu0 %vm5296_vm1, %v5295_v48 }
 0x766   : > { %4898 = vmatprep.subr.bf16.mxu0 %v5295_v48  ;;  %v2401_v63 = vpop.permute.xlu1 %2400 }
 0x76a   : > { %v2503_v5 = vpop.permute.xlu1 %2502 }
 0x76b   : > { %v2508_v18 = vsel %vm591_vm2, %v2503_v5, 0 }
 0x76e   : > { %v2501_v53 = vpop.permute.xlu1 %2500 }
 0x770   : > { %v5213_v42 = vpop.eup %5212 }
 0x771   : > { %v1957_v50 = vmul.f32 %v5213_v42, %v5871_v28 }
 0x772   : > { %v2603_v8 = vpop.permute.xlu1 %2602 }
 0x773   : > { %v1965_v4 = vpack.c.bf16 %v1957_v50, %v1957_v50  ;;  %v2608_v22 = vsel %vm591_vm2, %v2603_v8, 0 }
 0x775   : > { %4835 = vmatmul.mubr.msk.bf16.vlgmr.msra.gmra.mxu1 %vm591_vm2, %v1965_v4 }
 0x776   : > { %4845 = vmatpush3.bf16.xpose.msra.mxu1 %v2408_v15  ;;  %4846 = vmatprep.mubr.msk.bf16.mxu1 %vm5296_vm1, %v5295_v48  ;;  %v2601_v28 = vpop.permute.xlu1 %2600 }
 0x777   : > { %4856 = vmatprep.subr.bf16.mxu1 %v5295_v48 }
 0x77a   : > { %v2703_v52 = vpop.permute.xlu1 %2702 }
 0x77b   : > { %v2708_v14 = vsel %vm591_vm2, %v2703_v52, 0 }
 0x77d   : > { %4847 = vmatmul.mubr.msk.bf16.vlgmr.msra.gmra.mxu1 %vm591_vm2, %v2401_v63 }
 0x77e   : > { %4857 = vmatpush3.bf16.xpose.msra.mxu1 %v2508_v18  ;;  %4858 = vmatprep.mubr.msk.bf16.mxu1 %vm5296_vm1, %v5295_v48  ;;  %v2701_v11 = vpop.permute.xlu1 %2700 }
 0x77f   : > { %4868 = vmatprep.subr.bf16.mxu1 %v5295_v48 }
 0x782   : > { %v2895_v23 = vpop.permute.xlu1 %2894 }
 0x783   : > { %v2900_v26 = vsel %vm1082_vm3, %v2895_v23, 0 }
 0x785   : > { %4859 = vmatmul.mubr.msk.bf16.vlgmr.msra.gmra.mxu1 %vm591_vm2, %v2501_v53 }
 0x786   : > { %4869 = vmatpush3.bf16.xpose.msra.mxu1 %v2608_v22  ;;  %4870 = vmatprep.mubr.msk.bf16.mxu1 %vm5296_vm1, %v5295_v48 }
 0x787   : > { %4880 = vmatprep.subr.bf16.mxu1 %v5295_v48 }
 0x78d   : > { %4871 = vmatmul.mubr.msk.bf16.vlgmr.msra.gmra.mxu1 %vm591_vm2, %v2601_v28  ;;  %v6014_v28 = vld [vmem:[%s6478_s7] sm:$0xff] }
 0x78e   : > { %4881 = vmatpush3.bf16.xpose.msra.mxu1 %v2708_v14  ;;  %4882 = vmatprep.mubr.msk.bf16.mxu1 %vm5296_vm1, %v5295_v48 }
 0x78f   : > { %4892 = vmatprep.subr.bf16.mxu1 %v5295_v48 }
 0x795   : > { %4883 = vmatmul.mubr.msk.bf16.vlgmr.msra.gmra.mxu1 %vm591_vm2, %v2701_v11 }
 0x796   : > { %4893 = vmatpush3.bf16.msra.mxu1 %v2900_v26  ;;  %4894 = vmatprep.mubr.msk.bf16.mxu1 %vm5296_vm1, %v5295_v48 }
 0x797   : > { %v5990_v46 = vpop.f32.mrf.mxu0  ;;  %4904 = vmatprep.subr.bf16.mxu1 %v5295_v48 }
 0x799   : > { %v4794_v0 = vpop.f32.mrf.mxu0 }
 0x79b   : > { %v2011_v9 = vpop.f32.mrf.mxu0 }
 0x79d   : > { %v4795_v6 = vpop.f32.mrf.mxu0 }
 0x79f   : > { %v5993_v30 = vpop.f32.mrf.mxu0 }
 0x7a1   : > { %v4806_v25 = vpop.f32.mrf.mxu0 }
 0x7a3   : > { %v2107_v27 = vpop.f32.mrf.mxu0 }
 0x7a5   : > { %v4807_v33 = vpop.f32.mrf.mxu0 }
 0x7c3   : > { %v5995_v1 = vpop.f32.mrf.mxu1 }
 0x7c4   : > { %v5070_v37 = vpack.i.bf16 %v5995_v1, %v5990_v46 }
 0x7c5   : > { %v4800_v51 = vpop.f32.mrf.mxu1 }
 0x7c7   : > { %v2059_v19 = vpop.f32.mrf.mxu1 }
 0x7c9   : > { %v4801_v39 = vpop.f32.mrf.mxu1 }
 0x7cb   : > { %v5999_v2 = vpop.f32.mrf.mxu1 }
 0x7cc   : > { %v5075_v54 = vpack.i.bf16 %v5999_v2, %v5993_v30 }
 0x7cd   : > { %v4812_v36 = vpop.f32.mrf.mxu1 }
 0x7cf   : > { %v2155_v40 = vpop.f32.mrf.mxu1  ;;  %v6003_v55 = vpop.f32.mrf.mxu0 }
 0x7d1   : > { %v4813_v21 = vpop.f32.mrf.mxu1  ;;  %v4818_v61 = vpop.f32.mrf.mxu0 }
 0x7d3   : > { %v2203_v56 = vpop.f32.mrf.mxu0 }
 0x7d5   : > { %v4819_v49 = vpop.f32.mrf.mxu0 }
 0x800   : > { %v6005_v59 = vpop.f32.mrf.mxu1 }
 0x801   : > { %v5090_v63 = vpack.i.bf16 %v6005_v59, %v6003_v55 }
 0x802   : > { %v4824_v5 = vpop.f32.mrf.mxu1 }
 0x804   : > { %v2251_v42 = vpop.f32.mrf.mxu1  ;;  %v6009_v50 = vpop.f32.mrf.mxu0 }
 0x806   : > { %v4825_v4 = vpop.f32.mrf.mxu1  ;;  %v4830_v53 = vpop.f32.mrf.mxu0 }
 0x808   : > { %v2299_v15 = vpop.f32.mrf.mxu0 }
 0x80a   : > { %v4831_v8 = vpop.f32.mrf.mxu0 }
 0x80c   : > { %v2394_v18 = vpop.f32.mrf.mxu0 }
 0x80d   : > { %v6017_v22 = vadd.f32 %v6014_v28, %v2394_v18 }
 0x80e   : > { %v4842_v52 = vpop.f32.mrf.mxu0 }
 0x80f   : > { %v2750_v11 = vsel %vm591_vm2, %v6017_v22, -inf }
 0x810   : > { %2751 = vmax.xlane.f32.xlu0 %v2750_v11  ;;  %v2397_v14 = vpop.f32.mrf.mxu0 }
 0x812   : > { %v4843_v23 = vpop.f32.mrf.mxu0 }
 0x814   : > { %v2494_v26 = vpop.f32.mrf.mxu0 }
 0x815   : > { %v2495_v0 = vadd.f32 %v6014_v28, %v2494_v26 }
 0x816   : > { %v4854_v9 = vpop.f32.mrf.mxu0 }
 0x817   : > { %v2756_v6 = vsel %vm591_vm2, %v2495_v0, -inf }
 0x818   : > { %2757 = vmax.xlane.f32.xlu0 %v2756_v6  ;;  %v2497_v25 = vpop.f32.mrf.mxu0 }
 0x81a   : > { %v4855_v27 = vpop.f32.mrf.mxu0 }
 0x81c   : > { %v2594_v33 = vpop.f32.mrf.mxu0 }
 0x81d   : > { %v2595_v9 = vadd.f32 %v6014_v28, %v2594_v33 }
 0x81e   : > { %v4866_v51 = vpop.f32.mrf.mxu0 }
 0x820   : > { %v2597_v19 = vpop.f32.mrf.mxu0 }
 0x821   : > { %v2762_v19 = vsel %vm591_vm2, %v2595_v9, -inf }
 0x822   : > { %v4867_v39 = vpop.f32.mrf.mxu0 }
 0x824   : > { %v2694_v36 = vpop.f32.mrf.mxu0 }
 0x825   : > { %v6033_v51 = vadd.f32 %v6014_v28, %v2694_v36 }
 0x826   : > { %v4878_v40 = vpop.f32.mrf.mxu0 }
 0x827   : > { %v2768_v33 = vsel %vm591_vm2, %v6033_v51, -inf }
 0x828   : > { %v2697_v21 = vpop.f32.mrf.mxu0 }
 0x82a   : > { %v4879_v61 = vpop.f32.mrf.mxu0 }
 0x835   : > { %v6023_v56 = vpop.f32.mrf.mxu1 }
 0x836   : > { %v5095_v49 = vpack.i.bf16 %v6023_v56, %v6009_v50 }
 0x837   : > { %v4836_v5 = vpop.f32.mrf.mxu1 }
 0x839   : > { %v2347_v42 = vpop.f32.mrf.mxu1 }
 0x83b   : > { %v4837_v4 = vpop.f32.mrf.mxu1 }
 0x83d   : > { %v2444_v53 = vpop.f32.mrf.mxu1 }
 0x83e   : > { %v2445_v15 = vadd.f32 %v6014_v28, %v2444_v53 }
 0x83f   : > { %v4848_v8 = vpop.f32.mrf.mxu1 }
 0x840   : > { %v2753_v18 = vsel %vm591_vm2, %v2445_v15, -inf }
 0x841   : > { %2754 = vmax.xlane.f32.xlu1 %v2753_v18  ;;  %v2447_v52 = vpop.f32.mrf.mxu1 }
 0x843   : > { %v4849_v11 = vpop.f32.mrf.mxu1 }
 0x845   : > { %v2544_v14 = vpop.f32.mrf.mxu1 }
 0x846   : > { %v2545_v23 = vadd.f32 %v6014_v28, %v2544_v14 }
 0x847   : > { %v4860_v26 = vpop.f32.mrf.mxu1 }
 0x848   : > { %v2759_v6 = vsel %vm591_vm2, %v2545_v23, -inf }
 0x849   : > { %v2547_v25 = vpop.f32.mrf.mxu1  ;;  %2760 = vmax.xlane.f32.xlu0 %v2759_v6 }
 0x84b   : > { %v4861_v27 = vpop.f32.mrf.mxu1 }
 0x84d   : > { %v2644_v39 = vpop.f32.mrf.mxu1  ;;  %2763 = vmax.xlane.f32.xlu0 %v2762_v19 }
 0x84e   : > { %v2645_v40 = vadd.f32 %v6014_v28, %v2644_v39 }
 0x84f   : > { %v4872_v21 = vpop.f32.mrf.mxu1 }
 0x850   : > { %v2765_v61 = vsel %vm591_vm2, %v2645_v40, -inf }
 0x851   : > { %2766 = vmax.xlane.f32.xlu1 %v2765_v61  ;;  %v2647_v5 = vpop.f32.mrf.mxu1  ;;  %2769 = vmax.xlane.f32.xlu0 %v2768_v33  ;;  %v2943_v33 = vpop.permute.xlu1 %2942 }
 0x853   : > { %v4873_v42 = vpop.f32.mrf.mxu1 }
 0x855   : > { %v2744_v4 = vpop.f32.mrf.mxu1 }
 0x856   : > { %v6045_v18 = vadd.f32 %v6014_v28, %v2744_v4 }
 0x857   : > { %v4884_v53 = vpop.f32.mrf.mxu1 }
 0x858   : > { %v2771_v52 = vsel %vm591_vm2, %v6045_v18, -inf }
 0x859   : > { %v2747_v36 = vpop.f32.mrf.mxu1 }
 0x85b   : > { %v4885_v8 = vpop.f32.mrf.mxu1 }
 0x862   : > { %3086 = vrot.lane.b32.xlu1 %v5487_v16, %s5304_s13 }
 0x867   : > { %3038 = vrot.lane.b32.xlu0 %v5473_v10, %s5304_s13 }
 0x886   : > { %2772 = vmax.xlane.f32.xlu1 %v2771_v52 }
 0x899   : > { %v2752_v11 = vpop.xlane.xlu0 %2751 }
 0x89a   : > { %v2774_v14 = vsub.f32 %v6017_v22, %v2752_v11  ;;  %v6058_v22 = vpop.permute.xlu1 %2990 }
 0x89c   : > { %v2782_v26 = vmul.f32 1.442695, %v2774_v14 }
 0x89e   : > { %5214 = vpow2.f32 %v2782_v26 }
 0x8a1   : > { %v2758_v6 = vpop.xlane.xlu0 %2757 }
 0x8a2   : > { %v2776_v25 = vsub.f32 %v2495_v0, %v2758_v6 }
 0x8a4   : > { %v2786_v27 = vmul.f32 1.442695, %v2776_v25 }
 0x8a6   : > { %5216 = vpow2.f32 %v2786_v27 }
 0x8ab   : > { %v6050_v19 = vpop.eup %5214 }
 0x8ac   : > { %v2798_v39 = vsel %vm591_vm2, %v6050_v19, 0.0 }
 0x8ad   : > { %2799 = vadd.xlane.f32.xlu0 %v2798_v39 }
 0x8b3   : > { %v6054_v21 = vpop.eup %5216 }
 0x8b4   : > { %v2804_v61 = vsel %vm591_vm2, %v6054_v21, 0.0 }
 0x8b5   : > { %2805 = vadd.xlane.f32.xlu0 %v2804_v61 }
 0x8ca   : > { %v2755_v5 = vpop.xlane.xlu1 %2754 }
 0x8cb   : > { %v2775_v42 = vsub.f32 %v2445_v15, %v2755_v5 }
 0x8cd   : > { %v2784_v0 = vmul.f32 1.442695, %v2775_v42 }
 0x8cf   : > { %5218 = vpow2.f32 %v2784_v0 }
 0x8d2   : > { %v2761_v4 = vpop.xlane.xlu0 %2760 }
 0x8d3   : > { %v2777_v53 = vsub.f32 %v2545_v23, %v2761_v4 }
 0x8d5   : > { %v2788_v36 = vmul.f32 1.442695, %v2777_v53 }
 0x8d6   : > { %v2764_v8 = vpop.xlane.xlu0 %2763 }
 0x8d7   : > { %5220 = vpow2.f32 %v2788_v36  ;;  %v2778_v52 = vsub.f32 %v2595_v9, %v2764_v8 }
 0x8d9   : > { %v2790_v11 = vmul.f32 1.442695, %v2778_v52 }
 0x8da   : > { %v2767_v9 = vpop.xlane.xlu1 %2766  ;;  %v2770_v39 = vpop.xlane.xlu0 %2769 }
 0x8db   : > { %5222 = vpow2.f32 %v2790_v11  ;;  %v2779_v27 = vsub.f32 %v2645_v40, %v2767_v9  ;;  %v2780_v5 = vsub.f32 %v6033_v51, %v2770_v39 }
 0x8dc   : > { %v6060_v14 = vpop.eup %5218 }
 0x8dd   : > { %v2801_v26 = vsel %vm591_vm2, %v6060_v14, 0.0  ;;  %v2792_v61 = vmul.f32 1.442695, %v2779_v27  ;;  %v2794_v42 = vmul.f32 1.442695, %v2780_v5  ;;  %v2948_v27 = vsel %vm1082_vm3, %v2943_v33, 0 }
 0x8de   : > { %2802 = vadd.xlane.f32.xlu1 %v2801_v26  ;;  %v6087_v51 = vpop.permute.xlu1 %3086  ;;  %v3039_v40 = vpop.permute.xlu0 %3038 }
 0x8df   : > { %5224 = vpow2.f32 %v2792_v61  ;;  %v3044_v39 = vsel %vm1082_vm3, %v3039_v40, 0  ;;  %v3092_v40 = vsel %vm1082_vm3, %v6087_v51, 0 }
 0x8e0   : > { %5226 = vpow2.f32 %v2794_v42 }
 0x8e4   : > { %v6064_v6 = vpop.eup %5220 }
 0x8e5   : > { %v2807_v15 = vsel %vm591_vm2, %v6064_v6, 0.0 }
 0x8e6   : > { %2808 = vadd.xlane.f32.xlu1 %v2807_v15 }
 0x8e8   : > { %v6068_v25 = vpop.eup %5222 }
 0x8e9   : > { %v2810_v23 = vsel %vm591_vm2, %v6068_v25, 0.0 }
 0x8ea   : > { %2811 = vadd.xlane.f32.xlu0 %v2810_v23 }
 0x8ec   : > { %v6077_v0 = vpop.eup %5224 }
 0x8ed   : > { %v2813_v4 = vsel %vm591_vm2, %v6077_v0, 0.0  ;;  %v6081_v53 = vpop.eup %5226 }
 0x8ee   : > { %v2816_v36 = vsel %vm591_vm2, %v6081_v53, 0.0 }
 0x8f7   : > { %3182 = vrot.lane.b32.xlu1 %v5494_v17, %s5304_s13 }
 0x900   : > { %3134 = vrot.lane.b32.xlu0 %v5481_v13, %s5304_s13 }
 0x90f   : > { %v2773_v8 = vpop.xlane.xlu1 %2772 }
 0x910   : > { %v2781_v52 = vsub.f32 %v6045_v18, %v2773_v8 }
 0x912   : > { %v2796_v26 = vmul.f32 1.442695, %v2781_v52 }
 0x91b   : > { %2814 = vadd.xlane.f32.xlu1 %v2813_v4 }
 0x91f   : > { %2817 = vadd.xlane.f32.xlu0 %v2816_v36 }
 0x92c   : > { %3282 = vrot.lane.b32.xlu1 %v5466_v3, %s5305_s16 }
 0x935   : > { %3232 = vrot.lane.b32.xlu0 %v5463_v62, %s5305_s16 }
 0x936   : > { %v2800_v11 = vpop.xlane.xlu0 %2799 }
 0x937   : > { %5228 = vrcp.f32 %v2800_v11 }
 0x938   : > { %5230 = vpow2.f32 %v2796_v26 }
 0x939   : > { %3230 = vrot.lane.b32.xlu0 %v5505_v24, %s5306_s17 }
 0x93d   : > { %3332 = vrot.lane.b32.xlu0 %v5469_v7, %s5305_s16 }
 0x93e   : > { %v2806_v15 = vpop.xlane.xlu0 %2805 }
 0x93f   : > { %5232 = vrcp.f32 %v2806_v15 }
 0x941   : > { %3330 = vrot.lane.b32.xlu0 %v5515_v20, %s5306_s17 }
 0x944   : > { %v5229_v23 = vpop.eup %5228 }
 0x945   : > { %3432 = vrot.lane.b32.xlu0 %v5473_v10, %s5305_s16  ;;  %v2830_v18 = vmul.f32 %v5229_v23, %v6050_v19  ;;  %v6107_v24 = vpop.eup %5230 }
 0x946   : > { %v2819_v33 = vsel %vm591_vm2, %v6107_v24, 0.0 }
 0x947   : > { %v2838_v9 = vpack.c.bf16 %v2830_v18, %v2830_v18 }
 0x949   : > { %3430 = vrot.lane.b32.xlu0 %v5533_v44, %s5306_s17  ;;  %4889 = vmatmul.mubr.msk.bf16.vlgmr.msra.gmra.mxu0 %vm591_vm2, %v2838_v9 }
 0x94a   : > { %4899 = vmatpush3.bf16.msra.mxu0 %v2948_v27  ;;  %4900 = vmatprep.mubr.msk.bf16.mxu0 %vm5296_vm1, %v5295_v48 }
 0x94b   : > { %4910 = vmatprep.subr.bf16.mxu0 %v5295_v48 }
 0x94c   : > { %v5233_v20 = vpop.eup %5232 }
 0x94d   : > { %3532 = vrot.lane.b32.xlu0 %v5481_v13, %s5305_s16  ;;  %v2832_v19 = vmul.f32 %v5233_v20, %v6054_v21 }
 0x94f   : > { %v2840_v44 = vpack.c.bf16 %v2832_v19, %v2832_v19 }
 0x950   : > { %2820 = vadd.xlane.f32.xlu1 %v2819_v33 }
 0x951   : > { %3530 = vrot.lane.b32.xlu0 %v5550_v29, %s5306_s17  ;;  %4901 = vmatmul.mubr.msk.bf16.vlgmr.msra.gmra.mxu0 %vm591_vm2, %v2840_v44 }
 0x952   : > { %4911 = vmatpush3.bf16.msra.mxu0 %v3044_v39  ;;  %4912 = vmatprep.mubr.msk.bf16.mxu0 %vm5296_vm1, %v5295_v48 }
 0x953   : > { %4922 = vmatprep.subr.bf16.mxu0 %v5295_v48 }
 0x961   : > { %3280 = vrot.lane.b32.xlu1 %v5517_v34, %s5306_s17 }
 0x965   : > { %3382 = vrot.lane.b32.xlu1 %v5477_v12, %s5305_s16 }
 0x967   : > { %v2803_v21 = vpop.xlane.xlu1 %2802 }
 0x968   : > { %5234 = vrcp.f32 %v2803_v21 }
 0x969   : > { %3380 = vrot.lane.b32.xlu1 %v5531_v43, %s5306_s17  ;;  %v2996_v43 = vsel %vm1082_vm3, %v6058_v22, 0 }
 0x96d   : > { %3482 = vrot.lane.b32.xlu1 %v5487_v16, %s5305_s16 }
 0x96f   : > { %v2809_v29 = vpop.xlane.xlu1 %2808 }
 0x970   : > { %5236 = vrcp.f32 %v2809_v29 }
 0x971   : > { %3480 = vrot.lane.b32.xlu1 %v5552_v38, %s5306_s17 }
 0x973   : > { %v2812_v61 = vpop.xlane.xlu0 %2811 }
 0x974   : > { %5238 = vrcp.f32 %v2812_v61 }
 0x975   : > { %v5235_v5 = vpop.eup %5234  ;;  %3582 = vrot.lane.b32.xlu1 %v5494_v17, %s5305_s16 }
 0x976   : > { %v2831_v34 = vmul.f32 %v5235_v5, %v6060_v14 }
 0x977   : > { %v3135_v22 = vpop.permute.xlu0 %3134 }
 0x978   : > { %v2839_v42 = vpack.c.bf16 %v2831_v34, %v2831_v34  ;;  %v3140_v52 = vsel %vm1082_vm3, %v3135_v22, 0 }
 0x979   : > { %3580 = vrot.lane.b32.xlu1 %v5569_v57, %s5306_s17 }
 0x97a   : > { %4895 = vmatmul.mubr.msk.bf16.vlgmr.msra.gmra.mxu1 %vm591_vm2, %v2839_v42 }
 0x97b   : > { %4905 = vmatpush3.bf16.msra.mxu1 %v2996_v43  ;;  %4906 = vmatprep.mubr.msk.bf16.mxu1 %vm5296_vm1, %v5295_v48 }
 0x97c   : > { %4916 = vmatprep.subr.bf16.mxu1 %v5295_v48 }
 0x97d   : > { %v5237_v38 = vpop.eup %5236 }
 0x97e   : > { %v2833_v4 = vmul.f32 %v5237_v38, %v6064_v6  ;;  %v3183_v6 = vpop.permute.xlu1 %3182 }
 0x97f   : > { %v3188_v27 = vsel %vm1082_vm3, %v3183_v6, 0 }
 0x980   : > { %v2841_v36 = vpack.c.bf16 %v2833_v4, %v2833_v4 }
 0x981   : > { %v5239_v14 = vpop.eup %5238 }
 0x982   : > { %4907 = vmatmul.mubr.msk.bf16.vlgmr.msra.gmra.mxu1 %vm591_vm2, %v2841_v36  ;;  %v2834_v57 = vmul.f32 %v5239_v14, %v6068_v25 }
 0x983   : > { %4917 = vmatpush3.bf16.msra.mxu1 %v3092_v40  ;;  %4918 = vmatprep.mubr.msk.bf16.mxu1 %vm5296_vm1, %v5295_v48 }
 0x984   : > { %v2842_v8 = vpack.c.bf16 %v2834_v57, %v2834_v57  ;;  %4928 = vmatprep.subr.bf16.mxu1 %v5295_v48 }
 0x986   : > { %4913 = vmatmul.mubr.msk.bf16.vlgmr.msra.gmra.mxu0 %vm591_vm2, %v2842_v8 }
 0x987   : > { %4923 = vmatpush3.bf16.msra.mxu0 %v3140_v52  ;;  %4924 = vmatprep.mubr.msk.bf16.mxu0 %vm5296_vm1, %v5295_v48 }
 0x988   : > { %4934 = vmatprep.subr.bf16.mxu0 %v5295_v48 }
 0x9a4   : > { %v2815_v25 = vpop.xlane.xlu1 %2814 }
 0x9a5   : > { %5240 = vrcp.f32 %v2815_v25 }
 0x9a8   : > { %v2818_v51 = vpop.xlane.xlu0 %2817  ;;  %v3283_v34 = vpop.permute.xlu1 %3282 }
 0x9a9   : > { %5242 = vrcp.f32 %v2818_v51  ;;  %v3288_v57 = vsel %vm591_vm2, %v3283_v34, 0 }
 0x9ac   : > { %v3233_v11 = vpop.permute.xlu0 %3232 }
 0x9ad   : > { %v3238_v44 = vsel %vm591_vm2, %v3233_v11, 0 }
 0x9b0   : > { %v3231_v15 = vpop.permute.xlu0 %3230 }
 0x9b2   : > { %v5241_v26 = vpop.eup %5240 }
 0x9b3   : > { %v2835_v23 = vmul.f32 %v5241_v26, %v6077_v0 }
 0x9b4   : > { %v3333_v19 = vpop.permute.xlu0 %3332 }
 0x9b5   : > { %v2843_v18 = vpack.c.bf16 %v2835_v23, %v2835_v23 }
 0x9b6   : > { %v5243_v9 = vpop.eup %5242 }
 0x9b7   : > { %4919 = vmatmul.mubr.msk.bf16.vlgmr.msra.gmra.mxu1 %vm591_vm2, %v2843_v18  ;;  %v2836_v20 = vmul.f32 %v5243_v9, %v6081_v53  ;;  %v3338_v53 = vsel %vm591_vm2, %v3333_v19, 0 }
 0x9b8   : > { %4929 = vmatpush3.bf16.msra.mxu1 %v3188_v27  ;;  %4930 = vmatprep.mubr.msk.bf16.mxu1 %vm5296_vm1, %v5295_v48  ;;  %v3331_v0 = vpop.permute.xlu0 %3330 }
 0x9b9   : > { %v2844_v33 = vpack.c.bf16 %v2836_v20, %v2836_v20  ;;  %4940 = vmatprep.subr.bf16.mxu1 %v5295_v48 }
 0x9bb   : > { %4925 = vmatmul.mubr.msk.bf16.vlgmr.msra.gmra.mxu0 %vm591_vm2, %v2844_v33 }
 0x9bc   : > { %4935 = vmatpush3.bf16.xpose.msra.mxu0 %v3238_v44  ;;  %4936 = vmatprep.mubr.msk.bf16.mxu0 %vm5296_vm1, %v5295_v48  ;;  %v3433_v39 = vpop.permute.xlu0 %3432 }
 0x9bd   : > { %4946 = vmatprep.subr.bf16.mxu0 %v5295_v48  ;;  %v3438_v29 = vsel %vm591_vm2, %v3433_v39, 0 }
 0x9c0   : > { %v3431_v21 = vpop.permute.xlu0 %3430 }
 0x9c3   : > { %4937 = vmatmul.mubr.msk.bf16.vlgmr.msra.gmra.mxu0 %vm591_vm2, %v3231_v15 }
 0x9c4   : > { %4947 = vmatpush3.bf16.xpose.msra.mxu0 %v3338_v53  ;;  %4948 = vmatprep.mubr.msk.bf16.mxu0 %vm5296_vm1, %v5295_v48  ;;  %v3533_v61 = vpop.permute.xlu0 %3532 }
 0x9c5   : > { %4958 = vmatprep.subr.bf16.mxu0 %v5295_v48  ;;  %v3538_v5 = vsel %vm591_vm2, %v3533_v61, 0 }
 0x9c8   : > { %v3531_v43 = vpop.permute.xlu0 %3530 }
 0x9cb   : > { %4949 = vmatmul.mubr.msk.bf16.vlgmr.msra.gmra.mxu0 %vm591_vm2, %v3331_v0 }
 0x9cc   : > { %4959 = vmatpush3.bf16.xpose.msra.mxu0 %v3438_v29  ;;  %4960 = vmatprep.mubr.msk.bf16.mxu0 %vm5296_vm1, %v5295_v48 }
 0x9cd   : > { %4970 = vmatprep.subr.bf16.mxu0 %v5295_v48 }
 0x9d3   : > { %4961 = vmatmul.mubr.msk.bf16.vlgmr.msra.gmra.mxu0 %vm591_vm2, %v3431_v21 }
 0x9d4   : > { %4971 = vmatpush3.bf16.xpose.msra.mxu0 %v3538_v5  ;;  %4972 = vmatprep.mubr.msk.bf16.mxu0 %vm5296_vm1, %v5295_v48 }
 0x9d5   : > { %4982 = vmatprep.subr.bf16.mxu0 %v5295_v48 }
 0x9d9   : > { %v2821_v42 = vpop.xlane.xlu1 %2820 }
 0x9da   : > { %5244 = vrcp.f32 %v2821_v42 }
 0x9db   : > { %4973 = vmatmul.mubr.msk.bf16.vlgmr.msra.gmra.mxu0 %vm591_vm2, %v3531_v43 }
 0x9dc   : > { %4984 = vmatprep.mubr.msk.bf16.mxu0 %vm5296_vm1, %v5295_v48 }
 0x9dd   : > { %v3281_v38 = vpop.permute.xlu1 %3280 }
 0x9e1   : > { %v3383_v14 = vpop.permute.xlu1 %3382 }
 0x9e2   : > { %v3388_v8 = vsel %vm591_vm2, %v3383_v14, 0 }
 0x9e5   : > { %v3381_v22 = vpop.permute.xlu1 %3380 }
 0x9e7   : > { %v5245_v4 = vpop.eup %5244 }
 0x9e8   : > { %v2837_v36 = vmul.f32 %v5245_v4, %v6107_v24 }
 0x9e9   : > { %v3483_v52 = vpop.permute.xlu1 %3482 }
 0x9ea   : > { %v2845_v40 = vpack.c.bf16 %v2837_v36, %v2837_v36  ;;  %v3488_v6 = vsel %vm591_vm2, %v3483_v52, 0 }
 0x9ec   : > { %4931 = vmatmul.mubr.msk.bf16.vlgmr.msra.gmra.mxu1 %vm591_vm2, %v2845_v40 }
 0x9ed   : > { %4941 = vmatpush3.bf16.xpose.msra.mxu1 %v3288_v57  ;;  %4942 = vmatprep.mubr.msk.bf16.mxu1 %vm5296_vm1, %v5295_v48  ;;  %v3481_v24 = vpop.permute.xlu1 %3480 }
 0x9ee   : > { %4952 = vmatprep.subr.bf16.mxu1 %v5295_v48 }
 0x9f1   : > { %v3583_v25 = vpop.permute.xlu1 %3582 }
 0x9f2   : > { %v3588_v51 = vsel %vm591_vm2, %v3583_v25, 0 }
 0x9f4   : > { %4943 = vmatmul.mubr.msk.bf16.vlgmr.msra.gmra.mxu1 %vm591_vm2, %v3281_v38 }
 0x9f5   : > { %4953 = vmatpush3.bf16.xpose.msra.mxu1 %v3388_v8  ;;  %4954 = vmatprep.mubr.msk.bf16.mxu1 %vm5296_vm1, %v5295_v48  ;;  %v3581_v26 = vpop.permute.xlu1 %3580 }
 0x9f6   : > { %4964 = vmatprep.subr.bf16.mxu1 %v5295_v48 }
 0x9fc   : > { %4955 = vmatmul.mubr.msk.bf16.vlgmr.msra.gmra.mxu1 %vm591_vm2, %v3381_v22 }
 0x9fd   : > { %4965 = vmatpush3.bf16.xpose.msra.mxu1 %v3488_v6  ;;  %4966 = vmatprep.mubr.msk.bf16.mxu1 %vm5296_vm1, %v5295_v48 }
 0x9fe   : > { %4976 = vmatprep.subr.bf16.mxu1 %v5295_v48 }
 0xa04   : > { %4967 = vmatmul.mubr.msk.bf16.vlgmr.msra.gmra.mxu1 %vm591_vm2, %v3481_v24 }
 0xa05   : > { %4977 = vmatpush3.bf16.xpose.msra.mxu1 %v3588_v51  ;;  %4978 = vmatprep.mubr.msk.bf16.mxu1 %vm5296_vm1, %v5295_v48 }
 0xa06   : > { %4988 = vmatprep.subr.bf16.mxu1 %v5295_v48 }
 0xa09   : > { %v6207_v11 = vpop.f32.mrf.mxu0 }
 0xa0b   : > { %v4890_v15 = vpop.f32.mrf.mxu0 }
 0xa0c   : > { %4979 = vmatmul.mubr.msk.bf16.vlgmr.msra.gmra.mxu1 %vm591_vm2, %v3581_v26 }
 0xa0d   : > { %v2891_v23 = vpop.f32.mrf.mxu0  ;;  %4990 = vmatprep.mubr.msk.bf16.mxu1 %vm5296_vm1, %v5295_v48 }
 0xa0f   : > { %v4891_v18 = vpop.f32.mrf.mxu0 }
 0xa11   : > { %v6212_v9 = vpop.f32.mrf.mxu0 }
 0xa13   : > { %v4902_v27 = vpop.f32.mrf.mxu0 }
 0xa15   : > { %v2987_v20 = vpop.f32.mrf.mxu0 }
 0xa17   : > { %v4903_v19 = vpop.f32.mrf.mxu0 }
 0xa3a   : > { %v6214_v33 = vpop.f32.mrf.mxu1 }
 0xa3b   : > { %v5080_v44 = vpack.i.bf16 %v6214_v33, %v6207_v11 }
 0xa3c   : > { %v4896_v0 = vpop.f32.mrf.mxu1 }
 0xa3e   : > { %v2939_v53 = vpop.f32.mrf.mxu1 }
 0xa40   : > { %v4897_v39 = vpop.f32.mrf.mxu1 }
 0xa42   : > { %v6218_v21 = vpop.f32.mrf.mxu1 }
 0xa43   : > { %v5085_v29 = vpack.i.bf16 %v6218_v21, %v6212_v9 }
 0xa44   : > { %v4908_v61 = vpop.f32.mrf.mxu1 }
 0xa46   : > { %v3035_v5 = vpop.f32.mrf.mxu1  ;;  %v6222_v34 = vpop.f32.mrf.mxu0 }
 0xa48   : > { %v4909_v42 = vpop.f32.mrf.mxu1  ;;  %v4914_v43 = vpop.f32.mrf.mxu0 }
 0xa4a   : > { %v3083_v38 = vpop.f32.mrf.mxu0 }
 0xa4c   : > { %v4915_v4 = vpop.f32.mrf.mxu0 }
 0xa77   : > { %v6224_v36 = vpop.f32.mrf.mxu1 }
 0xa78   : > { %v5105_v14 = vpack.i.bf16 %v6224_v36, %v6222_v34 }
 0xa79   : > { %v4920_v40 = vpop.f32.mrf.mxu1 }
 0xa7b   : > { %v3131_v57 = vpop.f32.mrf.mxu1  ;;  %v6228_v22 = vpop.f32.mrf.mxu0 }
 0xa7d   : > { %v4921_v8 = vpop.f32.mrf.mxu1  ;;  %v4926_v52 = vpop.f32.mrf.mxu0 }
 0xa7f   : > { %v3179_v24 = vpop.f32.mrf.mxu0 }
 0xa81   : > { %v4927_v6 = vpop.f32.mrf.mxu0 }
 0xa83   : > { %v3274_v25 = vpop.f32.mrf.mxu0 }
 0xa84   : > { %v6231_v51 = vadd.f32 %v6014_v28, %v3274_v25 }
 0xa85   : > { %v4938_v26 = vpop.f32.mrf.mxu0 }
 0xa86   : > { %v3630_v15 = vsel %vm591_vm2, %v6231_v51, -inf }
 0xa87   : > { %3631 = vmax.xlane.f32.xlu0 %v3630_v15  ;;  %v3277_v23 = vpop.f32.mrf.mxu0 }
 0xa89   : > { %v4939_v18 = vpop.f32.mrf.mxu0 }
 0xa8b   : > { %v3374_v27 = vpop.f32.mrf.mxu0 }
 0xa8c   : > { %v6236_v20 = vadd.f32 %v6014_v28, %v3374_v27 }
 0xa8d   : > { %v4950_v19 = vpop.f32.mrf.mxu0 }
 0xa8e   : > { %v3636_v0 = vsel %vm591_vm2, %v6236_v20, -inf }
 0xa8f   : > { %3637 = vmax.xlane.f32.xlu0 %v3636_v0  ;;  %v3377_v53 = vpop.f32.mrf.mxu0 }
 0xa91   : > { %v4951_v39 = vpop.f32.mrf.mxu0 }
 0xa93   : > { %v3474_v61 = vpop.f32.mrf.mxu0 }
 0xa95   : > { %v4962_v5 = vpop.f32.mrf.mxu0 }
 0xa96   : > { %v3475_v5 = vadd.f32 %v6014_v28, %v3474_v61 }
 0xa97   : > { %v3477_v42 = vpop.f32.mrf.mxu0 }
 0xa99   : > { %v4963_v43 = vpop.f32.mrf.mxu0 }
 0xa9b   : > { %v3574_v38 = vpop.f32.mrf.mxu0 }
 0xa9d   : > { %v4974_v4 = vpop.f32.mrf.mxu0 }
 0xa9f   : > { %v3577_v40 = vpop.f32.mrf.mxu0 }
 0xaa0   : > { %v3575_v40 = vadd.f32 %v6014_v28, %v3574_v38 }
 0xaa1   : > { %v4975_v57 = vpop.f32.mrf.mxu0 }
 0xaa2   : > { %v3642_v57 = vsel %vm591_vm2, %v3475_v5, -inf  ;;  %v3648_v61 = vsel %vm591_vm2, %v3575_v40, -inf }
 0xaac   : > { %v6240_v8 = vpop.f32.mrf.mxu1 }
 0xaad   : > { %v5115_v52 = vpack.i.bf16 %v6240_v8, %v6228_v22 }
 0xaae   : > { %v4932_v24 = vpop.f32.mrf.mxu1 }
 0xab0   : > { %v3227_v6 = vpop.f32.mrf.mxu1 }
 0xab2   : > { %v4933_v25 = vpop.f32.mrf.mxu1 }
 0xab4   : > { %v3324_v26 = vpop.f32.mrf.mxu1 }
 0xab5   : > { %v3325_v15 = vadd.f32 %v6014_v28, %v3324_v26 }
 0xab6   : > { %v4944_v23 = vpop.f32.mrf.mxu1 }
 0xab7   : > { %v3633_v18 = vsel %vm591_vm2, %v3325_v15, -inf }
 0xab8   : > { %3634 = vmax.xlane.f32.xlu1 %v3633_v18  ;;  %v3327_v27 = vpop.f32.mrf.mxu1 }
 0xaba   : > { %v4945_v19 = vpop.f32.mrf.mxu1 }
 0xabc   : > { %v3424_v0 = vpop.f32.mrf.mxu1 }
 0xabd   : > { %v6247_v53 = vadd.f32 %v6014_v28, %v3424_v0 }
 0xabe   : > { %v4956_v39 = vpop.f32.mrf.mxu1 }
 0xabf   : > { %v3639_v42 = vsel %vm591_vm2, %v6247_v53, -inf }
 0xac0   : > { %v3427_v43 = vpop.f32.mrf.mxu1  ;;  %3640 = vmax.xlane.f32.xlu0 %v3639_v42 }
 0xac2   : > { %v4957_v4 = vpop.f32.mrf.mxu1 }
 0xac4   : > { %v3524_v24 = vpop.f32.mrf.mxu1  ;;  %3643 = vmax.xlane.f32.xlu0 %v3642_v57 }
 0xac5   : > { %v6255_v6 = vadd.f32 %v6014_v28, %v3524_v24 }
 0xac6   : > { %v4968_v25 = vpop.f32.mrf.mxu1 }
 0xac7   : > { %v3645_v26 = vsel %vm591_vm2, %v6255_v6, -inf }
 0xac8   : > { %3646 = vmax.xlane.f32.xlu1 %v3645_v26  ;;  %v3527_v23 = vpop.f32.mrf.mxu1  ;;  %3649 = vmax.xlane.f32.xlu0 %v3648_v61 }
 0xaca   : > { %v4969_v18 = vpop.f32.mrf.mxu1 }
 0xacc   : > { %v3624_v27 = vpop.f32.mrf.mxu1 }
 0xacd   : > { %v6267_v39 = vadd.f32 %v6014_v28, %v3624_v27 }
 0xace   : > { %v4980_v19 = vpop.f32.mrf.mxu1 }
 0xacf   : > { %v3651_v42 = vsel %vm591_vm2, %v6267_v39, -inf }
 0xad0   : > { %v3627_v38 = vpop.f32.mrf.mxu1 }
 0xad2   : > { %v4981_v0 = vpop.f32.mrf.mxu1 }
 0xad9   : > { %3774 = vrot.lane.b32.xlu1 %v5466_v3, %s5307_s18 }
 0xadd   : > { %3822 = vrot.lane.b32.xlu1 %v5469_v7, %s5307_s18 }
 0xade   : > { %3726 = vrot.lane.b32.xlu0 %v5463_v62, %s5307_s18 }
 0xb01   : > { %3652 = vmax.xlane.f32.xlu1 %v3651_v42 }
 0xb10   : > { %v3632_v43 = vpop.xlane.xlu0 %3631 }
 0xb11   : > { %v3654_v4 = vsub.f32 %v6231_v51, %v3632_v43 }
 0xb12   : > { %3870 = vrot.lane.b32.xlu1 %v5477_v12, %s5307_s18 }
 0xb13   : > { %v3662_v3 = vmul.f32 1.442695, %v3654_v4 }
 0xb15   : > { %5246 = vpow2.f32 %v3662_v3 }
 0xb18   : > { %v3638_v57 = vpop.xlane.xlu0 %3637 }
 0xb19   : > { %v3656_v7 = vsub.f32 %v6236_v20, %v3638_v57 }
 0xb1b   : > { %v3666_v24 = vmul.f32 1.442695, %v3656_v7 }
 0xb1d   : > { %5248 = vpow2.f32 %v3666_v24 }
 0xb22   : > { %v6275_v62 = vpop.eup %5246 }
 0xb23   : > { %v3678_v28 = vsel %vm591_vm2, %v6275_v62, 0.0 }
 0xb24   : > { %3679 = vadd.xlane.f32.xlu0 %v3678_v28 }
 0xb2a   : > { %v6279_v25 = vpop.eup %5248 }
 0xb2b   : > { %v3684_v51 = vsel %vm591_vm2, %v6279_v25, 0.0 }
 0xb2c   : > { %3685 = vadd.xlane.f32.xlu0 %v3684_v51 }
 0xb41   : > { %v3635_v12 = vpop.xlane.xlu1 %3634 }
 0xb42   : > { %v3655_v26 = vsub.f32 %v3325_v15, %v3635_v12  ;;  %3918 = vrot.lane.b32.xlu0 %v5473_v10, %s5307_s18 }
 0xb44   : > { %v3664_v20 = vmul.f32 1.442695, %v3655_v26 }
 0xb46   : > { %5250 = vpow2.f32 %v3664_v20 }
 0xb49   : > { %v3641_v61 = vpop.xlane.xlu0 %3640 }
 0xb4a   : > { %v3657_v28 = vsub.f32 %v6247_v53, %v3641_v61 }
 0xb4c   : > { %v3668_v51 = vmul.f32 1.442695, %v3657_v28 }
 0xb4d   : > { %v3644_v23 = vpop.xlane.xlu0 %3643 }
 0xb4e   : > { %v3658_v18 = vsub.f32 %v3475_v5, %v3644_v23 }
 0xb50   : > { %v3670_v27 = vmul.f32 1.442695, %v3658_v18 }
 0xb51   : > { %v3647_v19 = vpop.xlane.xlu1 %3646  ;;  %v3650_v38 = vpop.xlane.xlu0 %3649 }
 0xb52   : > { %5252 = vpow2.f32 %v3670_v27  ;;  %v3660_v0 = vsub.f32 %v3575_v40, %v3650_v38  ;;  %v3659_v12 = vsub.f32 %v6255_v6, %v3647_v19 }
 0xb53   : > { %v6285_v42 = vpop.eup %5250 }
 0xb54   : > { %v3674_v43 = vmul.f32 1.442695, %v3660_v0  ;;  %v3681_v4 = vsel %vm591_vm2, %v6285_v42, 0.0  ;;  %v3672_v26 = vmul.f32 1.442695, %v3659_v12 }
 0xb55   : > { %3682 = vadd.xlane.f32.xlu1 %v3681_v4  ;;  %v3775_v15 = vpop.permute.xlu1 %3774  ;;  %v3727_v3 = vpop.permute.xlu0 %3726 }
 0xb56   : > { %v3780_v10 = vsel %vm1082_vm3, %v3775_v15, 0  ;;  %v3732_v57 = vsel %vm1082_vm3, %v3727_v3, 0  ;;  %5254 = vpow2.f32 %v3674_v43 }
 0xb57   : > { %4983 = vmatpush3.bf16.msra.mxu0 %v3732_v57  ;;  %4989 = vmatpush3.bf16.msra.mxu1 %v3780_v10  ;;  %5256 = vpow2.f32 %v3668_v51 }
 0xb58   : > { %4994 = vmatprep.subr.bf16.mxu0 %v5295_v48  ;;  %5000 = vmatprep.subr.bf16.mxu1 %v5295_v48  ;;  %5258 = vpow2.f32 %v3672_v26 }
 0xb59   : > { %v3823_v53 = vpop.permute.xlu1 %3822 }
 0xb5f   : > { %v6293_v5 = vpop.eup %5252 }
 0xb60   : > { %v3690_v40 = vsel %vm591_vm2, %v6293_v5, 0.0 }
 0xb61   : > { %3691 = vadd.xlane.f32.xlu0 %v3690_v40 }
 0xb63   : > { %v6297_v7 = vpop.eup %5254 }
 0xb64   : > { %v3696_v24 = vsel %vm591_vm2, %v6297_v7, 0.0 }
 0xb65   : > { %3697 = vadd.xlane.f32.xlu0 %v3696_v24 }
 0xb66   : > { %3966 = vrot.lane.b32.xlu1 %v5487_v16, %s5307_s18  ;;  %v6314_v16 = vpop.eup %5256 }
 0xb67   : > { %v6321_v6 = vpop.eup %5258 }
 0xb68   : > { %v3693_v11 = vsel %vm591_vm2, %v6321_v6, 0.0 }
 0xb7b   : > { %4014 = vrot.lane.b32.xlu0 %v5481_v13, %s5307_s18  ;;  %v3687_v13 = vsel %vm591_vm2, %v6314_v16, 0.0 }
 0xb7f   : > { %5071 = vrot.lane.b32.xlu0 %v5070_v37, %s5308_s19 }
 0xb83   : > { %5081 = vrot.lane.b32.xlu0 %v5080_v44, %s5309_s20 }
 0xb87   : > { %5091 = vrot.lane.b32.xlu0 %v5090_v63, %s5308_s19 }
 0xb8a   : > { %v3653_v46 = vpop.xlane.xlu1 %3652  ;;  %3688 = vadd.xlane.f32.xlu1 %v3687_v13 }
 0xb8b   : > { %v3661_v1 = vsub.f32 %v6267_v39, %v3653_v46 }
 0xb8d   : > { %v3676_v37 = vmul.f32 1.442695, %v3661_v1 }
 0xb8e   : > { %3694 = vadd.xlane.f32.xlu1 %v3693_v11  ;;  %v3871_v56 = vpop.permute.xlu1 %3870 }
 0xb8f   : > { %5260 = vpow2.f32 %v3676_v37  ;;  %v3876_v23 = vsel %vm1082_vm3, %v3871_v56, 0 }
 0xb9c   : > { %v6326_v33 = vpop.eup %5260 }
 0xb9d   : > { %v3699_v55 = vsel %vm591_vm2, %v6326_v33, 0.0 }
 0xb9e   : > { %3700 = vadd.xlane.f32.xlu1 %v3699_v55 }
 0xbad   : > { %v3680_v59 = vpop.xlane.xlu0 %3679 }
 0xbae   : > { %5262 = vrcp.f32 %v3680_v59 }
 0xbaf   : > { %4062 = vrot.lane.b32.xlu1 %v5494_v17, %s5307_s18  ;;  %v3828_v17 = vsel %vm1082_vm3, %v3823_v53, 0 }
 0xbb3   : > { %5076 = vrot.lane.b32.xlu1 %v5075_v54, %s5308_s19 }
 0xbb5   : > { %v3686_v63 = vpop.xlane.xlu0 %3685 }
 0xbb6   : > { %5264 = vrcp.f32 %v3686_v63 }
 0xbb7   : > { %5086 = vrot.lane.b32.xlu1 %v5085_v29, %s5309_s20 }
 0xbb9   : > { %v3919_v54 = vpop.permute.xlu0 %3918 }
 0xbba   : > { %v3924_v50 = vsel %vm1082_vm3, %v3919_v54, 0 }
 0xbbb   : > { %v5263_v44 = vpop.eup %5262  ;;  %5096 = vrot.lane.b32.xlu1 %v5095_v49, %s5308_s19 }
 0xbbc   : > { %v3710_v39 = vmul.f32 %v5263_v44, %v6275_v62 }
 0xbbe   : > { %v3718_v20 = vpack.c.bf16 %v3710_v39, %v3710_v39  ;;  %v5132_v39 = vld [vmem:[%s6476_s5 + $0x8] sm:$0xff]  }
 0xbc0   : > { %4985 = vmatmul.mubr.msk.bf16.vlgmr.msra.gmra.mxu0 %vm591_vm2, %v3718_v20 }
 0xbc1   : > { %4995 = vmatpush3.bf16.msra.mxu0 %v3828_v17  ;;  %4996 = vmatprep.mubr.msk.bf16.mxu0 %vm5296_vm1, %v5295_v48 }
 0xbc2   : > { %5006 = vmatprep.subr.bf16.mxu0 %v5295_v48 }
 0xbc3   : > { %v5265_v30 = vpop.eup %5264 }
 0xbc4   : > { %v3712_v2 = vmul.f32 %v5265_v30, %v6279_v25 }
 0xbc6   : > { %v3720_v9 = vpack.c.bf16 %v3712_v2, %v3712_v2 }
 0xbc8   : > { %4997 = vmatmul.mubr.msk.bf16.vlgmr.msra.gmra.mxu0 %vm591_vm2, %v3720_v9 }
 0xbc9   : > { %5007 = vmatpush3.bf16.msra.mxu0 %v3924_v50  ;;  %5008 = vmatprep.mubr.msk.bf16.mxu0 %vm5296_vm1, %v5295_v48 }
 0xbca   : > { %5018 = vmatprep.subr.bf16.mxu0 %v5295_v48 }
 0xbde   : > { %v3683_v49 = vpop.xlane.xlu1 %3682 }
 0xbdf   : > { %5266 = vrcp.f32 %v3683_v49 }
 0xbe2   : > { %v3967_v15 = vpop.permute.xlu1 %3966 }
 0xbe3   : > { %v3972_v28 = vsel %vm1082_vm3, %v3967_v15, 0 }
 0xbea   : > { %v3692_v21 = vpop.xlane.xlu0 %3691 }
 0xbeb   : > { %5268 = vrcp.f32 %v3692_v21 }
 0xbec   : > { %v5267_v29 = vpop.eup %5266 }
 0xbed   : > { %v3711_v62 = vmul.f32 %v5267_v29, %v6285_v42 }
 0xbee   : > { %v3698_v61 = vpop.xlane.xlu0 %3697 }
 0xbef   : > { %v3719_v25 = vpack.c.bf16 %v3711_v62, %v3711_v62  ;;  %5270 = vrcp.f32 %v3698_v61  ;;  %v5133_v62 = vld [vmem:[%s6476_s5] sm:$0xff]  }
 0xbf1   : > { %4991 = vmatmul.mubr.msk.bf16.vlgmr.msra.gmra.mxu1 %vm591_vm2, %v3719_v25 }
 0xbf2   : > { %5001 = vmatpush3.bf16.msra.mxu1 %v3876_v23  ;;  %5002 = vmatprep.mubr.msk.bf16.mxu1 %vm5296_vm1, %v5295_v48  ;;  %v4015_v19 = vpop.permute.xlu0 %4014 }
 0xbf3   : > { %5012 = vmatprep.subr.bf16.mxu1 %v5295_v48  ;;  %v4020_v42 = vsel %vm1082_vm3, %v4015_v19, 0 }
 0xbf8   : > { %v5269_v18 = vpop.eup %5268 }
 0xbf9   : > { %v3714_v27 = vmul.f32 %v5269_v18, %v6293_v5 }
 0xbfb   : > { %v3722_v38 = vpack.c.bf16 %v3714_v27, %v3714_v27 }
 0xbfc   : > { %v5271_v0 = vpop.eup %5270 }
 0xbfd   : > { %5009 = vmatmul.mubr.msk.bf16.vlgmr.msra.gmra.mxu0 %vm591_vm2, %v3722_v38  ;;  %v3716_v43 = vmul.f32 %v5271_v0, %v6297_v7 }
 0xbfe   : > { %5019 = vmatpush3.bf16.msra.mxu0 %v4020_v42  ;;  %5020 = vmatprep.mubr.msk.bf16.mxu0 %vm5296_vm1, %v5295_v48 }
 0xbff   : > { %v3724_v4 = vpack.c.bf16 %v3716_v43, %v3716_v43  ;;  %5030 = vmatprep.subr.bf16.mxu0 %v5132_v39 }
 0xc05   : > { %5021 = vmatmul.mubr.msk.bf16.vlgmr.msra.gmra.mxu0 %vm591_vm2, %v3724_v4 }
 0xc06   : > { %5031 = vmatpush3.bf16.msra.mxu0 %v5132_v39 }
 0xc07   : > { %5032 = vmatprep.subr.bf16.mxu0 %v5133_v62 }
 0xc0a   : > { %5033 = vmatpush3.bf16.msra.mxu0 %v5133_v62 }
 0xc13   : > { %v3689_v3 = vpop.xlane.xlu1 %3688 }
 0xc14   : > { %5272 = vrcp.f32 %v3689_v3  ;;  %v5072_v3 = vpop.permute.xlu0 %5071 }
 0xc15   : > { %v5073_v22 = vunpack.i.l.bf16 %v5072_v3 }
 0xc17   : > { %v3695_v10 = vpop.xlane.xlu1 %3694 }
 0xc18   : > { %5274 = vrcp.f32 %v3695_v10  ;;  %v5082_v10 = vpop.permute.xlu0 %5081 }
 0xc19   : > { %v5084_v8 = vunpack.i.h.bf16 %v5082_v10 }
 0xc21   : > { %v5273_v57 = vpop.eup %5272 }
 0xc22   : > { %v3713_v5 = vmul.f32 %v5273_v57, %v6314_v16  ;;  %v5092_v57 = vpop.permute.xlu0 %5091 }
 0xc24   : > { %v3721_v40 = vpack.c.bf16 %v3713_v5, %v3713_v5  ;;  %v5074_v5 = vunpack.i.h.bf16 %v5072_v3 }
 0xc25   : > { %v5275_v24 = vpop.eup %5274 }
 0xc26   : > { %5003 = vmatmul.mubr.msk.bf16.vlgmr.msra.gmra.mxu1 %vm591_vm2, %v3721_v40  ;;  %v3715_v7 = vmul.f32 %v5275_v24, %v6321_v6  ;;  %v4207_v24 = vsel %vm591_vm2, %v5770_v31, %v5074_v5 }
 0xc27   : > { %5013 = vmatpush3.bf16.msra.mxu1 %v3972_v28  ;;  %v3701_v51 = vpop.xlane.xlu1 %3700  ;;  %5014 = vmatprep.mubr.msk.bf16.mxu1 %vm5296_vm1, %v5295_v48  ;;  %v4206_v28 = vsel %vm591_vm2, %v5772_v32, %v5073_v22  ;;  %v5279_v22 = vld [vmem:[%s5372_s11 + $0x10] sm:$0xff] }
 0xc28   : > { %5276 = vrcp.f32 %v3701_v51  ;;  %5024 = vmatprep.subr.bf16.mxu1 %v5295_v48  ;;  %v3723_v26 = vpack.c.bf16 %v3715_v7, %v3715_v7 }
 0xc2b   : > { %v4063_v12 = vpop.permute.xlu1 %4062 }
 0xc2c   : > { %v4068_v16 = vsel %vm1082_vm3, %v4063_v12, 0 }
 0xc2e   : > { %5015 = vmatmul.mubr.msk.bf16.vlgmr.msra.gmra.mxu1 %vm591_vm2, %v3723_v26  ;;  %v4216_v26 = vsel %vm4214_vm4, %v4207_v24, %v5084_v8  ;;  %v5280_v24 = vld [vmem:[%s5372_s11] sm:$0xff] }
 0xc2f   : > { %5025 = vmatpush3.bf16.msra.mxu1 %v4068_v16  ;;  %5026 = vmatprep.mubr.msk.bf16.mxu1 %vm5296_vm1, %v5295_v48 }
 0xc35   : > { %v5277_v53 = vpop.eup %5276 }
 0xc36   : > { %v3717_v13 = vmul.f32 %v5277_v53, %v6326_v33 }
 0xc38   : > { %v3725_v46 = vpack.c.bf16 %v3717_v13, %v3717_v13 }
 0xc3a   : > { %5027 = vmatmul.mubr.msk.bf16.vlgmr.msra.gmra.mxu1 %vm591_vm2, %v3725_v46  ;;  %v5077_v46 = vpop.permute.xlu1 %5076 }
 0xc3b   : > { %v5079_v31 = vunpack.i.h.bf16 %v5077_v46 }
 0xc80   : > { %v3768_v6 = vpop.f32.mrf.mxu0 }
 0xc82   : > { %v4986_v1 = vpop.f32.mrf.mxu0 }
 0xc84   : > { %v3771_v37 = vpop.f32.mrf.mxu0 }
 0xc85   : > { %v5078_v37 = vunpack.i.l.bf16 %v5077_v46 }
 0xc86   : > { %v4987_v11 = vpop.f32.mrf.mxu0 }
 0xc88   : > { %v3864_v55 = vpop.f32.mrf.mxu0 }
 0xc8a   : > { %v4998_v59 = vpop.f32.mrf.mxu0 }
 0xc8b   : > { %v4209_v59 = vsel %vm591_vm2, %v5776_v45, %v5079_v31  ;;  %v5283_v31 = vld [vmem:[%s5372_s11 + $0x30] sm:$0xff] }
 0xc8c   : > { %v3867_v63 = vpop.f32.mrf.mxu0 }
 0xc8d   : > { %v4208_v63 = vsel %vm591_vm2, %v5774_v41, %v5078_v37 }
 0xc8e   : > { %v4999_v44 = vpop.f32.mrf.mxu0 }
 0xcb1   : > { %v3816_v48 = vpop.f32.mrf.mxu1 }
 0xcb2   : > { %v5100_v20 = vpack.i.bf16 %v3816_v48, %v3768_v6  ;;  %v5087_v6 = vpop.permute.xlu1 %5086 }
 0xcb3   : > { %v4992_v33 = vpop.f32.mrf.mxu1  ;;  %v5089_v11 = vunpack.i.h.bf16 %v5087_v6  ;;  %v5088_v32 = vunpack.i.l.bf16 %v5087_v6 }
 0xcb4   : > { %5101 = vrot.lane.b32.xlu0 %v5100_v20, %s5310_s23 }
 0xcb5   : > { %v3819_v17 = vpop.f32.mrf.mxu1  ;;  %v4217_v48 = vsel %vm4214_vm4, %v4208_v63, %v5088_v32  ;;  %v4218_v20 = vsel %vm4214_vm4, %v4209_v59, %v5089_v11 }
 0xcb6   : > { %v5097_v1 = vpop.permute.xlu1 %5096 }
 0xcb7   : > { %v4993_v30 = vpop.f32.mrf.mxu1 }
 0xcb8   : > { %5106 = vrot.lane.b32.xlu0 %v5105_v14, %s5309_s20 }
 0xcbd   : > { %v3960_v2 = vpop.f32.mrf.mxu0 }
 0xcbf   : > { %v5010_v54 = vpop.f32.mrf.mxu0 }
 0xcc0   : > { %v5094_v54 = vunpack.i.h.bf16 %v5092_v57 }
 0xcc1   : > { %v3963_v9 = vpop.f32.mrf.mxu0 }
 0xcc2   : > { %v5093_v9 = vunpack.i.l.bf16 %v5092_v57  ;;  %v4211_v41 = vsel %vm591_vm2, %v5780_v58, %v5094_v54 }
 0xcc3   : > { %v5011_v50 = vpop.f32.mrf.mxu0 }
 0xcc5   : > { %v4056_v56 = vpop.f32.mrf.mxu0 }
 0xcc7   : > { %v5022_v49 = vpop.f32.mrf.mxu0 }
 0xcc8   : > { %v4210_v49 = vsel %vm591_vm2, %v5778_v47, %v5093_v9 }
 0xcc9   : > { %v4059_v21 = vpop.f32.mrf.mxu0 }
 0xccb   : > { %v5023_v29 = vpop.f32.mrf.mxu0 }
 0xce6   : > { %v3912_v25 = vpop.f32.mrf.mxu1 }
 0xce7   : > { %v5110_v61 = vpack.i.bf16 %v3912_v25, %v3864_v55 }
 0xce8   : > { %v5004_v23 = vpop.f32.mrf.mxu1 }
 0xce9   : > { %5111 = vrot.lane.b32.xlu1 %v5110_v61, %s5310_s23 }
 0xcea   : > { %v3915_v34 = vpop.f32.mrf.mxu1 }
 0xcec   : > { %v5005_v36 = vpop.f32.mrf.mxu1 }
 0xced   : > { %5116 = vrot.lane.b32.xlu1 %v5115_v52, %s5309_s20  ;;  %v5083_v52 = vunpack.i.l.bf16 %v5082_v10 }
 0xcee   : > { %v4008_v14 = vpop.f32.mrf.mxu1 }
 0xcef   : > { %v5120_v18 = vpack.i.bf16 %v4008_v14, %v3960_v2  ;;  %v4215_v12 = vsel %vm4214_vm4, %v4206_v28, %v5083_v52  ;;  %v5099_v14 = vunpack.i.h.bf16 %v5097_v1 }
 0xcf0   : > { %v5016_v27 = vpop.f32.mrf.mxu1 }
 0xcf1   : > { %5121 = vrot.lane.b32.xlu0 %v5120_v18, %s5310_s23  ;;  %v5098_v18 = vunpack.i.l.bf16 %v5097_v1 }
 0xcf2   : > { %v4011_v19 = vpop.f32.mrf.mxu1 }
 0xcf3   : > { %v4213_v19 = vsel %vm591_vm2, %v5791_v35, %v5099_v14  ;;  %v4485_v35 = vld [vmem:[%s6477_s6] ss:$0 sm:$0xff] }
 0xcf4   : > { %v5017_v38 = vpop.f32.mrf.mxu1 }
 0xcf5   : > { %v4212_v38 = vsel %vm591_vm2, %v5782_v60, %v5098_v18 }
 0xcfa   : > { %v4104_v0 = vpop.f32.mrf.mxu1 }
 0xcfb   : > { %v5125_v42 = vpack.i.bf16 %v4104_v0, %v4056_v56 }
 0xcfc   : > { %v5028_v43 = vpop.f32.mrf.mxu1 }
 0xcfd   : > { %5126 = vrot.lane.b32.xlu1 %v5125_v42, %s5310_s23 }
 0xcfe   : > { %v4107_v4 = vpop.f32.mrf.mxu1 }
 0xd00   : > { %v5029_v15 = vpop.f32.mrf.mxu1 }
 0xd26   : > { %v5102_v40 = vpop.permute.xlu0 %5101 }
 0xd27   : > { %v5104_v51 = vunpack.i.h.bf16 %v5102_v40  ;;  %v5103_v7 = vunpack.i.l.bf16 %v5102_v40 }
 0xd29   : > { %v4224_v16 = vsel %vm4223_vm5, %v4215_v12, %v5103_v7  ;;  %v4225_v53 = vsel %vm4223_vm5, %v4216_v26, %v5104_v51  ;;  %v5281_v12 = vld [vmem:[%s5372_s11 + $0x18] sm:$0xff] }
 0xd2a   : > { %v4232_v13 = vpack.c.bf16 %v4225_v53, %v4224_v16  ;;  %v5107_v33 = vpop.permute.xlu0 %5106  ;;  %v5282_v53 = vld [vmem:[%s5372_s11 + $0x8] sm:$0xff] }
 0xd2b   : > { %v5109_v50 = vunpack.i.h.bf16 %v5107_v33  ;;  %v5108_v56 = vunpack.i.l.bf16 %v5107_v33  ;;  %v5286_v33 = vld [vmem:[%s5372_s11 + $0x28] sm:$0xff] }
 0xd2c   : > { %5034 = vmatprep.mubr.msk.bf16.mxu0 %vm331_vm0, %v4232_v13 }
 0xd2d   : > { %v4219_v62 = vsel %vm4214_vm4, %v4210_v49, %v5108_v56  ;;  %v4220_v25 = vsel %vm4214_vm4, %v4211_v41, %v5109_v50 }
 0xd5b   : > { %v5112_v55 = vpop.permute.xlu1 %5111 }
 0xd5c   : > { %v5114_v44 = vunpack.i.h.bf16 %v5112_v55  ;;  %v5113_v39 = vunpack.i.l.bf16 %v5112_v55  ;;  %v5284_v55 = vld [vmem:[%s5372_s11 + $0x20] sm:$0xff] }
 0xd5e   : > { %v4227_v17 = vsel %vm4223_vm5, %v4218_v20, %v5114_v44  ;;  %v4226_v30 = vsel %vm4223_vm5, %v4217_v48, %v5113_v39  ;;  %v5285_v39 = vld [vmem:[%s5372_s11 + $0x38] sm:$0xff] }
 0xd5f   : > { %v4233_v2 = vpack.c.bf16 %v4227_v17, %v4226_v30  ;;  %v5117_v36 = vpop.permute.xlu1 %5116 }
 0xd60   : > { %v5119_v58 = vunpack.i.h.bf16 %v5117_v36  ;;  %v5118_v27 = vunpack.i.l.bf16 %v5117_v36 }
 0xd61   : > { %5035 = vmatmul.mubr.msk.bf16.vlgmr.msra.gmra.mxu0 %vm331_vm0, %v4233_v2 }
 0xd62   : > { %v4222_v43 = vsel %vm4214_vm4, %v4213_v19, %v5119_v58  ;;  %v4221_v4 = vsel %vm4214_vm4, %v4212_v38, %v5118_v27 }
 0xd63   : > { %v5122_v45 = vpop.permute.xlu0 %5121 }
 0xd64   : > { %v5124_v21 = vunpack.i.h.bf16 %v5122_v45  ;;  %v5123_v29 = vunpack.i.l.bf16 %v5122_v45 }
 0xd66   : > { %v4228_v61 = vsel %vm4223_vm5, %v4219_v62, %v5123_v29  ;;  %v4229_v23 = vsel %vm4223_vm5, %v4220_v25, %v5124_v21 }
 0xd67   : > { %v4234_v34 = vpack.c.bf16 %v4229_v23, %v4228_v61 }
 0xd69   : > { %5038 = vmatprep.mubr.msk.bf16.mxu0 %vm331_vm0, %v4234_v34 }
 0xd6f   : > { %v5127_v47 = vpop.permute.xlu1 %5126 }
 0xd70   : > { %v5129_v0 = vunpack.i.h.bf16 %v5127_v47  ;;  %v5128_v42 = vunpack.i.l.bf16 %v5127_v47 }
 0xd72   : > { %v4231_v15 = vsel %vm4223_vm5, %v4222_v43, %v5129_v0  ;;  %v4230_v3 = vsel %vm4223_vm5, %v4221_v4, %v5128_v42 }
 0xd73   : > { %v4235_v10 = vpack.c.bf16 %v4231_v15, %v4230_v3 }
 0xd75   : > { %5039 = vmatmul.mubr.msk.bf16.gmra.mxu0 %vm331_vm0, %v4235_v10 }
 0xe21   : > { %v5036_v60 = vpop.f32.mrf.mxu0 }
 0xe22   : > { %v4309_v57 = vadd.f32 %v5036_v60, %v4485_v35 }
 0xe23   : > { %v4300_v5 = vpop.f32.mrf.mxu0 }
 0xe24   : > { %v4333_v8 = vadd.f32 %v5279_v22, %v4309_v57  ;;  %v4301_v52 = vadd.f32 %v4485_v35, %v4300_v5 }
 0xe25   : > { %v5037_v40 = vpop.f32.mrf.mxu0 }
 0xe26   : > { %4341 = vst.msk [vmem:[%s6442_s12 + $0x10] sm:$0xff] %vm331_vm0, %v4333_v8  ;;  %v4331_v28 = vadd.f32 %v5280_v24, %v4301_v52  ;;  %v4312_v51 = vadd.f32 %v5037_v40, %v4485_v35 }
 0xe27   : > { %v4303_v7 = vpop.f32.mrf.mxu0 }
 0xe28   : > { %4339 = vst.msk [vmem:[%s6442_s12] sm:$0xff] %vm331_vm0, %v4331_v28  ;;  %v4334_v26 = vadd.f32 %v5281_v12, %v4312_v51  ;;  %v4304_v16 = vadd.f32 %v4485_v35, %v4303_v7 }
 0xe2a   : > { %4342 = vst.msk [vmem:[%s6442_s12 + $0x18] sm:$0xff] %vm331_vm0, %v4334_v26  ;;  %v4332_v13 = vadd.f32 %v5282_v53, %v4304_v16 }
 0xe2c   : > { %4340 = vst.msk [vmem:[%s6442_s12 + $0x8] sm:$0xff] %vm331_vm0, %v4332_v13 }
 0xe35   : > { %v5040_v46 = vpop.f32.mrf.mxu0 }
 0xe36   : > { %v4325_v6 = vadd.f32 %v5040_v46, %v4485_v35 }
 0xe37   : > { %v4316_v1 = vpop.f32.mrf.mxu0 }
 0xe38   : > { %v4337_v37 = vadd.f32 %v5283_v31, %v4325_v6  ;;  %v4317_v11 = vadd.f32 %v4485_v35, %v4316_v1 }
 0xe39   : > { %v5041_v32 = vpop.f32.mrf.mxu0 }
 0xe3a   : > { %4345 = vst.msk [vmem:[%s6442_s12 + $0x30] sm:$0xff] %vm331_vm0, %v4337_v37  ;;  %v4335_v59 = vadd.f32 %v5284_v55, %v4317_v11  ;;  %v4328_v63 = vadd.f32 %v5041_v32, %v4485_v35 }
 0xe3b   : > { %v4319_v44 = vpop.f32.mrf.mxu0 }
 0xe3c   : > { %4343 = vst.msk [vmem:[%s6442_s12 + $0x20] sm:$0xff] %vm331_vm0, %v4335_v59  ;;  %v4338_v48 = vadd.f32 %v5285_v39, %v4328_v63  ;;  %v4320_v20 = vadd.f32 %v4485_v35, %v4319_v44 }
 0xe3e   : > { %4346 = vst.msk [vmem:[%s6442_s12 + $0x38] sm:$0xff] %vm331_vm0, %v4338_v48  ;;  %v4336_v17 = vadd.f32 %v5286_v33, %v4320_v20 }
 0xe40   : > { %4344 = vst.msk [vmem:[%s6442_s12 + $0x28] sm:$0xff] %vm331_vm0, %v4336_v17 }
 0xe41 PF: > { %s18_s27 = sadd.s32 1, %s5293_s27  }
 0xe42   : > { %p15_p4 = scmp.ge.s32.totalorder %s18_s27, 4  }
 0xe44   :  { %17 = sbr.rel (!%p15_p4) target bundleno = 1 (0x1), region = 82 }

// kernel: moe_star_forward.8
= control target key start
LH: loop header
LB: loop body
LE: loop exit
PB: predicated region body
PF: predicated region fallthrough
CT: control target
= control target key end

     0   :  { %s5322_s24 = smov 0   ;;  %s6403_s0 = inlined_call_operand.vmem [shape: f32[16,8,32], index: 0, kind: input, shape index: {}]   ;;  %s6404_s1 = inlined_call_operand.vmem [shape: f32[1,1,32], index: 1, kind: input, shape index: {}]   ;;  %s6405_s2 = inlined_call_operand.vmem [shape: f32[1,1,32], index: 2, kind: input, shape index: {}]   ;;  %s6406_s3 = inlined_call_operand.vmem [shape: bf16[32,96], index: 3, kind: input, shape index: {}]   ;;  %s6407_s4 = inlined_call_operand.vmem [shape: f32[1,96], index: 4, kind: input, shape index: {}]   ;;  %s6408_s5 = inlined_call_operand.vmem [shape: bf16[32,32], index: 5, kind: input, shape index: {}]   ;;  %s6409_s6 = inlined_call_operand.vmem [shape: f32[1,32], index: 6, kind: input, shape index: {}]   ;;  %s6410_s7 = inlined_call_operand.vmem [shape: f32[16,8,32], index: 7, kind: output, shape index: {}]  }
   0x1 LB: > { %s4375_s25 = sadd.s32 4294967295, %s5264_s24   ;;  %p4379_p0 = scmp.ge.s32.totalorder %s5264_s24, 1  ;;  %s5264_s24 = sphi %s5322_s24, %s17_s24  }
   0x2   : > { %p238_p1 = scmp.lt.s32.totalorder %s5264_s24, 3 }
   0x4   : > { %p239_p2 = pnand %p4379_p0, %p238_p1 }
   0x5   : > { %s4380_s26 = sshll.u32 (!%p239_p2), %s4375_s25, 3  ;;  %s5268_s18 = smov (!%p239_p2), 96  }
   0x6   : > { %242 = sbr.rel (%p239_p2) target bundleno = 3641 (0xe39), region = 48  ;;  %p271_p3 = scmp.lt.s32.totalorder (!%p239_p2), %s4380_s26, 15 }
   0x7   : > { %s5269_s19 = smov (!%p239_p2), 64   ;;  %s5270_s20 = smov (!%p239_p2), 88  }
   0x8   : > { %s5271_s21 = smov (!%p239_p2), 120   ;;  %s5272_s22 = smov (!%p239_p2), 56  }
   0x9   : > { %s5273_s23 = smov (!%p239_p2), 80   ;;  %s5274_s25 = smov (!%p239_p2), 112  }
   0xa   : > { %s5275_s28 = smov (!%p239_p2), 48   ;;  %s5276_s29 = smov (!%p239_p2), 72  }
   0xb   : > { %s6412_s26 = smov (!%p271_p3, %s4380_s26), 15  ;;  %vm303_vm0 = vcmask 261120   ;;  %v5102_v56 = vld [vmem:[%s6406_s3 + $0x8] sm:$0xff]   ;;  %v5103_v57 = vld [vmem:[%s6406_s3] sm:$0xff]   ;;  %vm5267_vm1 = vmmov 0   ;;  %vm563_vm2 = vcmask 64512  }
   0xc   : > { %s4381_s27 = sshll.u32 %s6412_s26, 3  ;;  %4606 = vmatprep.subr.bf16.mxu0 %v5102_v56  ;;  %5014 = vmatprep.subr.bf16.mxu1 %v5102_v56  ;;  %vm1054_vm3 = vcmask 1043456   ;;  %s5277_s8 = smov 104   ;;  %vm4186_vm4 = vcmask 130048   ;;  %vm4195_vm5 = vcmask 195584  }
   0xd   : > { %s5338_s30 = scalar_lea.vmem %s6403_s0, %s4381_s27  ;;  %4607 = vmatpush3.bf16.msra.mxu0 %v5102_v56  ;;  %5016 = vmatpush3.bf16.msra.mxu1 %v5102_v56  ;;  %s5278_s9 = smov 40  }
   0xe   : > { %v283_v0 = vld [vmem:[%s5338_s30] sm:$0xff]  ;;  %v285_v1 = vld [vmem:[%s5338_s30 + $0x10] sm:$0xff]  ;;  %v284_v2 = vld [vmem:[%s5338_s30 + $0x8] sm:$0xff]  ;;  %4608 = vmatprep.subr.bf16.mxu0 %v5103_v57  ;;  %5015 = vmatprep.subr.bf16.mxu1 %v5103_v57  ;;  %s5279_s10 = smov 8   ;;  %s5280_s11 = smov 16  }
   0xf   : > { %v304_v3 = vsel %vm303_vm0, %v283_v0, 0.0  ;;  %v310_v4 = vsel %vm303_vm0, %v285_v1, 0.0  ;;  %v286_v5 = vld [vmem:[%s5338_s30 + $0x18] sm:$0xff]  ;;  %v307_v6 = vsel %vm303_vm0, %v284_v2, 0.0  ;;  %v287_v8 = vld [vmem:[%s5338_s30 + $0x20] sm:$0xff]  ;;  %v288_v9 = vld [vmem:[%s5338_s30 + $0x28] sm:$0xff] }
  0x10   : > { %305 = vadd.xlane.f32.xlu0 %v304_v3  ;;  %311 = vadd.xlane.f32.xlu1 %v310_v4  ;;  %v313_v7 = vsel %vm303_vm0, %v286_v5, 0.0  ;;  %v316_v10 = vsel %vm303_vm0, %v287_v8, 0.0  ;;  %v319_v11 = vsel %vm303_vm0, %v288_v9, 0.0  ;;  %v289_v12 = vld [vmem:[%s5338_s30 + $0x30] sm:$0xff]  ;;  %v290_v13 = vld [vmem:[%s5338_s30 + $0x38] sm:$0xff]  ;;  %s5281_s14 = smov 24  }
  0x11   : > { %v322_v14 = vsel %vm303_vm0, %v289_v12, 0.0  ;;  %v325_v15 = vsel %vm303_vm0, %v290_v13, 0.0  ;;  %4609 = vmatpush3.bf16.msra.mxu0 %v5103_v57  ;;  %5017 = vmatpush3.bf16.msra.mxu1 %v5103_v57 }
  0x14   : > { %308 = vadd.xlane.f32.xlu0 %v307_v6  ;;  %314 = vadd.xlane.f32.xlu1 %v313_v7 }
  0x18   : > { %317 = vadd.xlane.f32.xlu0 %v316_v10  ;;  %320 = vadd.xlane.f32.xlu1 %v319_v11 }
  0x1c   : > { %323 = vadd.xlane.f32.xlu0 %v322_v14  ;;  %326 = vadd.xlane.f32.xlu1 %v325_v15 }
  0x99   : > { %v306_v16 = vpop.xlane.xlu0 %305  ;;  %v312_v17 = vpop.xlane.xlu1 %311 }
  0x9a   : > { %v329_v18 = vmul.f32 0.03125, %v306_v16  ;;  %v331_v19 = vmul.f32 0.03125, %v312_v17 }
  0x9c   : > { %v5356_v20 = vsub.f32 %v283_v0, %v329_v18  ;;  %v5358_v21 = vsub.f32 %v285_v1, %v331_v19 }
  0x9d   : > { %v309_v22 = vpop.xlane.xlu0 %308  ;;  %v315_v23 = vpop.xlane.xlu1 %314 }
  0x9e   : > { %v330_v24 = vmul.f32 0.03125, %v309_v22  ;;  %v332_v25 = vmul.f32 0.03125, %v315_v23  ;;  %v345_v26 = vmul.f32 %v5356_v20, %v5356_v20  ;;  %v347_v27 = vmul.f32 %v5358_v21, %v5358_v21  ;;  %v4384_v22 = vld [vmem:[%s6404_s1] ss:$0 sm:$0xff] }
  0xa0   : > { %v5364_v28 = vsub.f32 %v284_v2, %v330_v24  ;;  %v5366_v29 = vsub.f32 %v286_v5, %v332_v25  ;;  %v353_v30 = vsel %vm303_vm0, %v345_v26, 0.0  ;;  %v359_v33 = vsel %vm303_vm0, %v347_v27, 0.0  ;;  %v4385_v27 = vld [vmem:[%s6405_s2] ss:$0 sm:$0xff] }
  0xa1   : > { %354 = vadd.xlane.f32.xlu0 %v353_v30  ;;  %v318_v31 = vpop.xlane.xlu0 %317  ;;  %v321_v32 = vpop.xlane.xlu1 %320 }
  0xa2   : > { %v333_v34 = vmul.f32 0.03125, %v318_v31  ;;  %v334_v35 = vmul.f32 0.03125, %v321_v32  ;;  %v346_v36 = vmul.f32 %v5364_v28, %v5364_v28  ;;  %v348_v37 = vmul.f32 %v5366_v29, %v5366_v29 }
  0xa4   : > { %v5374_v38 = vsub.f32 %v287_v8, %v333_v34  ;;  %v5376_v39 = vsub.f32 %v288_v9, %v334_v35  ;;  %v356_v40 = vsel %vm303_vm0, %v346_v36, 0.0  ;;  %v362_v43 = vsel %vm303_vm0, %v348_v37, 0.0 }
  0xa5   : > { %360 = vadd.xlane.f32.xlu0 %v359_v33  ;;  %357 = vadd.xlane.f32.xlu1 %v356_v40  ;;  %v324_v41 = vpop.xlane.xlu0 %323  ;;  %v327_v42 = vpop.xlane.xlu1 %326 }
  0xa6   : > { %v335_v44 = vmul.f32 0.03125, %v324_v41  ;;  %v336_v45 = vmul.f32 0.03125, %v327_v42  ;;  %v349_v46 = vmul.f32 %v5374_v38, %v5374_v38  ;;  %v350_v47 = vmul.f32 %v5376_v39, %v5376_v39 }
  0xa8   : > { %v5384_v48 = vsub.f32 %v289_v12, %v335_v44  ;;  %v5386_v49 = vsub.f32 %v290_v13, %v336_v45  ;;  %v365_v50 = vsel %vm303_vm0, %v349_v46, 0.0  ;;  %v368_v51 = vsel %vm303_vm0, %v350_v47, 0.0 }
  0xa9   : > { %363 = vadd.xlane.f32.xlu1 %v362_v43  ;;  %366 = vadd.xlane.f32.xlu0 %v365_v50 }
  0xaa   : > { %v351_v52 = vmul.f32 %v5384_v48, %v5384_v48  ;;  %v352_v53 = vmul.f32 %v5386_v49, %v5386_v49 }
  0xac   : > { %v371_v54 = vsel %vm303_vm0, %v351_v52, 0.0  ;;  %v374_v55 = vsel %vm303_vm0, %v352_v53, 0.0 }
  0xad   : > { %369 = vadd.xlane.f32.xlu1 %v368_v51  ;;  %372 = vadd.xlane.f32.xlu0 %v371_v54 }
  0xb1   : > { %375 = vadd.xlane.f32.xlu1 %v374_v55 }
 0x12a   : > { %v355_v58 = vpop.xlane.xlu0 %354 }
 0x12b   : > { %v377_v59 = vmul.f32 0.03125, %v355_v58 }
 0x12d   : > { %v385_v60 = vadd.f32 1e-05, %v377_v59 }
 0x12e   : > { %v358_v61 = vpop.xlane.xlu1 %357  ;;  %v361_v62 = vpop.xlane.xlu0 %360 }
 0x12f   : > { %5106 = vrsqrt.f32 %v385_v60  ;;  %v378_v63 = vmul.f32 0.03125, %v358_v61  ;;  %v379_v0 = vmul.f32 0.03125, %v361_v62 }
 0x131   : > { %v386_v1 = vadd.f32 1e-05, %v378_v63  ;;  %v387_v2 = vadd.f32 1e-05, %v379_v0 }
 0x132   : > { %v364_v3 = vpop.xlane.xlu1 %363  ;;  %v367_v4 = vpop.xlane.xlu0 %366 }
 0x133   : > { %5108 = vrsqrt.f32 %v386_v1  ;;  %v380_v5 = vmul.f32 0.03125, %v364_v3  ;;  %v381_v6 = vmul.f32 0.03125, %v367_v4 }
 0x134   : > { %5110 = vrsqrt.f32 %v387_v2 }
 0x135   : > { %v388_v7 = vadd.f32 1e-05, %v380_v5  ;;  %v389_v8 = vadd.f32 1e-05, %v381_v6 }
 0x136   : > { %v370_v9 = vpop.xlane.xlu1 %369  ;;  %v373_v10 = vpop.xlane.xlu0 %372 }
 0x137   : > { %5112 = vrsqrt.f32 %v388_v7  ;;  %v382_v11 = vmul.f32 0.03125, %v370_v9  ;;  %v383_v12 = vmul.f32 0.03125, %v373_v10 }
 0x138   : > { %5114 = vrsqrt.f32 %v389_v8 }
 0x139   : > { %v390_v13 = vadd.f32 1e-05, %v382_v11  ;;  %v391_v14 = vadd.f32 1e-05, %v383_v12 }
 0x13a   : > { %v376_v15 = vpop.xlane.xlu1 %375 }
 0x13b   : > { %5116 = vrsqrt.f32 %v390_v13  ;;  %v384_v16 = vmul.f32 0.03125, %v376_v15 }
 0x13c   : > { %v5107_v17 = vpop.eup %5106  ;;  %5118 = vrsqrt.f32 %v391_v14 }
 0x13d   : > { %v392_v18 = vadd.f32 1e-05, %v384_v16  ;;  %v401_v19 = vmul.f32 %v5107_v17, %v5356_v20 }
 0x13f   : > { %5120 = vrsqrt.f32 %v392_v18  ;;  %v415_v26 = vmul.f32 %v4384_v22, %v401_v19 }
 0x140   : > { %v5109_v23 = vpop.eup %5108 }
 0x141   : > { %v5111_v24 = vpop.eup %5110  ;;  %v402_v25 = vmul.f32 %v5109_v23, %v5364_v28  ;;  %v429_v20 = vadd.f32 %v4385_v27, %v415_v26 }
 0x142   : > { %v403_v30 = vmul.f32 %v5111_v24, %v5358_v21 }
 0x143   : > { %v416_v31 = vmul.f32 %v4384_v22, %v402_v25 }
 0x144   : > { %v5113_v32 = vpop.eup %5112  ;;  %v417_v36 = vmul.f32 %v4384_v22, %v403_v30 }
 0x145   : > { %v5115_v33 = vpop.eup %5114  ;;  %v430_v34 = vadd.f32 %v4385_v27, %v416_v31  ;;  %v404_v35 = vmul.f32 %v5113_v32, %v5366_v29 }
 0x146   : > { %v405_v37 = vmul.f32 %v5115_v33, %v5374_v38  ;;  %v431_v43 = vadd.f32 %v4385_v27, %v417_v36 }
 0x147   : > { %v437_v40 = vpack.c.bf16 %v430_v34, %v429_v20  ;;  %v418_v41 = vmul.f32 %v4384_v22, %v404_v35 }
 0x148   : > { %v5117_v28 = vpop.eup %5116  ;;  %v419_v45 = vmul.f32 %v4384_v22, %v405_v37 }
 0x149   : > { %v5119_v42 = vpop.eup %5118  ;;  %4610 = vmatprep.mubr.msk.bf16.mxu0 %vm303_vm0, %v437_v40  ;;  %v432_v44 = vadd.f32 %v4385_v27, %v418_v41  ;;  %v406_v21 = vmul.f32 %v5117_v28, %v5376_v39 }
 0x14a   : > { %v407_v46 = vmul.f32 %v5119_v42, %v5384_v48  ;;  %v433_v29 = vadd.f32 %v4385_v27, %v419_v45  ;;  %v5266_v48 = vmov 0.0  }
 0x14b   : > { %v438_v47 = vpack.c.bf16 %v432_v44, %v431_v43  ;;  %v420_v50 = vmul.f32 %v4384_v22, %v406_v21  ;;  %4618 = vmatprep.subr.bf16.mxu1 %v5266_v48  ;;  %4630 = vmatprep.subr.bf16.mxu0 %v5266_v48 }
 0x14c   : > { %v5121_v51 = vpop.eup %5120  ;;  %v421_v53 = vmul.f32 %v4384_v22, %v407_v46 }
 0x14d   : > { %4611 = vmatmul.mubr.msk.bf16.vlgmr.msra.gmra.mxu0 %vm303_vm0, %v438_v47  ;;  %v434_v38 = vadd.f32 %v4385_v27, %v420_v50  ;;  %v408_v52 = vmul.f32 %v5121_v51, %v5386_v49  ;;  %v4386_v49 = vld [vmem:[%s6407_s4] ss:$0 sm:$0xff] }
 0x14e   : > { %v435_v56 = vadd.f32 %v4385_v27, %v421_v53  ;;  %4632 = vmatprep.mubr.msk.bf16.mxu0 %vm5267_vm1, %v5266_v48 }
 0x14f   : > { %v439_v54 = vpack.c.bf16 %v434_v38, %v433_v29  ;;  %v422_v55 = vmul.f32 %v4384_v22, %v408_v52 }
 0x151   : > { %4614 = vmatprep.mubr.msk.bf16.mxu1 %vm303_vm0, %v439_v54  ;;  %v436_v57 = vadd.f32 %v4385_v27, %v422_v55 }
 0x153   : > { %v440_v39 = vpack.c.bf16 %v436_v57, %v435_v56 }
 0x155   : > { %4615 = vmatmul.mubr.msk.bf16.vlgmr.msra.gmra.mxu1 %vm303_vm0, %v440_v39 }
 0x156   : > { %4620 = vmatprep.mubr.msk.bf16.mxu1 %vm5267_vm1, %v5266_v48 }
 0x20d   : > { %v4612_v58 = vpop.f32.mrf.mxu0 }
 0x20e   : > { %v514_v2 = vadd.f32 %v4612_v58, %v4386_v49 }
 0x20f   : > { %v505_v59 = vpop.f32.mrf.mxu0 }
 0x210   : > { %v506_v60 = vadd.f32 %v4386_v49, %v505_v59  ;;  %v5435_v7 = vpack.c.bf16 %v514_v2, %v514_v2  ;;  %v538_v30 = vmul.f32 0.35355338, %v514_v2 }
 0x211   : > { %v4613_v61 = vpop.f32.mrf.mxu0 }
 0x212   : > { %v5429_v62 = vpack.c.bf16 %v506_v60, %v506_v60  ;;  %v517_v8 = vadd.f32 %v4613_v61, %v4386_v49  ;;  %v536_v22 = vmul.f32 0.35355338, %v506_v60  ;;  %v5481_v20 = vpack.c.bf16 %v538_v30, %v538_v30 }
 0x213   : > { %v508_v63 = vpop.f32.mrf.mxu0 }
 0x214   : > { %v509_v0 = vadd.f32 %v4386_v49, %v508_v63  ;;  %561 = vrot.lane.b32.xlu0 %v5429_v62, %s5268_s18  ;;  %v5443_v12 = vpack.c.bf16 %v517_v8, %v517_v8  ;;  %v5471_v24 = vpack.c.bf16 %v536_v22, %v536_v22  ;;  %v539_v40 = vmul.f32 0.35355338, %v517_v8 }
 0x215   : > { %v4616_v1 = vpop.f32.mrf.mxu1 }
 0x216   : > { %v5432_v3 = vpack.c.bf16 %v509_v0, %v509_v0  ;;  %v5437_v9 = vadd.f32 %v4616_v1, %v4386_v49  ;;  %v537_v31 = vmul.f32 0.35355338, %v509_v0  ;;  %v5497_v43 = vpack.c.bf16 %v539_v40, %v539_v40 }
 0x217   : > { %v521_v4 = vpop.f32.mrf.mxu1 }
 0x218   : > { %v522_v5 = vadd.f32 %v4386_v49, %v521_v4  ;;  %611 = vrot.lane.b32.xlu1 %v5432_v3, %s5268_s18  ;;  %v5447_v13 = vpack.c.bf16 %v5437_v9, %v5437_v9  ;;  %v5483_v34 = vpack.c.bf16 %v537_v31, %v537_v31  ;;  %v542_v47 = vmul.f32 0.35355338, %v5437_v9 }
 0x219   : > { %v4617_v6 = vpop.f32.mrf.mxu1 }
 0x21a   : > { %v5439_v10 = vpack.c.bf16 %v522_v5, %v522_v5  ;;  %v5451_v15 = vadd.f32 %v4617_v6, %v4386_v49  ;;  %v540_v41 = vmul.f32 0.35355338, %v522_v5  ;;  %v5516_v29 = vpack.c.bf16 %v542_v47, %v542_v47 }
 0x21b   : > { %v524_v11 = vpop.f32.mrf.mxu1 }
 0x21c   : > { %660 = vrot.lane.b32.xlu1 %v5435_v7, %s5268_s18  ;;  %758 = vrot.lane.b32.xlu0 %v5439_v10, %s5268_s18  ;;  %v525_v14 = vadd.f32 %v4386_v49, %v524_v11  ;;  %v5460_v17 = vpack.c.bf16 %v5451_v15, %v5451_v15  ;;  %v5499_v44 = vpack.c.bf16 %v540_v41, %v540_v41  ;;  %v543_v55 = vmul.f32 0.35355338, %v5451_v15 }
 0x21e   : > { %v5453_v16 = vpack.c.bf16 %v525_v14, %v525_v14  ;;  %v541_v50 = vmul.f32 0.35355338, %v525_v14  ;;  %v5535_v57 = vpack.c.bf16 %v543_v55, %v543_v55 }
 0x220   : > { %709 = vrot.lane.b32.xlu1 %v5443_v12, %s5268_s18  ;;  %856 = vrot.lane.b32.xlu0 %v5447_v13, %s5268_s18  ;;  %v5518_v38 = vpack.c.bf16 %v541_v50, %v541_v50 }
 0x224   : > { %807 = vrot.lane.b32.xlu1 %v5453_v16, %s5268_s18  ;;  %1049 = vrot.lane.b32.xlu0 %v5429_v62, %s5269_s19 }
 0x228   : > { %905 = vrot.lane.b32.xlu1 %v5460_v17, %s5268_s18 }
 0x22c   : > { %1146 = vrot.lane.b32.xlu1 %v5435_v7, %s5269_s19 }
 0x230   : > { %1194 = vrot.lane.b32.xlu1 %v5443_v12, %s5269_s19 }
 0x234   : > { %1098 = vrot.lane.b32.xlu1 %v5432_v3, %s5269_s19 }
 0x286   : > { %v562_v18 = vpop.permute.xlu0 %561 }
 0x287   : > { %v568_v19 = vsel %vm563_vm2, %v562_v18, 0 }
 0x288   : > { %4619 = vmatpush3.bf16.xpose.msra.mxu1 %v568_v19 }
 0x289   : > { %4624 = vmatprep.subr.bf16.mxu1 %v5266_v48 }
 0x28a   : > { %v612_v23 = vpop.permute.xlu1 %611 }
 0x28b   : > { %v617_v26 = vsel %vm563_vm2, %v612_v23, 0 }
 0x28e   : > { %v661_v25 = vpop.permute.xlu1 %660  ;;  %v759_v33 = vpop.permute.xlu0 %758 }
 0x28f   : > { %v666_v27 = vsel %vm563_vm2, %v661_v25, 0  ;;  %4621 = vmatmul.mubr.msk.bf16.vlgmr.msra.gmra.mxu1 %vm563_vm2, %v5471_v24  ;;  %v764_v36 = vsel %vm563_vm2, %v759_v33, 0 }
 0x290   : > { %4625 = vmatpush3.bf16.xpose.msra.mxu1 %v617_v26  ;;  %4631 = vmatpush3.bf16.xpose.msra.mxu0 %v666_v27 }
 0x291   : > { %4626 = vmatprep.mubr.msk.bf16.mxu1 %vm5267_vm1, %v5266_v48  ;;  %4636 = vmatprep.subr.bf16.mxu1 %v5266_v48 }
 0x292   : > { %v710_v32 = vpop.permute.xlu1 %709  ;;  %4642 = vmatprep.subr.bf16.mxu0 %v5266_v48  ;;  %v857_v42 = vpop.permute.xlu0 %856 }
 0x293   : > { %v715_v37 = vsel %vm563_vm2, %v710_v32, 0  ;;  %v862_v21 = vsel %vm563_vm2, %v857_v42, 0 }
 0x296   : > { %v808_v35 = vpop.permute.xlu1 %807  ;;  %v1050_v51 = vpop.permute.xlu0 %1049 }
 0x297   : > { %4627 = vmatmul.mubr.msk.bf16.vlgmr.msra.gmra.mxu1 %vm563_vm2, %v5483_v34  ;;  %4633 = vmatmul.mubr.msk.bf16.vlgmr.msra.gmra.mxu0 %vm563_vm2, %v5481_v20  ;;  %v813_v45 = vsel %vm563_vm2, %v808_v35, 0  ;;  %v1056_v53 = vsel %vm1054_vm3, %v1050_v51, 0 }
 0x298   : > { %4637 = vmatpush3.bf16.xpose.msra.mxu1 %v715_v37  ;;  %4643 = vmatpush3.bf16.xpose.msra.mxu0 %v764_v36 }
 0x299   : > { %4644 = vmatprep.mubr.msk.bf16.mxu0 %vm5267_vm1, %v5266_v48  ;;  %4638 = vmatprep.mubr.msk.bf16.mxu1 %vm5267_vm1, %v5266_v48 }
 0x29a   : > { %v906_v28 = vpop.permute.xlu1 %905  ;;  %4648 = vmatprep.subr.bf16.mxu1 %v5266_v48  ;;  %4654 = vmatprep.subr.bf16.mxu0 %v5266_v48 }
 0x29b   : > { %v911_v54 = vsel %vm563_vm2, %v906_v28, 0 }
 0x29e   : > { %v5507_v46 = vpop.permute.xlu1 %1146 }
 0x29f   : > { %4639 = vmatmul.mubr.msk.bf16.vlgmr.msra.gmra.mxu1 %vm563_vm2, %v5497_v43  ;;  %4645 = vmatmul.mubr.msk.bf16.vlgmr.msra.gmra.mxu0 %vm563_vm2, %v5499_v44 }
 0x2a0   : > { %4649 = vmatpush3.bf16.xpose.msra.mxu1 %v813_v45  ;;  %4655 = vmatpush3.bf16.xpose.msra.mxu0 %v862_v21 }
 0x2a1   : > { %4650 = vmatprep.mubr.msk.bf16.mxu1 %vm5267_vm1, %v5266_v48  ;;  %4656 = vmatprep.mubr.msk.bf16.mxu0 %vm5267_vm1, %v5266_v48 }
 0x2a2   : > { %4660 = vmatprep.subr.bf16.mxu1 %v5266_v48  ;;  %4666 = vmatprep.subr.bf16.mxu0 %v5266_v48  ;;  %v5520_v52 = vpop.permute.xlu1 %1194 }
 0x2a6   : > { %v1099_v56 = vpop.permute.xlu1 %1098 }
 0x2a7   : > { %4651 = vmatmul.mubr.msk.bf16.vlgmr.msra.gmra.mxu1 %vm563_vm2, %v5518_v38  ;;  %4657 = vmatmul.mubr.msk.bf16.vlgmr.msra.gmra.mxu0 %vm563_vm2, %v5516_v29  ;;  %v1104_v39 = vsel %vm1054_vm3, %v1099_v56, 0 }
 0x2a8   : > { %4661 = vmatpush3.bf16.xpose.msra.mxu1 %v911_v54  ;;  %4667 = vmatpush3.bf16.msra.mxu0 %v1056_v53 }
 0x2a9   : > { %4662 = vmatprep.mubr.msk.bf16.mxu1 %vm5267_vm1, %v5266_v48  ;;  %4672 = vmatprep.subr.bf16.mxu1 %v5266_v48 }
 0x2aa   : > { %4668 = vmatprep.mubr.msk.bf16.mxu0 %vm5267_vm1, %v5266_v48  ;;  %4678 = vmatprep.subr.bf16.mxu0 %v5266_v48 }
 0x2af   : > { %4663 = vmatmul.mubr.msk.bf16.vlgmr.msra.gmra.mxu1 %vm563_vm2, %v5535_v57 }
 0x2b0   : > { %4673 = vmatpush3.bf16.msra.mxu1 %v1104_v39  ;;  %4674 = vmatprep.mubr.msk.bf16.mxu1 %vm5267_vm1, %v5266_v48 }
 0x2b1   : > { %4684 = vmatprep.subr.bf16.mxu1 %v5266_v48 }
 0x34f   : > { %v604_v58 = vpop.f32.mrf.mxu1 }
 0x350   : > { %v953_v8 = vsel %vm563_vm2, %v604_v58, -inf }
 0x351   : > { %v4622_v49 = vpop.f32.mrf.mxu1 }
 0x353   : > { %v607_v59 = vpop.f32.mrf.mxu1 }
 0x355   : > { %v4623_v60 = vpop.f32.mrf.mxu1 }
 0x357   : > { %v653_v61 = vpop.f32.mrf.mxu1  ;;  %v702_v63 = vpop.f32.mrf.mxu0 }
 0x358   : > { %v959_v0 = vsel %vm563_vm2, %v702_v63, -inf  ;;  %v956_v1 = vsel %vm563_vm2, %v653_v61, -inf }
 0x359   : > { %v4634_v2 = vpop.f32.mrf.mxu0  ;;  %960 = vmax.xlane.f32.xlu0 %v959_v0  ;;  %957 = vmax.xlane.f32.xlu1 %v956_v1  ;;  %v4628_v4 = vpop.f32.mrf.mxu1 }
 0x35b   : > { %v656_v5 = vpop.f32.mrf.mxu1  ;;  %v705_v6 = vpop.f32.mrf.mxu0 }
 0x35d   : > { %v4635_v9 = vpop.f32.mrf.mxu0  ;;  %954 = vmax.xlane.f32.xlu0 %v953_v8  ;;  %v4629_v11 = vpop.f32.mrf.mxu1 }
 0x35f   : > { %v751_v14 = vpop.f32.mrf.mxu1  ;;  %v800_v15 = vpop.f32.mrf.mxu0 }
 0x360   : > { %v965_v18 = vsel %vm563_vm2, %v800_v15, -inf  ;;  %v962_v40 = vsel %vm563_vm2, %v751_v14, -inf }
 0x361   : > { %v4640_v19 = vpop.f32.mrf.mxu1  ;;  %966 = vmax.xlane.f32.xlu0 %v965_v18  ;;  %v4646_v22 = vpop.f32.mrf.mxu0 }
 0x363   : > { %v754_v23 = vpop.f32.mrf.mxu1  ;;  %v803_v25 = vpop.f32.mrf.mxu0 }
 0x365   : > { %v4641_v26 = vpop.f32.mrf.mxu1  ;;  %v4647_v27 = vpop.f32.mrf.mxu0 }
 0x367   : > { %v5547_v30 = vpop.f32.mrf.mxu1  ;;  %v5549_v31 = vpop.f32.mrf.mxu0 }
 0x368   : > { %v971_v32 = vsel %vm563_vm2, %v5549_v31, -inf  ;;  %v968_v50 = vsel %vm563_vm2, %v5547_v30, -inf }
 0x369   : > { %v4652_v33 = vpop.f32.mrf.mxu1  ;;  %972 = vmax.xlane.f32.xlu0 %v971_v32  ;;  %v4658_v35 = vpop.f32.mrf.mxu0 }
 0x36a   : > { %1290 = vrot.lane.b32.xlu1 %v5453_v16, %s5269_s19 }
 0x36b   : > { %v852_v36 = vpop.f32.mrf.mxu1  ;;  %v901_v37 = vpop.f32.mrf.mxu0 }
 0x36d   : > { %v4653_v41 = vpop.f32.mrf.mxu1  ;;  %963 = vmax.xlane.f32.xlu0 %v962_v40  ;;  %v4659_v28 = vpop.f32.mrf.mxu0 }
 0x36f   : > { %v5556_v42 = vpop.f32.mrf.mxu1 }
 0x370   : > { %v974_v51 = vsel %vm563_vm2, %v5556_v42, -inf }
 0x371   : > { %v4664_v21 = vpop.f32.mrf.mxu1 }
 0x373   : > { %v950_v45 = vpop.f32.mrf.mxu1 }
 0x375   : > { %v4665_v47 = vpop.f32.mrf.mxu1 }
 0x383   : > { %1242 = vrot.lane.b32.xlu0 %v5439_v10, %s5269_s19 }
 0x38e   : > { %969 = vmax.xlane.f32.xlu1 %v968_v50 }
 0x392   : > { %975 = vmax.xlane.f32.xlu1 %v974_v51 }
 0x3a3   : > { %1386 = vrot.lane.b32.xlu1 %v5460_v17, %s5269_s19 }
 0x3e2   : > { %v958_v53 = vpop.xlane.xlu1 %957  ;;  %v961_v54 = vpop.xlane.xlu0 %960 }
 0x3e3   : > { %v978_v55 = vsub.f32 %v653_v61, %v958_v53  ;;  %v979_v56 = vsub.f32 %v702_v63, %v961_v54 }
 0x3e5   : > { %v987_v39 = vmul.f32 1.442695, %v978_v55  ;;  %v989_v49 = vmul.f32 1.442695, %v979_v56 }
 0x3e6   : > { %v955_v59 = vpop.xlane.xlu0 %954 }
 0x3e7   : > { %5122 = vpow2.f32 %v987_v39  ;;  %v977_v60 = vsub.f32 %v604_v58, %v955_v59  ;;  %v1200_v59 = vsel %vm1054_vm3, %v5520_v52, 0  ;;  %v1152_v52 = vsel %vm1054_vm3, %v5507_v46, 0 }
 0x3e8   : > { %5124 = vpow2.f32 %v989_v49 }
 0x3e9   : > { %v985_v0 = vmul.f32 1.442695, %v977_v60 }
 0x3ea   : > { %v967_v1 = vpop.xlane.xlu0 %966 }
 0x3eb   : > { %5126 = vpow2.f32 %v985_v0  ;;  %v981_v2 = vsub.f32 %v800_v15, %v967_v1 }
 0x3ed   : > { %v993_v4 = vmul.f32 1.442695, %v981_v2 }
 0x3ef   : > { %5128 = vpow2.f32 %v993_v4 }
 0x3f2   : > { %v973_v5 = vpop.xlane.xlu0 %972 }
 0x3f3   : > { %v983_v33 = vsub.f32 %v5549_v31, %v973_v5 }
 0x3f4   : > { %v5566_v6 = vpop.eup %5122 }
 0x3f5   : > { %v5568_v8 = vpop.eup %5124  ;;  %v1004_v61 = vsel %vm563_vm2, %v5566_v6, 0.0  ;;  %v997_v35 = vmul.f32 1.442695, %v983_v33 }
 0x3f6   : > { %1005 = vadd.xlane.f32.xlu1 %v1004_v61  ;;  %v1007_v63 = vsel %vm563_vm2, %v5568_v8, 0.0  ;;  %v964_v58 = vpop.xlane.xlu0 %963 }
 0x3f7   : > { %1008 = vadd.xlane.f32.xlu0 %v1007_v63  ;;  %v980_v9 = vsub.f32 %v751_v14, %v964_v58  ;;  %v5586_v14 = vpop.permute.xlu1 %1290 }
 0x3f8   : > { %v5574_v11 = vpop.eup %5126 }
 0x3f9   : > { %v991_v15 = vmul.f32 1.442695, %v980_v9  ;;  %v1001_v18 = vsel %vm563_vm2, %v5574_v11, 0.0 }
 0x3fa   : > { %v1243_v47 = vpop.permute.xlu0 %1242 }
 0x3fb   : > { %5130 = vpow2.f32 %v991_v15  ;;  %1002 = vadd.xlane.f32.xlu0 %v1001_v18  ;;  %v1248_v61 = vsel %vm1054_vm3, %v1243_v47, 0  ;;  %v1296_v15 = vsel %vm1054_vm3, %v5586_v14, 0 }
 0x3fc   : > { %v5578_v19 = vpop.eup %5128 }
 0x3fd   : > { %v1013_v22 = vsel %vm563_vm2, %v5578_v19, 0.0 }
 0x3ff   : > { %1014 = vadd.xlane.f32.xlu0 %v1013_v22 }
 0x408   : > { %v5582_v23 = vpop.eup %5130 }
 0x409   : > { %v1010_v25 = vsel %vm563_vm2, %v5582_v23, 0.0 }
 0x40a   : > { %1011 = vadd.xlane.f32.xlu1 %v1010_v25 }
 0x415   : > { %1338 = vrot.lane.b32.xlu0 %v5447_v13, %s5269_s19 }
 0x417   : > { %v970_v26 = vpop.xlane.xlu1 %969 }
 0x418   : > { %v982_v27 = vsub.f32 %v5547_v30, %v970_v26 }
 0x41a   : > { %v995_v32 = vmul.f32 1.442695, %v982_v27 }
 0x41b   : > { %v976_v30 = vpop.xlane.xlu1 %975 }
 0x41c   : > { %5132 = vpow2.f32 %v995_v32  ;;  %v984_v31 = vsub.f32 %v5556_v42, %v976_v30 }
 0x41d   : > { %5134 = vpow2.f32 %v997_v35 }
 0x41e   : > { %v999_v28 = vmul.f32 1.442695, %v984_v31 }
 0x41f   : > { %v5625_v45 = vpop.permute.xlu1 %1386 }
 0x420   : > { %5136 = vpow2.f32 %v999_v28  ;;  %v1392_v32 = vsel %vm1054_vm3, %v5625_v45, 0 }
 0x429   : > { %v5592_v36 = vpop.eup %5132 }
 0x42a   : > { %v1016_v37 = vsel %vm563_vm2, %v5592_v36, 0.0  ;;  %v5596_v40 = vpop.eup %5134 }
 0x42b   : > { %1017 = vadd.xlane.f32.xlu1 %v1016_v37  ;;  %v1019_v41 = vsel %vm563_vm2, %v5596_v40, 0.0 }
 0x42d   : > { %v5611_v21 = vpop.eup %5136 }
 0x42e   : > { %v1022_v42 = vsel %vm563_vm2, %v5611_v21, 0.0 }
 0x434   : > { %1020 = vadd.xlane.f32.xlu0 %v1019_v41 }
 0x43c   : > { %1488 = vrot.lane.b32.xlu1 %v5432_v3, %s5270_s20 }
 0x44a   : > { %1437 = vrot.lane.b32.xlu0 %v5429_v62, %s5270_s20 }
 0x44e   : > { %1435 = vrot.lane.b32.xlu0 %v5471_v24, %s5271_s21 }
 0x452   : > { %1539 = vrot.lane.b32.xlu0 %v5435_v7, %s5270_s20 }
 0x456   : > { %1537 = vrot.lane.b32.xlu0 %v5481_v20, %s5271_s21 }
 0x45a   : > { %1641 = vrot.lane.b32.xlu0 %v5439_v10, %s5270_s20 }
 0x45e   : > { %1639 = vrot.lane.b32.xlu0 %v5499_v44, %s5271_s21 }
 0x460   : > { %1023 = vadd.xlane.f32.xlu1 %v1022_v42 }
 0x462   : > { %1743 = vrot.lane.b32.xlu0 %v5447_v13, %s5270_s20 }
 0x466   : > { %1741 = vrot.lane.b32.xlu0 %v5516_v29, %s5271_s21 }
 0x46a   : > { %1938 = vrot.lane.b32.xlu0 %v5429_v62, %s5272_s22 }
 0x471   : > { %1486 = vrot.lane.b32.xlu1 %v5483_v34, %s5271_s21 }
 0x475   : > { %1590 = vrot.lane.b32.xlu1 %v5443_v12, %s5270_s20 }
 0x479   : > { %1588 = vrot.lane.b32.xlu1 %v5497_v43, %s5271_s21 }
 0x47d   : > { %1692 = vrot.lane.b32.xlu1 %v5453_v16, %s5270_s20 }
 0x47f   : > { %v1006_v50 = vpop.xlane.xlu1 %1005 }
 0x480   : > { %5138 = vrcp.f32 %v1006_v50  ;;  %v1009_v51 = vpop.xlane.xlu0 %1008 }
 0x481   : > { %1690 = vrot.lane.b32.xlu1 %v5518_v38, %s5271_s21 }
 0x484   : > { %v1003_v53 = vpop.xlane.xlu0 %1002 }
 0x485   : > { %5140 = vrcp.f32 %v1003_v53  ;;  %1794 = vrot.lane.b32.xlu1 %v5460_v17, %s5270_s20 }
 0x486   : > { %5142 = vrcp.f32 %v1009_v51 }
 0x488   : > { %v1015_v55 = vpop.xlane.xlu0 %1014 }
 0x489   : > { %1792 = vrot.lane.b32.xlu1 %v5535_v57, %s5271_s21  ;;  %5144 = vrcp.f32 %v1015_v55  ;;  %s6374_s21 = scalar_lea.vmem %s6410_s7, %s4381_s27 }
 0x48c   : > { %v1339_v9 = vpop.permute.xlu0 %1338 }
 0x48d   : > { %v5139_v54 = vpop.eup %5138  ;;  %1986 = vrot.lane.b32.xlu1 %v5432_v3, %s5272_s22  ;;  %v1344_v18 = vsel %vm1054_vm3, %v1339_v9, 0 }
 0x48e   : > { %v1034_v56 = vmul.f32 %v5139_v54, %v5566_v6 }
 0x490   : > { %v1042_v39 = vpack.c.bf16 %v1034_v56, %v1034_v56 }
 0x491   : > { %2034 = vrot.lane.b32.xlu1 %v5435_v7, %s5272_s22 }
 0x492   : > { %v5141_v49 = vpop.eup %5140  ;;  %4675 = vmatmul.mubr.msk.bf16.vlgmr.msra.gmra.mxu1 %vm563_vm2, %v1042_v39 }
 0x493   : > { %4685 = vmatpush3.bf16.msra.mxu1 %v1200_v59  ;;  %v1012_v60 = vpop.xlane.xlu1 %1011  ;;  %v1033_v0 = vmul.f32 %v5141_v49, %v5574_v11  ;;  %4686 = vmatprep.mubr.msk.bf16.mxu1 %vm5267_vm1, %v5266_v48  ;;  %v5143_v2 = vpop.eup %5142 }
 0x494   : > { %5146 = vrcp.f32 %v1012_v60  ;;  %4696 = vmatprep.subr.bf16.mxu1 %v5266_v48  ;;  %v1035_v4 = vmul.f32 %v5143_v2, %v5568_v8 }
 0x495   : > { %2082 = vrot.lane.b32.xlu1 %v5443_v12, %s5272_s22  ;;  %v1041_v1 = vpack.c.bf16 %v1033_v0, %v1033_v0 }
 0x496   : > { %v1043_v5 = vpack.c.bf16 %v1035_v4, %v1035_v4  ;;  %v5145_v6 = vpop.eup %5144 }
 0x497   : > { %4669 = vmatmul.mubr.msk.bf16.vlgmr.msra.gmra.mxu0 %vm563_vm2, %v1041_v1  ;;  %v1037_v63 = vmul.f32 %v5145_v6, %v5578_v19 }
 0x498   : > { %4679 = vmatpush3.bf16.msra.mxu0 %v1152_v52  ;;  %4680 = vmatprep.mubr.msk.bf16.mxu0 %vm5267_vm1, %v5266_v48 }
 0x499   : > { %4690 = vmatprep.subr.bf16.mxu0 %v5266_v48  ;;  %v1045_v8 = vpack.c.bf16 %v1037_v63, %v1037_v63 }
 0x49f   : > { %4681 = vmatmul.mubr.msk.bf16.vlgmr.msra.gmra.mxu0 %vm563_vm2, %v1043_v5 }
 0x4a0   : > { %4691 = vmatpush3.bf16.msra.mxu0 %v1248_v61  ;;  %4692 = vmatprep.mubr.msk.bf16.mxu0 %vm5267_vm1, %v5266_v48 }
 0x4a1   : > { %v5147_v46 = vpop.eup %5146  ;;  %4702 = vmatprep.subr.bf16.mxu0 %v5266_v48 }
 0x4a2   : > { %v1036_v58 = vmul.f32 %v5147_v46, %v5582_v23 }
 0x4a4   : > { %v1044_v11 = vpack.c.bf16 %v1036_v58, %v1036_v58 }
 0x4a6   : > { %4687 = vmatmul.mubr.msk.bf16.vlgmr.msra.gmra.mxu1 %vm563_vm2, %v1044_v11 }
 0x4a7   : > { %4693 = vmatmul.mubr.msk.bf16.vlgmr.msra.gmra.mxu0 %vm563_vm2, %v1045_v8  ;;  %4697 = vmatpush3.bf16.msra.mxu1 %v1296_v15 }
 0x4a8   : > { %4703 = vmatpush3.bf16.msra.mxu0 %v1344_v18  ;;  %4698 = vmatprep.mubr.msk.bf16.mxu1 %vm5267_vm1, %v5266_v48 }
 0x4a9   : > { %4708 = vmatprep.subr.bf16.mxu1 %v5266_v48  ;;  %4704 = vmatprep.mubr.msk.bf16.mxu0 %vm5267_vm1, %v5266_v48 }
 0x4aa   : > { %4714 = vmatprep.subr.bf16.mxu0 %v5266_v48 }
 0x4b4   : > { %v1018_v19 = vpop.xlane.xlu1 %1017 }
 0x4b5   : > { %5148 = vrcp.f32 %v1018_v19 }
 0x4b8   : > { %v1489_v47 = vpop.permute.xlu1 %1488 }
 0x4b9   : > { %v1494_v1 = vsel %vm563_vm2, %v1489_v47, 0 }
 0x4bd   : > { %v1021_v22 = vpop.xlane.xlu0 %1020 }
 0x4be   : > { %5150 = vrcp.f32 %v1021_v22 }
 0x4c1   : > { %v1438_v23 = vpop.permute.xlu0 %1437 }
 0x4c2   : > { %v5149_v25 = vpop.eup %5148 }
 0x4c3   : > { %v1038_v14 = vmul.f32 %v5149_v25, %v5592_v36  ;;  %v1443_v36 = vsel %vm563_vm2, %v1438_v23, 0 }
 0x4c5   : > { %v1436_v26 = vpop.permute.xlu0 %1435  ;;  %v1046_v27 = vpack.c.bf16 %v1038_v14, %v1038_v14 }
 0x4c7   : > { %4699 = vmatmul.mubr.msk.bf16.vlgmr.msra.gmra.mxu1 %vm563_vm2, %v1046_v27 }
 0x4c8   : > { %4709 = vmatpush3.bf16.msra.mxu1 %v1392_v32  ;;  %4710 = vmatprep.mubr.msk.bf16.mxu1 %vm5267_vm1, %v5266_v48 }
 0x4c9   : > { %v1540_v33 = vpop.permute.xlu0 %1539  ;;  %4720 = vmatprep.subr.bf16.mxu1 %v5266_v48 }
 0x4ca   : > { %v1545_v28 = vsel %vm563_vm2, %v1540_v33, 0 }
 0x4cb   : > { %v5151_v35 = vpop.eup %5150 }
 0x4cc   : > { %v1039_v37 = vmul.f32 %v5151_v35, %v5596_v40 }
 0x4cd   : > { %v1538_v30 = vpop.permute.xlu0 %1537 }
 0x4ce   : > { %v1047_v41 = vpack.c.bf16 %v1039_v37, %v1039_v37 }
 0x4d0   : > { %4705 = vmatmul.mubr.msk.bf16.vlgmr.msra.gmra.mxu0 %vm563_vm2, %v1047_v41 }
 0x4d1   : > { %4715 = vmatpush3.bf16.xpose.msra.mxu0 %v1443_v36  ;;  %4716 = vmatprep.mubr.msk.bf16.mxu0 %vm5267_vm1, %v5266_v48  ;;  %v1642_v31 = vpop.permute.xlu0 %1641 }
 0x4d2   : > { %4726 = vmatprep.subr.bf16.mxu0 %v5266_v48  ;;  %v1647_v42 = vsel %vm563_vm2, %v1642_v31, 0 }
 0x4d5   : > { %v1640_v40 = vpop.permute.xlu0 %1639 }
 0x4d8   : > { %4717 = vmatmul.mubr.msk.bf16.vlgmr.msra.gmra.mxu0 %vm563_vm2, %v1436_v26 }
 0x4d9   : > { %4727 = vmatpush3.bf16.xpose.msra.mxu0 %v1545_v28  ;;  %4728 = vmatprep.mubr.msk.bf16.mxu0 %vm5267_vm1, %v5266_v48  ;;  %v1744_v45 = vpop.permute.xlu0 %1743 }
 0x4da   : > { %4738 = vmatprep.subr.bf16.mxu0 %v5266_v48  ;;  %v1749_v51 = vsel %vm563_vm2, %v1744_v45, 0 }
 0x4dd   : > { %v1742_v50 = vpop.permute.xlu0 %1741 }
 0x4e0   : > { %4729 = vmatmul.mubr.msk.bf16.vlgmr.msra.gmra.mxu0 %vm563_vm2, %v1538_v30 }
 0x4e1   : > { %4739 = vmatpush3.bf16.xpose.msra.mxu0 %v1647_v42  ;;  %4740 = vmatprep.mubr.msk.bf16.mxu0 %vm5267_vm1, %v5266_v48  ;;  %v1939_v54 = vpop.permute.xlu0 %1938 }
 0x4e2   : > { %4750 = vmatprep.subr.bf16.mxu0 %v5266_v48  ;;  %v1944_v56 = vsel %vm1054_vm3, %v1939_v54, 0 }
 0x4e8   : > { %4741 = vmatmul.mubr.msk.bf16.vlgmr.msra.gmra.mxu0 %vm563_vm2, %v1640_v40 }
 0x4e9   : > { %4751 = vmatpush3.bf16.xpose.msra.mxu0 %v1749_v51  ;;  %v1024_v53 = vpop.xlane.xlu1 %1023  ;;  %4752 = vmatprep.mubr.msk.bf16.mxu0 %vm5267_vm1, %v5266_v48 }
 0x4ea   : > { %5152 = vrcp.f32 %v1024_v53  ;;  %4762 = vmatprep.subr.bf16.mxu0 %v5266_v48 }
 0x4ed   : > { %v1487_v55 = vpop.permute.xlu1 %1486 }
 0x4f0   : > { %4753 = vmatmul.mubr.msk.bf16.vlgmr.msra.gmra.mxu0 %vm563_vm2, %v1742_v50 }
 0x4f1   : > { %4763 = vmatpush3.bf16.msra.mxu0 %v1944_v56  ;;  %4764 = vmatprep.mubr.msk.bf16.mxu0 %vm5267_vm1, %v5266_v48  ;;  %v1591_v39 = vpop.permute.xlu1 %1590 }
 0x4f2   : > { %4774 = vmatprep.subr.bf16.mxu0 %v5266_v48  ;;  %v1596_v52 = vsel %vm563_vm2, %v1591_v39, 0 }
 0x4f5   : > { %v1589_v0 = vpop.permute.xlu1 %1588 }
 0x4f7   : > { %v5153_v49 = vpop.eup %5152 }
 0x4f8   : > { %v1040_v59 = vmul.f32 %v5153_v49, %v5611_v21 }
 0x4f9   : > { %v1693_v2 = vpop.permute.xlu1 %1692 }
 0x4fa   : > { %v1048_v60 = vpack.c.bf16 %v1040_v59, %v1040_v59  ;;  %v1698_v4 = vsel %vm563_vm2, %v1693_v2, 0 }
 0x4fc   : > { %4711 = vmatmul.mubr.msk.bf16.vlgmr.msra.gmra.mxu1 %vm563_vm2, %v1048_v60 }
 0x4fd   : > { %4721 = vmatpush3.bf16.xpose.msra.mxu1 %v1494_v1  ;;  %4722 = vmatprep.mubr.msk.bf16.mxu1 %vm5267_vm1, %v5266_v48  ;;  %v1691_v21 = vpop.permute.xlu1 %1690 }
 0x4fe   : > { %4732 = vmatprep.subr.bf16.mxu1 %v5266_v48 }
 0x501   : > { %v1795_v5 = vpop.permute.xlu1 %1794 }
 0x502   : > { %v1800_v61 = vsel %vm563_vm2, %v1795_v5, 0 }
 0x504   : > { %4723 = vmatmul.mubr.msk.bf16.vlgmr.msra.gmra.mxu1 %vm563_vm2, %v1487_v55 }
 0x505   : > { %4733 = vmatpush3.bf16.xpose.msra.mxu1 %v1596_v52  ;;  %4734 = vmatprep.mubr.msk.bf16.mxu1 %vm5267_vm1, %v5266_v48  ;;  %v1793_v6 = vpop.permute.xlu1 %1792 }
 0x506   : > { %4744 = vmatprep.subr.bf16.mxu1 %v5266_v48 }
 0x509   : > { %v1987_v46 = vpop.permute.xlu1 %1986 }
 0x50a   : > { %v1992_v63 = vsel %vm1054_vm3, %v1987_v46, 0 }
 0x50c   : > { %4735 = vmatmul.mubr.msk.bf16.vlgmr.msra.gmra.mxu1 %vm563_vm2, %v1589_v0 }
 0x50d   : > { %4745 = vmatpush3.bf16.xpose.msra.mxu1 %v1698_v4  ;;  %4746 = vmatprep.mubr.msk.bf16.mxu1 %vm5267_vm1, %v5266_v48 }
 0x50e   : > { %4756 = vmatprep.subr.bf16.mxu1 %v5266_v48 }
 0x514   : > { %4747 = vmatmul.mubr.msk.bf16.vlgmr.msra.gmra.mxu1 %vm563_vm2, %v1691_v21 }
 0x515   : > { %4757 = vmatpush3.bf16.xpose.msra.mxu1 %v1800_v61  ;;  %4758 = vmatprep.mubr.msk.bf16.mxu1 %vm5267_vm1, %v5266_v48 }
 0x516   : > { %4768 = vmatprep.subr.bf16.mxu1 %v5266_v48 }
 0x51c   : > { %4759 = vmatmul.mubr.msk.bf16.vlgmr.msra.gmra.mxu1 %vm563_vm2, %v1793_v6 }
 0x51d   : > { %4769 = vmatpush3.bf16.msra.mxu1 %v1992_v63  ;;  %4770 = vmatprep.mubr.msk.bf16.mxu1 %vm5267_vm1, %v5266_v48 }
 0x51e   : > { %4780 = vmatprep.subr.bf16.mxu1 %v5266_v48 }
 0x552   : > { %v5731_v58 = vpop.f32.mrf.mxu1 }
 0x554   : > { %v4676_v9 = vpop.f32.mrf.mxu1 }
 0x556   : > { %v1143_v11 = vpop.f32.mrf.mxu1 }
 0x557   : > { %v5733_v8 = vpop.f32.mrf.mxu0 }
 0x558   : > { %v4677_v15 = vpop.f32.mrf.mxu1 }
 0x559   : > { %v4670_v18 = vpop.f32.mrf.mxu0 }
 0x55b   : > { %v1095_v19 = vpop.f32.mrf.mxu0 }
 0x55d   : > { %v4671_v22 = vpop.f32.mrf.mxu0 }
 0x55f   : > { %v5735_v23 = vpop.f32.mrf.mxu0 }
 0x561   : > { %v4682_v25 = vpop.f32.mrf.mxu0 }
 0x563   : > { %v1191_v14 = vpop.f32.mrf.mxu0 }
 0x565   : > { %v4683_v26 = vpop.f32.mrf.mxu0 }
 0x566   : > { %v5737_v27 = vpop.f32.mrf.mxu1 }
 0x567   : > { %v5739_v32 = vpop.f32.mrf.mxu0 }
 0x568   : > { %v4688_v33 = vpop.f32.mrf.mxu1 }
 0x569   : > { %v4694_v35 = vpop.f32.mrf.mxu0 }
 0x56a   : > { %v1239_v37 = vpop.f32.mrf.mxu1 }
 0x56b   : > { %v1287_v41 = vpop.f32.mrf.mxu0 }
 0x56c   : > { %v4689_v30 = vpop.f32.mrf.mxu1 }
 0x56d   : > { %v4695_v36 = vpop.f32.mrf.mxu0 }
 0x587   : > { %v5741_v31 = vpop.f32.mrf.mxu1 }
 0x589   : > { %v4700_v28 = vpop.f32.mrf.mxu1 }
 0x58b   : > { %v1335_v40 = vpop.f32.mrf.mxu1 }
 0x58d   : > { %v4701_v42 = vpop.f32.mrf.mxu1 }
 0x590   : > { %v5743_v45 = vpop.f32.mrf.mxu0 }
 0x592   : > { %v4706_v47 = vpop.f32.mrf.mxu0 }
 0x594   : > { %v1383_v50 = vpop.f32.mrf.mxu0 }
 0x596   : > { %v4707_v51 = vpop.f32.mrf.mxu0 }
 0x598   : > { %v1479_v53 = vpop.f32.mrf.mxu0 }
 0x599   : > { %v1842_v54 = vsel %vm563_vm2, %v1479_v53, -inf }
 0x59a   : > { %1843 = vmax.xlane.f32.xlu0 %v1842_v54  ;;  %v4718_v55 = vpop.f32.mrf.mxu0 }
 0x59c   : > { %v1482_v56 = vpop.f32.mrf.mxu0 }
 0x59e   : > { %v4719_v39 = vpop.f32.mrf.mxu0 }
 0x5a0   : > { %v1581_v49 = vpop.f32.mrf.mxu0 }
 0x5a1   : > { %v1848_v59 = vsel %vm563_vm2, %v1581_v49, -inf }
 0x5a2   : > { %1849 = vmax.xlane.f32.xlu0 %v1848_v59  ;;  %v4730_v60 = vpop.f32.mrf.mxu0 }
 0x5a4   : > { %v1584_v0 = vpop.f32.mrf.mxu0 }
 0x5a6   : > { %v4731_v1 = vpop.f32.mrf.mxu0 }
 0x5a8   : > { %v5747_v2 = vpop.f32.mrf.mxu0 }
 0x5a9   : > { %v1854_v41 = vsel %vm563_vm2, %v5747_v2, -inf }
 0x5aa   : > { %v4742_v52 = vpop.f32.mrf.mxu0 }
 0x5ac   : > { %v1686_v21 = vpop.f32.mrf.mxu0 }
 0x5ae   : > { %v4743_v4 = vpop.f32.mrf.mxu0 }
 0x5b0   : > { %v5749_v5 = vpop.f32.mrf.mxu0 }
 0x5b1   : > { %v1860_v40 = vsel %vm563_vm2, %v5749_v5, -inf }
 0x5b2   : > { %v4754_v6 = vpop.f32.mrf.mxu0 }
 0x5b4   : > { %v1788_v61 = vpop.f32.mrf.mxu0 }
 0x5b6   : > { %v4755_v46 = vpop.f32.mrf.mxu0 }
 0x5bc   : > { %v5751_v63 = vpop.f32.mrf.mxu1 }
 0x5be   : > { %v4712_v9 = vpop.f32.mrf.mxu1 }
 0x5bf   : > { %v5776_v9 = vpop.permute.xlu1 %2034 }
 0x5c0   : > { %v1431_v11 = vpop.f32.mrf.mxu1 }
 0x5c2   : > { %v4713_v15 = vpop.f32.mrf.mxu1 }
 0x5c4   : > { %v1530_v18 = vpop.f32.mrf.mxu1 }
 0x5c5   : > { %v1845_v19 = vsel %vm563_vm2, %v1530_v18, -inf }
 0x5c6   : > { %1846 = vmax.xlane.f32.xlu1 %v1845_v19  ;;  %v4724_v22 = vpop.f32.mrf.mxu1 }
 0x5c8   : > { %v1533_v25 = vpop.f32.mrf.mxu1 }
 0x5ca   : > { %v4725_v14 = vpop.f32.mrf.mxu1 }
 0x5cc   : > { %v1632_v26 = vpop.f32.mrf.mxu1 }
 0x5cd   : > { %v1851_v33 = vsel %vm563_vm2, %v1632_v26, -inf }
 0x5ce   : > { %v4736_v35 = vpop.f32.mrf.mxu1  ;;  %1852 = vmax.xlane.f32.xlu0 %v1851_v33 }
 0x5d0   : > { %v1635_v37 = vpop.f32.mrf.mxu1 }
 0x5d2   : > { %v4737_v30 = vpop.f32.mrf.mxu1  ;;  %1855 = vmax.xlane.f32.xlu0 %v1854_v41 }
 0x5d4   : > { %v1734_v36 = vpop.f32.mrf.mxu1 }
 0x5d5   : > { %v1857_v28 = vsel %vm563_vm2, %v1734_v36, -inf }
 0x5d6   : > { %1858 = vmax.xlane.f32.xlu1 %v1857_v28  ;;  %v4748_v42 = vpop.f32.mrf.mxu1  ;;  %1861 = vmax.xlane.f32.xlu0 %v1860_v40 }
 0x5d8   : > { %v1737_v47 = vpop.f32.mrf.mxu1 }
 0x5da   : > { %v4749_v50 = vpop.f32.mrf.mxu1 }
 0x5dc   : > { %v5760_v51 = vpop.f32.mrf.mxu1 }
 0x5dd   : > { %v1863_v39 = vsel %vm563_vm2, %v5760_v51, -inf }
 0x5de   : > { %v4760_v54 = vpop.f32.mrf.mxu1 }
 0x5e0   : > { %v1839_v55 = vpop.f32.mrf.mxu1 }
 0x5e2   : > { %v4761_v56 = vpop.f32.mrf.mxu1 }
 0x5e7   : > { %2178 = vrot.lane.b32.xlu1 %v5453_v16, %s5272_s22 }
 0x5ec   : > { %2130 = vrot.lane.b32.xlu0 %v5439_v10, %s5272_s22 }
 0x60b   : > { %1864 = vmax.xlane.f32.xlu1 %v1863_v39 }
 0x623   : > { %v1844_v59 = vpop.xlane.xlu0 %1843 }
 0x624   : > { %v1866_v60 = vsub.f32 %v1479_v53, %v1844_v59  ;;  %v5778_v53 = vpop.permute.xlu1 %2082 }
 0x626   : > { %v1874_v0 = vmul.f32 1.442695, %v1866_v60 }
 0x628   : > { %5154 = vpow2.f32 %v1874_v0 }
 0x62b   : > { %v1850_v1 = vpop.xlane.xlu0 %1849 }
 0x62c   : > { %v1868_v52 = vsub.f32 %v1581_v49, %v1850_v1 }
 0x62e   : > { %v1878_v21 = vmul.f32 1.442695, %v1868_v52 }
 0x630   : > { %5156 = vpow2.f32 %v1878_v21 }
 0x635   : > { %v5768_v4 = vpop.eup %5154 }
 0x636   : > { %v1890_v6 = vsel %vm563_vm2, %v5768_v4, 0.0 }
 0x637   : > { %1891 = vadd.xlane.f32.xlu0 %v1890_v6 }
 0x63d   : > { %v5772_v61 = vpop.eup %5156 }
 0x63e   : > { %v1896_v46 = vsel %vm563_vm2, %v5772_v61, 0.0 }
 0x63f   : > { %1897 = vadd.xlane.f32.xlu0 %v1896_v46 }
 0x64f   : > { %v1847_v11 = vpop.xlane.xlu1 %1846 }
 0x650   : > { %v1867_v49 = vsub.f32 %v1530_v18, %v1847_v11 }
 0x652   : > { %v1876_v15 = vmul.f32 1.442695, %v1867_v49  ;;  %v2040_v49 = vsel %vm1054_vm3, %v5776_v9, 0 }
 0x654   : > { %5158 = vpow2.f32 %v1876_v15 }
 0x657   : > { %v1853_v19 = vpop.xlane.xlu0 %1852 }
 0x658   : > { %v1869_v22 = vsub.f32 %v1632_v26, %v1853_v19 }
 0x65a   : > { %v1880_v25 = vmul.f32 1.442695, %v1869_v22 }
 0x65b   : > { %v1856_v14 = vpop.xlane.xlu0 %1855 }
 0x65c   : > { %5160 = vpow2.f32 %v1880_v25  ;;  %v1870_v33 = vsub.f32 %v5747_v2, %v1856_v14 }
 0x65e   : > { %v1882_v35 = vmul.f32 1.442695, %v1870_v33 }
 0x65f   : > { %v1859_v2 = vpop.xlane.xlu1 %1858  ;;  %v1862_v42 = vpop.xlane.xlu0 %1861 }
 0x660   : > { %5162 = vpow2.f32 %v1882_v35  ;;  %v1871_v40 = vsub.f32 %v1734_v36, %v1859_v2  ;;  %v1872_v50 = vsub.f32 %v5749_v5, %v1862_v42 }
 0x661   : > { %v5781_v37 = vpop.eup %5158 }
 0x662   : > { %v1893_v41 = vsel %vm563_vm2, %v5781_v37, 0.0  ;;  %v1884_v47 = vmul.f32 1.442695, %v1871_v40  ;;  %v1886_v54 = vmul.f32 1.442695, %v1872_v50 }
 0x663   : > { %1894 = vadd.xlane.f32.xlu1 %v1893_v41  ;;  %v5808_v5 = vpop.permute.xlu1 %2178  ;;  %v2131_v60 = vpop.permute.xlu0 %2130 }
 0x664   : > { %5164 = vpow2.f32 %v1884_v47  ;;  %v2136_v9 = vsel %vm1054_vm3, %v2131_v60, 0 }
 0x665   : > { %5166 = vpow2.f32 %v1886_v54 }
 0x669   : > { %v5785_v30 = vpop.eup %5160 }
 0x66a   : > { %v1899_v18 = vsel %vm563_vm2, %v5785_v30, 0.0 }
 0x66b   : > { %1900 = vadd.xlane.f32.xlu1 %v1899_v18  ;;  %v2088_v18 = vsel %vm1054_vm3, %v5778_v53, 0  ;;  %v2184_v53 = vsel %vm1054_vm3, %v5808_v5, 0 }
 0x66d   : > { %v5789_v26 = vpop.eup %5162 }
 0x66e   : > { %v1902_v28 = vsel %vm563_vm2, %v5789_v26, 0.0 }
 0x66f   : > { %1903 = vadd.xlane.f32.xlu0 %v1902_v28 }
 0x671   : > { %v5798_v55 = vpop.eup %5164 }
 0x672   : > { %v1905_v56 = vsel %vm563_vm2, %v5798_v55, 0.0  ;;  %v5802_v39 = vpop.eup %5166 }
 0x673   : > { %v1908_v59 = vsel %vm563_vm2, %v5802_v39, 0.0 }
 0x67c   : > { %2274 = vrot.lane.b32.xlu1 %v5460_v17, %s5272_s22 }
 0x685   : > { %2226 = vrot.lane.b32.xlu0 %v5447_v13, %s5272_s22 }
 0x694   : > { %v1865_v36 = vpop.xlane.xlu1 %1864 }
 0x695   : > { %v1873_v0 = vsub.f32 %v5760_v51, %v1865_v36 }
 0x697   : > { %v1888_v1 = vmul.f32 1.442695, %v1873_v0 }
 0x6a0   : > { %1906 = vadd.xlane.f32.xlu1 %v1905_v56 }
 0x6a4   : > { %1909 = vadd.xlane.f32.xlu0 %v1908_v59 }
 0x6b1   : > { %2374 = vrot.lane.b32.xlu1 %v5432_v3, %s5273_s23 }
 0x6ba   : > { %2324 = vrot.lane.b32.xlu0 %v5429_v62, %s5273_s23 }
 0x6be   : > { %2322 = vrot.lane.b32.xlu0 %v5471_v24, %s5274_s25 }
 0x6c0   : > { %v1892_v52 = vpop.xlane.xlu0 %1891 }
 0x6c1   : > { %5168 = vrcp.f32 %v1892_v52 }
 0x6c2   : > { %2424 = vrot.lane.b32.xlu0 %v5435_v7, %s5273_s23  ;;  %5170 = vpow2.f32 %v1888_v1 }
 0x6c6   : > { %2422 = vrot.lane.b32.xlu0 %v5481_v20, %s5274_s25 }
 0x6c8   : > { %v1898_v21 = vpop.xlane.xlu0 %1897 }
 0x6c9   : > { %5172 = vrcp.f32 %v1898_v21 }
 0x6ca   : > { %2524 = vrot.lane.b32.xlu0 %v5439_v10, %s5273_s23 }
 0x6ce   : > { %v5169_v51 = vpop.eup %5168  ;;  %2522 = vrot.lane.b32.xlu0 %v5499_v44, %s5274_s25 }
 0x6cf   : > { %v1922_v6 = vmul.f32 %v5169_v51, %v5768_v4  ;;  %v5824_v46 = vpop.eup %5170 }
 0x6d0   : > { %v1911_v15 = vsel %vm563_vm2, %v5824_v46, 0.0 }
 0x6d1   : > { %v1930_v11 = vpack.c.bf16 %v1922_v6, %v1922_v6 }
 0x6d2   : > { %2624 = vrot.lane.b32.xlu0 %v5447_v13, %s5273_s23 }
 0x6d3   : > { %4765 = vmatmul.mubr.msk.bf16.vlgmr.msra.gmra.mxu0 %vm563_vm2, %v1930_v11 }
 0x6d4   : > { %4775 = vmatpush3.bf16.msra.mxu0 %v2040_v49  ;;  %4776 = vmatprep.mubr.msk.bf16.mxu0 %vm5267_vm1, %v5266_v48 }
 0x6d5   : > { %1912 = vadd.xlane.f32.xlu1 %v1911_v15  ;;  %4786 = vmatprep.subr.bf16.mxu0 %v5266_v48 }
 0x6d6   : > { %v5173_v4 = vpop.eup %5172  ;;  %2622 = vrot.lane.b32.xlu0 %v5516_v29, %s5274_s25 }
 0x6d7   : > { %v1924_v19 = vmul.f32 %v5173_v4, %v5772_v61 }
 0x6d9   : > { %v1932_v22 = vpack.c.bf16 %v1924_v19, %v1924_v19 }
 0x6da   : > { %2818 = vrot.lane.b32.xlu0 %v5429_v62, %s5275_s28 }
 0x6db   : > { %4777 = vmatmul.mubr.msk.bf16.vlgmr.msra.gmra.mxu0 %vm563_vm2, %v1932_v22 }
 0x6dc   : > { %4787 = vmatpush3.bf16.msra.mxu0 %v2136_v9  ;;  %4788 = vmatprep.mubr.msk.bf16.mxu0 %vm5267_vm1, %v5266_v48 }
 0x6dd   : > { %4798 = vmatprep.subr.bf16.mxu0 %v5266_v48 }
 0x6e6   : > { %2372 = vrot.lane.b32.xlu1 %v5483_v34, %s5274_s25 }
 0x6ea   : > { %2474 = vrot.lane.b32.xlu1 %v5443_v12, %s5273_s23 }
 0x6ec   : > { %v1895_v61 = vpop.xlane.xlu1 %1894 }
 0x6ed   : > { %5174 = vrcp.f32 %v1895_v61 }
 0x6ee   : > { %2472 = vrot.lane.b32.xlu1 %v5497_v43, %s5274_s25 }
 0x6f2   : > { %2574 = vrot.lane.b32.xlu1 %v5453_v16, %s5273_s23 }
 0x6f4   : > { %v1901_v25 = vpop.xlane.xlu1 %1900 }
 0x6f5   : > { %5176 = vrcp.f32 %v1901_v25 }
 0x6f6   : > { %2572 = vrot.lane.b32.xlu1 %v5518_v38, %s5274_s25 }
 0x6f8   : > { %v1904_v14 = vpop.xlane.xlu0 %1903 }
 0x6f9   : > { %5178 = vrcp.f32 %v1904_v14 }
 0x6fa   : > { %v5175_v33 = vpop.eup %5174  ;;  %2674 = vrot.lane.b32.xlu1 %v5460_v17, %s5273_s23 }
 0x6fb   : > { %v1923_v35 = vmul.f32 %v5175_v33, %v5781_v37 }
 0x6fc   : > { %v2227_v47 = vpop.permute.xlu0 %2226 }
 0x6fd   : > { %v1931_v41 = vpack.c.bf16 %v1923_v35, %v1923_v35 }
 0x6fe   : > { %2672 = vrot.lane.b32.xlu1 %v5535_v57, %s5274_s25 }
 0x6ff   : > { %4771 = vmatmul.mubr.msk.bf16.vlgmr.msra.gmra.mxu1 %vm563_vm2, %v1931_v41 }
 0x700   : > { %4781 = vmatpush3.bf16.msra.mxu1 %v2088_v18  ;;  %4782 = vmatprep.mubr.msk.bf16.mxu1 %vm5267_vm1, %v5266_v48 }
 0x701   : > { %4792 = vmatprep.subr.bf16.mxu1 %v5266_v48 }
 0x702   : > { %v5177_v28 = vpop.eup %5176  ;;  %2866 = vrot.lane.b32.xlu1 %v5432_v3, %s5275_s28 }
 0x703   : > { %v1925_v37 = vmul.f32 %v5177_v28, %v5785_v30  ;;  %v2232_v30 = vsel %vm1054_vm3, %v2227_v47, 0 }
 0x705   : > { %v1933_v2 = vpack.c.bf16 %v1925_v37, %v1925_v37 }
 0x706   : > { %v5179_v40 = vpop.eup %5178  ;;  %2914 = vrot.lane.b32.xlu1 %v5435_v7, %s5275_s28 }
 0x707   : > { %4783 = vmatmul.mubr.msk.bf16.vlgmr.msra.gmra.mxu1 %vm563_vm2, %v1933_v2  ;;  %v1926_v42 = vmul.f32 %v5179_v40, %v5789_v26  ;;  %v2275_v26 = vpop.permute.xlu1 %2274 }
 0x708   : > { %4793 = vmatpush3.bf16.msra.mxu1 %v2184_v53  ;;  %4794 = vmatprep.mubr.msk.bf16.mxu1 %vm5267_vm1, %v5266_v48  ;;  %v2280_v21 = vsel %vm1054_vm3, %v2275_v26, 0 }
 0x709   : > { %v1934_v50 = vpack.c.bf16 %v1926_v42, %v1926_v42  ;;  %4804 = vmatprep.subr.bf16.mxu1 %v5266_v48 }
 0x70a   : > { %2962 = vrot.lane.b32.xlu1 %v5443_v12, %s5275_s28 }
 0x70b   : > { %4789 = vmatmul.mubr.msk.bf16.vlgmr.msra.gmra.mxu0 %vm563_vm2, %v1934_v50 }
 0x70c   : > { %4799 = vmatpush3.bf16.msra.mxu0 %v2232_v30  ;;  %4800 = vmatprep.mubr.msk.bf16.mxu0 %vm5267_vm1, %v5266_v48 }
 0x70d   : > { %4810 = vmatprep.subr.bf16.mxu0 %v5266_v48 }
 0x729   : > { %v1907_v54 = vpop.xlane.xlu1 %1906 }
 0x72a   : > { %5180 = vrcp.f32 %v1907_v54 }
 0x72d   : > { %v1910_v56 = vpop.xlane.xlu0 %1909  ;;  %v2375_v61 = vpop.permute.xlu1 %2374 }
 0x72e   : > { %5182 = vrcp.f32 %v1910_v56  ;;  %v2380_v40 = vsel %vm563_vm2, %v2375_v61, 0 }
 0x731   : > { %v2325_v59 = vpop.permute.xlu0 %2324 }
 0x732   : > { %v2330_v49 = vsel %vm563_vm2, %v2325_v59, 0 }
 0x735   : > { %v2323_v5 = vpop.permute.xlu0 %2322 }
 0x737   : > { %v5181_v36 = vpop.eup %5180 }
 0x738   : > { %v1927_v60 = vmul.f32 %v5181_v36, %v5798_v55 }
 0x739   : > { %v2425_v0 = vpop.permute.xlu0 %2424 }
 0x73a   : > { %v1935_v1 = vpack.c.bf16 %v1927_v60, %v1927_v60 }
 0x73b   : > { %v5183_v52 = vpop.eup %5182 }
 0x73c   : > { %4795 = vmatmul.mubr.msk.bf16.vlgmr.msra.gmra.mxu1 %vm563_vm2, %v1935_v1  ;;  %v1928_v51 = vmul.f32 %v5183_v52, %v5802_v39  ;;  %v2430_v39 = vsel %vm563_vm2, %v2425_v0, 0 }
 0x73d   : > { %4805 = vmatpush3.bf16.msra.mxu1 %v2280_v21  ;;  %4806 = vmatprep.mubr.msk.bf16.mxu1 %vm5267_vm1, %v5266_v48  ;;  %v2423_v11 = vpop.permute.xlu0 %2422 }
 0x73e   : > { %v1936_v6 = vpack.c.bf16 %v1928_v51, %v1928_v51  ;;  %4816 = vmatprep.subr.bf16.mxu1 %v5266_v48 }
 0x740   : > { %4801 = vmatmul.mubr.msk.bf16.vlgmr.msra.gmra.mxu0 %vm563_vm2, %v1936_v6 }
 0x741   : > { %4811 = vmatpush3.bf16.xpose.msra.mxu0 %v2330_v49  ;;  %4812 = vmatprep.mubr.msk.bf16.mxu0 %vm5267_vm1, %v5266_v48  ;;  %v2525_v55 = vpop.permute.xlu0 %2524 }
 0x742   : > { %4822 = vmatprep.subr.bf16.mxu0 %v5266_v48  ;;  %v2530_v4 = vsel %vm563_vm2, %v2525_v55, 0 }
 0x745   : > { %v2523_v15 = vpop.permute.xlu0 %2522 }
 0x748   : > { %4813 = vmatmul.mubr.msk.bf16.vlgmr.msra.gmra.mxu0 %vm563_vm2, %v2323_v5 }
 0x749   : > { %4823 = vmatpush3.bf16.xpose.msra.mxu0 %v2430_v39  ;;  %4824 = vmatprep.mubr.msk.bf16.mxu0 %vm5267_vm1, %v5266_v48  ;;  %v2625_v19 = vpop.permute.xlu0 %2624 }
 0x74a   : > { %4834 = vmatprep.subr.bf16.mxu0 %v5266_v48  ;;  %v2630_v9 = vsel %vm563_vm2, %v2625_v19, 0 }
 0x74d   : > { %v2623_v22 = vpop.permute.xlu0 %2622 }
 0x750   : > { %4825 = vmatmul.mubr.msk.bf16.vlgmr.msra.gmra.mxu0 %vm563_vm2, %v2423_v11 }
 0x751   : > { %4835 = vmatpush3.bf16.xpose.msra.mxu0 %v2530_v4  ;;  %4836 = vmatprep.mubr.msk.bf16.mxu0 %vm5267_vm1, %v5266_v48  ;;  %v2819_v25 = vpop.permute.xlu0 %2818 }
 0x752   : > { %4846 = vmatprep.subr.bf16.mxu0 %v5266_v48  ;;  %v2824_v33 = vsel %vm1054_vm3, %v2819_v25, 0 }
 0x758   : > { %4837 = vmatmul.mubr.msk.bf16.vlgmr.msra.gmra.mxu0 %vm563_vm2, %v2523_v15 }
 0x759   : > { %4847 = vmatpush3.bf16.xpose.msra.mxu0 %v2630_v9  ;;  %4848 = vmatprep.mubr.msk.bf16.mxu0 %vm5267_vm1, %v5266_v48 }
 0x75a   : > { %4858 = vmatprep.subr.bf16.mxu0 %v5266_v48 }
 0x75e   : > { %v1913_v14 = vpop.xlane.xlu1 %1912 }
 0x75f   : > { %5184 = vrcp.f32 %v1913_v14 }
 0x760   : > { %4849 = vmatmul.mubr.msk.bf16.vlgmr.msra.gmra.mxu0 %vm563_vm2, %v2623_v22 }
 0x761   : > { %4859 = vmatpush3.bf16.msra.mxu0 %v2824_v33  ;;  %4860 = vmatprep.mubr.msk.bf16.mxu0 %vm5267_vm1, %v5266_v48 }
 0x762   : > { %4870 = vmatprep.subr.bf16.mxu0 %v5266_v48  ;;  %v2373_v35 = vpop.permute.xlu1 %2372 }
 0x766   : > { %v2475_v41 = vpop.permute.xlu1 %2474 }
 0x767   : > { %v2480_v42 = vsel %vm563_vm2, %v2475_v41, 0 }
 0x76a   : > { %v2473_v2 = vpop.permute.xlu1 %2472 }
 0x76c   : > { %v5185_v18 = vpop.eup %5184 }
 0x76d   : > { %v1929_v28 = vmul.f32 %v5185_v18, %v5824_v46 }
 0x76e   : > { %v2575_v53 = vpop.permute.xlu1 %2574 }
 0x76f   : > { %v1937_v37 = vpack.c.bf16 %v1929_v28, %v1929_v28  ;;  %v2580_v47 = vsel %vm563_vm2, %v2575_v53, 0 }
 0x771   : > { %4807 = vmatmul.mubr.msk.bf16.vlgmr.msra.gmra.mxu1 %vm563_vm2, %v1937_v37 }
 0x772   : > { %4817 = vmatpush3.bf16.xpose.msra.mxu1 %v2380_v40  ;;  %4818 = vmatprep.mubr.msk.bf16.mxu1 %vm5267_vm1, %v5266_v48  ;;  %v2573_v46 = vpop.permute.xlu1 %2572 }
 0x773   : > { %4828 = vmatprep.subr.bf16.mxu1 %v5266_v48 }
 0x776   : > { %v2675_v50 = vpop.permute.xlu1 %2674 }
 0x777   : > { %v2680_v26 = vsel %vm563_vm2, %v2675_v50, 0 }
 0x779   : > { %4819 = vmatmul.mubr.msk.bf16.vlgmr.msra.gmra.mxu1 %vm563_vm2, %v2373_v35 }
 0x77a   : > { %4829 = vmatpush3.bf16.xpose.msra.mxu1 %v2480_v42  ;;  %4830 = vmatprep.mubr.msk.bf16.mxu1 %vm5267_vm1, %v5266_v48  ;;  %v2673_v30 = vpop.permute.xlu1 %2672 }
 0x77b   : > { %4840 = vmatprep.subr.bf16.mxu1 %v5266_v48 }
 0x77e   : > { %v2867_v54 = vpop.permute.xlu1 %2866 }
 0x77f   : > { %v2872_v56 = vsel %vm1054_vm3, %v2867_v54, 0 }
 0x781   : > { %4831 = vmatmul.mubr.msk.bf16.vlgmr.msra.gmra.mxu1 %vm563_vm2, %v2473_v2 }
 0x782   : > { %4841 = vmatpush3.bf16.xpose.msra.mxu1 %v2580_v47  ;;  %4842 = vmatprep.mubr.msk.bf16.mxu1 %vm5267_vm1, %v5266_v48 }
 0x783   : > { %4852 = vmatprep.subr.bf16.mxu1 %v5266_v48 }
 0x789   : > { %4843 = vmatmul.mubr.msk.bf16.vlgmr.msra.gmra.mxu1 %vm563_vm2, %v2573_v46 }
 0x78a   : > { %4853 = vmatpush3.bf16.xpose.msra.mxu1 %v2680_v26  ;;  %4854 = vmatprep.mubr.msk.bf16.mxu1 %vm5267_vm1, %v5266_v48 }
 0x78b   : > { %4864 = vmatprep.subr.bf16.mxu1 %v5266_v48 }
 0x791   : > { %4855 = vmatmul.mubr.msk.bf16.vlgmr.msra.gmra.mxu1 %vm563_vm2, %v2673_v30 }
 0x792   : > { %4865 = vmatpush3.bf16.msra.mxu1 %v2872_v56  ;;  %4866 = vmatprep.mubr.msk.bf16.mxu1 %vm5267_vm1, %v5266_v48 }
 0x793   : > { %v5943_v59 = vpop.f32.mrf.mxu0  ;;  %4876 = vmatprep.subr.bf16.mxu1 %v5266_v48 }
 0x795   : > { %v4766_v5 = vpop.f32.mrf.mxu0 }
 0x797   : > { %v1983_v36 = vpop.f32.mrf.mxu0 }
 0x799   : > { %v4767_v60 = vpop.f32.mrf.mxu0 }
 0x79b   : > { %v5946_v0 = vpop.f32.mrf.mxu0 }
 0x79d   : > { %v4778_v1 = vpop.f32.mrf.mxu0 }
 0x79f   : > { %v2079_v52 = vpop.f32.mrf.mxu0 }
 0x7a1   : > { %v4779_v21 = vpop.f32.mrf.mxu0 }
 0x7bf   : > { %v5948_v51 = vpop.f32.mrf.mxu1 }
 0x7c0   : > { %v5042_v6 = vpack.i.bf16 %v5948_v51, %v5943_v59 }
 0x7c1   : > { %v4772_v11 = vpop.f32.mrf.mxu1 }
 0x7c3   : > { %v2031_v49 = vpop.f32.mrf.mxu1 }
 0x7c5   : > { %v4773_v55 = vpop.f32.mrf.mxu1 }
 0x7c7   : > { %v5952_v39 = vpop.f32.mrf.mxu1 }
 0x7c8   : > { %v5047_v15 = vpack.i.bf16 %v5952_v39, %v5946_v0 }
 0x7c9   : > { %v4784_v4 = vpop.f32.mrf.mxu1 }
 0x7cb   : > { %v2127_v19 = vpop.f32.mrf.mxu1  ;;  %v5956_v22 = vpop.f32.mrf.mxu0 }
 0x7cd   : > { %v4785_v9 = vpop.f32.mrf.mxu1  ;;  %v4790_v61 = vpop.f32.mrf.mxu0 }
 0x7cf   : > { %v2175_v25 = vpop.f32.mrf.mxu0 }
 0x7d1   : > { %v4791_v14 = vpop.f32.mrf.mxu0 }
 0x7fc   : > { %v5958_v33 = vpop.f32.mrf.mxu1 }
 0x7fd   : > { %v5062_v35 = vpack.i.bf16 %v5958_v33, %v5956_v22 }
 0x7fe   : > { %v4796_v41 = vpop.f32.mrf.mxu1 }
 0x800   : > { %v2223_v18 = vpop.f32.mrf.mxu1  ;;  %v5962_v28 = vpop.f32.mrf.mxu0 }
 0x802   : > { %v4797_v37 = vpop.f32.mrf.mxu1  ;;  %v4802_v2 = vpop.f32.mrf.mxu0 }
 0x804   : > { %v2271_v40 = vpop.f32.mrf.mxu0 }
 0x806   : > { %v4803_v53 = vpop.f32.mrf.mxu0 }
 0x808   : > { %v2366_v42 = vpop.f32.mrf.mxu0 }
 0x809   : > { %v2722_v46 = vsel %vm563_vm2, %v2366_v42, -inf }
 0x80a   : > { %2723 = vmax.xlane.f32.xlu0 %v2722_v46  ;;  %v4814_v47 = vpop.f32.mrf.mxu0 }
 0x80c   : > { %v2369_v50 = vpop.f32.mrf.mxu0 }
 0x80e   : > { %v4815_v30 = vpop.f32.mrf.mxu0 }
 0x810   : > { %v2466_v26 = vpop.f32.mrf.mxu0 }
 0x811   : > { %v2728_v54 = vsel %vm563_vm2, %v2466_v26, -inf }
 0x812   : > { %2729 = vmax.xlane.f32.xlu0 %v2728_v54  ;;  %v4826_v56 = vpop.f32.mrf.mxu0 }
 0x814   : > { %v2469_v5 = vpop.f32.mrf.mxu0 }
 0x816   : > { %v4827_v36 = vpop.f32.mrf.mxu0 }
 0x818   : > { %v5966_v60 = vpop.f32.mrf.mxu0 }
 0x819   : > { %v2734_v30 = vsel %vm563_vm2, %v5966_v60, -inf }
 0x81a   : > { %v4838_v1 = vpop.f32.mrf.mxu0 }
 0x81c   : > { %v2569_v52 = vpop.f32.mrf.mxu0 }
 0x81e   : > { %v4839_v21 = vpop.f32.mrf.mxu0 }
 0x820   : > { %v5968_v11 = vpop.f32.mrf.mxu0 }
 0x821   : > { %v2740_v36 = vsel %vm563_vm2, %v5968_v11, -inf }
 0x822   : > { %v4850_v49 = vpop.f32.mrf.mxu0 }
 0x824   : > { %v2669_v55 = vpop.f32.mrf.mxu0 }
 0x826   : > { %v4851_v4 = vpop.f32.mrf.mxu0 }
 0x831   : > { %v5970_v19 = vpop.f32.mrf.mxu1 }
 0x832   : > { %v5067_v9 = vpack.i.bf16 %v5970_v19, %v5962_v28 }
 0x833   : > { %v4808_v61 = vpop.f32.mrf.mxu1 }
 0x835   : > { %v2319_v25 = vpop.f32.mrf.mxu1 }
 0x837   : > { %v4809_v14 = vpop.f32.mrf.mxu1 }
 0x839   : > { %v2416_v41 = vpop.f32.mrf.mxu1 }
 0x83a   : > { %v2725_v18 = vsel %vm563_vm2, %v2416_v41, -inf }
 0x83b   : > { %2726 = vmax.xlane.f32.xlu1 %v2725_v18  ;;  %v4820_v37 = vpop.f32.mrf.mxu1 }
 0x83d   : > { %v2419_v2 = vpop.f32.mrf.mxu1 }
 0x83f   : > { %v4821_v40 = vpop.f32.mrf.mxu1 }
 0x841   : > { %v2516_v53 = vpop.f32.mrf.mxu1 }
 0x842   : > { %v2731_v46 = vsel %vm563_vm2, %v2516_v53, -inf }
 0x843   : > { %v4832_v47 = vpop.f32.mrf.mxu1  ;;  %2732 = vmax.xlane.f32.xlu0 %v2731_v46 }
 0x845   : > { %v2519_v50 = vpop.f32.mrf.mxu1 }
 0x847   : > { %v4833_v54 = vpop.f32.mrf.mxu1  ;;  %2735 = vmax.xlane.f32.xlu0 %v2734_v30 }
 0x849   : > { %v2616_v56 = vpop.f32.mrf.mxu1 }
 0x84a   : > { %v2737_v5 = vsel %vm563_vm2, %v2616_v56, -inf }
 0x84b   : > { %2738 = vmax.xlane.f32.xlu1 %v2737_v5  ;;  %v4844_v1 = vpop.f32.mrf.mxu1  ;;  %2741 = vmax.xlane.f32.xlu0 %v2740_v36  ;;  %v2915_v5 = vpop.permute.xlu1 %2914 }
 0x84d   : > { %v2619_v52 = vpop.f32.mrf.mxu1 }
 0x84f   : > { %v4845_v21 = vpop.f32.mrf.mxu1 }
 0x851   : > { %v5981_v49 = vpop.f32.mrf.mxu1 }
 0x852   : > { %v2743_v25 = vsel %vm563_vm2, %v5981_v49, -inf }
 0x853   : > { %v4856_v55 = vpop.f32.mrf.mxu1 }
 0x855   : > { %v2719_v4 = vpop.f32.mrf.mxu1 }
 0x857   : > { %v4857_v61 = vpop.f32.mrf.mxu1 }
 0x85c   : > { %3058 = vrot.lane.b32.xlu1 %v5453_v16, %s5275_s28 }
 0x861   : > { %3010 = vrot.lane.b32.xlu0 %v5439_v10, %s5275_s28 }
 0x880   : > { %2744 = vmax.xlane.f32.xlu1 %v2743_v25 }
 0x893   : > { %v2724_v14 = vpop.xlane.xlu0 %2723 }
 0x894   : > { %v2746_v18 = vsub.f32 %v2366_v42, %v2724_v14  ;;  %v5997_v42 = vpop.permute.xlu1 %2962 }
 0x896   : > { %v2754_v37 = vmul.f32 1.442695, %v2746_v18 }
 0x898   : > { %5186 = vpow2.f32 %v2754_v37 }
 0x89b   : > { %v2730_v2 = vpop.xlane.xlu0 %2729 }
 0x89c   : > { %v2748_v40 = vsub.f32 %v2466_v26, %v2730_v2 }
 0x89e   : > { %v2758_v46 = vmul.f32 1.442695, %v2748_v40 }
 0x8a0   : > { %5188 = vpow2.f32 %v2758_v46 }
 0x8a5   : > { %v5989_v47 = vpop.eup %5186 }
 0x8a6   : > { %v2770_v50 = vsel %vm563_vm2, %v5989_v47, 0.0 }
 0x8a7   : > { %2771 = vadd.xlane.f32.xlu0 %v2770_v50 }
 0x8ad   : > { %v5993_v30 = vpop.eup %5188 }
 0x8ae   : > { %v2776_v54 = vsel %vm563_vm2, %v5993_v30, 0.0 }
 0x8af   : > { %2777 = vadd.xlane.f32.xlu0 %v2776_v54 }
 0x8c4   : > { %v2727_v36 = vpop.xlane.xlu1 %2726 }
 0x8c5   : > { %v2747_v1 = vsub.f32 %v2416_v41, %v2727_v36 }
 0x8c7   : > { %v2756_v26 = vmul.f32 1.442695, %v2747_v1 }
 0x8c9   : > { %5190 = vpow2.f32 %v2756_v26 }
 0x8cc   : > { %v2733_v52 = vpop.xlane.xlu0 %2732 }
 0x8cd   : > { %v2749_v21 = vsub.f32 %v2516_v53, %v2733_v52 }
 0x8cf   : > { %v2760_v55 = vmul.f32 1.442695, %v2749_v21 }
 0x8d0   : > { %v2736_v4 = vpop.xlane.xlu0 %2735 }
 0x8d1   : > { %5192 = vpow2.f32 %v2760_v55  ;;  %v2750_v61 = vsub.f32 %v5966_v60, %v2736_v4 }
 0x8d3   : > { %v2762_v25 = vmul.f32 1.442695, %v2750_v61 }
 0x8d4   : > { %v2739_v60 = vpop.xlane.xlu1 %2738  ;;  %v2742_v46 = vpop.xlane.xlu0 %2741 }
 0x8d5   : > { %5194 = vpow2.f32 %v2762_v25  ;;  %v2751_v40 = vsub.f32 %v2616_v56, %v2739_v60  ;;  %v2752_v54 = vsub.f32 %v5968_v11, %v2742_v46  ;;  %v2920_v60 = vsel %vm1054_vm3, %v2915_v5, 0 }
 0x8d6   : > { %v6000_v14 = vpop.eup %5190 }
 0x8d7   : > { %v2773_v18 = vsel %vm563_vm2, %v6000_v14, 0.0  ;;  %v2764_v50 = vmul.f32 1.442695, %v2751_v40  ;;  %v2766_v36 = vmul.f32 1.442695, %v2752_v54 }
 0x8d8   : > { %2774 = vadd.xlane.f32.xlu1 %v2773_v18  ;;  %v6027_v11 = vpop.permute.xlu1 %3058  ;;  %v3011_v56 = vpop.permute.xlu0 %3010 }
 0x8d9   : > { %5196 = vpow2.f32 %v2764_v50  ;;  %v3016_v40 = vsel %vm1054_vm3, %v3011_v56, 0 }
 0x8da   : > { %5198 = vpow2.f32 %v2766_v36 }
 0x8de   : > { %v6004_v37 = vpop.eup %5192 }
 0x8df   : > { %v2779_v41 = vsel %vm563_vm2, %v6004_v37, 0.0 }
 0x8e0   : > { %2780 = vadd.xlane.f32.xlu1 %v2779_v41 }
 0x8e2   : > { %v6008_v53 = vpop.eup %5194 }
 0x8e3   : > { %v2782_v2 = vsel %vm563_vm2, %v6008_v53, 0.0 }
 0x8e4   : > { %2783 = vadd.xlane.f32.xlu0 %v2782_v2 }
 0x8e6   : > { %v6017_v1 = vpop.eup %5196 }
 0x8e7   : > { %v2785_v26 = vsel %vm563_vm2, %v6017_v1, 0.0  ;;  %v6021_v52 = vpop.eup %5198 }
 0x8e8   : > { %v2788_v21 = vsel %vm563_vm2, %v6021_v52, 0.0 }
 0x8f1   : > { %3154 = vrot.lane.b32.xlu1 %v5460_v17, %s5275_s28 }
 0x8fa   : > { %3106 = vrot.lane.b32.xlu0 %v5447_v13, %s5275_s28 }
 0x909   : > { %v2745_v55 = vpop.xlane.xlu1 %2744 }
 0x90a   : > { %v2753_v4 = vsub.f32 %v5981_v49, %v2745_v55 }
 0x90c   : > { %v2768_v25 = vmul.f32 1.442695, %v2753_v4 }
 0x915   : > { %2786 = vadd.xlane.f32.xlu1 %v2785_v26 }
 0x919   : > { %2789 = vadd.xlane.f32.xlu0 %v2788_v21  ;;  %v3064_v21 = vsel %vm1054_vm3, %v6027_v11, 0 }
 0x926   : > { %3254 = vrot.lane.b32.xlu1 %v5432_v3, %s5276_s29 }
 0x92f   : > { %3204 = vrot.lane.b32.xlu0 %v5429_v62, %s5276_s29 }
 0x930   : > { %v2772_v61 = vpop.xlane.xlu0 %2771 }
 0x931   : > { %5200 = vrcp.f32 %v2772_v61 }
 0x932   : > { %5202 = vpow2.f32 %v2768_v25 }
 0x933   : > { %3202 = vrot.lane.b32.xlu0 %v5471_v24, %s5277_s8 }
 0x937   : > { %3304 = vrot.lane.b32.xlu0 %v5435_v7, %s5276_s29 }
 0x938   : > { %v2778_v18 = vpop.xlane.xlu0 %2777 }
 0x939   : > { %5204 = vrcp.f32 %v2778_v18 }
 0x93b   : > { %3302 = vrot.lane.b32.xlu0 %v5481_v20, %s5277_s8 }
 0x93e   : > { %v5201_v41 = vpop.eup %5200 }
 0x93f   : > { %3404 = vrot.lane.b32.xlu0 %v5439_v10, %s5276_s29  ;;  %v2802_v49 = vmul.f32 %v5201_v41, %v5989_v47  ;;  %v6047_v24 = vpop.eup %5202 }
 0x940   : > { %v2791_v5 = vsel %vm563_vm2, %v6047_v24, 0.0 }
 0x941   : > { %v2810_v2 = vpack.c.bf16 %v2802_v49, %v2802_v49 }
 0x943   : > { %3402 = vrot.lane.b32.xlu0 %v5499_v44, %s5277_s8  ;;  %4861 = vmatmul.mubr.msk.bf16.vlgmr.msra.gmra.mxu0 %vm563_vm2, %v2810_v2 }
 0x944   : > { %4871 = vmatpush3.bf16.msra.mxu0 %v2920_v60  ;;  %4872 = vmatprep.mubr.msk.bf16.mxu0 %vm5267_vm1, %v5266_v48 }
 0x945   : > { %4882 = vmatprep.subr.bf16.mxu0 %v5266_v48 }
 0x946   : > { %v5205_v20 = vpop.eup %5204 }
 0x947   : > { %3504 = vrot.lane.b32.xlu0 %v5447_v13, %s5276_s29  ;;  %v2804_v47 = vmul.f32 %v5205_v20, %v5993_v30 }
 0x949   : > { %v2812_v44 = vpack.c.bf16 %v2804_v47, %v2804_v47 }
 0x94a   : > { %2792 = vadd.xlane.f32.xlu1 %v2791_v5 }
 0x94b   : > { %3502 = vrot.lane.b32.xlu0 %v5516_v29, %s5277_s8  ;;  %4873 = vmatmul.mubr.msk.bf16.vlgmr.msra.gmra.mxu0 %vm563_vm2, %v2812_v44 }
 0x94c   : > { %4883 = vmatpush3.bf16.msra.mxu0 %v3016_v40  ;;  %4884 = vmatprep.mubr.msk.bf16.mxu0 %vm5267_vm1, %v5266_v48 }
 0x94d   : > { %4894 = vmatprep.subr.bf16.mxu0 %v5266_v48 }
 0x95b   : > { %3252 = vrot.lane.b32.xlu1 %v5483_v34, %s5277_s8 }
 0x95f   : > { %3354 = vrot.lane.b32.xlu1 %v5443_v12, %s5276_s29 }
 0x961   : > { %v2775_v30 = vpop.xlane.xlu1 %2774 }
 0x962   : > { %5206 = vrcp.f32 %v2775_v30 }
 0x963   : > { %3352 = vrot.lane.b32.xlu1 %v5497_v43, %s5277_s8  ;;  %v2968_v43 = vsel %vm1054_vm3, %v5997_v42, 0 }
 0x967   : > { %3454 = vrot.lane.b32.xlu1 %v5453_v16, %s5276_s29 }
 0x969   : > { %v2781_v29 = vpop.xlane.xlu1 %2780 }
 0x96a   : > { %5208 = vrcp.f32 %v2781_v29 }
 0x96b   : > { %3452 = vrot.lane.b32.xlu1 %v5518_v38, %s5277_s8 }
 0x96d   : > { %v2784_v46 = vpop.xlane.xlu0 %2783 }
 0x96e   : > { %5210 = vrcp.f32 %v2784_v46 }
 0x96f   : > { %v5207_v50 = vpop.eup %5206  ;;  %3554 = vrot.lane.b32.xlu1 %v5460_v17, %s5276_s29 }
 0x970   : > { %v2803_v34 = vmul.f32 %v5207_v50, %v6000_v14 }
 0x971   : > { %v3107_v42 = vpop.permute.xlu0 %3106 }
 0x972   : > { %v2811_v54 = vpack.c.bf16 %v2803_v34, %v2803_v34  ;;  %v3112_v55 = vsel %vm1054_vm3, %v3107_v42, 0 }
 0x973   : > { %3552 = vrot.lane.b32.xlu1 %v5535_v57, %s5277_s8 }
 0x974   : > { %4867 = vmatmul.mubr.msk.bf16.vlgmr.msra.gmra.mxu1 %vm563_vm2, %v2811_v54 }
 0x975   : > { %4877 = vmatpush3.bf16.msra.mxu1 %v2968_v43  ;;  %4878 = vmatprep.mubr.msk.bf16.mxu1 %vm5267_vm1, %v5266_v48 }
 0x976   : > { %4888 = vmatprep.subr.bf16.mxu1 %v5266_v48 }
 0x977   : > { %v5209_v38 = vpop.eup %5208 }
 0x978   : > { %v2805_v36 = vmul.f32 %v5209_v38, %v6004_v37  ;;  %v3155_v37 = vpop.permute.xlu1 %3154 }
 0x979   : > { %v3160_v2 = vsel %vm1054_vm3, %v3155_v37, 0 }
 0x97a   : > { %v2813_v26 = vpack.c.bf16 %v2805_v36, %v2805_v36 }
 0x97b   : > { %v5211_v14 = vpop.eup %5210 }
 0x97c   : > { %4879 = vmatmul.mubr.msk.bf16.vlgmr.msra.gmra.mxu1 %vm563_vm2, %v2813_v26  ;;  %v2806_v57 = vmul.f32 %v5211_v14, %v6008_v53 }
 0x97d   : > { %4889 = vmatpush3.bf16.msra.mxu1 %v3064_v21  ;;  %4890 = vmatprep.mubr.msk.bf16.mxu1 %vm5267_vm1, %v5266_v48 }
 0x97e   : > { %v2814_v56 = vpack.c.bf16 %v2806_v57, %v2806_v57  ;;  %4900 = vmatprep.subr.bf16.mxu1 %v5266_v48 }
 0x980   : > { %4885 = vmatmul.mubr.msk.bf16.vlgmr.msra.gmra.mxu0 %vm563_vm2, %v2814_v56 }
 0x981   : > { %4895 = vmatpush3.bf16.msra.mxu0 %v3112_v55  ;;  %4896 = vmatprep.mubr.msk.bf16.mxu0 %vm5267_vm1, %v5266_v48 }
 0x982   : > { %4906 = vmatprep.subr.bf16.mxu0 %v5266_v48 }
 0x99e   : > { %v2787_v53 = vpop.xlane.xlu1 %2786 }
 0x99f   : > { %5212 = vrcp.f32 %v2787_v53 }
 0x9a2   : > { %v2790_v11 = vpop.xlane.xlu0 %2789  ;;  %v3255_v50 = vpop.permute.xlu1 %3254 }
 0x9a3   : > { %5214 = vrcp.f32 %v2790_v11  ;;  %v3260_v21 = vsel %vm563_vm2, %v3255_v50, 0 }
 0x9a6   : > { %v3205_v4 = vpop.permute.xlu0 %3204 }
 0x9a7   : > { %v3210_v5 = vsel %vm563_vm2, %v3205_v4, 0 }
 0x9aa   : > { %v3203_v25 = vpop.permute.xlu0 %3202 }
 0x9ac   : > { %v5213_v61 = vpop.eup %5212 }
 0x9ad   : > { %v2807_v18 = vmul.f32 %v5213_v61, %v6017_v1 }
 0x9ae   : > { %v3305_v20 = vpop.permute.xlu0 %3304 }
 0x9af   : > { %v2815_v41 = vpack.c.bf16 %v2807_v18, %v2807_v18 }
 0x9b0   : > { %v5215_v49 = vpop.eup %5214 }
 0x9b1   : > { %4891 = vmatmul.mubr.msk.bf16.vlgmr.msra.gmra.mxu1 %vm563_vm2, %v2815_v41  ;;  %v2808_v60 = vmul.f32 %v5215_v49, %v6021_v52  ;;  %v3310_v52 = vsel %vm563_vm2, %v3305_v20, 0 }
 0x9b2   : > { %4901 = vmatpush3.bf16.msra.mxu1 %v3160_v2  ;;  %4902 = vmatprep.mubr.msk.bf16.mxu1 %vm5267_vm1, %v5266_v48  ;;  %v3303_v1 = vpop.permute.xlu0 %3302 }
 0x9b3   : > { %v2816_v47 = vpack.c.bf16 %v2808_v60, %v2808_v60  ;;  %4912 = vmatprep.subr.bf16.mxu1 %v5266_v48 }
 0x9b5   : > { %4897 = vmatmul.mubr.msk.bf16.vlgmr.msra.gmra.mxu0 %vm563_vm2, %v2816_v47 }
 0x9b6   : > { %4907 = vmatpush3.bf16.xpose.msra.mxu0 %v3210_v5  ;;  %4908 = vmatprep.mubr.msk.bf16.mxu0 %vm5267_vm1, %v5266_v48  ;;  %v3405_v44 = vpop.permute.xlu0 %3404 }
 0x9b7   : > { %4918 = vmatprep.subr.bf16.mxu0 %v5266_v48  ;;  %v3410_v30 = vsel %vm563_vm2, %v3405_v44, 0 }
 0x9ba   : > { %v3403_v40 = vpop.permute.xlu0 %3402 }
 0x9bd   : > { %4909 = vmatmul.mubr.msk.bf16.vlgmr.msra.gmra.mxu0 %vm563_vm2, %v3203_v25 }
 0x9be   : > { %4919 = vmatpush3.bf16.xpose.msra.mxu0 %v3310_v52  ;;  %4920 = vmatprep.mubr.msk.bf16.mxu0 %vm5267_vm1, %v5266_v48  ;;  %v3505_v29 = vpop.permute.xlu0 %3504 }
 0x9bf   : > { %4930 = vmatprep.subr.bf16.mxu0 %v5266_v48  ;;  %v3510_v46 = vsel %vm563_vm2, %v3505_v29, 0 }
 0x9c2   : > { %v3503_v54 = vpop.permute.xlu0 %3502 }
 0x9c5   : > { %4921 = vmatmul.mubr.msk.bf16.vlgmr.msra.gmra.mxu0 %vm563_vm2, %v3303_v1 }
 0x9c6   : > { %4931 = vmatpush3.bf16.xpose.msra.mxu0 %v3410_v30  ;;  %4932 = vmatprep.mubr.msk.bf16.mxu0 %vm5267_vm1, %v5266_v48 }
 0x9c7   : > { %4942 = vmatprep.subr.bf16.mxu0 %v5266_v48 }
 0x9cd   : > { %4933 = vmatmul.mubr.msk.bf16.vlgmr.msra.gmra.mxu0 %vm563_vm2, %v3403_v40 }
 0x9ce   : > { %4943 = vmatpush3.bf16.xpose.msra.mxu0 %v3510_v46  ;;  %4944 = vmatprep.mubr.msk.bf16.mxu0 %vm5267_vm1, %v5266_v48 }
 0x9cf   : > { %4954 = vmatprep.subr.bf16.mxu0 %v5266_v48 }
 0x9d3   : > { %v2793_v34 = vpop.xlane.xlu1 %2792 }
 0x9d4   : > { %5216 = vrcp.f32 %v2793_v34 }
 0x9d5   : > { %4945 = vmatmul.mubr.msk.bf16.vlgmr.msra.gmra.mxu0 %vm563_vm2, %v3503_v54 }
 0x9d6   : > { %4956 = vmatprep.mubr.msk.bf16.mxu0 %vm5267_vm1, %v5266_v48 }
 0x9d7   : > { %v3253_v43 = vpop.permute.xlu1 %3252 }
 0x9db   : > { %v3355_v26 = vpop.permute.xlu1 %3354 }
 0x9dc   : > { %v3360_v42 = vsel %vm563_vm2, %v3355_v26, 0 }
 0x9df   : > { %v3353_v57 = vpop.permute.xlu1 %3352 }
 0x9e1   : > { %v5217_v38 = vpop.eup %5216 }
 0x9e2   : > { %v2809_v36 = vmul.f32 %v5217_v38, %v6047_v24 }
 0x9e3   : > { %v3455_v56 = vpop.permute.xlu1 %3454 }
 0x9e4   : > { %v2817_v14 = vpack.c.bf16 %v2809_v36, %v2809_v36  ;;  %v3460_v55 = vsel %vm563_vm2, %v3455_v56, 0 }
 0x9e6   : > { %4903 = vmatmul.mubr.msk.bf16.vlgmr.msra.gmra.mxu1 %vm563_vm2, %v2817_v14 }
 0x9e7   : > { %4913 = vmatpush3.bf16.xpose.msra.mxu1 %v3260_v21  ;;  %4914 = vmatprep.mubr.msk.bf16.mxu1 %vm5267_vm1, %v5266_v48  ;;  %v3453_v24 = vpop.permute.xlu1 %3452 }
 0x9e8   : > { %4924 = vmatprep.subr.bf16.mxu1 %v5266_v48 }
 0x9eb   : > { %v3555_v37 = vpop.permute.xlu1 %3554 }
 0x9ec   : > { %v3560_v53 = vsel %vm563_vm2, %v3555_v37, 0 }
 0x9ee   : > { %4915 = vmatmul.mubr.msk.bf16.vlgmr.msra.gmra.mxu1 %vm563_vm2, %v3253_v43 }
 0x9ef   : > { %4925 = vmatpush3.bf16.xpose.msra.mxu1 %v3360_v42  ;;  %4926 = vmatprep.mubr.msk.bf16.mxu1 %vm5267_vm1, %v5266_v48  ;;  %v3553_v4 = vpop.permute.xlu1 %3552 }
 0x9f0   : > { %4936 = vmatprep.subr.bf16.mxu1 %v5266_v48 }
 0x9f6   : > { %4927 = vmatmul.mubr.msk.bf16.vlgmr.msra.gmra.mxu1 %vm563_vm2, %v3353_v57 }
 0x9f7   : > { %4937 = vmatpush3.bf16.xpose.msra.mxu1 %v3460_v55  ;;  %4938 = vmatprep.mubr.msk.bf16.mxu1 %vm5267_vm1, %v5266_v48 }
 0x9f8   : > { %4948 = vmatprep.subr.bf16.mxu1 %v5266_v48 }
 0x9fe   : > { %4939 = vmatmul.mubr.msk.bf16.vlgmr.msra.gmra.mxu1 %vm563_vm2, %v3453_v24 }
 0x9ff   : > { %4949 = vmatpush3.bf16.xpose.msra.mxu1 %v3560_v53  ;;  %4950 = vmatprep.mubr.msk.bf16.mxu1 %vm5267_vm1, %v5266_v48 }
 0xa00   : > { %4960 = vmatprep.subr.bf16.mxu1 %v5266_v48 }
 0xa03   : > { %v6147_v11 = vpop.f32.mrf.mxu0 }
 0xa05   : > { %v4862_v61 = vpop.f32.mrf.mxu0 }
 0xa06   : > { %4951 = vmatmul.mubr.msk.bf16.vlgmr.msra.gmra.mxu1 %vm563_vm2, %v3553_v4 }
 0xa07   : > { %v2863_v25 = vpop.f32.mrf.mxu0  ;;  %4962 = vmatprep.mubr.msk.bf16.mxu1 %vm5267_vm1, %v5266_v48 }
 0xa09   : > { %v4863_v18 = vpop.f32.mrf.mxu0 }
 0xa0b   : > { %v6152_v41 = vpop.f32.mrf.mxu0 }
 0xa0d   : > { %v4874_v49 = vpop.f32.mrf.mxu0 }
 0xa0f   : > { %v2959_v2 = vpop.f32.mrf.mxu0 }
 0xa11   : > { %v4875_v60 = vpop.f32.mrf.mxu0 }
 0xa34   : > { %v6154_v20 = vpop.f32.mrf.mxu1 }
 0xa35   : > { %v5052_v47 = vpack.i.bf16 %v6154_v20, %v6147_v11 }
 0xa36   : > { %v4868_v5 = vpop.f32.mrf.mxu1 }
 0xa38   : > { %v2911_v1 = vpop.f32.mrf.mxu1 }
 0xa3a   : > { %v4869_v52 = vpop.f32.mrf.mxu1 }
 0xa3c   : > { %v6158_v44 = vpop.f32.mrf.mxu1 }
 0xa3d   : > { %v5057_v40 = vpack.i.bf16 %v6158_v44, %v6152_v41 }
 0xa3e   : > { %v4880_v30 = vpop.f32.mrf.mxu1 }
 0xa40   : > { %v3007_v29 = vpop.f32.mrf.mxu1  ;;  %v6162_v46 = vpop.f32.mrf.mxu0 }
 0xa42   : > { %v4881_v50 = vpop.f32.mrf.mxu1  ;;  %v4886_v34 = vpop.f32.mrf.mxu0 }
 0xa44   : > { %v3055_v54 = vpop.f32.mrf.mxu0 }
 0xa46   : > { %v4887_v43 = vpop.f32.mrf.mxu0 }
 0xa71   : > { %v6164_v38 = vpop.f32.mrf.mxu1 }
 0xa72   : > { %v5077_v36 = vpack.i.bf16 %v6164_v38, %v6162_v46 }
 0xa73   : > { %v4892_v26 = vpop.f32.mrf.mxu1 }
 0xa75   : > { %v3103_v14 = vpop.f32.mrf.mxu1  ;;  %v6168_v21 = vpop.f32.mrf.mxu0 }
 0xa77   : > { %v4893_v57 = vpop.f32.mrf.mxu1  ;;  %v4898_v42 = vpop.f32.mrf.mxu0 }
 0xa79   : > { %v3151_v56 = vpop.f32.mrf.mxu0 }
 0xa7b   : > { %v4899_v24 = vpop.f32.mrf.mxu0 }
 0xa7d   : > { %v3246_v55 = vpop.f32.mrf.mxu0 }
 0xa7e   : > { %v3602_v37 = vsel %vm563_vm2, %v3246_v55, -inf }
 0xa7f   : > { %3603 = vmax.xlane.f32.xlu0 %v3602_v37  ;;  %v4910_v53 = vpop.f32.mrf.mxu0 }
 0xa81   : > { %v3249_v4 = vpop.f32.mrf.mxu0 }
 0xa83   : > { %v4911_v61 = vpop.f32.mrf.mxu0 }
 0xa85   : > { %v3346_v25 = vpop.f32.mrf.mxu0 }
 0xa86   : > { %v3608_v18 = vsel %vm563_vm2, %v3346_v25, -inf }
 0xa87   : > { %3609 = vmax.xlane.f32.xlu0 %v3608_v18  ;;  %v4922_v49 = vpop.f32.mrf.mxu0 }
 0xa89   : > { %v3349_v2 = vpop.f32.mrf.mxu0 }
 0xa8b   : > { %v4923_v60 = vpop.f32.mrf.mxu0 }
 0xa8d   : > { %v6172_v5 = vpop.f32.mrf.mxu0 }
 0xa8e   : > { %v3614_v60 = vsel %vm563_vm2, %v6172_v5, -inf }
 0xa8f   : > { %v4934_v1 = vpop.f32.mrf.mxu0 }
 0xa91   : > { %v3449_v52 = vpop.f32.mrf.mxu0 }
 0xa93   : > { %v4935_v30 = vpop.f32.mrf.mxu0 }
 0xa95   : > { %v6174_v29 = vpop.f32.mrf.mxu0 }
 0xa97   : > { %v4946_v50 = vpop.f32.mrf.mxu0 }
 0xa98   : > { %v3620_v50 = vsel %vm563_vm2, %v6174_v29, -inf }
 0xa99   : > { %v3549_v34 = vpop.f32.mrf.mxu0 }
 0xa9b   : > { %v4947_v54 = vpop.f32.mrf.mxu0 }
 0xaa6   : > { %v6176_v43 = vpop.f32.mrf.mxu1 }
 0xaa7   : > { %v5087_v26 = vpack.i.bf16 %v6176_v43, %v6168_v21 }
 0xaa8   : > { %v4904_v14 = vpop.f32.mrf.mxu1 }
 0xaaa   : > { %v3199_v57 = vpop.f32.mrf.mxu1 }
 0xaac   : > { %v4905_v42 = vpop.f32.mrf.mxu1 }
 0xaae   : > { %v3296_v56 = vpop.f32.mrf.mxu1 }
 0xaaf   : > { %v3605_v24 = vsel %vm563_vm2, %v3296_v56, -inf }
 0xab0   : > { %3606 = vmax.xlane.f32.xlu1 %v3605_v24  ;;  %v4916_v37 = vpop.f32.mrf.mxu1 }
 0xab2   : > { %v3299_v53 = vpop.f32.mrf.mxu1 }
 0xab4   : > { %v4917_v4 = vpop.f32.mrf.mxu1 }
 0xab6   : > { %v6181_v61 = vpop.f32.mrf.mxu1 }
 0xab7   : > { %v3611_v18 = vsel %vm563_vm2, %v6181_v61, -inf }
 0xab8   : > { %v4928_v49 = vpop.f32.mrf.mxu1  ;;  %3612 = vmax.xlane.f32.xlu0 %v3611_v18 }
 0xaba   : > { %v3399_v2 = vpop.f32.mrf.mxu1 }
 0xabc   : > { %v4929_v1 = vpop.f32.mrf.mxu1  ;;  %3615 = vmax.xlane.f32.xlu0 %v3614_v60 }
 0xabe   : > { %v6187_v52 = vpop.f32.mrf.mxu1 }
 0xabf   : > { %v3617_v30 = vsel %vm563_vm2, %v6187_v52, -inf }
 0xac0   : > { %3618 = vmax.xlane.f32.xlu1 %v3617_v30  ;;  %v4940_v34 = vpop.f32.mrf.mxu1  ;;  %3621 = vmax.xlane.f32.xlu0 %v3620_v50 }
 0xac2   : > { %v3499_v54 = vpop.f32.mrf.mxu1 }
 0xac4   : > { %v4941_v14 = vpop.f32.mrf.mxu1 }
 0xac6   : > { %v6193_v57 = vpop.f32.mrf.mxu1 }
 0xac7   : > { %v3623_v53 = vsel %vm563_vm2, %v6193_v57, -inf }
 0xac8   : > { %v4952_v42 = vpop.f32.mrf.mxu1 }
 0xaca   : > { %v3599_v24 = vpop.f32.mrf.mxu1 }
 0xacc   : > { %v4953_v37 = vpop.f32.mrf.mxu1 }
 0xad1   : > { %3746 = vrot.lane.b32.xlu1 %v5432_v3, %s5278_s9 }
 0xad5   : > { %3794 = vrot.lane.b32.xlu1 %v5435_v7, %s5278_s9 }
 0xad6   : > { %3698 = vrot.lane.b32.xlu0 %v5429_v62, %s5278_s9 }
 0xaf9   : > { %3624 = vmax.xlane.f32.xlu1 %v3623_v53 }
 0xb08   : > { %v3604_v4 = vpop.xlane.xlu0 %3603 }
 0xb09   : > { %v3626_v18 = vsub.f32 %v3246_v55, %v3604_v4 }
 0xb0a   : > { %3842 = vrot.lane.b32.xlu1 %v5443_v12, %s5278_s9 }
 0xb0b   : > { %v3634_v49 = vmul.f32 1.442695, %v3626_v18 }
 0xb0d   : > { %5218 = vpow2.f32 %v3634_v49 }
 0xb10   : > { %v3610_v2 = vpop.xlane.xlu0 %3609 }
 0xb11   : > { %v3628_v60 = vsub.f32 %v3346_v25, %v3610_v2 }
 0xb13   : > { %v3638_v3 = vmul.f32 1.442695, %v3628_v60 }
 0xb15   : > { %5220 = vpow2.f32 %v3638_v3 }
 0xb1a   : > { %v6205_v1 = vpop.eup %5218 }
 0xb1b   : > { %v3650_v62 = vsel %vm563_vm2, %v6205_v1, 0.0 }
 0xb1c   : > { %3651 = vadd.xlane.f32.xlu0 %v3650_v62 }
 0xb22   : > { %v6209_v7 = vpop.eup %5220 }
 0xb23   : > { %v3656_v55 = vsel %vm563_vm2, %v6209_v7, 0.0 }
 0xb24   : > { %3657 = vadd.xlane.f32.xlu0 %v3656_v55 }
 0xb39   : > { %v3607_v30 = vpop.xlane.xlu1 %3606 }
 0xb3a   : > { %v3627_v12 = vsub.f32 %v3296_v56, %v3607_v30  ;;  %3890 = vrot.lane.b32.xlu0 %v5439_v10, %s5278_s9 }
 0xb3c   : > { %v3636_v25 = vmul.f32 1.442695, %v3627_v12 }
 0xb3e   : > { %5222 = vpow2.f32 %v3636_v25 }
 0xb41   : > { %v3613_v50 = vpop.xlane.xlu0 %3612 }
 0xb42   : > { %v3629_v62 = vsub.f32 %v6181_v61, %v3613_v50 }
 0xb44   : > { %v3640_v55 = vmul.f32 1.442695, %v3629_v62 }
 0xb45   : > { %v3616_v34 = vpop.xlane.xlu0 %3615 }
 0xb46   : > { %v3630_v54 = vsub.f32 %v6172_v5, %v3616_v34 }
 0xb48   : > { %v3642_v14 = vmul.f32 1.442695, %v3630_v54 }
 0xb49   : > { %v3619_v42 = vpop.xlane.xlu1 %3618  ;;  %v3622_v24 = vpop.xlane.xlu0 %3621 }
 0xb4a   : > { %5224 = vpow2.f32 %v3642_v14  ;;  %v3632_v37 = vsub.f32 %v6174_v29, %v3622_v24  ;;  %v3631_v30 = vsub.f32 %v6187_v52, %v3619_v42 }
 0xb4b   : > { %v6217_v53 = vpop.eup %5222 }
 0xb4c   : > { %v3646_v4 = vmul.f32 1.442695, %v3632_v37  ;;  %v3653_v56 = vsel %vm563_vm2, %v6217_v53, 0.0  ;;  %v3644_v12 = vmul.f32 1.442695, %v3631_v30 }
 0xb4d   : > { %3654 = vadd.xlane.f32.xlu1 %v3653_v56  ;;  %v3747_v10 = vpop.permute.xlu1 %3746  ;;  %v3699_v18 = vpop.permute.xlu0 %3698 }
 0xb4e   : > { %v3752_v49 = vsel %vm1054_vm3, %v3747_v10, 0  ;;  %v3704_v2 = vsel %vm1054_vm3, %v3699_v18, 0  ;;  %5226 = vpow2.f32 %v3646_v4 }
 0xb4f   : > { %4955 = vmatpush3.bf16.msra.mxu0 %v3704_v2  ;;  %4961 = vmatpush3.bf16.msra.mxu1 %v3752_v49  ;;  %5228 = vpow2.f32 %v3640_v55 }
 0xb50   : > { %4966 = vmatprep.subr.bf16.mxu0 %v5266_v48  ;;  %4972 = vmatprep.subr.bf16.mxu1 %v5266_v48  ;;  %5230 = vpow2.f32 %v3644_v12 }
 0xb51   : > { %v3795_v61 = vpop.permute.xlu1 %3794 }
 0xb57   : > { %v6225_v5 = vpop.eup %5224 }
 0xb58   : > { %v3662_v29 = vsel %vm563_vm2, %v6225_v5, 0.0 }
 0xb59   : > { %3663 = vadd.xlane.f32.xlu0 %v3662_v29 }
 0xb5b   : > { %v6229_v60 = vpop.eup %5226 }
 0xb5c   : > { %v3668_v3 = vsel %vm563_vm2, %v6229_v60, 0.0 }
 0xb5d   : > { %3669 = vadd.xlane.f32.xlu0 %v3668_v3 }
 0xb5e   : > { %3938 = vrot.lane.b32.xlu1 %v5453_v16, %s5278_s9  ;;  %v6246_v16 = vpop.eup %5228 }
 0xb5f   : > { %v6253_v52 = vpop.eup %5230 }
 0xb60   : > { %v3665_v11 = vsel %vm563_vm2, %v6253_v52, 0.0 }
 0xb73   : > { %3986 = vrot.lane.b32.xlu0 %v5447_v13, %s5278_s9  ;;  %v3659_v13 = vsel %vm563_vm2, %v6246_v16, 0.0 }
 0xb77   : > { %5043 = vrot.lane.b32.xlu0 %v5042_v6, %s5279_s10 }
 0xb7b   : > { %5053 = vrot.lane.b32.xlu0 %v5052_v47, %s5280_s11 }
 0xb7f   : > { %5063 = vrot.lane.b32.xlu0 %v5062_v35, %s5279_s10 }
 0xb82   : > { %v3625_v59 = vpop.xlane.xlu1 %3624  ;;  %3660 = vadd.xlane.f32.xlu1 %v3659_v13 }
 0xb83   : > { %v3633_v51 = vsub.f32 %v6193_v57, %v3625_v59 }
 0xb85   : > { %v3648_v6 = vmul.f32 1.442695, %v3633_v51 }
 0xb86   : > { %3666 = vadd.xlane.f32.xlu1 %v3665_v11  ;;  %v3843_v19 = vpop.permute.xlu1 %3842 }
 0xb87   : > { %5232 = vpow2.f32 %v3648_v6  ;;  %v3848_v34 = vsel %vm1054_vm3, %v3843_v19, 0 }
 0xb94   : > { %v6258_v20 = vpop.eup %5232 }
 0xb95   : > { %v3671_v22 = vsel %vm563_vm2, %v6258_v20, 0.0 }
 0xb96   : > { %3672 = vadd.xlane.f32.xlu1 %v3671_v22 }
 0xba5   : > { %v3652_v33 = vpop.xlane.xlu0 %3651 }
 0xba6   : > { %5234 = vrcp.f32 %v3652_v33 }
 0xba7   : > { %4034 = vrot.lane.b32.xlu1 %v5460_v17, %s5278_s9  ;;  %v3800_v17 = vsel %vm1054_vm3, %v3795_v61, 0 }
 0xbab   : > { %5048 = vrot.lane.b32.xlu1 %v5047_v15, %s5279_s10 }
 0xbad   : > { %v3658_v35 = vpop.xlane.xlu0 %3657 }
 0xbae   : > { %5236 = vrcp.f32 %v3658_v35 }
 0xbaf   : > { %5058 = vrot.lane.b32.xlu1 %v5057_v40, %s5280_s11 }
 0xbb1   : > { %v3891_v15 = vpop.permute.xlu0 %3890 }
 0xbb2   : > { %v3896_v28 = vsel %vm1054_vm3, %v3891_v15, 0 }
 0xbb3   : > { %v5235_v47 = vpop.eup %5234  ;;  %5068 = vrot.lane.b32.xlu1 %v5067_v9, %s5279_s10 }
 0xbb4   : > { %v3682_v57 = vmul.f32 %v5235_v47, %v6205_v1 }
 0xbb6   : > { %v3690_v25 = vpack.c.bf16 %v3682_v57, %v3682_v57  ;;  %v5104_v57 = vld [vmem:[%s6408_s5 + $0x8] sm:$0xff]  }
 0xbb8   : > { %4957 = vmatmul.mubr.msk.bf16.vlgmr.msra.gmra.mxu0 %vm563_vm2, %v3690_v25 }
 0xbb9   : > { %4967 = vmatpush3.bf16.msra.mxu0 %v3800_v17  ;;  %4968 = vmatprep.mubr.msk.bf16.mxu0 %vm5267_vm1, %v5266_v48 }
 0xbba   : > { %4978 = vmatprep.subr.bf16.mxu0 %v5266_v48 }
 0xbbb   : > { %v5237_v0 = vpop.eup %5236 }
 0xbbc   : > { %v3684_v39 = vmul.f32 %v5237_v0, %v6209_v7 }
 0xbbe   : > { %v3692_v41 = vpack.c.bf16 %v3684_v39, %v3684_v39 }
 0xbc0   : > { %4969 = vmatmul.mubr.msk.bf16.vlgmr.msra.gmra.mxu0 %vm563_vm2, %v3692_v41 }
 0xbc1   : > { %4979 = vmatpush3.bf16.msra.mxu0 %v3896_v28  ;;  %4980 = vmatprep.mubr.msk.bf16.mxu0 %vm5267_vm1, %v5266_v48 }
 0xbc2   : > { %4990 = vmatprep.subr.bf16.mxu0 %v5266_v48 }
 0xbd6   : > { %v3655_v9 = vpop.xlane.xlu1 %3654 }
 0xbd7   : > { %5238 = vrcp.f32 %v3655_v9 }
 0xbda   : > { %v3939_v10 = vpop.permute.xlu1 %3938 }
 0xbdb   : > { %v3944_v62 = vsel %vm1054_vm3, %v3939_v10, 0 }
 0xbe2   : > { %v3664_v44 = vpop.xlane.xlu0 %3663 }
 0xbe3   : > { %5240 = vrcp.f32 %v3664_v44 }
 0xbe4   : > { %v5239_v40 = vpop.eup %5238 }
 0xbe5   : > { %v3683_v1 = vmul.f32 %v5239_v40, %v6217_v53 }
 0xbe6   : > { %v3670_v50 = vpop.xlane.xlu0 %3669 }
 0xbe7   : > { %v3691_v7 = vpack.c.bf16 %v3683_v1, %v3683_v1  ;;  %5242 = vrcp.f32 %v3670_v50  ;;  %v5105_v1 = vld [vmem:[%s6408_s5] sm:$0xff]  }
 0xbe9   : > { %4963 = vmatmul.mubr.msk.bf16.vlgmr.msra.gmra.mxu1 %vm563_vm2, %v3691_v7 }
 0xbea   : > { %4973 = vmatpush3.bf16.msra.mxu1 %v3848_v34  ;;  %4974 = vmatprep.mubr.msk.bf16.mxu1 %vm5267_vm1, %v5266_v48  ;;  %v3987_v42 = vpop.permute.xlu0 %3986 }
 0xbeb   : > { %4984 = vmatprep.subr.bf16.mxu1 %v5266_v48  ;;  %v3992_v53 = vsel %vm1054_vm3, %v3987_v42, 0 }
 0xbf0   : > { %v5241_v54 = vpop.eup %5240 }
 0xbf1   : > { %v3686_v14 = vmul.f32 %v5241_v54, %v6225_v5 }
 0xbf3   : > { %v3694_v24 = vpack.c.bf16 %v3686_v14, %v3686_v14 }
 0xbf4   : > { %v5243_v37 = vpop.eup %5242 }
 0xbf5   : > { %4981 = vmatmul.mubr.msk.bf16.vlgmr.msra.gmra.mxu0 %vm563_vm2, %v3694_v24  ;;  %v3688_v4 = vmul.f32 %v5243_v37, %v6229_v60 }
 0xbf6   : > { %4991 = vmatpush3.bf16.msra.mxu0 %v3992_v53  ;;  %4992 = vmatprep.mubr.msk.bf16.mxu0 %vm5267_vm1, %v5266_v48 }
 0xbf7   : > { %v3696_v56 = vpack.c.bf16 %v3688_v4, %v3688_v4  ;;  %5002 = vmatprep.subr.bf16.mxu0 %v5104_v57 }
 0xbfd   : > { %4993 = vmatmul.mubr.msk.bf16.vlgmr.msra.gmra.mxu0 %vm563_vm2, %v3696_v56 }
 0xbfe   : > { %5003 = vmatpush3.bf16.msra.mxu0 %v5104_v57 }
 0xbff   : > { %5004 = vmatprep.subr.bf16.mxu0 %v5105_v1 }
 0xc02   : > { %5005 = vmatpush3.bf16.msra.mxu0 %v5105_v1 }
 0xc0b   : > { %v3661_v18 = vpop.xlane.xlu1 %3660 }
 0xc0c   : > { %5244 = vrcp.f32 %v3661_v18  ;;  %v5044_v18 = vpop.permute.xlu0 %5043 }
 0xc0d   : > { %v5045_v21 = vunpack.i.l.bf16 %v5044_v18 }
 0xc0f   : > { %v3667_v49 = vpop.xlane.xlu1 %3666 }
 0xc10   : > { %5246 = vrcp.f32 %v3667_v49  ;;  %v5054_v49 = vpop.permute.xlu0 %5053 }
 0xc11   : > { %v5056_v43 = vunpack.i.h.bf16 %v5054_v49 }
 0xc19   : > { %v5245_v2 = vpop.eup %5244 }
 0xc1a   : > { %v3685_v5 = vmul.f32 %v5245_v2, %v6246_v16  ;;  %v5064_v2 = vpop.permute.xlu0 %5063 }
 0xc1c   : > { %v3693_v29 = vpack.c.bf16 %v3685_v5, %v3685_v5  ;;  %v5046_v5 = vunpack.i.h.bf16 %v5044_v18 }
 0xc1d   : > { %v5247_v3 = vpop.eup %5246 }
 0xc1e   : > { %4975 = vmatmul.mubr.msk.bf16.vlgmr.msra.gmra.mxu1 %vm563_vm2, %v3693_v29  ;;  %v3687_v60 = vmul.f32 %v5247_v3, %v6253_v52  ;;  %v4179_v3 = vsel %vm563_vm2, %v5731_v58, %v5046_v5 }
 0xc1f   : > { %4985 = vmatpush3.bf16.msra.mxu1 %v3944_v62  ;;  %v3673_v55 = vpop.xlane.xlu1 %3672  ;;  %4986 = vmatprep.mubr.msk.bf16.mxu1 %vm5267_vm1, %v5266_v48  ;;  %v4178_v62 = vsel %vm563_vm2, %v5733_v8, %v5045_v21  ;;  %v5250_v21 = vld [vmem:[%s5338_s30 + $0x10] sm:$0xff] }
 0xc20   : > { %5248 = vrcp.f32 %v3673_v55  ;;  %4996 = vmatprep.subr.bf16.mxu1 %v5266_v48  ;;  %v3695_v12 = vpack.c.bf16 %v3687_v60, %v3687_v60 }
 0xc23   : > { %v4035_v30 = vpop.permute.xlu1 %4034 }
 0xc24   : > { %v4040_v16 = vsel %vm1054_vm3, %v4035_v30, 0 }
 0xc26   : > { %4987 = vmatmul.mubr.msk.bf16.vlgmr.msra.gmra.mxu1 %vm563_vm2, %v3695_v12  ;;  %v4188_v12 = vsel %vm4186_vm4, %v4179_v3, %v5056_v43  ;;  %v5251_v3 = vld [vmem:[%s5338_s30] sm:$0xff] }
 0xc27   : > { %4997 = vmatpush3.bf16.msra.mxu1 %v4040_v16  ;;  %4998 = vmatprep.mubr.msk.bf16.mxu1 %vm5267_vm1, %v5266_v48 }
 0xc2d   : > { %v5249_v61 = vpop.eup %5248 }
 0xc2e   : > { %v3689_v13 = vmul.f32 %v5249_v61, %v6258_v20 }
 0xc30   : > { %v3697_v59 = vpack.c.bf16 %v3689_v13, %v3689_v13 }
 0xc32   : > { %4999 = vmatmul.mubr.msk.bf16.vlgmr.msra.gmra.mxu1 %vm563_vm2, %v3697_v59  ;;  %v5049_v59 = vpop.permute.xlu1 %5048 }
 0xc33   : > { %v5051_v58 = vunpack.i.h.bf16 %v5049_v59 }
 0xc78   : > { %v3740_v52 = vpop.f32.mrf.mxu0 }
 0xc7a   : > { %v4958_v51 = vpop.f32.mrf.mxu0 }
 0xc7c   : > { %v3743_v6 = vpop.f32.mrf.mxu0 }
 0xc7d   : > { %v5050_v6 = vunpack.i.l.bf16 %v5049_v59 }
 0xc7e   : > { %v4959_v11 = vpop.f32.mrf.mxu0 }
 0xc80   : > { %v3836_v22 = vpop.f32.mrf.mxu0 }
 0xc82   : > { %v4970_v33 = vpop.f32.mrf.mxu0 }
 0xc83   : > { %v4181_v33 = vsel %vm563_vm2, %v5737_v27, %v5051_v58  ;;  %v5254_v58 = vld [vmem:[%s5338_s30 + $0x30] sm:$0xff] }
 0xc84   : > { %v3839_v35 = vpop.f32.mrf.mxu0 }
 0xc85   : > { %v4180_v35 = vsel %vm563_vm2, %v5735_v23, %v5050_v6 }
 0xc86   : > { %v4971_v47 = vpop.f32.mrf.mxu0 }
 0xca9   : > { %v3788_v48 = vpop.f32.mrf.mxu1 }
 0xcaa   : > { %v5072_v25 = vpack.i.bf16 %v3788_v48, %v3740_v52  ;;  %v5059_v52 = vpop.permute.xlu1 %5058 }
 0xcab   : > { %v4964_v20 = vpop.f32.mrf.mxu1  ;;  %v5061_v11 = vunpack.i.h.bf16 %v5059_v52  ;;  %v5060_v8 = vunpack.i.l.bf16 %v5059_v52 }
 0xcac   : > { %5073 = vrot.lane.b32.xlu0 %v5072_v25, %s5281_s14 }
 0xcad   : > { %v3791_v17 = vpop.f32.mrf.mxu1  ;;  %v4189_v48 = vsel %vm4186_vm4, %v4180_v35, %v5060_v8  ;;  %v4190_v25 = vsel %vm4186_vm4, %v4181_v33, %v5061_v11 }
 0xcae   : > { %v5069_v51 = vpop.permute.xlu1 %5068 }
 0xcaf   : > { %v4965_v0 = vpop.f32.mrf.mxu1 }
 0xcb0   : > { %5078 = vrot.lane.b32.xlu0 %v5077_v36, %s5280_s11 }
 0xcb5   : > { %v3932_v39 = vpop.f32.mrf.mxu0 }
 0xcb7   : > { %v4982_v15 = vpop.f32.mrf.mxu0 }
 0xcb8   : > { %v5066_v15 = vunpack.i.h.bf16 %v5064_v2 }
 0xcb9   : > { %v3935_v41 = vpop.f32.mrf.mxu0 }
 0xcba   : > { %v5065_v41 = vunpack.i.l.bf16 %v5064_v2  ;;  %v4183_v23 = vsel %vm563_vm2, %v5741_v31, %v5066_v15 }
 0xcbb   : > { %v4983_v28 = vpop.f32.mrf.mxu0 }
 0xcbd   : > { %v4028_v19 = vpop.f32.mrf.mxu0 }
 0xcbf   : > { %v4994_v9 = vpop.f32.mrf.mxu0 }
 0xcc0   : > { %v4182_v9 = vsel %vm563_vm2, %v5739_v32, %v5065_v41 }
 0xcc1   : > { %v4031_v44 = vpop.f32.mrf.mxu0 }
 0xcc3   : > { %v4995_v40 = vpop.f32.mrf.mxu0 }
 0xcde   : > { %v3884_v7 = vpop.f32.mrf.mxu1 }
 0xcdf   : > { %v5082_v50 = vpack.i.bf16 %v3884_v7, %v3836_v22 }
 0xce0   : > { %v4976_v34 = vpop.f32.mrf.mxu1 }
 0xce1   : > { %5083 = vrot.lane.b32.xlu1 %v5082_v50, %s5281_s14 }
 0xce2   : > { %v3887_v46 = vpop.f32.mrf.mxu1 }
 0xce4   : > { %v4977_v38 = vpop.f32.mrf.mxu1 }
 0xce5   : > { %5088 = vrot.lane.b32.xlu1 %v5087_v26, %s5280_s11  ;;  %v5055_v26 = vunpack.i.l.bf16 %v5054_v49 }
 0xce6   : > { %v3980_v36 = vpop.f32.mrf.mxu1 }
 0xce7   : > { %v5092_v54 = vpack.i.bf16 %v3980_v36, %v3932_v39  ;;  %v4187_v30 = vsel %vm4186_vm4, %v4178_v62, %v5055_v26  ;;  %v5071_v36 = vunpack.i.h.bf16 %v5069_v51 }
 0xce8   : > { %v4988_v14 = vpop.f32.mrf.mxu1 }
 0xce9   : > { %5093 = vrot.lane.b32.xlu0 %v5092_v54, %s5281_s14  ;;  %v5070_v54 = vunpack.i.l.bf16 %v5069_v51 }
 0xcea   : > { %v3983_v42 = vpop.f32.mrf.mxu1 }
 0xceb   : > { %v4185_v42 = vsel %vm563_vm2, %v5751_v63, %v5071_v36  ;;  %v4457_v63 = vld [vmem:[%s6409_s6] ss:$0 sm:$0xff] }
 0xcec   : > { %v4989_v24 = vpop.f32.mrf.mxu1 }
 0xced   : > { %v4184_v24 = vsel %vm563_vm2, %v5743_v45, %v5070_v54 }
 0xcf2   : > { %v4076_v37 = vpop.f32.mrf.mxu1 }
 0xcf3   : > { %v5097_v53 = vpack.i.bf16 %v4076_v37, %v4028_v19 }
 0xcf4   : > { %v5000_v4 = vpop.f32.mrf.mxu1 }
 0xcf5   : > { %5098 = vrot.lane.b32.xlu1 %v5097_v53, %s5281_s14 }
 0xcf6   : > { %v4079_v56 = vpop.f32.mrf.mxu1 }
 0xcf8   : > { %v5001_v10 = vpop.f32.mrf.mxu1 }
 0xd1e   : > { %v5074_v29 = vpop.permute.xlu0 %5073 }
 0xd1f   : > { %v5076_v55 = vunpack.i.h.bf16 %v5074_v29  ;;  %v5075_v60 = vunpack.i.l.bf16 %v5074_v29 }
 0xd21   : > { %v4196_v16 = vsel %vm4195_vm5, %v4187_v30, %v5075_v60  ;;  %v4197_v61 = vsel %vm4195_vm5, %v4188_v12, %v5076_v55  ;;  %v5252_v30 = vld [vmem:[%s5338_s30 + $0x18] sm:$0xff] }
 0xd22   : > { %v4204_v13 = vpack.c.bf16 %v4197_v61, %v4196_v16  ;;  %v5079_v20 = vpop.permute.xlu0 %5078  ;;  %v5253_v61 = vld [vmem:[%s5338_s30 + $0x8] sm:$0xff] }
 0xd23   : > { %v5081_v28 = vunpack.i.h.bf16 %v5079_v20  ;;  %v5080_v19 = vunpack.i.l.bf16 %v5079_v20  ;;  %v5257_v20 = vld [vmem:[%s5338_s30 + $0x28] sm:$0xff] }
 0xd24   : > { %5006 = vmatprep.mubr.msk.bf16.mxu0 %vm303_vm0, %v4204_v13 }
 0xd25   : > { %v4191_v1 = vsel %vm4186_vm4, %v4182_v9, %v5080_v19  ;;  %v4192_v7 = vsel %vm4186_vm4, %v4183_v23, %v5081_v28 }
 0xd53   : > { %v5084_v22 = vpop.permute.xlu1 %5083 }
 0xd54   : > { %v5086_v47 = vunpack.i.h.bf16 %v5084_v22  ;;  %v5085_v57 = vunpack.i.l.bf16 %v5084_v22  ;;  %v5255_v22 = vld [vmem:[%s5338_s30 + $0x20] sm:$0xff] }
 0xd56   : > { %v4199_v17 = vsel %vm4195_vm5, %v4190_v25, %v5086_v47  ;;  %v4198_v0 = vsel %vm4195_vm5, %v4189_v48, %v5085_v57  ;;  %v5256_v57 = vld [vmem:[%s5338_s30 + $0x38] sm:$0xff] }
 0xd57   : > { %v4205_v39 = vpack.c.bf16 %v4199_v17, %v4198_v0  ;;  %v5089_v38 = vpop.permute.xlu1 %5088 }
 0xd58   : > { %v5091_v31 = vunpack.i.h.bf16 %v5089_v38  ;;  %v5090_v14 = vunpack.i.l.bf16 %v5089_v38 }
 0xd59   : > { %5007 = vmatmul.mubr.msk.bf16.vlgmr.msra.gmra.mxu0 %vm303_vm0, %v4205_v39 }
 0xd5a   : > { %v4194_v4 = vsel %vm4186_vm4, %v4185_v42, %v5091_v31  ;;  %v4193_v56 = vsel %vm4186_vm4, %v4184_v24, %v5090_v14 }
 0xd5b   : > { %v5094_v27 = vpop.permute.xlu0 %5093 }
 0xd5c   : > { %v5096_v44 = vunpack.i.h.bf16 %v5094_v27  ;;  %v5095_v40 = vunpack.i.l.bf16 %v5094_v27 }
 0xd5e   : > { %v4200_v50 = vsel %vm4195_vm5, %v4191_v1, %v5095_v40  ;;  %v4201_v34 = vsel %vm4195_vm5, %v4192_v7, %v5096_v44 }
 0xd5f   : > { %v4206_v46 = vpack.c.bf16 %v4201_v34, %v4200_v50 }
 0xd61   : > { %5010 = vmatprep.mubr.msk.bf16.mxu0 %vm303_vm0, %v4206_v46 }
 0xd67   : > { %v5099_v32 = vpop.permute.xlu1 %5098 }
 0xd68   : > { %v5101_v37 = vunpack.i.h.bf16 %v5099_v32  ;;  %v5100_v53 = vunpack.i.l.bf16 %v5099_v32 }
 0xd6a   : > { %v4203_v10 = vsel %vm4195_vm5, %v4194_v4, %v5101_v37  ;;  %v4202_v18 = vsel %vm4195_vm5, %v4193_v56, %v5100_v53 }
 0xd6b   : > { %v4207_v49 = vpack.c.bf16 %v4203_v10, %v4202_v18 }
 0xd6d   : > { %5011 = vmatmul.mubr.msk.bf16.gmra.mxu0 %vm303_vm0, %v4207_v49 }
 0xe19   : > { %v5008_v45 = vpop.f32.mrf.mxu0 }
 0xe1a   : > { %v4281_v2 = vadd.f32 %v5008_v45, %v4457_v63 }
 0xe1b   : > { %v4272_v5 = vpop.f32.mrf.mxu0 }
 0xe1c   : > { %v4305_v43 = vadd.f32 %v5250_v21, %v4281_v2  ;;  %v4273_v26 = vadd.f32 %v4457_v63, %v4272_v5 }
 0xe1d   : > { %v5009_v29 = vpop.f32.mrf.mxu0 }
 0xe1e   : > { %4313 = vst.msk [vmem:[%s6374_s21 + $0x10] sm:$0xff] %vm303_vm0, %v4305_v43  ;;  %v4303_v62 = vadd.f32 %v5251_v3, %v4273_v26  ;;  %v4284_v55 = vadd.f32 %v5009_v29, %v4457_v63 }
 0xe1f   : > { %v4275_v60 = vpop.f32.mrf.mxu0 }
 0xe20   : > { %4311 = vst.msk [vmem:[%s6374_s21] sm:$0xff] %vm303_vm0, %v4303_v62  ;;  %v4306_v12 = vadd.f32 %v5252_v30, %v4284_v55  ;;  %v4276_v16 = vadd.f32 %v4457_v63, %v4275_v60 }
 0xe22   : > { %4314 = vst.msk [vmem:[%s6374_s21 + $0x18] sm:$0xff] %vm303_vm0, %v4306_v12  ;;  %v4304_v13 = vadd.f32 %v5253_v61, %v4276_v16 }
 0xe24   : > { %4312 = vst.msk [vmem:[%s6374_s21 + $0x8] sm:$0xff] %vm303_vm0, %v4304_v13 }
 0xe2d   : > { %v5012_v59 = vpop.f32.mrf.mxu0 }
 0xe2e   : > { %v4297_v52 = vadd.f32 %v5012_v59, %v4457_v63 }
 0xe2f   : > { %v4288_v51 = vpop.f32.mrf.mxu0 }
 0xe30   : > { %v4309_v6 = vadd.f32 %v5254_v58, %v4297_v52  ;;  %v4289_v11 = vadd.f32 %v4457_v63, %v4288_v51 }
 0xe31   : > { %v5013_v8 = vpop.f32.mrf.mxu0 }
 0xe32   : > { %4317 = vst.msk [vmem:[%s6374_s21 + $0x30] sm:$0xff] %vm303_vm0, %v4309_v6  ;;  %v4307_v33 = vadd.f32 %v5255_v22, %v4289_v11  ;;  %v4300_v35 = vadd.f32 %v5013_v8, %v4457_v63 }
 0xe33   : > { %v4291_v47 = vpop.f32.mrf.mxu0 }
 0xe34   : > { %4315 = vst.msk [vmem:[%s6374_s21 + $0x20] sm:$0xff] %vm303_vm0, %v4307_v33  ;;  %v4310_v48 = vadd.f32 %v5256_v57, %v4300_v35  ;;  %v4292_v25 = vadd.f32 %v4457_v63, %v4291_v47 }
 0xe36   : > { %4318 = vst.msk [vmem:[%s6374_s21 + $0x38] sm:$0xff] %vm303_vm0, %v4310_v48  ;;  %v4308_v17 = vadd.f32 %v5257_v20, %v4292_v25 }
 0xe38   : > { %4316 = vst.msk [vmem:[%s6374_s21 + $0x28] sm:$0xff] %vm303_vm0, %v4308_v17 }
 0xe39 PF: > { %s17_s24 = sadd.s32 1, %s5264_s24  }
 0xe3a   : > { %p14_p4 = scmp.ge.s32.totalorder %s17_s24, 4  }
 0xe3c   :  { %16 = sbr.rel (!%p14_p4) target bundleno = 1 (0x1), region = 78 }

</bundles_post_ra>
